<compile_context>
chip_gen: v7x
topology: tpu7x:2x2x1
jax: 0.10.0
libtpu: 0.0.40
codegen_flags: <defaults>
</compile_context>

<pallas_src>
import jax
import jax.numpy as jnp
from jax import lax
from jax.experimental import pallas as pl
from jax.experimental.pallas import tpu as pltpu

KSIZE = 7
PAD = 3
LANE = 128
SUBLANE = 8


def _round_up(x, m):
    return (x + m - 1) // m * m


def _tiled_vmem_bytes(shape, itemsize):
    """Actual (8, 128)-tiled VMEM footprint of a buffer with this shape."""
    if len(shape) == 1:
        return _round_up(shape[0], LANE) * itemsize
    lead = 1
    for d in shape[:-2]:
        lead *= d
    return (lead * _round_up(shape[-2], SUBLANE)
            * _round_up(shape[-1], LANE) * itemsize)


def _make_kernel(*, G, c_chunk, nc, rem, H, W, W_pad):
    """Build the kernel body for static shape parameters."""

    def kernel(w_ref, b_ref, x_ref, o_ref, sum_ref, max_ref, pad_ref):
        c_step = pl.program_id(1)

        # ---- init running channel sum / max at the start of each batch group ----
        @pl.when(c_step == 0)
        def _init():
            sum_ref[...] = jnp.zeros_like(sum_ref)
            max_ref[...] = jnp.full_like(max_ref, -jnp.inf)

        # ---- channel reduction over lane-dense (rows, H*W) slabs ----
        def accumulate(rows):
            for g in range(G):
                xc = x_ref[g, pl.ds(0, rows), :].astype(jnp.float32)  # (rows, HW)
                sum_ref[pl.ds(g, 1), :] = (
                    sum_ref[pl.ds(g, 1), :]
                    + jnp.sum(xc, axis=0, keepdims=True))
                max_ref[pl.ds(g, 1), :] = jnp.maximum(
                    max_ref[pl.ds(g, 1), :],
                    jnp.max(xc, axis=0, keepdims=True))

        if rem == 0:
            # C % c_chunk == 0: single steady-state path, no masking ever.
            accumulate(c_chunk)
        else:
            # Ragged last chunk: static tail slice, no per-element masks.
            @pl.when(c_step < nc - 1)
            def _steady():
                accumulate(c_chunk)

            @pl.when(c_step == nc - 1)
            def _tail():
                accumulate(rem)

        # ---- finalize: 7x7 conv over [sum/C | max] + sigmoid (last C step) ----
        @pl.when(c_step == nc - 1)
        def _finalize():
            # Zero-padded maps in persistent VMEM scratch; borders stay zero,
            # interior rows are copied (de-flattened) from the accumulators.
            # The 1/C mean scaling is pre-folded into the avg conv taps.
            pad_ref[...] = jnp.zeros_like(pad_ref)
            for g in range(G):
                s_row = sum_ref[pl.ds(g, 1), :]                  # (1, HW)
                m_row = max_ref[pl.ds(g, 1), :]
                for r in range(H):
                    cols = slice(r * W, (r + 1) * W)
                    pad_ref[g, 0, pl.ds(PAD + r, 1), pl.ds(PAD, W)] = s_row[:, cols]
                    pad_ref[g, 1, pl.ds(PAD + r, 1), pl.ds(PAD, W)] = m_row[:, cols]

            for g in range(G):
                maps = pad_ref[g]                                # (2, HP8, WL)
                # 4 partial accumulators (sum/max x kx parity) -> VALU ILP,
                # while keeping vreg pressure independent of G (per-g loop).
                accs = [jnp.zeros((H, W_pad), jnp.float32) for _ in range(4)]
                for kx in range(KSIZE):
                    # One lane shift per kx (hoisted out of the ky loop); the
                    # slab is lane-dense: width W_pad (multiple of 128).
                    slab = maps[:, :, kx:kx + W_pad]             # (2, HP8, W_pad)
                    p = kx & 1
                    for ky in range(KSIZE):
                        win = slab[:, ky:ky + H, :]              # (2, H, W_pad)
                        w_sum = w_ref[ky * KSIZE + kx]                   # w[0,0]/C
                        w_max = w_ref[KSIZE * KSIZE + ky * KSIZE + kx]   # w[0,1]
                        accs[p] = accs[p] + w_sum * win[0]
                        accs[2 + p] = accs[2 + p] + w_max * win[1]
                conv = (accs[0] + accs[1]) + (accs[2] + accs[3]) + b_ref[0]
                # Lane-dense (H, W_pad) store -> unmasked vst; wrapper trims.
                o_ref[g, 0] = jax.nn.sigmoid(conv).astype(o_ref.dtype)

    return kernel


def spatial_attention(x, weight, bias, *, block_budget_bytes=8 * 2**20):
    """x: (B, C, H, W); weight: (1, 2, 7, 7); bias: (1,) -> (B, 1, H, W)."""
    B, C, H, W = x.shape
    HW = H * W
    W_pad = _round_up(W, LANE)                 # lane-dense conv/output width
    HP8 = _round_up(H + 2 * PAD, SUBLANE)      # padded-map sublane extent
    WL = _round_up(W_pad + 2 * PAD, LANE)      # padded-map lane extent
    itemsize = x.dtype.itemsize

    # ---- choose channel chunk / batch fold from the *tiled* VMEM footprint ----
    chan_row_bytes = _round_up(HW, LANE) * itemsize           # one channel row
    full_c_bytes = _round_up(C, SUBLANE) * chan_row_bytes     # whole C, one image

    if full_c_bytes <= block_budget_bytes:
        # Common path: whole C per block; fold G batch images per grid step.
        c_chunk, nc = C, 1
        g_fit = max(1, block_budget_bytes // full_c_bytes)
        g_par = B if B < 2 else max(1, B // 2)   # keep >= 2 parallel steps (v7x)
        g_target = int(max(1, min(B, g_fit, g_par, 8)))
        G = max(d for d in range(1, g_target + 1) if B % d == 0)
    else:
        # Fallback for very large C*H*W: chunk channels, one image per step.
        G = 1
        c_chunk = (block_budget_bytes // chan_row_bytes) // SUBLANE * SUBLANE
        c_chunk = int(max(SUBLANE, c_chunk))     # multiple of 8 (2nd-minor dim)
        if c_chunk >= C:
            c_chunk, nc = C, 1
        else:
            nc = int(pl.cdiv(C, c_chunk))
    G = int(G)
    c_chunk = int(c_chunk)
    nc = int(nc)
    nb = B // G
    last_rows = C - (nc - 1) * c_chunk
    rem = 0 if last_rows == c_chunk else int(last_rows)

    # 1/C mean scaling folded into the 49 "avg" taps (conv is linear).
    w = weight.astype(jnp.float32)
    w_flat = jnp.concatenate([w[0, 0].reshape(-1) * (1.0 / C),
                              w[0, 1].reshape(-1)])            # (98,)
    b_flat = bias.reshape(-1).astype(jnp.float32)              # (1,)

    # ---- VMEM budget from the real (8,128)-tiled footprints ----
    in_blk = _tiled_vmem_bytes((G, c_chunk, HW), itemsize)
    out_blk = _tiled_vmem_bytes((G, 1, H, W_pad), itemsize)
    scratch_bytes = (2 * _tiled_vmem_bytes((G, HW), 4)
                     + _tiled_vmem_bytes((G, 2, HP8, WL), 4))

    n_in_buf = 2
    # Deeper input pipeline only when the grid is long and blocks are large
    # enough for DMA-issue latency to matter (pure-DMA-bound kernel).
    if (nb * nc >= 4 and in_blk >= (1 << 20)
            and 3 * in_blk + 2 * out_blk + scratch_bytes <= 36 * 2**20):
        n_in_buf = 3

    need = n_in_buf * in_blk + 2 * out_blk + scratch_bytes
    # Cap the request at 48 MiB so the same config fits v7x's 64 MiB VMEM
    # (v5e/v6e have 128 MiB); floor at 32 MiB for compiler-internal scratch.
    vmem_limit = int(max(32 * 2**20, min(2 * need, 48 * 2**20), need + 4 * 2**20))

    x2 = x.reshape(B, C, HW)                   # contiguous view, lane-dense DMA
    x_index = lambda b, c: (b, c, 0)
    if n_in_buf == 3:
        x_spec = pl.BlockSpec((G, c_chunk, HW), x_index,
                              pipeline_mode=pl.Buffered(3))
    else:
        x_spec = pl.BlockSpec((G, c_chunk, HW), x_index)

    kernel = _make_kernel(G=G, c_chunk=c_chunk, nc=nc, rem=rem,
                          H=H, W=W, W_pad=W_pad)

    out = pl.pallas_call(
        kernel,
        out_shape=jax.ShapeDtypeStruct((B, 1, H, W_pad), x.dtype),
        grid=(nb, nc),
        in_specs=[
            pl.BlockSpec(memory_space=pltpu.MemorySpace.SMEM),   # conv weights
            pl.BlockSpec(memory_space=pltpu.MemorySpace.SMEM),   # conv bias
            x_spec,
        ],
        out_specs=pl.BlockSpec((G, 1, H, W_pad), lambda b, c: (b, 0, 0, 0)),
        scratch_shapes=[
            pltpu.VMEM((G, HW), jnp.float32),          # running channel sum
            pltpu.VMEM((G, HW), jnp.float32),          # running channel max
            pltpu.VMEM((G, 2, HP8, WL), jnp.float32),  # zero-padded sum/max maps
        ],
        compiler_params=pltpu.CompilerParams(
            dimension_semantics=("parallel", "arbitrary"),
            vmem_limit_bytes=vmem_limit,
        ),
    )(w_flat, b_flat, x2)

    return out[:, :, :, :W]                    # trim lane-padding columns


def spatial_attention_ref(x, weight, bias):
    """Pure-JAX reference matching the PyTorch module."""
    avg = jnp.mean(x, axis=1, keepdims=True)
    mx = jnp.max(x, axis=1, keepdims=True)
    out = jnp.concatenate([avg, mx], axis=1)                 # (B, 2, H, W)
    conv = lax.conv_general_dilated(
        out.astype(jnp.float32), weight.astype(jnp.float32),
        window_strides=(1, 1), padding=((PAD, PAD), (PAD, PAD)),
        dimension_numbers=("NCHW", "OIHW", "NCHW"))
    return jax.nn.sigmoid(conv + bias.reshape(1, -1, 1, 1)).astype(x.dtype)


if __name__ == "__main__":
    key = jax.random.PRNGKey(0)
    k_x, k_w, k_b = jax.random.split(key, 3)

    # Deterministic Conv2d(2, 1, kernel_size=7) parameter init.
    fan_in = 2 * KSIZE * KSIZE
    bound = 1.0 / (fan_in ** 0.5)
    weight = jax.random.uniform(k_w, (1, 2, KSIZE, KSIZE), jnp.float32,
                                minval=-bound, maxval=bound)
    bias = jax.random.uniform(k_b, (1,), jnp.float32, minval=-bound, maxval=bound)

    # Main spec shape, a batch-folded (G=2) case, and a forced channel-chunked
    # case (exercises the ragged-tail fallback path).
    cases = [
        ((2, 4, 16, 16), {}),
        ((4, 8, 8, 8), {}),
        ((2, 20, 16, 16), {"block_budget_bytes": 8 * 1024}),
    ]
    for idx, (shape, kwargs) in enumerate(cases):
        xk = jax.random.fold_in(k_x, idx)
        x = jax.random.normal(xk, shape, dtype=jnp.float32)

        out = jax.block_until_ready(spatial_attention(x, weight, bias, **kwargs))
        ref = spatial_attention_ref(x, weight, bias)

        assert out.shape == (shape[0], 1, shape[2], shape[3]), out.shape
        err = jnp.max(jnp.abs(out - ref))
        assert jnp.allclose(out, ref, atol=1e-5, rtol=1e-5), (
            f"case {idx}: max abs err = {err}")

    print("KERNEL_OK")
</pallas_src>

<mosaic_0001>
module attributes {stable_mosaic.version = 11 : i64} {
  func.func @kernel(%arg0: i32, %arg1: i32, %arg2: memref<98xf32, #tpu.memory_space<smem>>, %arg3: memref<1xf32, #tpu.memory_space<smem>>, %arg4: memref<1x4x256xf32, #tpu.memory_space<vmem>>, %arg5: memref<1x1x16x128xf32, #tpu.memory_space<vmem>>, %arg6: memref<1x256xf32, #tpu.memory_space<vmem>>, %arg7: memref<1x256xf32, #tpu.memory_space<vmem>>, %arg8: memref<1x2x24x256xf32, #tpu.memory_space<vmem>>) attributes {dimension_semantics = [#tpu.dimension_semantics<parallel>, #tpu.dimension_semantics<arbitrary>], iteration_bounds = array<i64: 2, 1>, scalar_prefetch = 0 : i64, scratch_operands = 3 : i64, tpu.core_type = #tpu.core_type<tc>, window_params = [{transform_indices = @transform_0, window_bounds = array<i64: 98>}, {transform_indices = @transform_1, window_bounds = array<i64: 1>}, {transform_indices = @transform_2, window_bounds = array<i64: 1, 4, 256>}, {transform_indices = @transform_3, window_bounds = array<i64: 1, 1, 16, 128>}]} {
    %c0_i32 = arith.constant 0 : i32
    %0 = arith.cmpi eq, %arg1, %c0_i32 : i32
    %1 = arith.extui %0 : i1 to i32
    %c0_i32_0 = arith.constant 0 : i32
    %2 = arith.cmpi ne, %1, %c0_i32_0 : i32
    scf.if %2 {
      %cst_14 = arith.constant 0.000000e+00 : f32
      %18 = vector.broadcast %cst_14 : f32 to vector<1x256xf32>
      %c0_15 = arith.constant 0 : index
      %c0_16 = arith.constant 0 : index
      %19 = vector.load %arg6[%c0_15, %c0_16] : memref<1x256xf32, #tpu.memory_space<vmem>>, vector<1x256xf32>
      tpu.vector_store %arg6[%c0_15, %c0_16], %18 {strides = array<i32>} : memref<1x256xf32, #tpu.memory_space<vmem>>, vector<1x256xf32>,
      %cst_17 = arith.constant 0xFF800000 : f32
      %20 = vector.broadcast %cst_17 : f32 to vector<1x256xf32>
      %c0_18 = arith.constant 0 : index
      %c0_19 = arith.constant 0 : index
      %21 = vector.load %arg7[%c0_18, %c0_19] : memref<1x256xf32, #tpu.memory_space<vmem>>, vector<1x256xf32>
      tpu.vector_store %arg7[%c0_18, %c0_19], %20 {strides = array<i32>} : memref<1x256xf32, #tpu.memory_space<vmem>>, vector<1x256xf32>,
    } else {
    }
    %c0 = arith.constant 0 : index
    %c0_1 = arith.constant 0 : index
    %c0_2 = arith.constant 0 : index
    %3 = vector.load %arg4[%c0, %c0_1, %c0_2] : memref<1x4x256xf32, #tpu.memory_space<vmem>>, vector<1x4x256xf32>
    %4 = vector.shape_cast %3 : vector<1x4x256xf32> to vector<4x256xf32>
    %c0_3 = arith.constant 0 : index
    %c0_4 = arith.constant 0 : index
    %5 = vector.load %arg6[%c0_3, %c0_4] : memref<1x256xf32, #tpu.memory_space<vmem>>, vector<1x256xf32>
    %cst = arith.constant dense<0.000000e+00> : vector<256xf32>
    %6 = vector.multi_reduction <add>, %4, %cst [0] : vector<4x256xf32> to vector<256xf32>
    %7 = vector.shape_cast %6 : vector<256xf32> to vector<1x256xf32>
    %8 = arith.addf %5, %7 : vector<1x256xf32>
    %c0_5 = arith.constant 0 : index
    %c0_6 = arith.constant 0 : index
    %9 = vector.load %arg6[%c0_5, %c0_6] : memref<1x256xf32, #tpu.memory_space<vmem>>, vector<1x256xf32>
    tpu.vector_store %arg6[%c0_5, %c0_6], %8 {strides = array<i32>} : memref<1x256xf32, #tpu.memory_space<vmem>>, vector<1x256xf32>,
    %c0_7 = arith.constant 0 : index
    %c0_8 = arith.constant 0 : index
    %10 = vector.load %arg7[%c0_7, %c0_8] : memref<1x256xf32, #tpu.memory_space<vmem>>, vector<1x256xf32>
    %cst_9 = arith.constant dense<0xFF800000> : vector<256xf32>
    %11 = vector.multi_reduction <maximumf>, %4, %cst_9 [0] : vector<4x256xf32> to vector<256xf32>
    %12 = vector.shape_cast %11 : vector<256xf32> to vector<1x256xf32>
    %13 = arith.maximumf %10, %12 : vector<1x256xf32>
    %c0_10 = arith.constant 0 : index
    %c0_11 = arith.constant 0 : index
    %14 = vector.load %arg7[%c0_10, %c0_11] : memref<1x256xf32, #tpu.memory_space<vmem>>, vector<1x256xf32>
    tpu.vector_store %arg7[%c0_10, %c0_11], %13 {strides = array<i32>} : memref<1x256xf32, #tpu.memory_space<vmem>>, vector<1x256xf32>,
    %c0_i32_12 = arith.constant 0 : i32
    %15 = arith.cmpi eq, %arg1, %c0_i32_12 : i32
    %16 = arith.extui %15 : i1 to i32
    %c0_i32_13 = arith.constant 0 : i32
    %17 = arith.cmpi ne, %16, %c0_i32_13 : i32
    scf.if %17 {
      %cst_14 = arith.constant 0.000000e+00 : f32
      %18 = vector.broadcast %cst_14 : f32 to vector<1x2x24x256xf32>
      %c0_15 = arith.constant 0 : index
      %c0_16 = arith.constant 0 : index
      %c0_17 = arith.constant 0 : index
      %c0_18 = arith.constant 0 : index
      %19 = vector.load %arg8[%c0_15, %c0_16, %c0_17, %c0_18] : memref<1x2x24x256xf32, #tpu.memory_space<vmem>>, vector<1x2x24x256xf32>
      tpu.vector_store %arg8[%c0_15, %c0_16, %c0_17, %c0_18], %18 {strides = array<i32>} : memref<1x2x24x256xf32, #tpu.memory_space<vmem>>, vector<1x2x24x256xf32>,
      %c0_19 = arith.constant 0 : index
      %c0_20 = arith.constant 0 : index
      %20 = vector.load %arg6[%c0_19, %c0_20] : memref<1x256xf32, #tpu.memory_space<vmem>>, vector<1x256xf32>
      %c0_21 = arith.constant 0 : index
      %c0_22 = arith.constant 0 : index
      %21 = vector.load %arg7[%c0_21, %c0_22] : memref<1x256xf32, #tpu.memory_space<vmem>>, vector<1x256xf32>
      %22 = vector.extract_strided_slice %20 {offsets = [0, 0], sizes = [1, 16], strides = [1, 1]} : vector<1x256xf32> to vector<1x16xf32>
      %c0_23 = arith.constant 0 : index
      %c0_24 = arith.constant 0 : index
      %c3 = arith.constant 3 : index
      %c3_25 = arith.constant 3 : index
      %23 = vector.load %arg8[%c0_23, %c0_24, %c3, %c3_25] : memref<1x2x24x256xf32, #tpu.memory_space<vmem>>, vector<1x1x1x16xf32>
      %24 = vector.shape_cast %23 : vector<1x1x1x16xf32> to vector<1x16xf32>
      %25 = vector.shape_cast %22 : vector<1x16xf32> to vector<1x1x1x16xf32>
      tpu.vector_store %arg8[%c0_23, %c0_24, %c3, %c3_25], %25 {strides = array<i32>} : memref<1x2x24x256xf32, #tpu.memory_space<vmem>>, vector<1x1x1x16xf32>,
      %26 = vector.extract_strided_slice %21 {offsets = [0, 0], sizes = [1, 16], strides = [1, 1]} : vector<1x256xf32> to vector<1x16xf32>
      %c0_26 = arith.constant 0 : index
      %c1 = arith.constant 1 : index
      %c3_27 = arith.constant 3 : index
      %c3_28 = arith.constant 3 : index
      %27 = vector.load %arg8[%c0_26, %c1, %c3_27, %c3_28] : memref<1x2x24x256xf32, #tpu.memory_space<vmem>>, vector<1x1x1x16xf32>
      %28 = vector.shape_cast %27 : vector<1x1x1x16xf32> to vector<1x16xf32>
      %29 = vector.shape_cast %26 : vector<1x16xf32> to vector<1x1x1x16xf32>
      tpu.vector_store %arg8[%c0_26, %c1, %c3_27, %c3_28], %29 {strides = array<i32>} : memref<1x2x24x256xf32, #tpu.memory_space<vmem>>, vector<1x1x1x16xf32>,
      %30 = vector.extract_strided_slice %20 {offsets = [0, 16], sizes = [1, 16], strides = [1, 1]} : vector<1x256xf32> to vector<1x16xf32>
      %c0_29 = arith.constant 0 : index
      %c0_30 = arith.constant 0 : index
      %c4 = arith.constant 4 : index
      %c3_31 = arith.constant 3 : index
      %31 = vector.load %arg8[%c0_29, %c0_30, %c4, %c3_31] : memref<1x2x24x256xf32, #tpu.memory_space<vmem>>, vector<1x1x1x16xf32>
      %32 = vector.shape_cast %31 : vector<1x1x1x16xf32> to vector<1x16xf32>
      %33 = vector.shape_cast %30 : vector<1x16xf32> to vector<1x1x1x16xf32>
      tpu.vector_store %arg8[%c0_29, %c0_30, %c4, %c3_31], %33 {strides = array<i32>} : memref<1x2x24x256xf32, #tpu.memory_space<vmem>>, vector<1x1x1x16xf32>,
      %34 = vector.extract_strided_slice %21 {offsets = [0, 16], sizes = [1, 16], strides = [1, 1]} : vector<1x256xf32> to vector<1x16xf32>
      %c0_32 = arith.constant 0 : index
      %c1_33 = arith.constant 1 : index
      %c4_34 = arith.constant 4 : index
      %c3_35 = arith.constant 3 : index
      %35 = vector.load %arg8[%c0_32, %c1_33, %c4_34, %c3_35] : memref<1x2x24x256xf32, #tpu.memory_space<vmem>>, vector<1x1x1x16xf32>
      %36 = vector.shape_cast %35 : vector<1x1x1x16xf32> to vector<1x16xf32>
      %37 = vector.shape_cast %34 : vector<1x16xf32> to vector<1x1x1x16xf32>
      tpu.vector_store %arg8[%c0_32, %c1_33, %c4_34, %c3_35], %37 {strides = array<i32>} : memref<1x2x24x256xf32, #tpu.memory_space<vmem>>, vector<1x1x1x16xf32>,
      %38 = vector.extract_strided_slice %20 {offsets = [0, 32], sizes = [1, 16], strides = [1, 1]} : vector<1x256xf32> to vector<1x16xf32>
      %c0_36 = arith.constant 0 : index
      %c0_37 = arith.constant 0 : index
      %c5 = arith.constant 5 : index
      %c3_38 = arith.constant 3 : index
      %39 = vector.load %arg8[%c0_36, %c0_37, %c5, %c3_38] : memref<1x2x24x256xf32, #tpu.memory_space<vmem>>, vector<1x1x1x16xf32>
      %40 = vector.shape_cast %39 : vector<1x1x1x16xf32> to vector<1x16xf32>
      %41 = vector.shape_cast %38 : vector<1x16xf32> to vector<1x1x1x16xf32>
      tpu.vector_store %arg8[%c0_36, %c0_37, %c5, %c3_38], %41 {strides = array<i32>} : memref<1x2x24x256xf32, #tpu.memory_space<vmem>>, vector<1x1x1x16xf32>,
      %42 = vector.extract_strided_slice %21 {offsets = [0, 32], sizes = [1, 16], strides = [1, 1]} : vector<1x256xf32> to vector<1x16xf32>
      %c0_39 = arith.constant 0 : index
      %c1_40 = arith.constant 1 : index
      %c5_41 = arith.constant 5 : index
      %c3_42 = arith.constant 3 : index
      %43 = vector.load %arg8[%c0_39, %c1_40, %c5_41, %c3_42] : memref<1x2x24x256xf32, #tpu.memory_space<vmem>>, vector<1x1x1x16xf32>
      %44 = vector.shape_cast %43 : vector<1x1x1x16xf32> to vector<1x16xf32>
      %45 = vector.shape_cast %42 : vector<1x16xf32> to vector<1x1x1x16xf32>
      tpu.vector_store %arg8[%c0_39, %c1_40, %c5_41, %c3_42], %45 {strides = array<i32>} : memref<1x2x24x256xf32, #tpu.memory_space<vmem>>, vector<1x1x1x16xf32>,
      %46 = vector.extract_strided_slice %20 {offsets = [0, 48], sizes = [1, 16], strides = [1, 1]} : vector<1x256xf32> to vector<1x16xf32>
      %c0_43 = arith.constant 0 : index
      %c0_44 = arith.constant 0 : index
      %c6 = arith.constant 6 : index
      %c3_45 = arith.constant 3 : index
      %47 = vector.load %arg8[%c0_43, %c0_44, %c6, %c3_45] : memref<1x2x24x256xf32, #tpu.memory_space<vmem>>, vector<1x1x1x16xf32>
      %48 = vector.shape_cast %47 : vector<1x1x1x16xf32> to vector<1x16xf32>
      %49 = vector.shape_cast %46 : vector<1x16xf32> to vector<1x1x1x16xf32>
      tpu.vector_store %arg8[%c0_43, %c0_44, %c6, %c3_45], %49 {strides = array<i32>} : memref<1x2x24x256xf32, #tpu.memory_space<vmem>>, vector<1x1x1x16xf32>,
      %50 = vector.extract_strided_slice %21 {offsets = [0, 48], sizes = [1, 16], strides = [1, 1]} : vector<1x256xf32> to vector<1x16xf32>
      %c0_46 = arith.constant 0 : index
      %c1_47 = arith.constant 1 : index
      %c6_48 = arith.constant 6 : index
      %c3_49 = arith.constant 3 : index
      %51 = vector.load %arg8[%c0_46, %c1_47, %c6_48, %c3_49] : memref<1x2x24x256xf32, #tpu.memory_space<vmem>>, vector<1x1x1x16xf32>
      %52 = vector.shape_cast %51 : vector<1x1x1x16xf32> to vector<1x16xf32>
      %53 = vector.shape_cast %50 : vector<1x16xf32> to vector<1x1x1x16xf32>
      tpu.vector_store %arg8[%c0_46, %c1_47, %c6_48, %c3_49], %53 {strides = array<i32>} : memref<1x2x24x256xf32, #tpu.memory_space<vmem>>, vector<1x1x1x16xf32>,
      %54 = vector.extract_strided_slice %20 {offsets = [0, 64], sizes = [1, 16], strides = [1, 1]} : vector<1x256xf32> to vector<1x16xf32>
      %c0_50 = arith.constant 0 : index
      %c0_51 = arith.constant 0 : index
      %c7 = arith.constant 7 : index
      %c3_52 = arith.constant 3 : index
      %55 = vector.load %arg8[%c0_50, %c0_51, %c7, %c3_52] : memref<1x2x24x256xf32, #tpu.memory_space<vmem>>, vector<1x1x1x16xf32>
      %56 = vector.shape_cast %55 : vector<1x1x1x16xf32> to vector<1x16xf32>
      %57 = vector.shape_cast %54 : vector<1x16xf32> to vector<1x1x1x16xf32>
      tpu.vector_store %arg8[%c0_50, %c0_51, %c7, %c3_52], %57 {strides = array<i32>} : memref<1x2x24x256xf32, #tpu.memory_space<vmem>>, vector<1x1x1x16xf32>,
      %58 = vector.extract_strided_slice %21 {offsets = [0, 64], sizes = [1, 16], strides = [1, 1]} : vector<1x256xf32> to vector<1x16xf32>
      %c0_53 = arith.constant 0 : index
      %c1_54 = arith.constant 1 : index
      %c7_55 = arith.constant 7 : index
      %c3_56 = arith.constant 3 : index
      %59 = vector.load %arg8[%c0_53, %c1_54, %c7_55, %c3_56] : memref<1x2x24x256xf32, #tpu.memory_space<vmem>>, vector<1x1x1x16xf32>
      %60 = vector.shape_cast %59 : vector<1x1x1x16xf32> to vector<1x16xf32>
      %61 = vector.shape_cast %58 : vector<1x16xf32> to vector<1x1x1x16xf32>
      tpu.vector_store %arg8[%c0_53, %c1_54, %c7_55, %c3_56], %61 {strides = array<i32>} : memref<1x2x24x256xf32, #tpu.memory_space<vmem>>, vector<1x1x1x16xf32>,
      %62 = vector.extract_strided_slice %20 {offsets = [0, 80], sizes = [1, 16], strides = [1, 1]} : vector<1x256xf32> to vector<1x16xf32>
      %c0_57 = arith.constant 0 : index
      %c0_58 = arith.constant 0 : index
      %c8 = arith.constant 8 : index
      %c3_59 = arith.constant 3 : index
      %63 = vector.load %arg8[%c0_57, %c0_58, %c8, %c3_59] : memref<1x2x24x256xf32, #tpu.memory_space<vmem>>, vector<1x1x1x16xf32>
      %64 = vector.shape_cast %63 : vector<1x1x1x16xf32> to vector<1x16xf32>
      %65 = vector.shape_cast %62 : vector<1x16xf32> to vector<1x1x1x16xf32>
      tpu.vector_store %arg8[%c0_57, %c0_58, %c8, %c3_59], %65 {strides = array<i32>} : memref<1x2x24x256xf32, #tpu.memory_space<vmem>>, vector<1x1x1x16xf32>,
      %66 = vector.extract_strided_slice %21 {offsets = [0, 80], sizes = [1, 16], strides = [1, 1]} : vector<1x256xf32> to vector<1x16xf32>
      %c0_60 = arith.constant 0 : index
      %c1_61 = arith.constant 1 : index
      %c8_62 = arith.constant 8 : index
      %c3_63 = arith.constant 3 : index
      %67 = vector.load %arg8[%c0_60, %c1_61, %c8_62, %c3_63] : memref<1x2x24x256xf32, #tpu.memory_space<vmem>>, vector<1x1x1x16xf32>
      %68 = vector.shape_cast %67 : vector<1x1x1x16xf32> to vector<1x16xf32>
      %69 = vector.shape_cast %66 : vector<1x16xf32> to vector<1x1x1x16xf32>
      tpu.vector_store %arg8[%c0_60, %c1_61, %c8_62, %c3_63], %69 {strides = array<i32>} : memref<1x2x24x256xf32, #tpu.memory_space<vmem>>, vector<1x1x1x16xf32>,
      %70 = vector.extract_strided_slice %20 {offsets = [0, 96], sizes = [1, 16], strides = [1, 1]} : vector<1x256xf32> to vector<1x16xf32>
      %c0_64 = arith.constant 0 : index
      %c0_65 = arith.constant 0 : index
      %c9 = arith.constant 9 : index
      %c3_66 = arith.constant 3 : index
      %71 = vector.load %arg8[%c0_64, %c0_65, %c9, %c3_66] : memref<1x2x24x256xf32, #tpu.memory_space<vmem>>, vector<1x1x1x16xf32>
      %72 = vector.shape_cast %71 : vector<1x1x1x16xf32> to vector<1x16xf32>
      %73 = vector.shape_cast %70 : vector<1x16xf32> to vector<1x1x1x16xf32>
      tpu.vector_store %arg8[%c0_64, %c0_65, %c9, %c3_66], %73 {strides = array<i32>} : memref<1x2x24x256xf32, #tpu.memory_space<vmem>>, vector<1x1x1x16xf32>,
      %74 = vector.extract_strided_slice %21 {offsets = [0, 96], sizes = [1, 16], strides = [1, 1]} : vector<1x256xf32> to vector<1x16xf32>
      %c0_67 = arith.constant 0 : index
      %c1_68 = arith.constant 1 : index
      %c9_69 = arith.constant 9 : index
      %c3_70 = arith.constant 3 : index
      %75 = vector.load %arg8[%c0_67, %c1_68, %c9_69, %c3_70] : memref<1x2x24x256xf32, #tpu.memory_space<vmem>>, vector<1x1x1x16xf32>
      %76 = vector.shape_cast %75 : vector<1x1x1x16xf32> to vector<1x16xf32>
      %77 = vector.shape_cast %74 : vector<1x16xf32> to vector<1x1x1x16xf32>
      tpu.vector_store %arg8[%c0_67, %c1_68, %c9_69, %c3_70], %77 {strides = array<i32>} : memref<1x2x24x256xf32, #tpu.memory_space<vmem>>, vector<1x1x1x16xf32>,
      %78 = vector.extract_strided_slice %20 {offsets = [0, 112], sizes = [1, 16], strides = [1, 1]} : vector<1x256xf32> to vector<1x16xf32>
      %c0_71 = arith.constant 0 : index
      %c0_72 = arith.constant 0 : index
      %c10 = arith.constant 10 : index
      %c3_73 = arith.constant 3 : index
      %79 = vector.load %arg8[%c0_71, %c0_72, %c10, %c3_73] : memref<1x2x24x256xf32, #tpu.memory_space<vmem>>, vector<1x1x1x16xf32>
      %80 = vector.shape_cast %79 : vector<1x1x1x16xf32> to vector<1x16xf32>
      %81 = vector.shape_cast %78 : vector<1x16xf32> to vector<1x1x1x16xf32>
      tpu.vector_store %arg8[%c0_71, %c0_72, %c10, %c3_73], %81 {strides = array<i32>} : memref<1x2x24x256xf32, #tpu.memory_space<vmem>>, vector<1x1x1x16xf32>,
      %82 = vector.extract_strided_slice %21 {offsets = [0, 112], sizes = [1, 16], strides = [1, 1]} : vector<1x256xf32> to vector<1x16xf32>
      %c0_74 = arith.constant 0 : index
      %c1_75 = arith.constant 1 : index
      %c10_76 = arith.constant 10 : index
      %c3_77 = arith.constant 3 : index
      %83 = vector.load %arg8[%c0_74, %c1_75, %c10_76, %c3_77] : memref<1x2x24x256xf32, #tpu.memory_space<vmem>>, vector<1x1x1x16xf32>
      %84 = vector.shape_cast %83 : vector<1x1x1x16xf32> to vector<1x16xf32>
      %85 = vector.shape_cast %82 : vector<1x16xf32> to vector<1x1x1x16xf32>
      tpu.vector_store %arg8[%c0_74, %c1_75, %c10_76, %c3_77], %85 {strides = array<i32>} : memref<1x2x24x256xf32, #tpu.memory_space<vmem>>, vector<1x1x1x16xf32>,
      %86 = vector.extract_strided_slice %20 {offsets = [0, 128], sizes = [1, 16], strides = [1, 1]} : vector<1x256xf32> to vector<1x16xf32>
      %c0_78 = arith.constant 0 : index
      %c0_79 = arith.constant 0 : index
      %c11 = arith.constant 11 : index
      %c3_80 = arith.constant 3 : index
      %87 = vector.load %arg8[%c0_78, %c0_79, %c11, %c3_80] : memref<1x2x24x256xf32, #tpu.memory_space<vmem>>, vector<1x1x1x16xf32>
      %88 = vector.shape_cast %87 : vector<1x1x1x16xf32> to vector<1x16xf32>
      %89 = vector.shape_cast %86 : vector<1x16xf32> to vector<1x1x1x16xf32>
      tpu.vector_store %arg8[%c0_78, %c0_79, %c11, %c3_80], %89 {strides = array<i32>} : memref<1x2x24x256xf32, #tpu.memory_space<vmem>>, vector<1x1x1x16xf32>,
      %90 = vector.extract_strided_slice %21 {offsets = [0, 128], sizes = [1, 16], strides = [1, 1]} : vector<1x256xf32> to vector<1x16xf32>
      %c0_81 = arith.constant 0 : index
      %c1_82 = arith.constant 1 : index
      %c11_83 = arith.constant 11 : index
      %c3_84 = arith.constant 3 : index
      %91 = vector.load %arg8[%c0_81, %c1_82, %c11_83, %c3_84] : memref<1x2x24x256xf32, #tpu.memory_space<vmem>>, vector<1x1x1x16xf32>
      %92 = vector.shape_cast %91 : vector<1x1x1x16xf32> to vector<1x16xf32>
      %93 = vector.shape_cast %90 : vector<1x16xf32> to vector<1x1x1x16xf32>
      tpu.vector_store %arg8[%c0_81, %c1_82, %c11_83, %c3_84], %93 {strides = array<i32>} : memref<1x2x24x256xf32, #tpu.memory_space<vmem>>, vector<1x1x1x16xf32>,
      %94 = vector.extract_strided_slice %20 {offsets = [0, 144], sizes = [1, 16], strides = [1, 1]} : vector<1x256xf32> to vector<1x16xf32>
      %c0_85 = arith.constant 0 : index
      %c0_86 = arith.constant 0 : index
      %c12 = arith.constant 12 : index
      %c3_87 = arith.constant 3 : index
      %95 = vector.load %arg8[%c0_85, %c0_86, %c12, %c3_87] : memref<1x2x24x256xf32, #tpu.memory_space<vmem>>, vector<1x1x1x16xf32>
      %96 = vector.shape_cast %95 : vector<1x1x1x16xf32> to vector<1x16xf32>
      %97 = vector.shape_cast %94 : vector<1x16xf32> to vector<1x1x1x16xf32>
      tpu.vector_store %arg8[%c0_85, %c0_86, %c12, %c3_87], %97 {strides = array<i32>} : memref<1x2x24x256xf32, #tpu.memory_space<vmem>>, vector<1x1x1x16xf32>,
      %98 = vector.extract_strided_slice %21 {offsets = [0, 144], sizes = [1, 16], strides = [1, 1]} : vector<1x256xf32> to vector<1x16xf32>
      %c0_88 = arith.constant 0 : index
      %c1_89 = arith.constant 1 : index
      %c12_90 = arith.constant 12 : index
      %c3_91 = arith.constant 3 : index
      %99 = vector.load %arg8[%c0_88, %c1_89, %c12_90, %c3_91] : memref<1x2x24x256xf32, #tpu.memory_space<vmem>>, vector<1x1x1x16xf32>
      %100 = vector.shape_cast %99 : vector<1x1x1x16xf32> to vector<1x16xf32>
      %101 = vector.shape_cast %98 : vector<1x16xf32> to vector<1x1x1x16xf32>
      tpu.vector_store %arg8[%c0_88, %c1_89, %c12_90, %c3_91], %101 {strides = array<i32>} : memref<1x2x24x256xf32, #tpu.memory_space<vmem>>, vector<1x1x1x16xf32>,
      %102 = vector.extract_strided_slice %20 {offsets = [0, 160], sizes = [1, 16], strides = [1, 1]} : vector<1x256xf32> to vector<1x16xf32>
      %c0_92 = arith.constant 0 : index
      %c0_93 = arith.constant 0 : index
      %c13 = arith.constant 13 : index
      %c3_94 = arith.constant 3 : index
      %103 = vector.load %arg8[%c0_92, %c0_93, %c13, %c3_94] : memref<1x2x24x256xf32, #tpu.memory_space<vmem>>, vector<1x1x1x16xf32>
      %104 = vector.shape_cast %103 : vector<1x1x1x16xf32> to vector<1x16xf32>
      %105 = vector.shape_cast %102 : vector<1x16xf32> to vector<1x1x1x16xf32>
      tpu.vector_store %arg8[%c0_92, %c0_93, %c13, %c3_94], %105 {strides = array<i32>} : memref<1x2x24x256xf32, #tpu.memory_space<vmem>>, vector<1x1x1x16xf32>,
      %106 = vector.extract_strided_slice %21 {offsets = [0, 160], sizes = [1, 16], strides = [1, 1]} : vector<1x256xf32> to vector<1x16xf32>
      %c0_95 = arith.constant 0 : index
      %c1_96 = arith.constant 1 : index
      %c13_97 = arith.constant 13 : index
      %c3_98 = arith.constant 3 : index
      %107 = vector.load %arg8[%c0_95, %c1_96, %c13_97, %c3_98] : memref<1x2x24x256xf32, #tpu.memory_space<vmem>>, vector<1x1x1x16xf32>
      %108 = vector.shape_cast %107 : vector<1x1x1x16xf32> to vector<1x16xf32>
      %109 = vector.shape_cast %106 : vector<1x16xf32> to vector<1x1x1x16xf32>
      tpu.vector_store %arg8[%c0_95, %c1_96, %c13_97, %c3_98], %109 {strides = array<i32>} : memref<1x2x24x256xf32, #tpu.memory_space<vmem>>, vector<1x1x1x16xf32>,
      %110 = vector.extract_strided_slice %20 {offsets = [0, 176], sizes = [1, 16], strides = [1, 1]} : vector<1x256xf32> to vector<1x16xf32>
      %c0_99 = arith.constant 0 : index
      %c0_100 = arith.constant 0 : index
      %c14 = arith.constant 14 : index
      %c3_101 = arith.constant 3 : index
      %111 = vector.load %arg8[%c0_99, %c0_100, %c14, %c3_101] : memref<1x2x24x256xf32, #tpu.memory_space<vmem>>, vector<1x1x1x16xf32>
      %112 = vector.shape_cast %111 : vector<1x1x1x16xf32> to vector<1x16xf32>
      %113 = vector.shape_cast %110 : vector<1x16xf32> to vector<1x1x1x16xf32>
      tpu.vector_store %arg8[%c0_99, %c0_100, %c14, %c3_101], %113 {strides = array<i32>} : memref<1x2x24x256xf32, #tpu.memory_space<vmem>>, vector<1x1x1x16xf32>,
      %114 = vector.extract_strided_slice %21 {offsets = [0, 176], sizes = [1, 16], strides = [1, 1]} : vector<1x256xf32> to vector<1x16xf32>
      %c0_102 = arith.constant 0 : index
      %c1_103 = arith.constant 1 : index
      %c14_104 = arith.constant 14 : index
      %c3_105 = arith.constant 3 : index
      %115 = vector.load %arg8[%c0_102, %c1_103, %c14_104, %c3_105] : memref<1x2x24x256xf32, #tpu.memory_space<vmem>>, vector<1x1x1x16xf32>
      %116 = vector.shape_cast %115 : vector<1x1x1x16xf32> to vector<1x16xf32>
      %117 = vector.shape_cast %114 : vector<1x16xf32> to vector<1x1x1x16xf32>
      tpu.vector_store %arg8[%c0_102, %c1_103, %c14_104, %c3_105], %117 {strides = array<i32>} : memref<1x2x24x256xf32, #tpu.memory_space<vmem>>, vector<1x1x1x16xf32>,
      %118 = vector.extract_strided_slice %20 {offsets = [0, 192], sizes = [1, 16], strides = [1, 1]} : vector<1x256xf32> to vector<1x16xf32>
      %c0_106 = arith.constant 0 : index
      %c0_107 = arith.constant 0 : index
      %c15 = arith.constant 15 : index
      %c3_108 = arith.constant 3 : index
      %119 = vector.load %arg8[%c0_106, %c0_107, %c15, %c3_108] : memref<1x2x24x256xf32, #tpu.memory_space<vmem>>, vector<1x1x1x16xf32>
      %120 = vector.shape_cast %119 : vector<1x1x1x16xf32> to vector<1x16xf32>
      %121 = vector.shape_cast %118 : vector<1x16xf32> to vector<1x1x1x16xf32>
      tpu.vector_store %arg8[%c0_106, %c0_107, %c15, %c3_108], %121 {strides = array<i32>} : memref<1x2x24x256xf32, #tpu.memory_space<vmem>>, vector<1x1x1x16xf32>,
      %122 = vector.extract_strided_slice %21 {offsets = [0, 192], sizes = [1, 16], strides = [1, 1]} : vector<1x256xf32> to vector<1x16xf32>
      %c0_109 = arith.constant 0 : index
      %c1_110 = arith.constant 1 : index
      %c15_111 = arith.constant 15 : index
      %c3_112 = arith.constant 3 : index
      %123 = vector.load %arg8[%c0_109, %c1_110, %c15_111, %c3_112] : memref<1x2x24x256xf32, #tpu.memory_space<vmem>>, vector<1x1x1x16xf32>
      %124 = vector.shape_cast %123 : vector<1x1x1x16xf32> to vector<1x16xf32>
      %125 = vector.shape_cast %122 : vector<1x16xf32> to vector<1x1x1x16xf32>
      tpu.vector_store %arg8[%c0_109, %c1_110, %c15_111, %c3_112], %125 {strides = array<i32>} : memref<1x2x24x256xf32, #tpu.memory_space<vmem>>, vector<1x1x1x16xf32>,
      %126 = vector.extract_strided_slice %20 {offsets = [0, 208], sizes = [1, 16], strides = [1, 1]} : vector<1x256xf32> to vector<1x16xf32>
      %c0_113 = arith.constant 0 : index
      %c0_114 = arith.constant 0 : index
      %c16 = arith.constant 16 : index
      %c3_115 = arith.constant 3 : index
      %127 = vector.load %arg8[%c0_113, %c0_114, %c16, %c3_115] : memref<1x2x24x256xf32, #tpu.memory_space<vmem>>, vector<1x1x1x16xf32>
      %128 = vector.shape_cast %127 : vector<1x1x1x16xf32> to vector<1x16xf32>
      %129 = vector.shape_cast %126 : vector<1x16xf32> to vector<1x1x1x16xf32>
      tpu.vector_store %arg8[%c0_113, %c0_114, %c16, %c3_115], %129 {strides = array<i32>} : memref<1x2x24x256xf32, #tpu.memory_space<vmem>>, vector<1x1x1x16xf32>,
      %130 = vector.extract_strided_slice %21 {offsets = [0, 208], sizes = [1, 16], strides = [1, 1]} : vector<1x256xf32> to vector<1x16xf32>
      %c0_116 = arith.constant 0 : index
      %c1_117 = arith.constant 1 : index
      %c16_118 = arith.constant 16 : index
      %c3_119 = arith.constant 3 : index
      %131 = vector.load %arg8[%c0_116, %c1_117, %c16_118, %c3_119] : memref<1x2x24x256xf32, #tpu.memory_space<vmem>>, vector<1x1x1x16xf32>
      %132 = vector.shape_cast %131 : vector<1x1x1x16xf32> to vector<1x16xf32>
      %133 = vector.shape_cast %130 : vector<1x16xf32> to vector<1x1x1x16xf32>
      tpu.vector_store %arg8[%c0_116, %c1_117, %c16_118, %c3_119], %133 {strides = array<i32>} : memref<1x2x24x256xf32, #tpu.memory_space<vmem>>, vector<1x1x1x16xf32>,
      %134 = vector.extract_strided_slice %20 {offsets = [0, 224], sizes = [1, 16], strides = [1, 1]} : vector<1x256xf32> to vector<1x16xf32>
      %c0_120 = arith.constant 0 : index
      %c0_121 = arith.constant 0 : index
      %c17 = arith.constant 17 : index
      %c3_122 = arith.constant 3 : index
      %135 = vector.load %arg8[%c0_120, %c0_121, %c17, %c3_122] : memref<1x2x24x256xf32, #tpu.memory_space<vmem>>, vector<1x1x1x16xf32>
      %136 = vector.shape_cast %135 : vector<1x1x1x16xf32> to vector<1x16xf32>
      %137 = vector.shape_cast %134 : vector<1x16xf32> to vector<1x1x1x16xf32>
      tpu.vector_store %arg8[%c0_120, %c0_121, %c17, %c3_122], %137 {strides = array<i32>} : memref<1x2x24x256xf32, #tpu.memory_space<vmem>>, vector<1x1x1x16xf32>,
      %138 = vector.extract_strided_slice %21 {offsets = [0, 224], sizes = [1, 16], strides = [1, 1]} : vector<1x256xf32> to vector<1x16xf32>
      %c0_123 = arith.constant 0 : index
      %c1_124 = arith.constant 1 : index
      %c17_125 = arith.constant 17 : index
      %c3_126 = arith.constant 3 : index
      %139 = vector.load %arg8[%c0_123, %c1_124, %c17_125, %c3_126] : memref<1x2x24x256xf32, #tpu.memory_space<vmem>>, vector<1x1x1x16xf32>
      %140 = vector.shape_cast %139 : vector<1x1x1x16xf32> to vector<1x16xf32>
      %141 = vector.shape_cast %138 : vector<1x16xf32> to vector<1x1x1x16xf32>
      tpu.vector_store %arg8[%c0_123, %c1_124, %c17_125, %c3_126], %141 {strides = array<i32>} : memref<1x2x24x256xf32, #tpu.memory_space<vmem>>, vector<1x1x1x16xf32>,
      %142 = vector.extract_strided_slice %20 {offsets = [0, 240], sizes = [1, 16], strides = [1, 1]} : vector<1x256xf32> to vector<1x16xf32>
      %c0_127 = arith.constant 0 : index
      %c0_128 = arith.constant 0 : index
      %c18 = arith.constant 18 : index
      %c3_129 = arith.constant 3 : index
      %143 = vector.load %arg8[%c0_127, %c0_128, %c18, %c3_129] : memref<1x2x24x256xf32, #tpu.memory_space<vmem>>, vector<1x1x1x16xf32>
      %144 = vector.shape_cast %143 : vector<1x1x1x16xf32> to vector<1x16xf32>
      %145 = vector.shape_cast %142 : vector<1x16xf32> to vector<1x1x1x16xf32>
      tpu.vector_store %arg8[%c0_127, %c0_128, %c18, %c3_129], %145 {strides = array<i32>} : memref<1x2x24x256xf32, #tpu.memory_space<vmem>>, vector<1x1x1x16xf32>,
      %146 = vector.extract_strided_slice %21 {offsets = [0, 240], sizes = [1, 16], strides = [1, 1]} : vector<1x256xf32> to vector<1x16xf32>
      %c0_130 = arith.constant 0 : index
      %c1_131 = arith.constant 1 : index
      %c18_132 = arith.constant 18 : index
      %c3_133 = arith.constant 3 : index
      %147 = vector.load %arg8[%c0_130, %c1_131, %c18_132, %c3_133] : memref<1x2x24x256xf32, #tpu.memory_space<vmem>>, vector<1x1x1x16xf32>
      %148 = vector.shape_cast %147 : vector<1x1x1x16xf32> to vector<1x16xf32>
      %149 = vector.shape_cast %146 : vector<1x16xf32> to vector<1x1x1x16xf32>
      tpu.vector_store %arg8[%c0_130, %c1_131, %c18_132, %c3_133], %149 {strides = array<i32>} : memref<1x2x24x256xf32, #tpu.memory_space<vmem>>, vector<1x1x1x16xf32>,
      %c0_134 = arith.constant 0 : index
      %c0_135 = arith.constant 0 : index
      %c0_136 = arith.constant 0 : index
      %c0_137 = arith.constant 0 : index
      %150 = vector.load %arg8[%c0_134, %c0_135, %c0_136, %c0_137] : memref<1x2x24x256xf32, #tpu.memory_space<vmem>>, vector<1x2x24x256xf32>
      %151 = vector.shape_cast %150 : vector<1x2x24x256xf32> to vector<2x24x256xf32>
      %cst_138 = arith.constant 0.000000e+00 : f32
      %152 = vector.broadcast %cst_138 : f32 to vector<16x128xf32>
      %cst_139 = arith.constant 0.000000e+00 : f32
      %153 = vector.broadcast %cst_139 : f32 to vector<16x128xf32>
      %cst_140 = arith.constant 0.000000e+00 : f32
      %154 = vector.broadcast %cst_140 : f32 to vector<16x128xf32>
      %cst_141 = arith.constant 0.000000e+00 : f32
      %155 = vector.broadcast %cst_141 : f32 to vector<16x128xf32>
      %156 = vector.extract_strided_slice %151 {offsets = [0, 0, 0], sizes = [2, 24, 128], strides = [1, 1, 1]} : vector<2x24x256xf32> to vector<2x24x128xf32>
      %157 = vector.extract_strided_slice %156 {offsets = [0, 0, 0], sizes = [2, 16, 128], strides = [1, 1, 1]} : vector<2x24x128xf32> to vector<2x16x128xf32>
      %c0_142 = arith.constant 0 : index
      %158 = memref.load %arg2[%c0_142] : memref<98xf32, #tpu.memory_space<smem>>
      %c49 = arith.constant 49 : index
      %159 = memref.load %arg2[%c49] : memref<98xf32, #tpu.memory_space<smem>>
      %160 = vector.extract_strided_slice %157 {offsets = [0, 0, 0], sizes = [1, 16, 128], strides = [1, 1, 1]} : vector<2x16x128xf32> to vector<1x16x128xf32>
      %161 = vector.shape_cast %160 : vector<1x16x128xf32> to vector<16x128xf32>
      %162 = vector.broadcast %158 : f32 to vector<16x128xf32>
      %163 = arith.mulf %162, %161 : vector<16x128xf32>
      %164 = arith.addf %152, %163 : vector<16x128xf32>
      %165 = vector.extract_strided_slice %157 {offsets = [1, 0, 0], sizes = [1, 16, 128], strides = [1, 1, 1]} : vector<2x16x128xf32> to vector<1x16x128xf32>
      %166 = vector.shape_cast %165 : vector<1x16x128xf32> to vector<16x128xf32>
      %167 = vector.broadcast %159 : f32 to vector<16x128xf32>
      %168 = arith.mulf %167, %166 : vector<16x128xf32>
      %169 = arith.addf %154, %168 : vector<16x128xf32>
      %170 = vector.extract_strided_slice %156 {offsets = [0, 1, 0], sizes = [2, 16, 128], strides = [1, 1, 1]} : vector<2x24x128xf32> to vector<2x16x128xf32>
      %c7_143 = arith.constant 7 : index
      %171 = memref.load %arg2[%c7_143] : memref<98xf32, #tpu.memory_space<smem>>
      %c56 = arith.constant 56 : index
      %172 = memref.load %arg2[%c56] : memref<98xf32, #tpu.memory_space<smem>>
      %173 = vector.extract_strided_slice %170 {offsets = [0, 0, 0], sizes = [1, 16, 128], strides = [1, 1, 1]} : vector<2x16x128xf32> to vector<1x16x128xf32>
      %174 = vector.shape_cast %173 : vector<1x16x128xf32> to vector<16x128xf32>
      %175 = vector.broadcast %171 : f32 to vector<16x128xf32>
      %176 = arith.mulf %175, %174 : vector<16x128xf32>
      %177 = arith.addf %164, %176 : vector<16x128xf32>
      %178 = vector.extract_strided_slice %170 {offsets = [1, 0, 0], sizes = [1, 16, 128], strides = [1, 1, 1]} : vector<2x16x128xf32> to vector<1x16x128xf32>
      %179 = vector.shape_cast %178 : vector<1x16x128xf32> to vector<16x128xf32>
      %180 = vector.broadcast %172 : f32 to vector<16x128xf32>
      %181 = arith.mulf %180, %179 : vector<16x128xf32>
      %182 = arith.addf %169, %181 : vector<16x128xf32>
      %183 = vector.extract_strided_slice %156 {offsets = [0, 2, 0], sizes = [2, 16, 128], strides = [1, 1, 1]} : vector<2x24x128xf32> to vector<2x16x128xf32>
      %c14_144 = arith.constant 14 : index
      %184 = memref.load %arg2[%c14_144] : memref<98xf32, #tpu.memory_space<smem>>
      %c63 = arith.constant 63 : index
      %185 = memref.load %arg2[%c63] : memref<98xf32, #tpu.memory_space<smem>>
      %186 = vector.extract_strided_slice %183 {offsets = [0, 0, 0], sizes = [1, 16, 128], strides = [1, 1, 1]} : vector<2x16x128xf32> to vector<1x16x128xf32>
      %187 = vector.shape_cast %186 : vector<1x16x128xf32> to vector<16x128xf32>
      %188 = vector.broadcast %184 : f32 to vector<16x128xf32>
      %189 = arith.mulf %188, %187 : vector<16x128xf32>
      %190 = arith.addf %177, %189 : vector<16x128xf32>
      %191 = vector.extract_strided_slice %183 {offsets = [1, 0, 0], sizes = [1, 16, 128], strides = [1, 1, 1]} : vector<2x16x128xf32> to vector<1x16x128xf32>
      %192 = vector.shape_cast %191 : vector<1x16x128xf32> to vector<16x128xf32>
      %193 = vector.broadcast %185 : f32 to vector<16x128xf32>
      %194 = arith.mulf %193, %192 : vector<16x128xf32>
      %195 = arith.addf %182, %194 : vector<16x128xf32>
      %196 = vector.extract_strided_slice %156 {offsets = [0, 3, 0], sizes = [2, 16, 128], strides = [1, 1, 1]} : vector<2x24x128xf32> to vector<2x16x128xf32>
      %c21 = arith.constant 21 : index
      %197 = memref.load %arg2[%c21] : memref<98xf32, #tpu.memory_space<smem>>
      %c70 = arith.constant 70 : index
      %198 = memref.load %arg2[%c70] : memref<98xf32, #tpu.memory_space<smem>>
      %199 = vector.extract_strided_slice %196 {offsets = [0, 0, 0], sizes = [1, 16, 128], strides = [1, 1, 1]} : vector<2x16x128xf32> to vector<1x16x128xf32>
      %200 = vector.shape_cast %199 : vector<1x16x128xf32> to vector<16x128xf32>
      %201 = vector.broadcast %197 : f32 to vector<16x128xf32>
      %202 = arith.mulf %201, %200 : vector<16x128xf32>
      %203 = arith.addf %190, %202 : vector<16x128xf32>
      %204 = vector.extract_strided_slice %196 {offsets = [1, 0, 0], sizes = [1, 16, 128], strides = [1, 1, 1]} : vector<2x16x128xf32> to vector<1x16x128xf32>
      %205 = vector.shape_cast %204 : vector<1x16x128xf32> to vector<16x128xf32>
      %206 = vector.broadcast %198 : f32 to vector<16x128xf32>
      %207 = arith.mulf %206, %205 : vector<16x128xf32>
      %208 = arith.addf %195, %207 : vector<16x128xf32>
      %209 = vector.extract_strided_slice %156 {offsets = [0, 4, 0], sizes = [2, 16, 128], strides = [1, 1, 1]} : vector<2x24x128xf32> to vector<2x16x128xf32>
      %c28 = arith.constant 28 : index
      %210 = memref.load %arg2[%c28] : memref<98xf32, #tpu.memory_space<smem>>
      %c77 = arith.constant 77 : index
      %211 = memref.load %arg2[%c77] : memref<98xf32, #tpu.memory_space<smem>>
      %212 = vector.extract_strided_slice %209 {offsets = [0, 0, 0], sizes = [1, 16, 128], strides = [1, 1, 1]} : vector<2x16x128xf32> to vector<1x16x128xf32>
      %213 = vector.shape_cast %212 : vector<1x16x128xf32> to vector<16x128xf32>
      %214 = vector.broadcast %210 : f32 to vector<16x128xf32>
      %215 = arith.mulf %214, %213 : vector<16x128xf32>
      %216 = arith.addf %203, %215 : vector<16x128xf32>
      %217 = vector.extract_strided_slice %209 {offsets = [1, 0, 0], sizes = [1, 16, 128], strides = [1, 1, 1]} : vector<2x16x128xf32> to vector<1x16x128xf32>
      %218 = vector.shape_cast %217 : vector<1x16x128xf32> to vector<16x128xf32>
      %219 = vector.broadcast %211 : f32 to vector<16x128xf32>
      %220 = arith.mulf %219, %218 : vector<16x128xf32>
      %221 = arith.addf %208, %220 : vector<16x128xf32>
      %222 = vector.extract_strided_slice %156 {offsets = [0, 5, 0], sizes = [2, 16, 128], strides = [1, 1, 1]} : vector<2x24x128xf32> to vector<2x16x128xf32>
      %c35 = arith.constant 35 : index
      %223 = memref.load %arg2[%c35] : memref<98xf32, #tpu.memory_space<smem>>
      %c84 = arith.constant 84 : index
      %224 = memref.load %arg2[%c84] : memref<98xf32, #tpu.memory_space<smem>>
      %225 = vector.extract_strided_slice %222 {offsets = [0, 0, 0], sizes = [1, 16, 128], strides = [1, 1, 1]} : vector<2x16x128xf32> to vector<1x16x128xf32>
      %226 = vector.shape_cast %225 : vector<1x16x128xf32> to vector<16x128xf32>
      %227 = vector.broadcast %223 : f32 to vector<16x128xf32>
      %228 = arith.mulf %227, %226 : vector<16x128xf32>
      %229 = arith.addf %216, %228 : vector<16x128xf32>
      %230 = vector.extract_strided_slice %222 {offsets = [1, 0, 0], sizes = [1, 16, 128], strides = [1, 1, 1]} : vector<2x16x128xf32> to vector<1x16x128xf32>
      %231 = vector.shape_cast %230 : vector<1x16x128xf32> to vector<16x128xf32>
      %232 = vector.broadcast %224 : f32 to vector<16x128xf32>
      %233 = arith.mulf %232, %231 : vector<16x128xf32>
      %234 = arith.addf %221, %233 : vector<16x128xf32>
      %235 = vector.extract_strided_slice %156 {offsets = [0, 6, 0], sizes = [2, 16, 128], strides = [1, 1, 1]} : vector<2x24x128xf32> to vector<2x16x128xf32>
      %c42 = arith.constant 42 : index
      %236 = memref.load %arg2[%c42] : memref<98xf32, #tpu.memory_space<smem>>
      %c91 = arith.constant 91 : index
      %237 = memref.load %arg2[%c91] : memref<98xf32, #tpu.memory_space<smem>>
      %238 = vector.extract_strided_slice %235 {offsets = [0, 0, 0], sizes = [1, 16, 128], strides = [1, 1, 1]} : vector<2x16x128xf32> to vector<1x16x128xf32>
      %239 = vector.shape_cast %238 : vector<1x16x128xf32> to vector<16x128xf32>
      %240 = vector.broadcast %236 : f32 to vector<16x128xf32>
      %241 = arith.mulf %240, %239 : vector<16x128xf32>
      %242 = arith.addf %229, %241 : vector<16x128xf32>
      %243 = vector.extract_strided_slice %235 {offsets = [1, 0, 0], sizes = [1, 16, 128], strides = [1, 1, 1]} : vector<2x16x128xf32> to vector<1x16x128xf32>
      %244 = vector.shape_cast %243 : vector<1x16x128xf32> to vector<16x128xf32>
      %245 = vector.broadcast %237 : f32 to vector<16x128xf32>
      %246 = arith.mulf %245, %244 : vector<16x128xf32>
      %247 = arith.addf %234, %246 : vector<16x128xf32>
      %248 = vector.extract_strided_slice %151 {offsets = [0, 0, 1], sizes = [2, 24, 128], strides = [1, 1, 1]} : vector<2x24x256xf32> to vector<2x24x128xf32>
      %249 = vector.extract_strided_slice %248 {offsets = [0, 0, 0], sizes = [2, 16, 128], strides = [1, 1, 1]} : vector<2x24x128xf32> to vector<2x16x128xf32>
      %c1_145 = arith.constant 1 : index
      %250 = memref.load %arg2[%c1_145] : memref<98xf32, #tpu.memory_space<smem>>
      %c50 = arith.constant 50 : index
      %251 = memref.load %arg2[%c50] : memref<98xf32, #tpu.memory_space<smem>>
      %252 = vector.extract_strided_slice %249 {offsets = [0, 0, 0], sizes = [1, 16, 128], strides = [1, 1, 1]} : vector<2x16x128xf32> to vector<1x16x128xf32>
      %253 = vector.shape_cast %252 : vector<1x16x128xf32> to vector<16x128xf32>
      %254 = vector.broadcast %250 : f32 to vector<16x128xf32>
      %255 = arith.mulf %254, %253 : vector<16x128xf32>
      %256 = arith.addf %153, %255 : vector<16x128xf32>
      %257 = vector.extract_strided_slice %249 {offsets = [1, 0, 0], sizes = [1, 16, 128], strides = [1, 1, 1]} : vector<2x16x128xf32> to vector<1x16x128xf32>
      %258 = vector.shape_cast %257 : vector<1x16x128xf32> to vector<16x128xf32>
      %259 = vector.broadcast %251 : f32 to vector<16x128xf32>
      %260 = arith.mulf %259, %258 : vector<16x128xf32>
      %261 = arith.addf %155, %260 : vector<16x128xf32>
      %262 = vector.extract_strided_slice %248 {offsets = [0, 1, 0], sizes = [2, 16, 128], strides = [1, 1, 1]} : vector<2x24x128xf32> to vector<2x16x128xf32>
      %c8_146 = arith.constant 8 : index
      %263 = memref.load %arg2[%c8_146] : memref<98xf32, #tpu.memory_space<smem>>
      %c57 = arith.constant 57 : index
      %264 = memref.load %arg2[%c57] : memref<98xf32, #tpu.memory_space<smem>>
      %265 = vector.extract_strided_slice %262 {offsets = [0, 0, 0], sizes = [1, 16, 128], strides = [1, 1, 1]} : vector<2x16x128xf32> to vector<1x16x128xf32>
      %266 = vector.shape_cast %265 : vector<1x16x128xf32> to vector<16x128xf32>
      %267 = vector.broadcast %263 : f32 to vector<16x128xf32>
      %268 = arith.mulf %267, %266 : vector<16x128xf32>
      %269 = arith.addf %256, %268 : vector<16x128xf32>
      %270 = vector.extract_strided_slice %262 {offsets = [1, 0, 0], sizes = [1, 16, 128], strides = [1, 1, 1]} : vector<2x16x128xf32> to vector<1x16x128xf32>
      %271 = vector.shape_cast %270 : vector<1x16x128xf32> to vector<16x128xf32>
      %272 = vector.broadcast %264 : f32 to vector<16x128xf32>
      %273 = arith.mulf %272, %271 : vector<16x128xf32>
      %274 = arith.addf %261, %273 : vector<16x128xf32>
      %275 = vector.extract_strided_slice %248 {offsets = [0, 2, 0], sizes = [2, 16, 128], strides = [1, 1, 1]} : vector<2x24x128xf32> to vector<2x16x128xf32>
      %c15_147 = arith.constant 15 : index
      %276 = memref.load %arg2[%c15_147] : memref<98xf32, #tpu.memory_space<smem>>
      %c64 = arith.constant 64 : index
      %277 = memref.load %arg2[%c64] : memref<98xf32, #tpu.memory_space<smem>>
      %278 = vector.extract_strided_slice %275 {offsets = [0, 0, 0], sizes = [1, 16, 128], strides = [1, 1, 1]} : vector<2x16x128xf32> to vector<1x16x128xf32>
      %279 = vector.shape_cast %278 : vector<1x16x128xf32> to vector<16x128xf32>
      %280 = vector.broadcast %276 : f32 to vector<16x128xf32>
      %281 = arith.mulf %280, %279 : vector<16x128xf32>
      %282 = arith.addf %269, %281 : vector<16x128xf32>
      %283 = vector.extract_strided_slice %275 {offsets = [1, 0, 0], sizes = [1, 16, 128], strides = [1, 1, 1]} : vector<2x16x128xf32> to vector<1x16x128xf32>
      %284 = vector.shape_cast %283 : vector<1x16x128xf32> to vector<16x128xf32>
      %285 = vector.broadcast %277 : f32 to vector<16x128xf32>
      %286 = arith.mulf %285, %284 : vector<16x128xf32>
      %287 = arith.addf %274, %286 : vector<16x128xf32>
      %288 = vector.extract_strided_slice %248 {offsets = [0, 3, 0], sizes = [2, 16, 128], strides = [1, 1, 1]} : vector<2x24x128xf32> to vector<2x16x128xf32>
      %c22 = arith.constant 22 : index
      %289 = memref.load %arg2[%c22] : memref<98xf32, #tpu.memory_space<smem>>
      %c71 = arith.constant 71 : index
      %290 = memref.load %arg2[%c71] : memref<98xf32, #tpu.memory_space<smem>>
      %291 = vector.extract_strided_slice %288 {offsets = [0, 0, 0], sizes = [1, 16, 128], strides = [1, 1, 1]} : vector<2x16x128xf32> to vector<1x16x128xf32>
      %292 = vector.shape_cast %291 : vector<1x16x128xf32> to vector<16x128xf32>
      %293 = vector.broadcast %289 : f32 to vector<16x128xf32>
      %294 = arith.mulf %293, %292 : vector<16x128xf32>
      %295 = arith.addf %282, %294 : vector<16x128xf32>
      %296 = vector.extract_strided_slice %288 {offsets = [1, 0, 0], sizes = [1, 16, 128], strides = [1, 1, 1]} : vector<2x16x128xf32> to vector<1x16x128xf32>
      %297 = vector.shape_cast %296 : vector<1x16x128xf32> to vector<16x128xf32>
      %298 = vector.broadcast %290 : f32 to vector<16x128xf32>
      %299 = arith.mulf %298, %297 : vector<16x128xf32>
      %300 = arith.addf %287, %299 : vector<16x128xf32>
      %301 = vector.extract_strided_slice %248 {offsets = [0, 4, 0], sizes = [2, 16, 128], strides = [1, 1, 1]} : vector<2x24x128xf32> to vector<2x16x128xf32>
      %c29 = arith.constant 29 : index
      %302 = memref.load %arg2[%c29] : memref<98xf32, #tpu.memory_space<smem>>
      %c78 = arith.constant 78 : index
      %303 = memref.load %arg2[%c78] : memref<98xf32, #tpu.memory_space<smem>>
      %304 = vector.extract_strided_slice %301 {offsets = [0, 0, 0], sizes = [1, 16, 128], strides = [1, 1, 1]} : vector<2x16x128xf32> to vector<1x16x128xf32>
      %305 = vector.shape_cast %304 : vector<1x16x128xf32> to vector<16x128xf32>
      %306 = vector.broadcast %302 : f32 to vector<16x128xf32>
      %307 = arith.mulf %306, %305 : vector<16x128xf32>
      %308 = arith.addf %295, %307 : vector<16x128xf32>
      %309 = vector.extract_strided_slice %301 {offsets = [1, 0, 0], sizes = [1, 16, 128], strides = [1, 1, 1]} : vector<2x16x128xf32> to vector<1x16x128xf32>
      %310 = vector.shape_cast %309 : vector<1x16x128xf32> to vector<16x128xf32>
      %311 = vector.broadcast %303 : f32 to vector<16x128xf32>
      %312 = arith.mulf %311, %310 : vector<16x128xf32>
      %313 = arith.addf %300, %312 : vector<16x128xf32>
      %314 = vector.extract_strided_slice %248 {offsets = [0, 5, 0], sizes = [2, 16, 128], strides = [1, 1, 1]} : vector<2x24x128xf32> to vector<2x16x128xf32>
      %c36 = arith.constant 36 : index
      %315 = memref.load %arg2[%c36] : memref<98xf32, #tpu.memory_space<smem>>
      %c85 = arith.constant 85 : index
      %316 = memref.load %arg2[%c85] : memref<98xf32, #tpu.memory_space<smem>>
      %317 = vector.extract_strided_slice %314 {offsets = [0, 0, 0], sizes = [1, 16, 128], strides = [1, 1, 1]} : vector<2x16x128xf32> to vector<1x16x128xf32>
      %318 = vector.shape_cast %317 : vector<1x16x128xf32> to vector<16x128xf32>
      %319 = vector.broadcast %315 : f32 to vector<16x128xf32>
      %320 = arith.mulf %319, %318 : vector<16x128xf32>
      %321 = arith.addf %308, %320 : vector<16x128xf32>
      %322 = vector.extract_strided_slice %314 {offsets = [1, 0, 0], sizes = [1, 16, 128], strides = [1, 1, 1]} : vector<2x16x128xf32> to vector<1x16x128xf32>
      %323 = vector.shape_cast %322 : vector<1x16x128xf32> to vector<16x128xf32>
      %324 = vector.broadcast %316 : f32 to vector<16x128xf32>
      %325 = arith.mulf %324, %323 : vector<16x128xf32>
      %326 = arith.addf %313, %325 : vector<16x128xf32>
      %327 = vector.extract_strided_slice %248 {offsets = [0, 6, 0], sizes = [2, 16, 128], strides = [1, 1, 1]} : vector<2x24x128xf32> to vector<2x16x128xf32>
      %c43 = arith.constant 43 : index
      %328 = memref.load %arg2[%c43] : memref<98xf32, #tpu.memory_space<smem>>
      %c92 = arith.constant 92 : index
      %329 = memref.load %arg2[%c92] : memref<98xf32, #tpu.memory_space<smem>>
      %330 = vector.extract_strided_slice %327 {offsets = [0, 0, 0], sizes = [1, 16, 128], strides = [1, 1, 1]} : vector<2x16x128xf32> to vector<1x16x128xf32>
      %331 = vector.shape_cast %330 : vector<1x16x128xf32> to vector<16x128xf32>
      %332 = vector.broadcast %328 : f32 to vector<16x128xf32>
      %333 = arith.mulf %332, %331 : vector<16x128xf32>
      %334 = arith.addf %321, %333 : vector<16x128xf32>
      %335 = vector.extract_strided_slice %327 {offsets = [1, 0, 0], sizes = [1, 16, 128], strides = [1, 1, 1]} : vector<2x16x128xf32> to vector<1x16x128xf32>
      %336 = vector.shape_cast %335 : vector<1x16x128xf32> to vector<16x128xf32>
      %337 = vector.broadcast %329 : f32 to vector<16x128xf32>
      %338 = arith.mulf %337, %336 : vector<16x128xf32>
      %339 = arith.addf %326, %338 : vector<16x128xf32>
      %340 = vector.extract_strided_slice %151 {offsets = [0, 0, 2], sizes = [2, 24, 128], strides = [1, 1, 1]} : vector<2x24x256xf32> to vector<2x24x128xf32>
      %341 = vector.extract_strided_slice %340 {offsets = [0, 0, 0], sizes = [2, 16, 128], strides = [1, 1, 1]} : vector<2x24x128xf32> to vector<2x16x128xf32>
      %c2 = arith.constant 2 : index
      %342 = memref.load %arg2[%c2] : memref<98xf32, #tpu.memory_space<smem>>
      %c51 = arith.constant 51 : index
      %343 = memref.load %arg2[%c51] : memref<98xf32, #tpu.memory_space<smem>>
      %344 = vector.extract_strided_slice %341 {offsets = [0, 0, 0], sizes = [1, 16, 128], strides = [1, 1, 1]} : vector<2x16x128xf32> to vector<1x16x128xf32>
      %345 = vector.shape_cast %344 : vector<1x16x128xf32> to vector<16x128xf32>
      %346 = vector.broadcast %342 : f32 to vector<16x128xf32>
      %347 = arith.mulf %346, %345 : vector<16x128xf32>
      %348 = arith.addf %242, %347 : vector<16x128xf32>
      %349 = vector.extract_strided_slice %341 {offsets = [1, 0, 0], sizes = [1, 16, 128], strides = [1, 1, 1]} : vector<2x16x128xf32> to vector<1x16x128xf32>
      %350 = vector.shape_cast %349 : vector<1x16x128xf32> to vector<16x128xf32>
      %351 = vector.broadcast %343 : f32 to vector<16x128xf32>
      %352 = arith.mulf %351, %350 : vector<16x128xf32>
      %353 = arith.addf %247, %352 : vector<16x128xf32>
      %354 = vector.extract_strided_slice %340 {offsets = [0, 1, 0], sizes = [2, 16, 128], strides = [1, 1, 1]} : vector<2x24x128xf32> to vector<2x16x128xf32>
      %c9_148 = arith.constant 9 : index
      %355 = memref.load %arg2[%c9_148] : memref<98xf32, #tpu.memory_space<smem>>
      %c58 = arith.constant 58 : index
      %356 = memref.load %arg2[%c58] : memref<98xf32, #tpu.memory_space<smem>>
      %357 = vector.extract_strided_slice %354 {offsets = [0, 0, 0], sizes = [1, 16, 128], strides = [1, 1, 1]} : vector<2x16x128xf32> to vector<1x16x128xf32>
      %358 = vector.shape_cast %357 : vector<1x16x128xf32> to vector<16x128xf32>
      %359 = vector.broadcast %355 : f32 to vector<16x128xf32>
      %360 = arith.mulf %359, %358 : vector<16x128xf32>
      %361 = arith.addf %348, %360 : vector<16x128xf32>
      %362 = vector.extract_strided_slice %354 {offsets = [1, 0, 0], sizes = [1, 16, 128], strides = [1, 1, 1]} : vector<2x16x128xf32> to vector<1x16x128xf32>
      %363 = vector.shape_cast %362 : vector<1x16x128xf32> to vector<16x128xf32>
      %364 = vector.broadcast %356 : f32 to vector<16x128xf32>
      %365 = arith.mulf %364, %363 : vector<16x128xf32>
      %366 = arith.addf %353, %365 : vector<16x128xf32>
      %367 = vector.extract_strided_slice %340 {offsets = [0, 2, 0], sizes = [2, 16, 128], strides = [1, 1, 1]} : vector<2x24x128xf32> to vector<2x16x128xf32>
      %c16_149 = arith.constant 16 : index
      %368 = memref.load %arg2[%c16_149] : memref<98xf32, #tpu.memory_space<smem>>
      %c65 = arith.constant 65 : index
      %369 = memref.load %arg2[%c65] : memref<98xf32, #tpu.memory_space<smem>>
      %370 = vector.extract_strided_slice %367 {offsets = [0, 0, 0], sizes = [1, 16, 128], strides = [1, 1, 1]} : vector<2x16x128xf32> to vector<1x16x128xf32>
      %371 = vector.shape_cast %370 : vector<1x16x128xf32> to vector<16x128xf32>
      %372 = vector.broadcast %368 : f32 to vector<16x128xf32>
      %373 = arith.mulf %372, %371 : vector<16x128xf32>
      %374 = arith.addf %361, %373 : vector<16x128xf32>
      %375 = vector.extract_strided_slice %367 {offsets = [1, 0, 0], sizes = [1, 16, 128], strides = [1, 1, 1]} : vector<2x16x128xf32> to vector<1x16x128xf32>
      %376 = vector.shape_cast %375 : vector<1x16x128xf32> to vector<16x128xf32>
      %377 = vector.broadcast %369 : f32 to vector<16x128xf32>
      %378 = arith.mulf %377, %376 : vector<16x128xf32>
      %379 = arith.addf %366, %378 : vector<16x128xf32>
      %380 = vector.extract_strided_slice %340 {offsets = [0, 3, 0], sizes = [2, 16, 128], strides = [1, 1, 1]} : vector<2x24x128xf32> to vector<2x16x128xf32>
      %c23 = arith.constant 23 : index
      %381 = memref.load %arg2[%c23] : memref<98xf32, #tpu.memory_space<smem>>
      %c72 = arith.constant 72 : index
      %382 = memref.load %arg2[%c72] : memref<98xf32, #tpu.memory_space<smem>>
      %383 = vector.extract_strided_slice %380 {offsets = [0, 0, 0], sizes = [1, 16, 128], strides = [1, 1, 1]} : vector<2x16x128xf32> to vector<1x16x128xf32>
      %384 = vector.shape_cast %383 : vector<1x16x128xf32> to vector<16x128xf32>
      %385 = vector.broadcast %381 : f32 to vector<16x128xf32>
      %386 = arith.mulf %385, %384 : vector<16x128xf32>
      %387 = arith.addf %374, %386 : vector<16x128xf32>
      %388 = vector.extract_strided_slice %380 {offsets = [1, 0, 0], sizes = [1, 16, 128], strides = [1, 1, 1]} : vector<2x16x128xf32> to vector<1x16x128xf32>
      %389 = vector.shape_cast %388 : vector<1x16x128xf32> to vector<16x128xf32>
      %390 = vector.broadcast %382 : f32 to vector<16x128xf32>
      %391 = arith.mulf %390, %389 : vector<16x128xf32>
      %392 = arith.addf %379, %391 : vector<16x128xf32>
      %393 = vector.extract_strided_slice %340 {offsets = [0, 4, 0], sizes = [2, 16, 128], strides = [1, 1, 1]} : vector<2x24x128xf32> to vector<2x16x128xf32>
      %c30 = arith.constant 30 : index
      %394 = memref.load %arg2[%c30] : memref<98xf32, #tpu.memory_space<smem>>
      %c79 = arith.constant 79 : index
      %395 = memref.load %arg2[%c79] : memref<98xf32, #tpu.memory_space<smem>>
      %396 = vector.extract_strided_slice %393 {offsets = [0, 0, 0], sizes = [1, 16, 128], strides = [1, 1, 1]} : vector<2x16x128xf32> to vector<1x16x128xf32>
      %397 = vector.shape_cast %396 : vector<1x16x128xf32> to vector<16x128xf32>
      %398 = vector.broadcast %394 : f32 to vector<16x128xf32>
      %399 = arith.mulf %398, %397 : vector<16x128xf32>
      %400 = arith.addf %387, %399 : vector<16x128xf32>
      %401 = vector.extract_strided_slice %393 {offsets = [1, 0, 0], sizes = [1, 16, 128], strides = [1, 1, 1]} : vector<2x16x128xf32> to vector<1x16x128xf32>
      %402 = vector.shape_cast %401 : vector<1x16x128xf32> to vector<16x128xf32>
      %403 = vector.broadcast %395 : f32 to vector<16x128xf32>
      %404 = arith.mulf %403, %402 : vector<16x128xf32>
      %405 = arith.addf %392, %404 : vector<16x128xf32>
      %406 = vector.extract_strided_slice %340 {offsets = [0, 5, 0], sizes = [2, 16, 128], strides = [1, 1, 1]} : vector<2x24x128xf32> to vector<2x16x128xf32>
      %c37 = arith.constant 37 : index
      %407 = memref.load %arg2[%c37] : memref<98xf32, #tpu.memory_space<smem>>
      %c86 = arith.constant 86 : index
      %408 = memref.load %arg2[%c86] : memref<98xf32, #tpu.memory_space<smem>>
      %409 = vector.extract_strided_slice %406 {offsets = [0, 0, 0], sizes = [1, 16, 128], strides = [1, 1, 1]} : vector<2x16x128xf32> to vector<1x16x128xf32>
      %410 = vector.shape_cast %409 : vector<1x16x128xf32> to vector<16x128xf32>
      %411 = vector.broadcast %407 : f32 to vector<16x128xf32>
      %412 = arith.mulf %411, %410 : vector<16x128xf32>
      %413 = arith.addf %400, %412 : vector<16x128xf32>
      %414 = vector.extract_strided_slice %406 {offsets = [1, 0, 0], sizes = [1, 16, 128], strides = [1, 1, 1]} : vector<2x16x128xf32> to vector<1x16x128xf32>
      %415 = vector.shape_cast %414 : vector<1x16x128xf32> to vector<16x128xf32>
      %416 = vector.broadcast %408 : f32 to vector<16x128xf32>
      %417 = arith.mulf %416, %415 : vector<16x128xf32>
      %418 = arith.addf %405, %417 : vector<16x128xf32>
      %419 = vector.extract_strided_slice %340 {offsets = [0, 6, 0], sizes = [2, 16, 128], strides = [1, 1, 1]} : vector<2x24x128xf32> to vector<2x16x128xf32>
      %c44 = arith.constant 44 : index
      %420 = memref.load %arg2[%c44] : memref<98xf32, #tpu.memory_space<smem>>
      %c93 = arith.constant 93 : index
      %421 = memref.load %arg2[%c93] : memref<98xf32, #tpu.memory_space<smem>>
      %422 = vector.extract_strided_slice %419 {offsets = [0, 0, 0], sizes = [1, 16, 128], strides = [1, 1, 1]} : vector<2x16x128xf32> to vector<1x16x128xf32>
      %423 = vector.shape_cast %422 : vector<1x16x128xf32> to vector<16x128xf32>
      %424 = vector.broadcast %420 : f32 to vector<16x128xf32>
      %425 = arith.mulf %424, %423 : vector<16x128xf32>
      %426 = arith.addf %413, %425 : vector<16x128xf32>
      %427 = vector.extract_strided_slice %419 {offsets = [1, 0, 0], sizes = [1, 16, 128], strides = [1, 1, 1]} : vector<2x16x128xf32> to vector<1x16x128xf32>
      %428 = vector.shape_cast %427 : vector<1x16x128xf32> to vector<16x128xf32>
      %429 = vector.broadcast %421 : f32 to vector<16x128xf32>
      %430 = arith.mulf %429, %428 : vector<16x128xf32>
      %431 = arith.addf %418, %430 : vector<16x128xf32>
      %432 = vector.extract_strided_slice %151 {offsets = [0, 0, 3], sizes = [2, 24, 128], strides = [1, 1, 1]} : vector<2x24x256xf32> to vector<2x24x128xf32>
      %433 = vector.extract_strided_slice %432 {offsets = [0, 0, 0], sizes = [2, 16, 128], strides = [1, 1, 1]} : vector<2x24x128xf32> to vector<2x16x128xf32>
      %c3_150 = arith.constant 3 : index
      %434 = memref.load %arg2[%c3_150] : memref<98xf32, #tpu.memory_space<smem>>
      %c52 = arith.constant 52 : index
      %435 = memref.load %arg2[%c52] : memref<98xf32, #tpu.memory_space<smem>>
      %436 = vector.extract_strided_slice %433 {offsets = [0, 0, 0], sizes = [1, 16, 128], strides = [1, 1, 1]} : vector<2x16x128xf32> to vector<1x16x128xf32>
      %437 = vector.shape_cast %436 : vector<1x16x128xf32> to vector<16x128xf32>
      %438 = vector.broadcast %434 : f32 to vector<16x128xf32>
      %439 = arith.mulf %438, %437 : vector<16x128xf32>
      %440 = arith.addf %334, %439 : vector<16x128xf32>
      %441 = vector.extract_strided_slice %433 {offsets = [1, 0, 0], sizes = [1, 16, 128], strides = [1, 1, 1]} : vector<2x16x128xf32> to vector<1x16x128xf32>
      %442 = vector.shape_cast %441 : vector<1x16x128xf32> to vector<16x128xf32>
      %443 = vector.broadcast %435 : f32 to vector<16x128xf32>
      %444 = arith.mulf %443, %442 : vector<16x128xf32>
      %445 = arith.addf %339, %444 : vector<16x128xf32>
      %446 = vector.extract_strided_slice %432 {offsets = [0, 1, 0], sizes = [2, 16, 128], strides = [1, 1, 1]} : vector<2x24x128xf32> to vector<2x16x128xf32>
      %c10_151 = arith.constant 10 : index
      %447 = memref.load %arg2[%c10_151] : memref<98xf32, #tpu.memory_space<smem>>
      %c59 = arith.constant 59 : index
      %448 = memref.load %arg2[%c59] : memref<98xf32, #tpu.memory_space<smem>>
      %449 = vector.extract_strided_slice %446 {offsets = [0, 0, 0], sizes = [1, 16, 128], strides = [1, 1, 1]} : vector<2x16x128xf32> to vector<1x16x128xf32>
      %450 = vector.shape_cast %449 : vector<1x16x128xf32> to vector<16x128xf32>
      %451 = vector.broadcast %447 : f32 to vector<16x128xf32>
      %452 = arith.mulf %451, %450 : vector<16x128xf32>
      %453 = arith.addf %440, %452 : vector<16x128xf32>
      %454 = vector.extract_strided_slice %446 {offsets = [1, 0, 0], sizes = [1, 16, 128], strides = [1, 1, 1]} : vector<2x16x128xf32> to vector<1x16x128xf32>
      %455 = vector.shape_cast %454 : vector<1x16x128xf32> to vector<16x128xf32>
      %456 = vector.broadcast %448 : f32 to vector<16x128xf32>
      %457 = arith.mulf %456, %455 : vector<16x128xf32>
      %458 = arith.addf %445, %457 : vector<16x128xf32>
      %459 = vector.extract_strided_slice %432 {offsets = [0, 2, 0], sizes = [2, 16, 128], strides = [1, 1, 1]} : vector<2x24x128xf32> to vector<2x16x128xf32>
      %c17_152 = arith.constant 17 : index
      %460 = memref.load %arg2[%c17_152] : memref<98xf32, #tpu.memory_space<smem>>
      %c66 = arith.constant 66 : index
      %461 = memref.load %arg2[%c66] : memref<98xf32, #tpu.memory_space<smem>>
      %462 = vector.extract_strided_slice %459 {offsets = [0, 0, 0], sizes = [1, 16, 128], strides = [1, 1, 1]} : vector<2x16x128xf32> to vector<1x16x128xf32>
      %463 = vector.shape_cast %462 : vector<1x16x128xf32> to vector<16x128xf32>
      %464 = vector.broadcast %460 : f32 to vector<16x128xf32>
      %465 = arith.mulf %464, %463 : vector<16x128xf32>
      %466 = arith.addf %453, %465 : vector<16x128xf32>
      %467 = vector.extract_strided_slice %459 {offsets = [1, 0, 0], sizes = [1, 16, 128], strides = [1, 1, 1]} : vector<2x16x128xf32> to vector<1x16x128xf32>
      %468 = vector.shape_cast %467 : vector<1x16x128xf32> to vector<16x128xf32>
      %469 = vector.broadcast %461 : f32 to vector<16x128xf32>
      %470 = arith.mulf %469, %468 : vector<16x128xf32>
      %471 = arith.addf %458, %470 : vector<16x128xf32>
      %472 = vector.extract_strided_slice %432 {offsets = [0, 3, 0], sizes = [2, 16, 128], strides = [1, 1, 1]} : vector<2x24x128xf32> to vector<2x16x128xf32>
      %c24 = arith.constant 24 : index
      %473 = memref.load %arg2[%c24] : memref<98xf32, #tpu.memory_space<smem>>
      %c73 = arith.constant 73 : index
      %474 = memref.load %arg2[%c73] : memref<98xf32, #tpu.memory_space<smem>>
      %475 = vector.extract_strided_slice %472 {offsets = [0, 0, 0], sizes = [1, 16, 128], strides = [1, 1, 1]} : vector<2x16x128xf32> to vector<1x16x128xf32>
      %476 = vector.shape_cast %475 : vector<1x16x128xf32> to vector<16x128xf32>
      %477 = vector.broadcast %473 : f32 to vector<16x128xf32>
      %478 = arith.mulf %477, %476 : vector<16x128xf32>
      %479 = arith.addf %466, %478 : vector<16x128xf32>
      %480 = vector.extract_strided_slice %472 {offsets = [1, 0, 0], sizes = [1, 16, 128], strides = [1, 1, 1]} : vector<2x16x128xf32> to vector<1x16x128xf32>
      %481 = vector.shape_cast %480 : vector<1x16x128xf32> to vector<16x128xf32>
      %482 = vector.broadcast %474 : f32 to vector<16x128xf32>
      %483 = arith.mulf %482, %481 : vector<16x128xf32>
      %484 = arith.addf %471, %483 : vector<16x128xf32>
      %485 = vector.extract_strided_slice %432 {offsets = [0, 4, 0], sizes = [2, 16, 128], strides = [1, 1, 1]} : vector<2x24x128xf32> to vector<2x16x128xf32>
      %c31 = arith.constant 31 : index
      %486 = memref.load %arg2[%c31] : memref<98xf32, #tpu.memory_space<smem>>
      %c80 = arith.constant 80 : index
      %487 = memref.load %arg2[%c80] : memref<98xf32, #tpu.memory_space<smem>>
      %488 = vector.extract_strided_slice %485 {offsets = [0, 0, 0], sizes = [1, 16, 128], strides = [1, 1, 1]} : vector<2x16x128xf32> to vector<1x16x128xf32>
      %489 = vector.shape_cast %488 : vector<1x16x128xf32> to vector<16x128xf32>
      %490 = vector.broadcast %486 : f32 to vector<16x128xf32>
      %491 = arith.mulf %490, %489 : vector<16x128xf32>
      %492 = arith.addf %479, %491 : vector<16x128xf32>
      %493 = vector.extract_strided_slice %485 {offsets = [1, 0, 0], sizes = [1, 16, 128], strides = [1, 1, 1]} : vector<2x16x128xf32> to vector<1x16x128xf32>
      %494 = vector.shape_cast %493 : vector<1x16x128xf32> to vector<16x128xf32>
      %495 = vector.broadcast %487 : f32 to vector<16x128xf32>
      %496 = arith.mulf %495, %494 : vector<16x128xf32>
      %497 = arith.addf %484, %496 : vector<16x128xf32>
      %498 = vector.extract_strided_slice %432 {offsets = [0, 5, 0], sizes = [2, 16, 128], strides = [1, 1, 1]} : vector<2x24x128xf32> to vector<2x16x128xf32>
      %c38 = arith.constant 38 : index
      %499 = memref.load %arg2[%c38] : memref<98xf32, #tpu.memory_space<smem>>
      %c87 = arith.constant 87 : index
      %500 = memref.load %arg2[%c87] : memref<98xf32, #tpu.memory_space<smem>>
      %501 = vector.extract_strided_slice %498 {offsets = [0, 0, 0], sizes = [1, 16, 128], strides = [1, 1, 1]} : vector<2x16x128xf32> to vector<1x16x128xf32>
      %502 = vector.shape_cast %501 : vector<1x16x128xf32> to vector<16x128xf32>
      %503 = vector.broadcast %499 : f32 to vector<16x128xf32>
      %504 = arith.mulf %503, %502 : vector<16x128xf32>
      %505 = arith.addf %492, %504 : vector<16x128xf32>
      %506 = vector.extract_strided_slice %498 {offsets = [1, 0, 0], sizes = [1, 16, 128], strides = [1, 1, 1]} : vector<2x16x128xf32> to vector<1x16x128xf32>
      %507 = vector.shape_cast %506 : vector<1x16x128xf32> to vector<16x128xf32>
      %508 = vector.broadcast %500 : f32 to vector<16x128xf32>
      %509 = arith.mulf %508, %507 : vector<16x128xf32>
      %510 = arith.addf %497, %509 : vector<16x128xf32>
      %511 = vector.extract_strided_slice %432 {offsets = [0, 6, 0], sizes = [2, 16, 128], strides = [1, 1, 1]} : vector<2x24x128xf32> to vector<2x16x128xf32>
      %c45 = arith.constant 45 : index
      %512 = memref.load %arg2[%c45] : memref<98xf32, #tpu.memory_space<smem>>
      %c94 = arith.constant 94 : index
      %513 = memref.load %arg2[%c94] : memref<98xf32, #tpu.memory_space<smem>>
      %514 = vector.extract_strided_slice %511 {offsets = [0, 0, 0], sizes = [1, 16, 128], strides = [1, 1, 1]} : vector<2x16x128xf32> to vector<1x16x128xf32>
      %515 = vector.shape_cast %514 : vector<1x16x128xf32> to vector<16x128xf32>
      %516 = vector.broadcast %512 : f32 to vector<16x128xf32>
      %517 = arith.mulf %516, %515 : vector<16x128xf32>
      %518 = arith.addf %505, %517 : vector<16x128xf32>
      %519 = vector.extract_strided_slice %511 {offsets = [1, 0, 0], sizes = [1, 16, 128], strides = [1, 1, 1]} : vector<2x16x128xf32> to vector<1x16x128xf32>
      %520 = vector.shape_cast %519 : vector<1x16x128xf32> to vector<16x128xf32>
      %521 = vector.broadcast %513 : f32 to vector<16x128xf32>
      %522 = arith.mulf %521, %520 : vector<16x128xf32>
      %523 = arith.addf %510, %522 : vector<16x128xf32>
      %524 = vector.extract_strided_slice %151 {offsets = [0, 0, 4], sizes = [2, 24, 128], strides = [1, 1, 1]} : vector<2x24x256xf32> to vector<2x24x128xf32>
      %525 = vector.extract_strided_slice %524 {offsets = [0, 0, 0], sizes = [2, 16, 128], strides = [1, 1, 1]} : vector<2x24x128xf32> to vector<2x16x128xf32>
      %c4_153 = arith.constant 4 : index
      %526 = memref.load %arg2[%c4_153] : memref<98xf32, #tpu.memory_space<smem>>
      %c53 = arith.constant 53 : index
      %527 = memref.load %arg2[%c53] : memref<98xf32, #tpu.memory_space<smem>>
      %528 = vector.extract_strided_slice %525 {offsets = [0, 0, 0], sizes = [1, 16, 128], strides = [1, 1, 1]} : vector<2x16x128xf32> to vector<1x16x128xf32>
      %529 = vector.shape_cast %528 : vector<1x16x128xf32> to vector<16x128xf32>
      %530 = vector.broadcast %526 : f32 to vector<16x128xf32>
      %531 = arith.mulf %530, %529 : vector<16x128xf32>
      %532 = arith.addf %426, %531 : vector<16x128xf32>
      %533 = vector.extract_strided_slice %525 {offsets = [1, 0, 0], sizes = [1, 16, 128], strides = [1, 1, 1]} : vector<2x16x128xf32> to vector<1x16x128xf32>
      %534 = vector.shape_cast %533 : vector<1x16x128xf32> to vector<16x128xf32>
      %535 = vector.broadcast %527 : f32 to vector<16x128xf32>
      %536 = arith.mulf %535, %534 : vector<16x128xf32>
      %537 = arith.addf %431, %536 : vector<16x128xf32>
      %538 = vector.extract_strided_slice %524 {offsets = [0, 1, 0], sizes = [2, 16, 128], strides = [1, 1, 1]} : vector<2x24x128xf32> to vector<2x16x128xf32>
      %c11_154 = arith.constant 11 : index
      %539 = memref.load %arg2[%c11_154] : memref<98xf32, #tpu.memory_space<smem>>
      %c60 = arith.constant 60 : index
      %540 = memref.load %arg2[%c60] : memref<98xf32, #tpu.memory_space<smem>>
      %541 = vector.extract_strided_slice %538 {offsets = [0, 0, 0], sizes = [1, 16, 128], strides = [1, 1, 1]} : vector<2x16x128xf32> to vector<1x16x128xf32>
      %542 = vector.shape_cast %541 : vector<1x16x128xf32> to vector<16x128xf32>
      %543 = vector.broadcast %539 : f32 to vector<16x128xf32>
      %544 = arith.mulf %543, %542 : vector<16x128xf32>
      %545 = arith.addf %532, %544 : vector<16x128xf32>
      %546 = vector.extract_strided_slice %538 {offsets = [1, 0, 0], sizes = [1, 16, 128], strides = [1, 1, 1]} : vector<2x16x128xf32> to vector<1x16x128xf32>
      %547 = vector.shape_cast %546 : vector<1x16x128xf32> to vector<16x128xf32>
      %548 = vector.broadcast %540 : f32 to vector<16x128xf32>
      %549 = arith.mulf %548, %547 : vector<16x128xf32>
      %550 = arith.addf %537, %549 : vector<16x128xf32>
      %551 = vector.extract_strided_slice %524 {offsets = [0, 2, 0], sizes = [2, 16, 128], strides = [1, 1, 1]} : vector<2x24x128xf32> to vector<2x16x128xf32>
      %c18_155 = arith.constant 18 : index
      %552 = memref.load %arg2[%c18_155] : memref<98xf32, #tpu.memory_space<smem>>
      %c67 = arith.constant 67 : index
      %553 = memref.load %arg2[%c67] : memref<98xf32, #tpu.memory_space<smem>>
      %554 = vector.extract_strided_slice %551 {offsets = [0, 0, 0], sizes = [1, 16, 128], strides = [1, 1, 1]} : vector<2x16x128xf32> to vector<1x16x128xf32>
      %555 = vector.shape_cast %554 : vector<1x16x128xf32> to vector<16x128xf32>
      %556 = vector.broadcast %552 : f32 to vector<16x128xf32>
      %557 = arith.mulf %556, %555 : vector<16x128xf32>
      %558 = arith.addf %545, %557 : vector<16x128xf32>
      %559 = vector.extract_strided_slice %551 {offsets = [1, 0, 0], sizes = [1, 16, 128], strides = [1, 1, 1]} : vector<2x16x128xf32> to vector<1x16x128xf32>
      %560 = vector.shape_cast %559 : vector<1x16x128xf32> to vector<16x128xf32>
      %561 = vector.broadcast %553 : f32 to vector<16x128xf32>
      %562 = arith.mulf %561, %560 : vector<16x128xf32>
      %563 = arith.addf %550, %562 : vector<16x128xf32>
      %564 = vector.extract_strided_slice %524 {offsets = [0, 3, 0], sizes = [2, 16, 128], strides = [1, 1, 1]} : vector<2x24x128xf32> to vector<2x16x128xf32>
      %c25 = arith.constant 25 : index
      %565 = memref.load %arg2[%c25] : memref<98xf32, #tpu.memory_space<smem>>
      %c74 = arith.constant 74 : index
      %566 = memref.load %arg2[%c74] : memref<98xf32, #tpu.memory_space<smem>>
      %567 = vector.extract_strided_slice %564 {offsets = [0, 0, 0], sizes = [1, 16, 128], strides = [1, 1, 1]} : vector<2x16x128xf32> to vector<1x16x128xf32>
      %568 = vector.shape_cast %567 : vector<1x16x128xf32> to vector<16x128xf32>
      %569 = vector.broadcast %565 : f32 to vector<16x128xf32>
      %570 = arith.mulf %569, %568 : vector<16x128xf32>
      %571 = arith.addf %558, %570 : vector<16x128xf32>
      %572 = vector.extract_strided_slice %564 {offsets = [1, 0, 0], sizes = [1, 16, 128], strides = [1, 1, 1]} : vector<2x16x128xf32> to vector<1x16x128xf32>
      %573 = vector.shape_cast %572 : vector<1x16x128xf32> to vector<16x128xf32>
      %574 = vector.broadcast %566 : f32 to vector<16x128xf32>
      %575 = arith.mulf %574, %573 : vector<16x128xf32>
      %576 = arith.addf %563, %575 : vector<16x128xf32>
      %577 = vector.extract_strided_slice %524 {offsets = [0, 4, 0], sizes = [2, 16, 128], strides = [1, 1, 1]} : vector<2x24x128xf32> to vector<2x16x128xf32>
      %c32 = arith.constant 32 : index
      %578 = memref.load %arg2[%c32] : memref<98xf32, #tpu.memory_space<smem>>
      %c81 = arith.constant 81 : index
      %579 = memref.load %arg2[%c81] : memref<98xf32, #tpu.memory_space<smem>>
      %580 = vector.extract_strided_slice %577 {offsets = [0, 0, 0], sizes = [1, 16, 128], strides = [1, 1, 1]} : vector<2x16x128xf32> to vector<1x16x128xf32>
      %581 = vector.shape_cast %580 : vector<1x16x128xf32> to vector<16x128xf32>
      %582 = vector.broadcast %578 : f32 to vector<16x128xf32>
      %583 = arith.mulf %582, %581 : vector<16x128xf32>
      %584 = arith.addf %571, %583 : vector<16x128xf32>
      %585 = vector.extract_strided_slice %577 {offsets = [1, 0, 0], sizes = [1, 16, 128], strides = [1, 1, 1]} : vector<2x16x128xf32> to vector<1x16x128xf32>
      %586 = vector.shape_cast %585 : vector<1x16x128xf32> to vector<16x128xf32>
      %587 = vector.broadcast %579 : f32 to vector<16x128xf32>
      %588 = arith.mulf %587, %586 : vector<16x128xf32>
      %589 = arith.addf %576, %588 : vector<16x128xf32>
      %590 = vector.extract_strided_slice %524 {offsets = [0, 5, 0], sizes = [2, 16, 128], strides = [1, 1, 1]} : vector<2x24x128xf32> to vector<2x16x128xf32>
      %c39 = arith.constant 39 : index
      %591 = memref.load %arg2[%c39] : memref<98xf32, #tpu.memory_space<smem>>
      %c88 = arith.constant 88 : index
      %592 = memref.load %arg2[%c88] : memref<98xf32, #tpu.memory_space<smem>>
      %593 = vector.extract_strided_slice %590 {offsets = [0, 0, 0], sizes = [1, 16, 128], strides = [1, 1, 1]} : vector<2x16x128xf32> to vector<1x16x128xf32>
      %594 = vector.shape_cast %593 : vector<1x16x128xf32> to vector<16x128xf32>
      %595 = vector.broadcast %591 : f32 to vector<16x128xf32>
      %596 = arith.mulf %595, %594 : vector<16x128xf32>
      %597 = arith.addf %584, %596 : vector<16x128xf32>
      %598 = vector.extract_strided_slice %590 {offsets = [1, 0, 0], sizes = [1, 16, 128], strides = [1, 1, 1]} : vector<2x16x128xf32> to vector<1x16x128xf32>
      %599 = vector.shape_cast %598 : vector<1x16x128xf32> to vector<16x128xf32>
      %600 = vector.broadcast %592 : f32 to vector<16x128xf32>
      %601 = arith.mulf %600, %599 : vector<16x128xf32>
      %602 = arith.addf %589, %601 : vector<16x128xf32>
      %603 = vector.extract_strided_slice %524 {offsets = [0, 6, 0], sizes = [2, 16, 128], strides = [1, 1, 1]} : vector<2x24x128xf32> to vector<2x16x128xf32>
      %c46 = arith.constant 46 : index
      %604 = memref.load %arg2[%c46] : memref<98xf32, #tpu.memory_space<smem>>
      %c95 = arith.constant 95 : index
      %605 = memref.load %arg2[%c95] : memref<98xf32, #tpu.memory_space<smem>>
      %606 = vector.extract_strided_slice %603 {offsets = [0, 0, 0], sizes = [1, 16, 128], strides = [1, 1, 1]} : vector<2x16x128xf32> to vector<1x16x128xf32>
      %607 = vector.shape_cast %606 : vector<1x16x128xf32> to vector<16x128xf32>
      %608 = vector.broadcast %604 : f32 to vector<16x128xf32>
      %609 = arith.mulf %608, %607 : vector<16x128xf32>
      %610 = arith.addf %597, %609 : vector<16x128xf32>
      %611 = vector.extract_strided_slice %603 {offsets = [1, 0, 0], sizes = [1, 16, 128], strides = [1, 1, 1]} : vector<2x16x128xf32> to vector<1x16x128xf32>
      %612 = vector.shape_cast %611 : vector<1x16x128xf32> to vector<16x128xf32>
      %613 = vector.broadcast %605 : f32 to vector<16x128xf32>
      %614 = arith.mulf %613, %612 : vector<16x128xf32>
      %615 = arith.addf %602, %614 : vector<16x128xf32>
      %616 = vector.extract_strided_slice %151 {offsets = [0, 0, 5], sizes = [2, 24, 128], strides = [1, 1, 1]} : vector<2x24x256xf32> to vector<2x24x128xf32>
      %617 = vector.extract_strided_slice %616 {offsets = [0, 0, 0], sizes = [2, 16, 128], strides = [1, 1, 1]} : vector<2x24x128xf32> to vector<2x16x128xf32>
      %c5_156 = arith.constant 5 : index
      %618 = memref.load %arg2[%c5_156] : memref<98xf32, #tpu.memory_space<smem>>
      %c54 = arith.constant 54 : index
      %619 = memref.load %arg2[%c54] : memref<98xf32, #tpu.memory_space<smem>>
      %620 = vector.extract_strided_slice %617 {offsets = [0, 0, 0], sizes = [1, 16, 128], strides = [1, 1, 1]} : vector<2x16x128xf32> to vector<1x16x128xf32>
      %621 = vector.shape_cast %620 : vector<1x16x128xf32> to vector<16x128xf32>
      %622 = vector.broadcast %618 : f32 to vector<16x128xf32>
      %623 = arith.mulf %622, %621 : vector<16x128xf32>
      %624 = arith.addf %518, %623 : vector<16x128xf32>
      %625 = vector.extract_strided_slice %617 {offsets = [1, 0, 0], sizes = [1, 16, 128], strides = [1, 1, 1]} : vector<2x16x128xf32> to vector<1x16x128xf32>
      %626 = vector.shape_cast %625 : vector<1x16x128xf32> to vector<16x128xf32>
      %627 = vector.broadcast %619 : f32 to vector<16x128xf32>
      %628 = arith.mulf %627, %626 : vector<16x128xf32>
      %629 = arith.addf %523, %628 : vector<16x128xf32>
      %630 = vector.extract_strided_slice %616 {offsets = [0, 1, 0], sizes = [2, 16, 128], strides = [1, 1, 1]} : vector<2x24x128xf32> to vector<2x16x128xf32>
      %c12_157 = arith.constant 12 : index
      %631 = memref.load %arg2[%c12_157] : memref<98xf32, #tpu.memory_space<smem>>
      %c61 = arith.constant 61 : index
      %632 = memref.load %arg2[%c61] : memref<98xf32, #tpu.memory_space<smem>>
      %633 = vector.extract_strided_slice %630 {offsets = [0, 0, 0], sizes = [1, 16, 128], strides = [1, 1, 1]} : vector<2x16x128xf32> to vector<1x16x128xf32>
      %634 = vector.shape_cast %633 : vector<1x16x128xf32> to vector<16x128xf32>
      %635 = vector.broadcast %631 : f32 to vector<16x128xf32>
      %636 = arith.mulf %635, %634 : vector<16x128xf32>
      %637 = arith.addf %624, %636 : vector<16x128xf32>
      %638 = vector.extract_strided_slice %630 {offsets = [1, 0, 0], sizes = [1, 16, 128], strides = [1, 1, 1]} : vector<2x16x128xf32> to vector<1x16x128xf32>
      %639 = vector.shape_cast %638 : vector<1x16x128xf32> to vector<16x128xf32>
      %640 = vector.broadcast %632 : f32 to vector<16x128xf32>
      %641 = arith.mulf %640, %639 : vector<16x128xf32>
      %642 = arith.addf %629, %641 : vector<16x128xf32>
      %643 = vector.extract_strided_slice %616 {offsets = [0, 2, 0], sizes = [2, 16, 128], strides = [1, 1, 1]} : vector<2x24x128xf32> to vector<2x16x128xf32>
      %c19 = arith.constant 19 : index
      %644 = memref.load %arg2[%c19] : memref<98xf32, #tpu.memory_space<smem>>
      %c68 = arith.constant 68 : index
      %645 = memref.load %arg2[%c68] : memref<98xf32, #tpu.memory_space<smem>>
      %646 = vector.extract_strided_slice %643 {offsets = [0, 0, 0], sizes = [1, 16, 128], strides = [1, 1, 1]} : vector<2x16x128xf32> to vector<1x16x128xf32>
      %647 = vector.shape_cast %646 : vector<1x16x128xf32> to vector<16x128xf32>
      %648 = vector.broadcast %644 : f32 to vector<16x128xf32>
      %649 = arith.mulf %648, %647 : vector<16x128xf32>
      %650 = arith.addf %637, %649 : vector<16x128xf32>
      %651 = vector.extract_strided_slice %643 {offsets = [1, 0, 0], sizes = [1, 16, 128], strides = [1, 1, 1]} : vector<2x16x128xf32> to vector<1x16x128xf32>
      %652 = vector.shape_cast %651 : vector<1x16x128xf32> to vector<16x128xf32>
      %653 = vector.broadcast %645 : f32 to vector<16x128xf32>
      %654 = arith.mulf %653, %652 : vector<16x128xf32>
      %655 = arith.addf %642, %654 : vector<16x128xf32>
      %656 = vector.extract_strided_slice %616 {offsets = [0, 3, 0], sizes = [2, 16, 128], strides = [1, 1, 1]} : vector<2x24x128xf32> to vector<2x16x128xf32>
      %c26 = arith.constant 26 : index
      %657 = memref.load %arg2[%c26] : memref<98xf32, #tpu.memory_space<smem>>
      %c75 = arith.constant 75 : index
      %658 = memref.load %arg2[%c75] : memref<98xf32, #tpu.memory_space<smem>>
      %659 = vector.extract_strided_slice %656 {offsets = [0, 0, 0], sizes = [1, 16, 128], strides = [1, 1, 1]} : vector<2x16x128xf32> to vector<1x16x128xf32>
      %660 = vector.shape_cast %659 : vector<1x16x128xf32> to vector<16x128xf32>
      %661 = vector.broadcast %657 : f32 to vector<16x128xf32>
      %662 = arith.mulf %661, %660 : vector<16x128xf32>
      %663 = arith.addf %650, %662 : vector<16x128xf32>
      %664 = vector.extract_strided_slice %656 {offsets = [1, 0, 0], sizes = [1, 16, 128], strides = [1, 1, 1]} : vector<2x16x128xf32> to vector<1x16x128xf32>
      %665 = vector.shape_cast %664 : vector<1x16x128xf32> to vector<16x128xf32>
      %666 = vector.broadcast %658 : f32 to vector<16x128xf32>
      %667 = arith.mulf %666, %665 : vector<16x128xf32>
      %668 = arith.addf %655, %667 : vector<16x128xf32>
      %669 = vector.extract_strided_slice %616 {offsets = [0, 4, 0], sizes = [2, 16, 128], strides = [1, 1, 1]} : vector<2x24x128xf32> to vector<2x16x128xf32>
      %c33 = arith.constant 33 : index
      %670 = memref.load %arg2[%c33] : memref<98xf32, #tpu.memory_space<smem>>
      %c82 = arith.constant 82 : index
      %671 = memref.load %arg2[%c82] : memref<98xf32, #tpu.memory_space<smem>>
      %672 = vector.extract_strided_slice %669 {offsets = [0, 0, 0], sizes = [1, 16, 128], strides = [1, 1, 1]} : vector<2x16x128xf32> to vector<1x16x128xf32>
      %673 = vector.shape_cast %672 : vector<1x16x128xf32> to vector<16x128xf32>
      %674 = vector.broadcast %670 : f32 to vector<16x128xf32>
      %675 = arith.mulf %674, %673 : vector<16x128xf32>
      %676 = arith.addf %663, %675 : vector<16x128xf32>
      %677 = vector.extract_strided_slice %669 {offsets = [1, 0, 0], sizes = [1, 16, 128], strides = [1, 1, 1]} : vector<2x16x128xf32> to vector<1x16x128xf32>
      %678 = vector.shape_cast %677 : vector<1x16x128xf32> to vector<16x128xf32>
      %679 = vector.broadcast %671 : f32 to vector<16x128xf32>
      %680 = arith.mulf %679, %678 : vector<16x128xf32>
      %681 = arith.addf %668, %680 : vector<16x128xf32>
      %682 = vector.extract_strided_slice %616 {offsets = [0, 5, 0], sizes = [2, 16, 128], strides = [1, 1, 1]} : vector<2x24x128xf32> to vector<2x16x128xf32>
      %c40 = arith.constant 40 : index
      %683 = memref.load %arg2[%c40] : memref<98xf32, #tpu.memory_space<smem>>
      %c89 = arith.constant 89 : index
      %684 = memref.load %arg2[%c89] : memref<98xf32, #tpu.memory_space<smem>>
      %685 = vector.extract_strided_slice %682 {offsets = [0, 0, 0], sizes = [1, 16, 128], strides = [1, 1, 1]} : vector<2x16x128xf32> to vector<1x16x128xf32>
      %686 = vector.shape_cast %685 : vector<1x16x128xf32> to vector<16x128xf32>
      %687 = vector.broadcast %683 : f32 to vector<16x128xf32>
      %688 = arith.mulf %687, %686 : vector<16x128xf32>
      %689 = arith.addf %676, %688 : vector<16x128xf32>
      %690 = vector.extract_strided_slice %682 {offsets = [1, 0, 0], sizes = [1, 16, 128], strides = [1, 1, 1]} : vector<2x16x128xf32> to vector<1x16x128xf32>
      %691 = vector.shape_cast %690 : vector<1x16x128xf32> to vector<16x128xf32>
      %692 = vector.broadcast %684 : f32 to vector<16x128xf32>
      %693 = arith.mulf %692, %691 : vector<16x128xf32>
      %694 = arith.addf %681, %693 : vector<16x128xf32>
      %695 = vector.extract_strided_slice %616 {offsets = [0, 6, 0], sizes = [2, 16, 128], strides = [1, 1, 1]} : vector<2x24x128xf32> to vector<2x16x128xf32>
      %c47 = arith.constant 47 : index
      %696 = memref.load %arg2[%c47] : memref<98xf32, #tpu.memory_space<smem>>
      %c96 = arith.constant 96 : index
      %697 = memref.load %arg2[%c96] : memref<98xf32, #tpu.memory_space<smem>>
      %698 = vector.extract_strided_slice %695 {offsets = [0, 0, 0], sizes = [1, 16, 128], strides = [1, 1, 1]} : vector<2x16x128xf32> to vector<1x16x128xf32>
      %699 = vector.shape_cast %698 : vector<1x16x128xf32> to vector<16x128xf32>
      %700 = vector.broadcast %696 : f32 to vector<16x128xf32>
      %701 = arith.mulf %700, %699 : vector<16x128xf32>
      %702 = arith.addf %689, %701 : vector<16x128xf32>
      %703 = vector.extract_strided_slice %695 {offsets = [1, 0, 0], sizes = [1, 16, 128], strides = [1, 1, 1]} : vector<2x16x128xf32> to vector<1x16x128xf32>
      %704 = vector.shape_cast %703 : vector<1x16x128xf32> to vector<16x128xf32>
      %705 = vector.broadcast %697 : f32 to vector<16x128xf32>
      %706 = arith.mulf %705, %704 : vector<16x128xf32>
      %707 = arith.addf %694, %706 : vector<16x128xf32>
      %708 = vector.extract_strided_slice %151 {offsets = [0, 0, 6], sizes = [2, 24, 128], strides = [1, 1, 1]} : vector<2x24x256xf32> to vector<2x24x128xf32>
      %709 = vector.extract_strided_slice %708 {offsets = [0, 0, 0], sizes = [2, 16, 128], strides = [1, 1, 1]} : vector<2x24x128xf32> to vector<2x16x128xf32>
      %c6_158 = arith.constant 6 : index
      %710 = memref.load %arg2[%c6_158] : memref<98xf32, #tpu.memory_space<smem>>
      %c55 = arith.constant 55 : index
      %711 = memref.load %arg2[%c55] : memref<98xf32, #tpu.memory_space<smem>>
      %712 = vector.extract_strided_slice %709 {offsets = [0, 0, 0], sizes = [1, 16, 128], strides = [1, 1, 1]} : vector<2x16x128xf32> to vector<1x16x128xf32>
      %713 = vector.shape_cast %712 : vector<1x16x128xf32> to vector<16x128xf32>
      %714 = vector.broadcast %710 : f32 to vector<16x128xf32>
      %715 = arith.mulf %714, %713 : vector<16x128xf32>
      %716 = arith.addf %610, %715 : vector<16x128xf32>
      %717 = vector.extract_strided_slice %709 {offsets = [1, 0, 0], sizes = [1, 16, 128], strides = [1, 1, 1]} : vector<2x16x128xf32> to vector<1x16x128xf32>
      %718 = vector.shape_cast %717 : vector<1x16x128xf32> to vector<16x128xf32>
      %719 = vector.broadcast %711 : f32 to vector<16x128xf32>
      %720 = arith.mulf %719, %718 : vector<16x128xf32>
      %721 = arith.addf %615, %720 : vector<16x128xf32>
      %722 = vector.extract_strided_slice %708 {offsets = [0, 1, 0], sizes = [2, 16, 128], strides = [1, 1, 1]} : vector<2x24x128xf32> to vector<2x16x128xf32>
      %c13_159 = arith.constant 13 : index
      %723 = memref.load %arg2[%c13_159] : memref<98xf32, #tpu.memory_space<smem>>
      %c62 = arith.constant 62 : index
      %724 = memref.load %arg2[%c62] : memref<98xf32, #tpu.memory_space<smem>>
      %725 = vector.extract_strided_slice %722 {offsets = [0, 0, 0], sizes = [1, 16, 128], strides = [1, 1, 1]} : vector<2x16x128xf32> to vector<1x16x128xf32>
      %726 = vector.shape_cast %725 : vector<1x16x128xf32> to vector<16x128xf32>
      %727 = vector.broadcast %723 : f32 to vector<16x128xf32>
      %728 = arith.mulf %727, %726 : vector<16x128xf32>
      %729 = arith.addf %716, %728 : vector<16x128xf32>
      %730 = vector.extract_strided_slice %722 {offsets = [1, 0, 0], sizes = [1, 16, 128], strides = [1, 1, 1]} : vector<2x16x128xf32> to vector<1x16x128xf32>
      %731 = vector.shape_cast %730 : vector<1x16x128xf32> to vector<16x128xf32>
      %732 = vector.broadcast %724 : f32 to vector<16x128xf32>
      %733 = arith.mulf %732, %731 : vector<16x128xf32>
      %734 = arith.addf %721, %733 : vector<16x128xf32>
      %735 = vector.extract_strided_slice %708 {offsets = [0, 2, 0], sizes = [2, 16, 128], strides = [1, 1, 1]} : vector<2x24x128xf32> to vector<2x16x128xf32>
      %c20 = arith.constant 20 : index
      %736 = memref.load %arg2[%c20] : memref<98xf32, #tpu.memory_space<smem>>
      %c69 = arith.constant 69 : index
      %737 = memref.load %arg2[%c69] : memref<98xf32, #tpu.memory_space<smem>>
      %738 = vector.extract_strided_slice %735 {offsets = [0, 0, 0], sizes = [1, 16, 128], strides = [1, 1, 1]} : vector<2x16x128xf32> to vector<1x16x128xf32>
      %739 = vector.shape_cast %738 : vector<1x16x128xf32> to vector<16x128xf32>
      %740 = vector.broadcast %736 : f32 to vector<16x128xf32>
      %741 = arith.mulf %740, %739 : vector<16x128xf32>
      %742 = arith.addf %729, %741 : vector<16x128xf32>
      %743 = vector.extract_strided_slice %735 {offsets = [1, 0, 0], sizes = [1, 16, 128], strides = [1, 1, 1]} : vector<2x16x128xf32> to vector<1x16x128xf32>
      %744 = vector.shape_cast %743 : vector<1x16x128xf32> to vector<16x128xf32>
      %745 = vector.broadcast %737 : f32 to vector<16x128xf32>
      %746 = arith.mulf %745, %744 : vector<16x128xf32>
      %747 = arith.addf %734, %746 : vector<16x128xf32>
      %748 = vector.extract_strided_slice %708 {offsets = [0, 3, 0], sizes = [2, 16, 128], strides = [1, 1, 1]} : vector<2x24x128xf32> to vector<2x16x128xf32>
      %c27 = arith.constant 27 : index
      %749 = memref.load %arg2[%c27] : memref<98xf32, #tpu.memory_space<smem>>
      %c76 = arith.constant 76 : index
      %750 = memref.load %arg2[%c76] : memref<98xf32, #tpu.memory_space<smem>>
      %751 = vector.extract_strided_slice %748 {offsets = [0, 0, 0], sizes = [1, 16, 128], strides = [1, 1, 1]} : vector<2x16x128xf32> to vector<1x16x128xf32>
      %752 = vector.shape_cast %751 : vector<1x16x128xf32> to vector<16x128xf32>
      %753 = vector.broadcast %749 : f32 to vector<16x128xf32>
      %754 = arith.mulf %753, %752 : vector<16x128xf32>
      %755 = arith.addf %742, %754 : vector<16x128xf32>
      %756 = vector.extract_strided_slice %748 {offsets = [1, 0, 0], sizes = [1, 16, 128], strides = [1, 1, 1]} : vector<2x16x128xf32> to vector<1x16x128xf32>
      %757 = vector.shape_cast %756 : vector<1x16x128xf32> to vector<16x128xf32>
      %758 = vector.broadcast %750 : f32 to vector<16x128xf32>
      %759 = arith.mulf %758, %757 : vector<16x128xf32>
      %760 = arith.addf %747, %759 : vector<16x128xf32>
      %761 = vector.extract_strided_slice %708 {offsets = [0, 4, 0], sizes = [2, 16, 128], strides = [1, 1, 1]} : vector<2x24x128xf32> to vector<2x16x128xf32>
      %c34 = arith.constant 34 : index
      %762 = memref.load %arg2[%c34] : memref<98xf32, #tpu.memory_space<smem>>
      %c83 = arith.constant 83 : index
      %763 = memref.load %arg2[%c83] : memref<98xf32, #tpu.memory_space<smem>>
      %764 = vector.extract_strided_slice %761 {offsets = [0, 0, 0], sizes = [1, 16, 128], strides = [1, 1, 1]} : vector<2x16x128xf32> to vector<1x16x128xf32>
      %765 = vector.shape_cast %764 : vector<1x16x128xf32> to vector<16x128xf32>
      %766 = vector.broadcast %762 : f32 to vector<16x128xf32>
      %767 = arith.mulf %766, %765 : vector<16x128xf32>
      %768 = arith.addf %755, %767 : vector<16x128xf32>
      %769 = vector.extract_strided_slice %761 {offsets = [1, 0, 0], sizes = [1, 16, 128], strides = [1, 1, 1]} : vector<2x16x128xf32> to vector<1x16x128xf32>
      %770 = vector.shape_cast %769 : vector<1x16x128xf32> to vector<16x128xf32>
      %771 = vector.broadcast %763 : f32 to vector<16x128xf32>
      %772 = arith.mulf %771, %770 : vector<16x128xf32>
      %773 = arith.addf %760, %772 : vector<16x128xf32>
      %774 = vector.extract_strided_slice %708 {offsets = [0, 5, 0], sizes = [2, 16, 128], strides = [1, 1, 1]} : vector<2x24x128xf32> to vector<2x16x128xf32>
      %c41 = arith.constant 41 : index
      %775 = memref.load %arg2[%c41] : memref<98xf32, #tpu.memory_space<smem>>
      %c90 = arith.constant 90 : index
      %776 = memref.load %arg2[%c90] : memref<98xf32, #tpu.memory_space<smem>>
      %777 = vector.extract_strided_slice %774 {offsets = [0, 0, 0], sizes = [1, 16, 128], strides = [1, 1, 1]} : vector<2x16x128xf32> to vector<1x16x128xf32>
      %778 = vector.shape_cast %777 : vector<1x16x128xf32> to vector<16x128xf32>
      %779 = vector.broadcast %775 : f32 to vector<16x128xf32>
      %780 = arith.mulf %779, %778 : vector<16x128xf32>
      %781 = arith.addf %768, %780 : vector<16x128xf32>
      %782 = vector.extract_strided_slice %774 {offsets = [1, 0, 0], sizes = [1, 16, 128], strides = [1, 1, 1]} : vector<2x16x128xf32> to vector<1x16x128xf32>
      %783 = vector.shape_cast %782 : vector<1x16x128xf32> to vector<16x128xf32>
      %784 = vector.broadcast %776 : f32 to vector<16x128xf32>
      %785 = arith.mulf %784, %783 : vector<16x128xf32>
      %786 = arith.addf %773, %785 : vector<16x128xf32>
      %787 = vector.extract_strided_slice %708 {offsets = [0, 6, 0], sizes = [2, 16, 128], strides = [1, 1, 1]} : vector<2x24x128xf32> to vector<2x16x128xf32>
      %c48 = arith.constant 48 : index
      %788 = memref.load %arg2[%c48] : memref<98xf32, #tpu.memory_space<smem>>
      %c97 = arith.constant 97 : index
      %789 = memref.load %arg2[%c97] : memref<98xf32, #tpu.memory_space<smem>>
      %790 = vector.extract_strided_slice %787 {offsets = [0, 0, 0], sizes = [1, 16, 128], strides = [1, 1, 1]} : vector<2x16x128xf32> to vector<1x16x128xf32>
      %791 = vector.shape_cast %790 : vector<1x16x128xf32> to vector<16x128xf32>
      %792 = vector.broadcast %788 : f32 to vector<16x128xf32>
      %793 = arith.mulf %792, %791 : vector<16x128xf32>
      %794 = arith.addf %781, %793 : vector<16x128xf32>
      %795 = vector.extract_strided_slice %787 {offsets = [1, 0, 0], sizes = [1, 16, 128], strides = [1, 1, 1]} : vector<2x16x128xf32> to vector<1x16x128xf32>
      %796 = vector.shape_cast %795 : vector<1x16x128xf32> to vector<16x128xf32>
      %797 = vector.broadcast %789 : f32 to vector<16x128xf32>
      %798 = arith.mulf %797, %796 : vector<16x128xf32>
      %799 = arith.addf %786, %798 : vector<16x128xf32>
      %800 = arith.addf %794, %702 : vector<16x128xf32>
      %801 = arith.addf %799, %707 : vector<16x128xf32>
      %802 = arith.addf %800, %801 : vector<16x128xf32>
      %c0_160 = arith.constant 0 : index
      %803 = memref.load %arg3[%c0_160] : memref<1xf32, #tpu.memory_space<smem>>
      %804 = vector.broadcast %803 : f32 to vector<16x128xf32>
      %805 = arith.addf %802, %804 : vector<16x128xf32>
      %806 = arith.negf %805 : vector<16x128xf32>
      %807 = math.exp %806 : vector<16x128xf32>
      %cst_161 = arith.constant 1.000000e+00 : f32
      %808 = vector.broadcast %cst_161 : f32 to vector<16x128xf32>
      %809 = arith.addf %808, %807 : vector<16x128xf32>
      %810 = arith.divf %808, %809 : vector<16x128xf32>
      %c0_162 = arith.constant 0 : index
      %c0_163 = arith.constant 0 : index
      %c0_164 = arith.constant 0 : index
      %c0_165 = arith.constant 0 : index
      %811 = vector.load %arg5[%c0_162, %c0_163, %c0_164, %c0_165] : memref<1x1x16x128xf32, #tpu.memory_space<vmem>>, vector<1x1x16x128xf32>
      %812 = vector.shape_cast %811 : vector<1x1x16x128xf32> to vector<16x128xf32>
      %813 = vector.shape_cast %810 : vector<16x128xf32> to vector<1x1x16x128xf32>
      tpu.vector_store %arg5[%c0_162, %c0_163, %c0_164, %c0_165], %813 {strides = array<i32>} : memref<1x1x16x128xf32, #tpu.memory_space<vmem>>, vector<1x1x16x128xf32>,
    } else {
    }
    return
  }
  func.func @transform_0(%arg0: i32, %arg1: i32) -> i32 {
    %c0_i32 = arith.constant 0 : i32
    %c0_i32_0 = arith.constant 0 : i32
    return %c0_i32 : i32
  }
  func.func @transform_1(%arg0: i32, %arg1: i32) -> i32 {
    %c0_i32 = arith.constant 0 : i32
    %c0_i32_0 = arith.constant 0 : i32
    return %c0_i32 : i32
  }
  func.func @transform_2(%arg0: i32, %arg1: i32) -> (i32, i32, i32) {
    %c0_i32 = arith.constant 0 : i32
    %c0_i32_0 = arith.constant 0 : i32
    return %arg0, %arg1, %c0_i32 : i32, i32, i32
  }
  func.func @transform_3(%arg0: i32, %arg1: i32) -> (i32, i32, i32, i32) {
    %c0_i32 = arith.constant 0 : i32
    %c0_i32_0 = arith.constant 0 : i32
    %c0_i32_1 = arith.constant 0 : i32
    %c0_i32_2 = arith.constant 0 : i32
    return %arg0, %c0_i32, %c0_i32_0, %c0_i32_1 : i32, i32, i32, i32
  }
}

</mosaic_0001>

<bundles_post_ra>
// kernel: tpu_custom_call.1
= control target key start
LH: loop header
LB: loop body
LE: loop exit
PB: predicated region body
PF: predicated region fallthrough
CT: control target
= control target key end

     0   :  { %s7470_s0 = inlined_call_operand.vmem [shape: f32[98], index: 0, kind: input, shape index: {}]   ;;  %s7471_s1 = inlined_call_operand.<no memory space> [shape: f32[1], index: 1, kind: input, shape index: {}]   ;;  %s7472_s2 = inlined_call_operand.hbm [shape: f32[2,4,256], index: 2, kind: input, shape index: {}]   ;;  %s7473_s3 = inlined_call_operand.hbm [shape: f32[2,1,16,128], index: 3, kind: output, shape index: {}]  }
   0x1   :  { %8 = sst [smem:[#allocation5]] %s7471_s1 }
   0x2   :  { %9 = vsyncpa [#allocation9], 0 }
   0x3   :  { %10 = vsyncpa [#allocation7], 0 }
   0x4   :  { %12 = vsyncpa [#allocation7 + $0x1], 0 }
   0x5   :  { %13 = vsyncpa [#allocation8], 0 }
   0x6   :  { %15 = vsyncpa [#allocation8 + $0x1], 0  ;;  %s4434_s14 = smov 0   ;;  %s4436_s15 = smov 0  }
   0x7   :  { %s4438_s16 = smov 0   ;;  %s4440_s17 = smov 0  }
   0x8   :  { %s4442_s18 = smov 0   ;;  %s4444_s19 = smov 0  }
   0x9 LB: > { %s4011_s1 = sadd.s32 4294967295, %s4382_s19   ;;  %s4012_s20 = sadd.s32 4294967294, %s4382_s19   ;;  %s4382_s19 = sphi %s4444_s19, %s21_s19   ;;  %s4378_s18 = sphi %s4442_s18, %s8268_s18   ;;  %s4374_s17 = sphi %s4440_s17, %s8267_s17   ;;  %s4370_s16 = sphi %s4438_s16, %s8266_s16   ;;  %s4366_s15 = sphi %s4436_s15, %s8265_s15   ;;  %s4362_s14 = sphi %s4434_s14, %s8264_s14  }
   0xa   : > { %p97_p0 = scmp.ne.s32.totalorder %s4366_s15, %s4362_s14  ;;  %p4468_p1 = scmp.eq.s32.totalorder %s4011_s1, 0 }
   0xb   : > { %p4472_p2 = scmp.eq.s32.totalorder %s4011_s1, 1  ;;  %p127_p3 = scmp.eq.s32.totalorder %s4012_s20, 1 }
   0xc   : > { %s7629_s21 = scalar_select %p4468_p1, 1, 0 }
   0xd   : > { %p4478_p4 = por %p4468_p1, %p97_p0  ;;  %p4013_p5 = scmp.ge.s32.totalorder %s4382_s19, 1 }
   0xe   : > { %p4483_p6 = por %p127_p3, %p97_p0  ;;  %p134_p7 = scmp.lt.s32.totalorder %s4382_s19, 3 }
   0xf   : > { %s7631_s23 = scalar_select %p4478_p4, 1, 0 }
  0x10   : > { %s7632_s24 = scalar_select %p4483_p6, 1, 0 }
  0x11   : > { %s147_s27 = sshll.u32 %s7470_s0, 4  ;;  %p4491_p8 = pnand %p4013_p5, %p134_p7  ;;  %s148_s27 = int_to_ptr.vmem [resolvable:$true] %s147_s27 }
  0x12   : > { %s33_s30 = sadd.s32 1, %s4378_s18  ;;  %s84_s4 = sadd.s32 1, %s4370_s16 }
  0x13   : > { %p4137_p10 = pneg %p4491_p8  ;;  %p35_p12 = scmp.ge.s32.totalorder %s33_s30, 2 }
  0x14   : > { %s4251_s5 = scalar_lea.vmem %s148_s27, 16  ;;  %p4259_p7 = scmp.lt.s32.totalorder %s148_s27, %s148_s27 }
  0x15   : > { %p4500_p11 = pnand %p4137_p10, %p4468_p1  ;;  %p4252_p13 = scmp.ne.s32.totalorder %s148_s27, %s4251_s5 }
  0x16   : > { %p4260_p6 = scmp.lt.s32.totalorder %s4251_s5, %s4251_s5 }
  0x17   : > { %p4253_p0 = pneg %p4500_p11 }
  0x18   : > { %p4261_p9 = por %p4260_p6, %p4259_p7 }
  0x19   : > { %p4254_p3 = pnand %p4253_p0, %p4252_p13 }
  0x1b   : > { %p4255_p5 = pneg %p4254_p3 }
  0x1d   : > { %p4262_p4 = pnand %p4261_p9, %p4255_p5 }
  0x1f   : > { %4265 = shalt.err (!%p4262_p4)
}
  0x20   : > { %s4384_s6 = smov [#allocation6]   ;;  %s8270_s30 = smov (%p35_p12, %s33_s30), 0 }
  0x21   : > { %4140 = dma.vmem_to_smem (!%p4500_p11), %s148_s27, 16, %s4384_s6, [#allocation9]  }
  0x22   : > { %p91_p10 = scmp.ne.s32.totalorder %s4370_s16, %s4366_s15  ;;  %p92_p6 = scmp.eq.s32.totalorder %s4382_s19, 0 }
  0x23   : > { %s79_s7 = ssub.s32 %s4378_s18, %s8270_s30  ;;  %p4150_p4 = scmp.lt.s32.totalorder %s4382_s19, 2 }
  0x24   : > { %p82_p9 = scmp.eq.s32.totalorder %s79_s7, 0  ;;  %p93_p13 = por %p92_p6, %p91_p10 }
  0x25   : > { %p4520_p0 = por %p4472_p2, %p91_p10  ;;  %s161_s9 = sand.u32 1, %s4370_s16  }
  0x26   : > { %s4526_s10 = scalar_select %p82_p9, %s4370_s16, %s84_s4  }
  0x27   : > { %s7635_s8 = scalar_select %p4520_p0, 1, 0 }
  0x28   : > { %s4016_s11 = sshll.u32 %s161_s9, 3  ;;  %s4127_s12 = sshll.u32 %s4378_s18, 7 }
  0x29   : > { %s4532_s20 = scalar_lea.hbm %s7472_s2, %s4127_s12  ;;  %s165_s25 = scalar_lea.vmem [#allocation10], %s4016_s11 }
  0x2a   : > { %s175_s22 = sshll.u32 %s165_s25, 4  ;;  %p4536_p2 = pnand %p4150_p4, %p93_p13  ;;  %s4534_s22 = int_to_ptr.vmem [resolvable:$true] %s175_s22 }
  0x2b   : > { %s162_s27 = scalar_lea.sflag [#allocation7], %s161_s9  ;;  %s4266_s29 = scalar_lea.hbm %s4532_s20, 128 }
  0x2c   : > { %p4267_p11 = scmp.ne.s32.totalorder %s4532_s20, %s4266_s29  ;;  %p4268_p12 = pneg %p4536_p2 }
  0x2d   : > { %s4271_s6 = scalar_lea.hbm %s7472_s2, 256  ;;  %p4272_p7 = scmp.lt.u32.totalorder %s4532_s20, %s7472_s2 }
  0x2e   : > { %p4269_p3 = pnand %p4268_p12, %p4267_p11  ;;  %p4273_p10 = scmp.lt.u32.totalorder %s4271_s6, %s4266_s29 }
  0x2f   : > { %p4275_p4 = scmp.lt.u32.totalorder %s4266_s29, %s4532_s20 }
  0x30   : > { %p4270_p5 = pneg %p4269_p3  ;;  %p4274_p6 = por %p4273_p10, %p4272_p7 }
  0x32   : > { %p4276_p9 = por %p4275_p4, %p4274_p6 }
  0x34   : > { %p4277_p13 = pnand %p4276_p9, %p4270_p5 }
  0x36   : > { %4280 = shalt.err (!%p4277_p13)
}
  0x37   : > { %s4281_s9 = scalar_lea.vmem %s4534_s22, 128  ;;  %s4385_s12 = smov [#allocation10]  }
  0x38   : > { %p4282_p11 = scmp.ne.s32.totalorder %s4534_s22, %s4281_s9  ;;  %s4286_s13 = sshll.u32 %s4385_s12, 4  ;;  %s4287_s13 = int_to_ptr.vmem [resolvable:$false] %s4286_s13 }
  0x39   : > { %s4288_s1 = scalar_lea.vmem %s4287_s13, 256  ;;  %p4289_p1 = scmp.lt.s32.totalorder %s4534_s22, %s4287_s13 }
  0x3a   : > { %p4284_p3 = pnand %p4282_p11, %p4268_p12  ;;  %p4290_p7 = scmp.lt.s32.totalorder %s4288_s1, %s4281_s9 }
  0x3c   : > { %p4285_p0 = pneg %p4284_p3  ;;  %p4291_p10 = por %p4290_p7, %p4289_p1 }
  0x3e   : > { %p4292_p6 = pnand %p4291_p10, %p4285_p0 }
  0x40   : > { %4295 = shalt.err (!%p4292_p6)
}
  0x41   : > { %4144 = dma.hbm_to_vmem [thread:$0]  (!%p4536_p2), %s4532_s20, 128, %s4534_s22, %s162_s27  }
  0x42   : > { %184 = sbr.rel (%p4491_p8) target bundleno = 1156 (0x484), region = 32 }
  0x49   : > { %p7637_p12 = scmp.ne.s32.totalorder %s7629_s21, 0 }
  0x4b   : > { %4349 = dma.done.wait (%p7637_p12), [#allocation9], 16  }
  0x4c   : > { %4351 = vsyncadd (%p7637_p12), [#allocation9], 4294967280  ;;  %s4572_s25 = sand.u32 1, %s4366_s15   ;;  %p7638_p1 = scmp.ne.s32.totalorder %s7631_s23, 0 }
  0x4d   : > { %s4021_s29 = sshll.u32 %s4572_s25, 3  ;;  %s191_s26 = scalar_lea.sflag [#allocation7], %s4572_s25 }
  0x4e   : > { %s194_s4 = scalar_lea.vmem [#allocation10], %s4021_s29 }
  0x4f   : > { %4353 = dma.done.wait (%p7638_p1), %s191_s26, 128  }
  0x50   : > { %4355 = vsyncadd (%p7638_p1), %s191_s26, 4294967168 }
  0x51   : > { %199 = sfence }
  0x52   : > { %v222_v0 = vlaneseq  ;;  %v228_v1 = vld [vmem:[%s194_s4] sm:$0xff]  ;;  %vm233_vm0 = vcmask 1043456   ;;  %v4386_v5 = vmov 0.0   ;;  %v4387_v8 = vmov -inf   ;;  %s4389_s21 = smov 112   ;;  %s4390_s23 = smov 115  }
  0x53   : > { %v231_v2 = vcombine.high %v228_v1, %v228_v1  ;;  %v234_v3 = vsel %vm233_vm0, %v228_v1, 0.0  ;;  %v273_v4 = vsel %vm233_vm0, %v228_v1, -inf  ;;  %310 = vst [vmem:[#allocation4] sm:$0xff] %v4386_v5  ;;  %311 = vst [vmem:[#allocation4 + $0x8] sm:$0xff] %v4386_v5  ;;  %v4388_v18 = vmov 1966171168  }
  0x54   : > { %312 = vst [vmem:[#allocation4 + $0x10] sm:$0xff] %v4386_v5  ;;  %314 = vst [vmem:[#allocation4 + $0x20] sm:$0xff] %v4386_v5  ;;  %vm4582_vm1 = vcmp.lt.s32.totalorder %v222_v0, 256  ;;  %v235_v7 = vrot.slane %v234_v3, 4  ;;  %v274_v10 = vrot.slane %v273_v4, 4  ;;  %v252_v19 = vunpack.c.l.s4 %v4388_v18  ;;  %s4391_s28 = smov 3  }
  0x55   : > { %316 = vst [vmem:[#allocation4 + $0x30] sm:$0xff] %v4386_v5  ;;  %318 = vst [vmem:[#allocation4 + $0x40] sm:$0xff] %v4386_v5  ;;  %v241_v9 = vsel %vm233_vm0, %v231_v2, 0.0  ;;  %v280_v11 = vsel %vm233_vm0, %v231_v2, -inf  ;;  %v255_v25 = vshrl.u32 %v222_v0, 7  ;;  %s4392_s20 = smov 99  }
  0x56   : > { %320 = vst [vmem:[#allocation4 + $0x50] sm:$0xff] %v4386_v5  ;;  %226 = vst.msk [vmem:[#allocation2] sm:$0x3] %vm4582_vm1, %v4386_v5  ;;  %v236_v12 = vadd.f32 %v235_v7, %v234_v3  ;;  %v242_v13 = vrot.slane %v241_v9, 4  ;;  %v281_v14 = vrot.slane %v280_v11, 4  ;;  %v275_v15 = vmax.f32 %v273_v4, %v274_v10  ;;  %s4393_s22 = smov 83  }
  0x57   : > { %227 = vst.msk [vmem:[#allocation3] sm:$0x3] %vm4582_vm1, %v4387_v8  ;;  %v253_v29 = vunpack.c.0.s8 %v252_v19  ;;  %v4596_v49 = vsub.s32 0, %v255_v25  ;;  %s4394_s27 = smov 67   ;;  %s4050_s5 = sld [smem:[#allocation6 + $0x2]]  ;;  %vm605_vm2 = vcmask 1046528  }
  0x58   : > { %v237_v16 = vrot.slane %v236_v12, 2  ;;  %v243_v17 = vadd.f32 %v242_v13, %v241_v9  ;;  %v282_v20 = vmax.f32 %v280_v11, %v281_v14  ;;  %v276_v21 = vrot.slane %v275_v15, 2  ;;  %s4395_s6 = smov 51   ;;  %s4396_s7 = smov 35  }
  0x59   : > { %v256_v37 = vsub.s32 %v253_v29, %v255_v25  ;;  %s4397_s11 = smov 19   ;;  %s4051_s9 = sld [smem:[#allocation6 + $0x33]]  ;;  %vm640_vm3 = vcmask 1045504   ;;  %vm675_vm4 = vcmask 1044480   ;;  %vm332_vm5 = vcmask 147480  }
  0x5a   : > { %v238_v22 = vadd.f32 %v237_v16, %v236_v12  ;;  %v244_v23 = vrot.slane %v243_v17, 2  ;;  %v283_v24 = vrot.slane %v282_v20, 2  ;;  %v277_v26 = vmax.f32 %v275_v15, %v276_v21  ;;  %s4052_s12 = sld [smem:[#allocation6 + $0x9]]  ;;  %s4398_s13 = smov 126  }
  0x5b   : > { %s4053_s1 = sld [smem:[#allocation6 + $0x3a]]  ;;  %s4399_s29 = smov 96   ;;  %vm744_vm6 = vcmask 1042432   ;;  %vm779_vm7 = vcmask 1041408   ;;  %vm1228_vm8 = vcmask 1031168   ;;  %vm2293_vm9 = vcmask 1014784  }
  0x5c   : > { %v239_v27 = vrot.slane %v238_v22, 1  ;;  %v245_v28 = vadd.f32 %v244_v23, %v243_v17  ;;  %v284_v30 = vmax.f32 %v282_v20, %v283_v24  ;;  %v278_v31 = vrot.slane %v277_v26, 1  ;;  %s4054_s26 = sld [smem:[#allocation6 + $0x10]]  ;;  %s4400_s4 = smov 80  }
  0x5d   : > { %v229_v43 = vld [vmem:[#allocation2] sm:$0x3]  ;;  %v4610_v54 = vstv %s4050_s5  ;;  %s4403_s5 = smov 32   ;;  %vm3358_vm10 = vcmask 998400   ;;  %vm3856_vm11 = vcmask 1039360   ;;  %p8261_p0 = scmp.ne.s32.totalorder %s7635_s8, 0 }
  0x5e   : > { %v240_v32 = vadd.f32 %v239_v27, %v238_v22  ;;  %v246_v33 = vrot.slane %v245_v28, 1  ;;  %v285_v34 = vrot.slane %v284_v30, 1  ;;  %v279_v35 = vmax.f32 %v277_v26, %v278_v31  ;;  %v272_v44 = vld [vmem:[#allocation3] sm:$0x3] }
  0x5f   : > { %v1213_v56 = vmul.f32 0.0, %v4610_v54  ;;  %v4620_v60 = vstv %s4051_s9  ;;  %s4058_s9 = sld [smem:[#allocation6 + $0x1e]] }
  0x60   : > { %v247_v36 = vadd.f32 %v246_v33, %v245_v28  ;;  %v286_v38 = vmax.f32 %v284_v30, %v285_v34  ;;  %v4624_v61 = vstv %s4052_s12  ;;  %v1237_v62 = vmul.f32 0.0, %v4620_v60  ;;  %s4059_s12 = sld [smem:[#allocation6 + $0x4f]] }
  0x61   : > { %v1262_v63 = vmul.f32 0.0, %v4624_v61  ;;  %v4632_v1 = vstv %s4053_s1  ;;  %s4060_s1 = sld [smem:[#allocation6 + $0x25]] }
  0x62   : > { %v250_v39 = vcombine.low %v240_v32, %v247_v36  ;;  %v289_v40 = vcombine.low %v279_v35, %v286_v38  ;;  %v1299_v2 = vmul.f32 0.0, %v4632_v1  ;;  %v4639_v4 = vstv %s4054_s26  ;;  %s4063_s26 = sld [smem:[#allocation6 + $0x5d]] }
  0x63   : > { %v1276_v0 = vrot.slane %v1262_v63, 1  ;;  %v1338_v5 = vmul.f32 0.0, %v4639_v4 }
  0x64   : > { %v257_v41 = vrot.slane %v250_v39, %v256_v37  ;;  %v296_v42 = vrot.slane %v289_v40, %v256_v37  ;;  %v1313_v3 = vrot.slane %v1299_v2, 1 }
  0x65   : > { %v1352_v6 = vrot.slane %v1338_v5, 2 }
  0x66   : > { %v264_v45 = vrot.slane %v257_v41, %v256_v37  ;;  %v303_v46 = vrot.slane %v296_v42, %v256_v37 }
  0x68   : > { %v266_v47 = vadd.f32 %v264_v45, %v229_v43  ;;  %v305_v48 = vmax.f32 %v272_v44, %v303_v46 }
  0x6a   : > { %271 = vst.msk [vmem:[#allocation2] sm:$0x3] %vm4582_vm1, %v266_v47  ;;  %306 = vst.msk [vmem:[#allocation3] sm:$0x3] %vm4582_vm1, %v305_v48 }
  0x71   : > { %v4598_v50 = vld [vmem:[#allocation2] sm:$0x3]  ;;  %v4600_v51 = vld [vmem:[#allocation3] sm:$0x3] }
  0x72   : > { %418 = vrot.lane.b32.xlu0 %v4598_v50, %s4389_s21  ;;  %v328_v52 = vrot.slane %v4598_v50, %v4596_v49  ;;  %v338_v53 = vrot.slane %v4600_v51, %v4596_v49  ;;  %v400_v55 = vrot.slane %v4598_v50, 1  ;;  %v409_v57 = vrot.slane %v4600_v51, 1 }
  0x74   : > { %344 = vrot.lane.b32.xlu1 %v328_v52, %s4390_s23  ;;  %v404_v58 = vrot.slane %v400_v55, %v4596_v49  ;;  %v413_v59 = vrot.slane %v409_v57, %v4596_v49 }
  0x76   : > { %329 = vrot.lane.b32.xlu0 %v328_v52, %s4391_s28 }
  0x78   : > { %348 = vrot.lane.b32.xlu1 %v338_v53, %s4390_s23  ;;  %s4401_s23 = smov 64  }
  0x7a   : > { %339 = vrot.lane.b32.xlu0 %v338_v53, %s4391_s28 }
  0x7c   : > { %356 = vrot.lane.b32.xlu1 %v338_v53, %s4392_s20 }
  0x7e   : > { %352 = vrot.lane.b32.xlu0 %v328_v52, %s4392_s20  ;;  %s4056_s20 = sld [smem:[#allocation6 + $0x17]] }
  0x80   : > { %364 = vrot.lane.b32.xlu1 %v338_v53, %s4393_s22 }
  0x82   : > { %360 = vrot.lane.b32.xlu0 %v328_v52, %s4393_s22  ;;  %s4402_s22 = smov 48  }
  0x84   : > { %372 = vrot.lane.b32.xlu1 %v338_v53, %s4394_s27  ;;  %v4653_v10 = vstv %s4056_s20  ;;  %s4069_s20 = sld [smem:[#allocation6 + $0x42]] }
  0x85   : > { %v1414_v11 = vmul.f32 0.0, %v4653_v10 }
  0x86   : > { %368 = vrot.lane.b32.xlu0 %v328_v52, %s4394_s27  ;;  %s4057_s27 = sld [smem:[#allocation6 + $0x48]] }
  0x87   : > { %v1428_v12 = vrot.slane %v1414_v11, 3 }
  0x88   : > { %380 = vrot.lane.b32.xlu1 %v338_v53, %s4395_s6 }
  0x8a   : > { %376 = vrot.lane.b32.xlu0 %v328_v52, %s4395_s6  ;;  %s4404_s6 = smov 16  }
  0x8c   : > { %388 = vrot.lane.b32.xlu1 %v338_v53, %s4396_s7  ;;  %v4660_v13 = vstv %s4057_s27  ;;  %s4071_s27 = sld [smem:[#allocation6 + $0x49]] }
  0x8d   : > { %v4664_v14 = vmul.f32 0.0, %v4660_v13 }
  0x8e   : > { %384 = vrot.lane.b32.xlu0 %v328_v52, %s4396_s7  ;;  %s4064_s7 = sld [smem:[#allocation6 + $0x3]] }
  0x8f   : > { %v1465_v15 = vrot.slane %v4664_v14, 3 }
  0x90   : > { %396 = vrot.lane.b32.xlu1 %v338_v53, %s4397_s11 }
  0x92   : > { %392 = vrot.lane.b32.xlu0 %v328_v52, %s4397_s11  ;;  %s4065_s11 = sld [smem:[#allocation6 + $0x34]] }
  0x94   : > { %1222 = vrot.lane.b32.xlu1 %v1213_v56, %s4398_s13  ;;  %v4701_v39 = vstv %s4064_s7  ;;  %s4074_s7 = sld [smem:[#allocation6 + $0x26]] }
  0x96   : > { %405 = vrot.lane.b32.xlu0 %v404_v58, %s4391_s28 }
  0x98   : > { %414 = vrot.lane.b32.xlu1 %v413_v59, %s4391_s28  ;;  %v4709_v43 = vstv %s4065_s11  ;;  %s4075_s11 = sld [smem:[#allocation6 + $0x57]] }
  0x9a   : > { %429 = vrot.lane.b32.xlu0 %v4600_v51, %s4389_s21  ;;  %s4055_s21 = sld [smem:[#allocation6 + $0x41]] }
  0x9c   : > { %1226 = vrot.lane.b32.xlu1 %v1213_v56, %s4398_s13 }
  0x9e   : > { %440 = vrot.lane.b32.xlu0 %v4598_v50, %s4399_s29 }
  0xa0   : > { %1246 = vrot.lane.b32.xlu1 %v1237_v62, %s4398_s13  ;;  %v4646_v7 = vstv %s4055_s21  ;;  %s4067_s21 = sld [smem:[#allocation6 + $0x3b]] }
  0xa1   : > { %v1375_v8 = vmul.f32 0.0, %v4646_v7 }
  0xa2   : > { %451 = vrot.lane.b32.xlu0 %v4600_v51, %s4399_s29  ;;  %s4062_s29 = sld [smem:[#allocation6 + $0x2c]] }
  0xa3   : > { %v1389_v9 = vrot.slane %v1375_v8, 2 }
  0xa4   : > { %1250 = vrot.lane.b32.xlu1 %v1237_v62, %s4398_s13 }
  0xa6   : > { %462 = vrot.lane.b32.xlu0 %v4598_v50, %s4400_s4 }
  0xa8   : > { %1285 = vrot.lane.b32.xlu1 %v1276_v0, %s4398_s13 }
  0xaa   : > { %473 = vrot.lane.b32.xlu0 %v4600_v51, %s4400_s4  ;;  %s4066_s4 = sld [smem:[#allocation6 + $0xa]] }
  0xac   : > { %1289 = vrot.lane.b32.xlu1 %v1276_v0, %s4398_s13 }
  0xae   : > { %484 = vrot.lane.b32.xlu0 %v4598_v50, %s4401_s23 }
  0xb0   : > { %1322 = vrot.lane.b32.xlu1 %v1313_v3, %s4398_s13 }
  0xb2   : > { %495 = vrot.lane.b32.xlu0 %v4600_v51, %s4401_s23  ;;  %s4068_s23 = sld [smem:[#allocation6 + $0x11]] }
  0xb4   : > { %1326 = vrot.lane.b32.xlu1 %v1313_v3, %s4398_s13 }
  0xb6   : > { %506 = vrot.lane.b32.xlu0 %v4598_v50, %s4402_s22 }
  0xb8   : > { %1361 = vrot.lane.b32.xlu1 %v1352_v6, %s4398_s13 }
  0xba   : > { %517 = vrot.lane.b32.xlu0 %v4600_v51, %s4402_s22  ;;  %s4070_s22 = sld [smem:[#allocation6 + $0x18]] }
  0xbc   : > { %1365 = vrot.lane.b32.xlu1 %v1352_v6, %s4398_s13 }
  0xbe   : > { %528 = vrot.lane.b32.xlu0 %v4598_v50, %s4403_s5 }
  0xc0   : > { %1398 = vrot.lane.b32.xlu1 %v1389_v9, %s4398_s13 }
  0xc2   : > { %539 = vrot.lane.b32.xlu0 %v4600_v51, %s4403_s5  ;;  %s4072_s5 = sld [smem:[#allocation6 + $0x1f]] }
  0xc4   : > { %1402 = vrot.lane.b32.xlu1 %v1389_v9, %s4398_s13 }
  0xc6   : > { %550 = vrot.lane.b32.xlu0 %v4598_v50, %s4404_s6 }
  0xc8   : > { %1437 = vrot.lane.b32.xlu1 %v1428_v12, %s4398_s13 }
  0xca   : > { %561 = vrot.lane.b32.xlu0 %v4600_v51, %s4404_s6  ;;  %s4073_s6 = sld [smem:[#allocation6 + $0x50]] }
  0xcc   : > { %1441 = vrot.lane.b32.xlu1 %v1428_v12, %s4398_s13 }
  0xd0   : > { %1474 = vrot.lane.b32.xlu1 %v1465_v15, %s4398_s13 }
  0xe4   : > { %v419_v16 = vpop.permute.xlu0 %418 }
  0xe5   : > { %v420_v17 = vrot.slane %v419_v16, 1 }
  0xe6   : > { %v345_v18 = vpop.permute.xlu1 %344 }
  0xe7   : > { %v424_v19 = vrot.slane %v420_v17, %v4596_v49  ;;  %347 = vst.msk [vmem:[#allocation4 + $0x4] sm:$0x1] %vm332_vm5, %v345_v18 }
  0xe8   : > { %v330_v20 = vpop.permute.xlu0 %329 }
  0xe9   : > { %333 = vst.msk [vmem:[#allocation4 + $0x3] sm:$0x1] %vm332_vm5, %v330_v20  ;;  %425 = vrot.lane.b32.xlu1 %v424_v19, %s4391_s28 }
  0xea   : > { %v349_v21 = vpop.permute.xlu1 %348 }
  0xeb   : > { %351 = vst.msk [vmem:[#allocation4 + $0x34] sm:$0x1] %vm332_vm5, %v349_v21 }
  0xec   : > { %v340_v22 = vpop.permute.xlu0 %339 }
  0xed   : > { %343 = vst.msk [vmem:[#allocation4 + $0x33] sm:$0x1] %vm332_vm5, %v340_v22 }
  0xee   : > { %v357_v23 = vpop.permute.xlu1 %356 }
  0xef   : > { %359 = vst.msk [vmem:[#allocation4 + $0x35] sm:$0x1] %vm332_vm5, %v357_v23 }
  0xf0   : > { %v353_v24 = vpop.permute.xlu0 %352 }
  0xf1   : > { %355 = vst.msk [vmem:[#allocation4 + $0x5] sm:$0x1] %vm332_vm5, %v353_v24 }
  0xf2   : > { %v365_v25 = vpop.permute.xlu1 %364 }
  0xf3   : > { %367 = vst.msk [vmem:[#allocation4 + $0x36] sm:$0x1] %vm332_vm5, %v365_v25 }
  0xf4   : > { %v361_v26 = vpop.permute.xlu0 %360 }
  0xf5   : > { %363 = vst.msk [vmem:[#allocation4 + $0x6] sm:$0x1] %vm332_vm5, %v361_v26 }
  0xf6   : > { %v373_v27 = vpop.permute.xlu1 %372 }
  0xf7   : > { %375 = vst.msk [vmem:[#allocation4 + $0x37] sm:$0x1] %vm332_vm5, %v373_v27 }
  0xf8   : > { %v369_v28 = vpop.permute.xlu0 %368 }
  0xf9   : > { %371 = vst.msk [vmem:[#allocation4 + $0x7] sm:$0x1] %vm332_vm5, %v369_v28 }
  0xfa   : > { %v381_v29 = vpop.permute.xlu1 %380 }
  0xfb   : > { %383 = vst.msk [vmem:[#allocation4 + $0x40] sm:$0x1] %vm332_vm5, %v381_v29 }
  0xfc   : > { %v377_v30 = vpop.permute.xlu0 %376 }
  0xfd   : > { %379 = vst.msk [vmem:[#allocation4 + $0x10] sm:$0x1] %vm332_vm5, %v377_v30 }
  0xfe   : > { %v389_v31 = vpop.permute.xlu1 %388  ;;  %v4694_v35 = vld [vmem:[#allocation4 + $0x30] sm:$0xff] }
  0xff   : > { %391 = vst.msk [vmem:[#allocation4 + $0x41] sm:$0x1] %vm332_vm5, %v389_v31  ;;  %v1236_v38 = vmul.f32 %v4620_v60, %v4694_v35  ;;  %v1744_v47 = vmul.f32 %v4709_v43, %v4694_v35 }
 0x100   : > { %v4689_v32 = vld [vmem:[#allocation4] sm:$0xff]  ;;  %v385_v33 = vpop.permute.xlu0 %384 }
 0x101   : > { %387 = vst.msk [vmem:[#allocation4 + $0x11] sm:$0x1] %vm332_vm5, %v385_v33  ;;  %v1212_v34 = vmul.f32 %v4610_v54, %v4689_v32  ;;  %v1717_v42 = vmul.f32 %v4701_v39, %v4689_v32 }
 0x102   : > { %v397_v36 = vpop.permute.xlu1 %396 }
 0x103   : > { %1220 = vrot.lane.b32.xlu0 %v1212_v34, %s4398_s13  ;;  %399 = vst.msk [vmem:[#allocation4 + $0x42] sm:$0x1] %vm332_vm5, %v397_v36 }
 0x104   : > { %v393_v37 = vpop.permute.xlu0 %392 }
 0x105   : > { %395 = vst.msk [vmem:[#allocation4 + $0x12] sm:$0x1] %vm332_vm5, %v393_v37 }
 0x106   : > { %v4703_v40 = vpop.permute.xlu1 %1222 }
 0x107   : > { %7641 = vst [vmem:[#allocation15_spill] sm:$0xff] %v4703_v40  ;;  %1244 = vrot.lane.b32.xlu0 %v1236_v38, %s4398_s13 }
 0x108   : > { %v406_v41 = vpop.permute.xlu0 %405 }
 0x109   : > { %408 = vst.msk [vmem:[#allocation4 + $0x13] sm:$0x1] %vm332_vm5, %v406_v41 }
 0x10a   : > { %v415_v44 = vpop.permute.xlu1 %414 }
 0x10b   : > { %1725 = vrot.lane.b32.xlu0 %v1717_v42, %s4398_s13  ;;  %417 = vst.msk [vmem:[#allocation4 + $0x43] sm:$0x1] %vm332_vm5, %v415_v44 }
 0x10c   : > { %v430_v45 = vpop.permute.xlu0 %429 }
 0x10d   : > { %v431_v46 = vrot.slane %v430_v45, 1 }
 0x10e   : > { %v4715_v48 = vpop.permute.xlu1 %1226 }
 0x10f   : > { %7642 = vst [vmem:[#allocation16_spill] sm:$0xff] %v4715_v48  ;;  %v435_v50 = vrot.slane %v431_v46, %v4596_v49  ;;  %1752 = vrot.lane.b32.xlu0 %v1744_v47, %s4398_s13  ;;  %v4760_v46 = vstv %s4058_s9  ;;  %s4076_s9 = sld [smem:[#allocation6 + $0x2d]] }
 0x110   : > { %v441_v51 = vpop.permute.xlu0 %440  ;;  %v1490_v47 = vmul.f32 0.0, %v4760_v46 }
 0x111   : > { %v442_v52 = vrot.slane %v441_v51, 1  ;;  %436 = vrot.lane.b32.xlu1 %v435_v50, %s4391_s28 }
 0x112   : > { %v4720_v53 = vpop.permute.xlu1 %1246  ;;  %v1504_v51 = vrot.slane %v1490_v47, 4 }
 0x113   : > { %7643 = vst [vmem:[#allocation17_spill] sm:$0xff] %v4720_v53  ;;  %v446_v55 = vrot.slane %v442_v52, %v4596_v49 }
 0x114   : > { %v452_v56 = vpop.permute.xlu0 %451 }
 0x115   : > { %v453_v57 = vrot.slane %v452_v56, 1  ;;  %447 = vrot.lane.b32.xlu1 %v446_v55, %s4391_s28  ;;  %v4770_v55 = vstv %s4059_s12  ;;  %s4077_s12 = sld [smem:[#allocation6 + $0x5e]] }
 0x116   : > { %v4724_v58 = vpop.permute.xlu1 %1250  ;;  %v1527_v56 = vmul.f32 0.0, %v4770_v55 }
 0x117   : > { %7644 = vst [vmem:[#allocation18_spill] sm:$0xff] %v4724_v58  ;;  %v457_v59 = vrot.slane %v453_v57, %v4596_v49 }
 0x118   : > { %v463_v62 = vpop.permute.xlu0 %462 }
 0x119   : > { %v464_v63 = vrot.slane %v463_v62, 1  ;;  %458 = vrot.lane.b32.xlu1 %v457_v59, %s4391_s28  ;;  %v1541_v59 = vrot.slane %v1527_v56, 4 }
 0x11a   : > { %v4728_v0 = vpop.permute.xlu1 %1285 }
 0x11b   : > { %7645 = vst [vmem:[#allocation19_spill] sm:$0xff] %v4728_v0  ;;  %v468_v2 = vrot.slane %v464_v63, %v4596_v49 }
 0x11c   : > { %v474_v3 = vpop.permute.xlu0 %473 }
 0x11d   : > { %v475_v5 = vrot.slane %v474_v3, 1  ;;  %469 = vrot.lane.b32.xlu1 %v468_v2, %s4391_s28 }
 0x11e   : > { %v4733_v8 = vpop.permute.xlu1 %1289 }
 0x11f   : > { %v479_v6 = vrot.slane %v475_v5, %v4596_v49  ;;  %7646 = vst [vmem:[#allocation20_spill] sm:$0xff] %v4733_v8 }
 0x120   : > { %v485_v9 = vpop.permute.xlu0 %484 }
 0x121   : > { %v486_v11 = vrot.slane %v485_v9, 1  ;;  %480 = vrot.lane.b32.xlu1 %v479_v6, %s4391_s28  ;;  %v4792_v9 = vstv %s4062_s29  ;;  %s4080_s29 = sld [smem:[#allocation6 + $0xb]] }
 0x122   : > { %v4738_v18 = vpop.permute.xlu1 %1322 }
 0x123   : > { %v490_v12 = vrot.slane %v486_v11, %v4596_v49  ;;  %7647 = vst [vmem:[#allocation21_spill] sm:$0xff] %v4738_v18  ;;  %v1642_v11 = vmul.f32 0.0, %v4792_v9 }
 0x124   : > { %v496_v16 = vpop.permute.xlu0 %495 }
 0x125   : > { %v497_v17 = vrot.slane %v496_v16, 1  ;;  %491 = vrot.lane.b32.xlu1 %v490_v12, %s4391_s28  ;;  %v1656_v12 = vrot.slane %v1642_v11, 6  ;;  %v4797_v16 = vstv %s4063_s26  ;;  %s4405_s26 = smov 124  }
 0x126   : > { %v4743_v23 = vpop.permute.xlu1 %1326 }
 0x127   : > { %v501_v19 = vrot.slane %v497_v17, %v4596_v49  ;;  %7648 = vst [vmem:[#allocation22_spill] sm:$0xff] %v4743_v23  ;;  %v1679_v17 = vmul.f32 0.0, %v4797_v16 }
 0x128   : > { %v507_v20 = vpop.permute.xlu0 %506 }
 0x129   : > { %v508_v21 = vrot.slane %v507_v20, 1  ;;  %502 = vrot.lane.b32.xlu1 %v501_v19, %s4391_s28  ;;  %v1693_v19 = vrot.slane %v1679_v17, 6  ;;  %v1718_v20 = vmul.f32 0.0, %v4701_v39 }
 0x12a   : > { %v4748_v29 = vpop.permute.xlu1 %1361 }
 0x12b   : > { %v512_v22 = vrot.slane %v508_v21, %v4596_v49  ;;  %7649 = vst [vmem:[#allocation23_spill] sm:$0xff] %v4748_v29  ;;  %v1745_v21 = vmul.f32 0.0, %v4709_v43 }
 0x12c   : > { %v518_v24 = vpop.permute.xlu0 %517 }
 0x12d   : > { %v519_v25 = vrot.slane %v518_v24, 1  ;;  %513 = vrot.lane.b32.xlu1 %v512_v22, %s4391_s28  ;;  %v4808_v22 = vstv %s4066_s4  ;;  %s4081_s4 = sld [smem:[#allocation6 + $0x3c]] }
 0x12e   : > { %v4753_v36 = vpop.permute.xlu1 %1365  ;;  %v1774_v24 = vmul.f32 0.0, %v4808_v22 }
 0x12f   : > { %v523_v26 = vrot.slane %v519_v25, %v4596_v49  ;;  %7650 = vst [vmem:[#allocation24_spill] sm:$0xff] %v4753_v36 }
 0x130   : > { %v529_v27 = vpop.permute.xlu0 %528  ;;  %v1788_v25 = vrot.slane %v1774_v24, 1 }
 0x131   : > { %v530_v28 = vrot.slane %v529_v27, 1  ;;  %524 = vrot.lane.b32.xlu1 %v523_v26, %s4391_s28  ;;  %v4814_v27 = vstv %s4067_s21  ;;  %s4082_s21 = sld [smem:[#allocation6 + $0x12]] }
 0x132   : > { %v4758_v45 = vpop.permute.xlu1 %1398 }
 0x133   : > { %v534_v30 = vrot.slane %v530_v28, %v4596_v49  ;;  %7651 = vst [vmem:[#allocation25_spill] sm:$0xff] %v4758_v45  ;;  %v1815_v28 = vmul.f32 0.0, %v4814_v27 }
 0x134   : > { %v540_v31 = vpop.permute.xlu0 %539 }
 0x135   : > { %v541_v33 = vrot.slane %v540_v31, 1  ;;  %535 = vrot.lane.b32.xlu1 %v534_v30, %s4391_s28  ;;  %v1829_v31 = vrot.slane %v1815_v28, 1 }
 0x136   : > { %v4765_v52 = vpop.permute.xlu1 %1402 }
 0x137   : > { %v545_v34 = vrot.slane %v541_v33, %v4596_v49  ;;  %7652 = vst [vmem:[#allocation26_spill] sm:$0xff] %v4765_v52 }
 0x138   : > { %v551_v37 = vpop.permute.xlu0 %550 }
 0x139   : > { %v552_v38 = vrot.slane %v551_v37, 1  ;;  %546 = vrot.lane.b32.xlu1 %v545_v34, %s4391_s28  ;;  %v4821_v34 = vstv %s4068_s23  ;;  %s4083_s23 = sld [smem:[#allocation6 + $0x43]] }
 0x13a   : > { %v4774_v57 = vpop.permute.xlu1 %1437  ;;  %v1858_v37 = vmul.f32 0.0, %v4821_v34 }
 0x13b   : > { %v556_v41 = vrot.slane %v552_v38, %v4596_v49  ;;  %7653 = vst [vmem:[#allocation27_spill] sm:$0xff] %v4774_v57 }
 0x13c   : > { %v562_v42 = vpop.permute.xlu0 %561 }
 0x13d   : > { %v563_v44 = vrot.slane %v562_v42, 1  ;;  %557 = vrot.lane.b32.xlu1 %v556_v41, %s4391_s28  ;;  %v1872_v41 = vrot.slane %v1858_v37, 2 }
 0x13e   : > { %v4780_v63 = vpop.permute.xlu1 %1441 }
 0x13f   : > { %v567_v50 = vrot.slane %v563_v44, %v4596_v49  ;;  %v4777_v49 = vstv %s4060_s1  ;;  %7654 = vst [vmem:[#allocation28_spill] sm:$0xff] %v4780_v63  ;;  %v4828_v44 = vstv %s4069_s20  ;;  %s4078_s1 = sld [smem:[#allocation6 + $0x4]]  ;;  %s4084_s20 = sld [smem:[#allocation6 + $0x19]] }
 0x140   : > { %v1566_v62 = vmul.f32 0.0, %v4777_v49  ;;  %v1899_v47 = vmul.f32 0.0, %v4828_v44 }
 0x141   : > { %568 = vrot.lane.b32.xlu1 %v567_v50, %s4391_s28  ;;  %s4061_s28 = sld [smem:[#allocation6 + $0x56]] }
 0x142   : > { %v1580_v14 = vrot.slane %v1566_v62, 5 }
 0x145   : > { %1478 = vrot.lane.b32.xlu1 %v1465_v15, %s4398_s13  ;;  %v4784_v15 = vpop.permute.xlu1 %1474 }
 0x146   : > { %7655 = vst [vmem:[#allocation29_spill] sm:$0xff] %v4784_v15 }
 0x147   : > { %v4786_v2 = vstv %s4061_s28  ;;  %s4079_s28 = sld [smem:[#allocation6 + $0x35]] }
 0x148   : > { %v1603_v3 = vmul.f32 0.0, %v4786_v2 }
 0x149   : > { %1513 = vrot.lane.b32.xlu1 %v1504_v51, %s4398_s13 }
 0x14a   : > { %v1617_v5 = vrot.slane %v1603_v3, 5 }
 0x14d   : > { %1517 = vrot.lane.b32.xlu1 %v1504_v51, %s4398_s13  ;;  %v1913_v51 = vrot.slane %v1899_v47, 2 }
 0x151   : > { %1550 = vrot.lane.b32.xlu1 %v1541_v59, %s4398_s13 }
 0x155   : > { %1554 = vrot.lane.b32.xlu1 %v1541_v59, %s4398_s13  ;;  %v4835_v59 = vstv %s4070_s22  ;;  %s4085_s22 = sld [smem:[#allocation6 + $0x4a]] }
 0x156   : > { %v1942_v62 = vmul.f32 0.0, %v4835_v59 }
 0x159   : > { %1589 = vrot.lane.b32.xlu1 %v1580_v14, %s4398_s13 }
 0x15b   : > { %v426_v6 = vpop.permute.xlu1 %425 }
 0x15c   : > { %428 = vst.msk [vmem:[#allocation4 + $0x14] sm:$0x1] %vm332_vm5, %v426_v6  ;;  %v1956_v6 = vrot.slane %v1942_v62, 3 }
 0x15d   : > { %1593 = vrot.lane.b32.xlu1 %v1580_v14, %s4398_s13 }
 0x161   : > { %1626 = vrot.lane.b32.xlu1 %v1617_v5, %s4398_s13 }
 0x165   : > { %1630 = vrot.lane.b32.xlu1 %v1617_v5, %s4398_s13 }
 0x169   : > { %1665 = vrot.lane.b32.xlu1 %v1656_v12, %s4398_s13 }
 0x16d   : > { %1669 = vrot.lane.b32.xlu1 %v1656_v12, %s4398_s13 }
 0x171   : > { %1702 = vrot.lane.b32.xlu1 %v1693_v19, %s4398_s13 }
 0x175   : > { %1706 = vrot.lane.b32.xlu1 %v1693_v19, %s4398_s13  ;;  %v4851_v19 = vstv %s4071_s27  ;;  %s4086_s27 = sld [smem:[#allocation6 + $0x20]] }
 0x179   : > { %1727 = vrot.lane.b32.xlu1 %v1718_v20, %s4398_s13 }
 0x17d   : > { %1731 = vrot.lane.b32.xlu1 %v1718_v20, %s4398_s13 }
 0x181   : > { %1754 = vrot.lane.b32.xlu1 %v1745_v21, %s4398_s13 }
 0x183   : > { %v437_v26 = vpop.permute.xlu1 %436 }
 0x184   : > { %439 = vst.msk [vmem:[#allocation4 + $0x44] sm:$0x1] %vm332_vm5, %v437_v26  ;;  %v1261_v26 = vmul.f32 %v4624_v61, %v4689_v32 }
 0x185   : > { %1758 = vrot.lane.b32.xlu1 %v1745_v21, %s4398_s13 }
 0x186   : > { %v1273_v37 = vrot.slane %v1261_v26, 1 }
 0x187   : > { %v448_v30 = vpop.permute.xlu1 %447 }
 0x188   : > { %450 = vst.msk [vmem:[#allocation4 + $0x15] sm:$0x1] %vm332_vm5, %v448_v30  ;;  %v4868_v30 = vstv %s4072_s5  ;;  %s4087_s5 = sld [smem:[#allocation6 + $0x51]] }
 0x189   : > { %1797 = vrot.lane.b32.xlu1 %v1788_v25, %s4398_s13 }
 0x18b   : > { %v459_v33 = vpop.permute.xlu1 %458 }
 0x18c   : > { %461 = vst.msk [vmem:[#allocation4 + $0x45] sm:$0x1] %vm332_vm5, %v459_v33 }
 0x18d   : > { %1801 = vrot.lane.b32.xlu1 %v1788_v25, %s4398_s13 }
 0x18f   : > { %v470_v38 = vpop.permute.xlu1 %469 }
 0x190   : > { %472 = vst.msk [vmem:[#allocation4 + $0x16] sm:$0x1] %vm332_vm5, %v470_v38 }
 0x191   : > { %1838 = vrot.lane.b32.xlu1 %v1829_v31, %s4398_s13 }
 0x193   : > { %v481_v42 = vpop.permute.xlu1 %480 }
 0x194   : > { %483 = vst.msk [vmem:[#allocation4 + $0x46] sm:$0x1] %vm332_vm5, %v481_v42  ;;  %v4878_v42 = vstv %s4073_s6  ;;  %s4088_s6 = sld [smem:[#allocation6 + $0x27]] }
 0x195   : > { %1842 = vrot.lane.b32.xlu1 %v1829_v31, %s4398_s13  ;;  %v2026_v31 = vmul.f32 0.0, %v4868_v30  ;;  %v2067_v47 = vmul.f32 0.0, %v4878_v42 }
 0x197   : > { %v492_v50 = vpop.permute.xlu1 %491 }
 0x198   : > { %494 = vst.msk [vmem:[#allocation4 + $0x17] sm:$0x1] %vm332_vm5, %v492_v50 }
 0x199   : > { %1881 = vrot.lane.b32.xlu1 %v1872_v41, %s4398_s13 }
 0x19b   : > { %v503_v56 = vpop.permute.xlu1 %502 }
 0x19c   : > { %505 = vst.msk [vmem:[#allocation4 + $0x47] sm:$0x1] %vm332_vm5, %v503_v56 }
 0x19d   : > { %1885 = vrot.lane.b32.xlu1 %v1872_v41, %s4398_s13 }
 0x19f   : > { %v4838_v14 = vld [vmem:[#allocation4 + $0x10] sm:$0xff]  ;;  %v514_v3 = vpop.permute.xlu1 %513 }
 0x1a0   : > { %516 = vst.msk [vmem:[#allocation4 + $0x20] sm:$0x1] %vm332_vm5, %v514_v3  ;;  %v1214_v5 = vmul.f32 %v4610_v54, %v4838_v14  ;;  %v1983_v54 = vmul.f32 0.0, %v4851_v19  ;;  %v1719_v21 = vmul.f32 %v4701_v39, %v4838_v14 }
 0x1a1   : > { %1922 = vrot.lane.b32.xlu1 %v1913_v51, %s4398_s13 }
 0x1a2   : > { %1224 = vrot.lane.b32.xlu0 %v1214_v5, %s4398_s13  ;;  %v1997_v24 = vrot.slane %v1983_v54, 3  ;;  %v1298_v5 = vmul.f32 %v4632_v1, %v4694_v35 }
 0x1a3   : > { %v4845_v11 = vld [vmem:[#allocation4 + $0x40] sm:$0xff]  ;;  %v525_v12 = vpop.permute.xlu1 %524 }
 0x1a4   : > { %527 = vst.msk [vmem:[#allocation4 + $0x50] sm:$0x1] %vm332_vm5, %v525_v12  ;;  %v1238_v17 = vmul.f32 %v4620_v60, %v4845_v11  ;;  %v1263_v60 = vmul.f32 %v4624_v61, %v4838_v14  ;;  %v1746_v28 = vmul.f32 %v4709_v43, %v4845_v11  ;;  %v2040_v43 = vrot.slane %v2026_v31, 4 }
 0x1a5   : > { %1926 = vrot.lane.b32.xlu1 %v1913_v51, %s4398_s13  ;;  %v1300_v62 = vmul.f32 %v4632_v1, %v4845_v11  ;;  %v1337_v31 = vmul.f32 %v4639_v4, %v4689_v32 }
 0x1a6   : > { %1248 = vrot.lane.b32.xlu0 %v1238_v17, %s4398_s13  ;;  %v1274_v39 = vrot.slane %v1263_v60, 1  ;;  %v1310_v60 = vrot.slane %v1298_v5, 1 }
 0x1a7   : > { %v536_v20 = vpop.permute.xlu1 %535 }
 0x1a8   : > { %538 = vst.msk [vmem:[#allocation4 + $0x21] sm:$0x1] %vm332_vm5, %v536_v20  ;;  %v1275_v38 = vsel %vm605_vm2, %v1273_v37, %v1274_v39  ;;  %v1311_v20 = vrot.slane %v1300_v62, 1 }
 0x1a9   : > { %1965 = vrot.lane.b32.xlu1 %v1956_v6, %s4398_s13 }
 0x1aa   : > { %1729 = vrot.lane.b32.xlu0 %v1719_v21, %s4398_s13  ;;  %v4901_v21 = vstv %s4074_s7  ;;  %v1312_v26 = vsel %vm605_vm2, %v1310_v60, %v1311_v20  ;;  %s4089_s7 = sld [smem:[#allocation6 + $0x58]] }
 0x1ab   : > { %v547_v25 = vpop.permute.xlu1 %546 }
 0x1ac   : > { %549 = vst.msk [vmem:[#allocation4 + $0x51] sm:$0x1] %vm332_vm5, %v547_v25 }
 0x1ad   : > { %1969 = vrot.lane.b32.xlu1 %v1956_v6, %s4398_s13  ;;  %v2081_v6 = vrot.slane %v2067_v47, 4  ;;  %v1349_v47 = vrot.slane %v1337_v31, 2 }
 0x1ae   : > { %1756 = vrot.lane.b32.xlu0 %v1746_v28, %s4398_s13 }
 0x1af   : > { %v558_v33 = vpop.permute.xlu1 %557 }
 0x1b0   : > { %560 = vst.msk [vmem:[#allocation4 + $0x22] sm:$0x1] %vm332_vm5, %v558_v33 }
 0x1b1   : > { %2006 = vrot.lane.b32.xlu1 %v1997_v24, %s4398_s13 }
 0x1b2   : > { %1283 = vrot.lane.b32.xlu0 %v1275_v38, %s4398_s13 }
 0x1b3   : > { %v569_v41 = vpop.permute.xlu1 %568 }
 0x1b4   : > { %571 = vst.msk [vmem:[#allocation4 + $0x52] sm:$0x1] %vm332_vm5, %v569_v41  ;;  %v4920_v41 = vstv %s4075_s11  ;;  %s4090_s11 = sld [smem:[#allocation6 + $0x2e]] }
 0x1b5   : > { %2010 = vrot.lane.b32.xlu1 %v1997_v24, %s4398_s13  ;;  %v2110_v24 = vmul.f32 0.0, %v4901_v21 }
 0x1b7   : > { %v4881_v50 = vld [vmem:[#allocation4 + $0x20] sm:$0xff]  ;;  %v4883_v51 = vpop.permute.xlu1 %1478 }
 0x1b8   : > { %7656 = vst [vmem:[#allocation30_spill] sm:$0xff] %v4883_v51  ;;  %v1265_v56 = vmul.f32 %v4624_v61, %v4881_v50 }
 0x1b9   : > { %2049 = vrot.lane.b32.xlu1 %v2040_v43, %s4398_s13 }
 0x1ba   : > { %v1279_v3 = vrot.slane %v1265_v56, 1  ;;  %v2151_v56 = vmul.f32 0.0, %v4920_v41 }
 0x1bb   : > { %v4892_v12 = vld [vmem:[#allocation4 + $0x50] sm:$0xff]  ;;  %v4894_v17 = vpop.permute.xlu1 %1513 }
 0x1bc   : > { %7657 = vst [vmem:[#allocation31_spill] sm:$0xff] %v4894_v17  ;;  %v1280_v54 = vsel %vm605_vm2, %v1274_v39, %v1279_v3  ;;  %v1302_v61 = vmul.f32 %v4632_v1, %v4892_v12  ;;  %v1339_v39 = vmul.f32 %v4639_v4, %v4838_v14  ;;  %v2124_v1 = vrot.slane %v2110_v24, 5 }
 0x1bd   : > { %1287 = vrot.lane.b32.xlu0 %v1280_v54, %s4398_s13  ;;  %2053 = vrot.lane.b32.xlu1 %v2040_v43, %s4398_s13  ;;  %v1341_v43 = vmul.f32 %v4639_v4, %v4881_v50  ;;  %v1376_v54 = vmul.f32 %v4646_v7, %v4845_v11  ;;  %v2165_v4 = vrot.slane %v2151_v56, 5  ;;  %v1378_v24 = vmul.f32 %v4646_v7, %v4892_v12 }
 0x1be   : > { %v1316_v28 = vrot.slane %v1302_v61, 1  ;;  %v1350_v38 = vrot.slane %v1339_v39, 2 }
 0x1bf   : > { %v4904_v25 = vpop.permute.xlu1 %1517  ;;  %v1355_v5 = vrot.slane %v1341_v43, 2  ;;  %v1387_v60 = vrot.slane %v1376_v54, 2  ;;  %v1392_v43 = vrot.slane %v1378_v24, 2  ;;  %v4958_v54 = vstv %s4077_s12  ;;  %s4092_s12 = sld [smem:[#allocation6 + $0x5]] }
 0x1c0   : > { %7658 = vst [vmem:[#allocation32_spill] sm:$0xff] %v4904_v25  ;;  %v1317_v37 = vsel %vm605_vm2, %v1311_v20, %v1316_v28  ;;  %v1351_v3 = vsel %vm640_vm3, %v1349_v47, %v1350_v38 }
 0x1c1   : > { %1320 = vrot.lane.b32.xlu0 %v1312_v26, %s4398_s13  ;;  %2090 = vrot.lane.b32.xlu1 %v2081_v6, %s4398_s13  ;;  %v1356_v61 = vsel %vm640_vm3, %v1350_v38, %v1355_v5  ;;  %v4939_v26 = vstv %s4076_s9  ;;  %v1415_v38 = vmul.f32 %v4653_v10, %v4838_v14  ;;  %v1393_v56 = vsel %vm640_vm3, %v1387_v60, %v1392_v43  ;;  %s4091_s9 = sld [smem:[#allocation6 + $0x5f]] }
 0x1c2   : > { %v2194_v39 = vmul.f32 0.0, %v4939_v26  ;;  %v1417_v5 = vmul.f32 %v4653_v10, %v4881_v50 }
 0x1c3   : > { %v4913_v33 = vpop.permute.xlu1 %1550 }
 0x1c4   : > { %7659 = vst [vmem:[#allocation33_spill] sm:$0xff] %v4913_v33 }
 0x1c5   : > { %2094 = vrot.lane.b32.xlu1 %v2081_v6, %s4398_s13  ;;  %1324 = vrot.lane.b32.xlu0 %v1317_v37, %s4398_s13  ;;  %v1374_v6 = vmul.f32 %v4646_v7, %v4694_v35  ;;  %v2208_v7 = vrot.slane %v2194_v39, 6  ;;  %v1431_v39 = vrot.slane %v1417_v5, 3 }
 0x1c7   : > { %v4923_v62 = vpop.permute.xlu1 %1554  ;;  %v1386_v28 = vrot.slane %v1374_v6, 2 }
 0x1c8   : > { %7660 = vst [vmem:[#allocation34_spill] sm:$0xff] %v4923_v62 }
 0x1c9   : > { %2133 = vrot.lane.b32.xlu1 %v2124_v1, %s4398_s13  ;;  %1359 = vrot.lane.b32.xlu0 %v1351_v3, %s4398_s13  ;;  %v1388_v37 = vsel %vm640_vm3, %v1386_v28, %v1387_v60  ;;  %v1426_v3 = vrot.slane %v1415_v38, 3  ;;  %v1452_v60 = vmul.f32 %v4660_v13, %v4845_v11 }
 0x1cb   : > { %v4932_v20 = vpop.permute.xlu1 %1589  ;;  %v1432_v43 = vsel %vm675_vm4, %v1426_v3, %v1431_v39  ;;  %v1463_v38 = vrot.slane %v1452_v60, 3  ;;  %v4989_v39 = vstv %s4078_s1  ;;  %s4093_s1 = sld [smem:[#allocation6 + $0x36]] }
 0x1cc   : > { %7661 = vst [vmem:[#allocation35_spill] sm:$0xff] %v4932_v20 }
 0x1cd   : > { %2137 = vrot.lane.b32.xlu1 %v2124_v1, %s4398_s13  ;;  %1363 = vrot.lane.b32.xlu0 %v1356_v61, %s4398_s13  ;;  %v1413_v1 = vmul.f32 %v4653_v10, %v4689_v32  ;;  %v2235_v61 = vmul.f32 0.0, %v4958_v54 }
 0x1cf   : > { %v4942_v31 = vpop.permute.xlu1 %1593  ;;  %v1425_v6 = vrot.slane %v1413_v1, 3  ;;  %v2249_v10 = vrot.slane %v2235_v61, 6  ;;  %v1454_v1 = vmul.f32 %v4660_v13, %v4892_v12 }
 0x1d0   : > { %7662 = vst [vmem:[#allocation36_spill] sm:$0xff] %v4942_v31 }
 0x1d1   : > { %2174 = vrot.lane.b32.xlu1 %v2165_v4, %s4398_s13  ;;  %1396 = vrot.lane.b32.xlu0 %v1388_v37, %s4398_s13  ;;  %v1427_v28 = vsel %vm675_vm4, %v1425_v6, %v1426_v3  ;;  %v1468_v61 = vrot.slane %v1454_v1, 3 }
 0x1d3   : > { %v4951_v47 = vpop.permute.xlu1 %1626 }
 0x1d4   : > { %7663 = vst [vmem:[#allocation37_spill] sm:$0xff] %v4951_v47 }
 0x1d5   : > { %2178 = vrot.lane.b32.xlu1 %v2165_v4, %s4398_s13  ;;  %1400 = vrot.lane.b32.xlu0 %v1393_v56, %s4398_s13  ;;  %v1450_v4 = vmul.f32 %v4660_v13, %v4694_v35  ;;  %v1489_v13 = vmul.f32 %v4760_v46, %v4689_v32 }
 0x1d7   : > { %v4961_v24 = vpop.permute.xlu1 %1630  ;;  %v1462_v56 = vrot.slane %v1450_v4, 3  ;;  %v1493_v4 = vmul.f32 %v4760_v46, %v4881_v50 }
 0x1d8   : > { %7664 = vst [vmem:[#allocation38_spill] sm:$0xff] %v4961_v24 }
 0x1d9   : > { %2217 = vrot.lane.b32.xlu1 %v2208_v7, %s4398_s13  ;;  %1435 = vrot.lane.b32.xlu0 %v1427_v28, %s4398_s13  ;;  %v1464_v6 = vsel %vm675_vm4, %v1462_v56, %v1463_v38  ;;  %v1491_v28 = vmul.f32 %v4760_v46, %v4838_v14  ;;  %v1501_v56 = vrot.slane %v1489_v13, 4  ;;  %v1528_v46 = vmul.f32 %v4770_v55, %v4845_v11 }
 0x1db   : > { %v4970_v37 = vpop.permute.xlu1 %1665  ;;  %v1502_v60 = vrot.slane %v1491_v28, 4 }
 0x1dc   : > { %7665 = vst [vmem:[#allocation39_spill] sm:$0xff] %v4970_v37 }
 0x1dd   : > { %2221 = vrot.lane.b32.xlu1 %v2208_v7, %s4398_s13  ;;  %1439 = vrot.lane.b32.xlu0 %v1432_v43, %s4398_s13  ;;  %v1469_v7 = vsel %vm675_vm4, %v1463_v38, %v1468_v61  ;;  %v4995_v43 = vld [vmem:[#allocation4 + $0x8] sm:$0xff]  ;;  %v1503_v38 = vsel %vm233_vm0, %v1501_v56, %v1502_v60  ;;  %v1507_v61 = vrot.slane %v1493_v4, 4  ;;  %v1530_v4 = vmul.f32 %v4770_v55, %v4892_v12 }
 0x1de   : > { %v2278_v1 = vmul.f32 %v4995_v43, %v4989_v39 }
 0x1df   : > { %v4977_v5 = vpop.permute.xlu1 %1669  ;;  %v1508_v13 = vsel %vm233_vm0, %v1502_v60, %v1507_v61  ;;  %v1544_v62 = vrot.slane %v1530_v4, 4  ;;  %v5039_v4 = vstv %s4081_s4  ;;  %s4096_s4 = sld [smem:[#allocation6 + $0x13]] }
 0x1e0   : > { %7666 = vst [vmem:[#allocation40_spill] sm:$0xff] %v4977_v5 }
 0x1e1   : > { %2258 = vrot.lane.b32.xlu1 %v2249_v10, %s4398_s13  ;;  %1472 = vrot.lane.b32.xlu0 %v1464_v6, %s4398_s13 }
 0x1e3   : > { %v4986_v3 = vpop.permute.xlu1 %1702 }
 0x1e4   : > { %7667 = vst [vmem:[#allocation41_spill] sm:$0xff] %v4986_v3 }
 0x1e5   : > { %2262 = vrot.lane.b32.xlu1 %v2249_v10, %s4398_s13  ;;  %1476 = vrot.lane.b32.xlu0 %v1469_v7, %s4398_s13  ;;  %v1526_v10 = vmul.f32 %v4770_v55, %v4694_v35  ;;  %v5011_v7 = vstv %s4079_s28  ;;  %v1567_v55 = vmul.f32 %v4777_v49, %v4838_v14  ;;  %s4094_s28 = sld [smem:[#allocation6 + $0xc]] }
 0x1e6   : > { %v2302_v56 = vmul.f32 %v4995_v43, %v5011_v7 }
 0x1e7   : > { %v4999_v6 = vpop.permute.xlu1 %1706  ;;  %v1538_v24 = vrot.slane %v1526_v10, 4  ;;  %v1578_v3 = vrot.slane %v1567_v55, 5 }
 0x1e8   : > { %7668 = vst [vmem:[#allocation42_spill] sm:$0xff] %v4999_v6  ;;  %v1539_v6 = vrot.slane %v1528_v46, 4 }
 0x1e9   : > { %2287 = vrot.lane.b32.xlu1 %v2278_v1, %s4405_s26  ;;  %1511 = vrot.lane.b32.xlu0 %v1503_v38, %s4398_s13  ;;  %v5019_v38 = vstv %s4080_s29  ;;  %s4095_s29 = sld [smem:[#allocation6 + $0x3d]] }
 0x1ea   : > { %v2327_v60 = vmul.f32 %v4995_v43, %v5019_v38  ;;  %v1540_v46 = vsel %vm233_vm0, %v1538_v24, %v1539_v6  ;;  %v1545_v51 = vsel %vm233_vm0, %v1539_v6, %v1544_v62  ;;  %v1569_v24 = vmul.f32 %v4777_v49, %v4881_v50 }
 0x1eb   : > { %v5008_v28 = vpop.permute.xlu1 %1727  ;;  %v1604_v6 = vmul.f32 %v4786_v2, %v4845_v11 }
 0x1ec   : > { %7669 = vst [vmem:[#allocation43_spill] sm:$0xff] %v5008_v28  ;;  %v1583_v62 = vrot.slane %v1569_v24, 5  ;;  %v5059_v24 = vstv %s4082_s21  ;;  %s4097_s21 = sld [smem:[#allocation6 + $0x44]] }
 0x1ed   : > { %2291 = vrot.lane.b32.xlu1 %v2278_v1, %s4405_s26  ;;  %1515 = vrot.lane.b32.xlu0 %v1508_v13, %s4398_s13  ;;  %v2341_v1 = vrot.slane %v2327_v60, 1  ;;  %v1565_v13 = vmul.f32 %v4777_v49, %v4689_v32  ;;  %v2364_v60 = vmul.f32 %v4995_v43, %v5039_v4  ;;  %v2403_v47 = vmul.f32 %v4995_v43, %v5059_v24 }
 0x1ee   : > { %v1584_v55 = vsel %vm744_vm6, %v1578_v3, %v1583_v62 }
 0x1ef   : > { %v5023_v61 = vpop.permute.xlu1 %1731  ;;  %v2378_v49 = vrot.slane %v2364_v60, 1 }
 0x1f0   : > { %7670 = vst [vmem:[#allocation44_spill] sm:$0xff] %v5023_v61 }
 0x1f1   : > { %2311 = vrot.lane.b32.xlu1 %v2302_v56, %s4405_s26  ;;  %1548 = vrot.lane.b32.xlu0 %v1540_v46, %s4398_s13  ;;  %v1577_v46 = vrot.slane %v1565_v13, 5  ;;  %v1615_v13 = vrot.slane %v1604_v6, 5  ;;  %v2417_v6 = vrot.slane %v2403_v47, 2 }
 0x1f3   : > { %v5032_v10 = vpop.permute.xlu1 %1754  ;;  %v1579_v37 = vsel %vm744_vm6, %v1577_v46, %v1578_v3  ;;  %v1606_v46 = vmul.f32 %v4786_v2, %v4892_v12 }
 0x1f4   : > { %7671 = vst [vmem:[#allocation45_spill] sm:$0xff] %v5032_v10 }
 0x1f5   : > { %2315 = vrot.lane.b32.xlu1 %v2302_v56, %s4405_s26  ;;  %1552 = vrot.lane.b32.xlu0 %v1545_v51, %s4398_s13  ;;  %v1602_v51 = vmul.f32 %v4786_v2, %v4694_v35  ;;  %v1620_v62 = vrot.slane %v1606_v46, 5  ;;  %v1643_v2 = vmul.f32 %v4792_v9, %v4838_v14  ;;  %v1645_v46 = vmul.f32 %v4792_v9, %v4881_v50 }
 0x1f7   : > { %v5043_v5 = vpop.permute.xlu1 %1758  ;;  %v1614_v60 = vrot.slane %v1602_v51, 5  ;;  %v1621_v20 = vsel %vm744_vm6, %v1615_v13, %v1620_v62  ;;  %v1654_v33 = vrot.slane %v1643_v2, 6  ;;  %v1680_v62 = vmul.f32 %v4797_v16, %v4845_v11 }
 0x1f8   : > { %7672 = vst [vmem:[#allocation46_spill] sm:$0xff] %v5043_v5 }
 0x1f9   : > { %2350 = vrot.lane.b32.xlu1 %v2341_v1, %s4405_s26  ;;  %1587 = vrot.lane.b32.xlu0 %v1579_v37, %s4398_s13  ;;  %v5061_v37 = vpop.permute.xlu0 %1220  ;;  %v1616_v3 = vsel %vm744_vm6, %v1614_v60, %v1615_v13  ;;  %v5083_v60 = vstv %s4083_s23  ;;  %v1659_v13 = vrot.slane %v1645_v46, 6  ;;  %v1691_v15 = vrot.slane %v1680_v62, 6  ;;  %s4098_s23 = sld [smem:[#allocation6 + $0x1a]] }
 0x1fa   : > { %7674 = vst [vmem:[#allocation48_spill] sm:$0xff] %v5061_v37  ;;  %v2440_v47 = vmul.f32 %v4995_v43, %v5083_v60  ;;  %v1682_v46 = vmul.f32 %v4797_v16, %v4892_v12 }
 0x1fb   : > { %v5052_v56 = vpop.permute.xlu1 %1797 }
 0x1fc   : > { %7673 = vst [vmem:[#allocation47_spill] sm:$0xff] %v5052_v56 }
 0x1fd   : > { %2354 = vrot.lane.b32.xlu1 %v2341_v1, %s4405_s26  ;;  %1591 = vrot.lane.b32.xlu0 %v1584_v55, %s4398_s13  ;;  %v1641_v1 = vmul.f32 %v4792_v9, %v4689_v32  ;;  %v5076_v55 = vpop.permute.xlu0 %1244 }
 0x1fe   : > { %7677 = vst [vmem:[#allocation51_spill] sm:$0xff] %v5076_v55 }
 0x1ff   : > { %v5065_v31 = vpop.permute.xlu1 %1801 }
 0x200   : > { %7675 = vst [vmem:[#allocation49_spill] sm:$0xff] %v5065_v31 }
 0x201   : > { %2387 = vrot.lane.b32.xlu1 %v2378_v49, %s4405_s26  ;;  %1624 = vrot.lane.b32.xlu0 %v1616_v3, %s4398_s13  ;;  %v1653_v3 = vrot.slane %v1641_v1, 6  ;;  %v5094_v9 = vpop.permute.xlu0 %1725  ;;  %v1660_v1 = vsel %vm779_vm7, %v1654_v33, %v1659_v13  ;;  %v1696_v13 = vrot.slane %v1682_v46, 6  ;;  %v1777_v46 = vmul.f32 %v4808_v22, %v4881_v50 }
 0x202   : > { %7679 = vst [vmem:[#allocation53_spill] sm:$0xff] %v5094_v9 }
 0x203   : > { %v5074_v51 = vpop.permute.xlu1 %1838  ;;  %v1655_v17 = vsel %vm779_vm7, %v1653_v3, %v1654_v33  ;;  %v1697_v52 = vsel %vm779_vm7, %v1691_v15, %v1696_v13  ;;  %v1816_v13 = vmul.f32 %v4814_v27, %v4845_v11 }
 0x204   : > { %7676 = vst [vmem:[#allocation50_spill] sm:$0xff] %v5074_v51 }
 0x205   : > { %1628 = vrot.lane.b32.xlu0 %v1621_v20, %s4398_s13  ;;  %2391 = vrot.lane.b32.xlu1 %v2378_v49, %s4405_s26  ;;  %v1678_v20 = vmul.f32 %v4797_v16, %v4694_v35  ;;  %v2454_v49 = vrot.slane %v2440_v47, 2  ;;  %v5111_v57 = vpop.permute.xlu0 %1752  ;;  %v1775_v16 = vmul.f32 %v4808_v22, %v4838_v14  ;;  %v1827_v23 = vrot.slane %v1816_v13, 1 }
 0x206   : > { %7682 = vst [vmem:[#allocation56_spill] sm:$0xff] %v5111_v57 }
 0x207   : > { %v5087_v25 = vpop.permute.xlu1 %1842  ;;  %v1690_v3 = vrot.slane %v1678_v20, 6  ;;  %v1786_v45 = vrot.slane %v1775_v16, 1 }
 0x208   : > { %7678 = vst [vmem:[#allocation52_spill] sm:$0xff] %v5087_v25 }
 0x209   : > { %1663 = vrot.lane.b32.xlu0 %v1655_v17, %s4398_s13  ;;  %2426 = vrot.lane.b32.xlu1 %v2417_v6, %s4405_s26  ;;  %v5105_v17 = vstv %s4084_s20  ;;  %v1692_v33 = vsel %vm779_vm7, %v1690_v3, %v1691_v15  ;;  %v5129_v3 = vstv %s4085_s22  ;;  %v1791_v15 = vrot.slane %v1777_v46, 1  ;;  %s4100_s20 = sld [smem:[#allocation6 + $0x21]]  ;;  %s4101_s22 = sld [smem:[#allocation6 + $0x52]] }
 0x20a   : > { %v2479_v63 = vmul.f32 %v4995_v43, %v5105_v17  ;;  %v1818_v46 = vmul.f32 %v4814_v27, %v4892_v12 }
 0x20b   : > { %v5098_v2 = vpop.permute.xlu1 %1881 }
 0x20c   : > { %7680 = vst [vmem:[#allocation54_spill] sm:$0xff] %v5098_v2  ;;  %v2493_v62 = vrot.slane %v2479_v63, 3  ;;  %v2516_v63 = vmul.f32 %v4995_v43, %v5129_v3 }
 0x20d   : > { %1667 = vrot.lane.b32.xlu0 %v1660_v1, %s4398_s13  ;;  %2430 = vrot.lane.b32.xlu1 %v2417_v6, %s4405_s26  ;;  %v1773_v6 = vmul.f32 %v4808_v22, %v4689_v32 }
 0x20f   : > { %v5109_v47 = vpop.permute.xlu1 %1885 }
 0x210   : > { %7681 = vst [vmem:[#allocation55_spill] sm:$0xff] %v5109_v47 }
 0x211   : > { %1700 = vrot.lane.b32.xlu0 %v1692_v33, %s4398_s13  ;;  %2463 = vrot.lane.b32.xlu1 %v2454_v49, %s4405_s26  ;;  %v1785_v33 = vrot.slane %v1773_v6, 1  ;;  %v1792_v6 = vsel %vm605_vm2, %v1786_v45, %v1791_v15  ;;  %v1832_v15 = vrot.slane %v1818_v46, 1 }
 0x213   : > { %v5120_v20 = vpop.permute.xlu1 %1922  ;;  %v1787_v29 = vsel %vm605_vm2, %v1785_v33, %v1786_v45  ;;  %v5151_v33 = vstv %s4086_s27  ;;  %s4102_s27 = sld [smem:[#allocation6 + $0x28]] }
 0x214   : > { %7683 = vst [vmem:[#allocation57_spill] sm:$0xff] %v5120_v20  ;;  %v5122_v1 = vpop.permute.xlu0 %1224  ;;  %v2555_v18 = vmul.f32 %v4995_v43, %v5151_v33 }
 0x215   : > { %7684 = vst [vmem:[#allocation58_spill] sm:$0xff] %v5122_v1  ;;  %1704 = vrot.lane.b32.xlu0 %v1697_v52, %s4398_s13  ;;  %2467 = vrot.lane.b32.xlu1 %v2454_v49, %s4405_s26  ;;  %v1814_v52 = vmul.f32 %v4814_v27, %v4694_v35  ;;  %v2530_v49 = vrot.slane %v2516_v63, 3  ;;  %v1859_v27 = vmul.f32 %v4821_v34, %v4838_v14 }
 0x216   : > { %v2569_v13 = vrot.slane %v2555_v18, 4 }
 0x217   : > { %v5133_v36 = vpop.permute.xlu1 %1926  ;;  %v1870_v0 = vrot.slane %v1859_v27, 2 }
 0x218   : > { %7685 = vst [vmem:[#allocation59_spill] sm:$0xff] %v5133_v36  ;;  %v5138_v22 = vpop.permute.xlu0 %1248 }
 0x219   : > { %7686 = vst [vmem:[#allocation60_spill] sm:$0xff] %v5138_v22  ;;  %1795 = vrot.lane.b32.xlu0 %v1787_v29, %s4398_s13  ;;  %2502 = vrot.lane.b32.xlu1 %v2493_v62, %s4405_s26  ;;  %v1826_v29 = vrot.slane %v1814_v52, 1 }
 0x21b   : > { %v5144_v16 = vpop.permute.xlu1 %1965  ;;  %v1828_v45 = vsel %vm605_vm2, %v1826_v29, %v1827_v23  ;;  %v1861_v29 = vmul.f32 %v4821_v34, %v4881_v50 }
 0x21c   : > { %7687 = vst [vmem:[#allocation61_spill] sm:$0xff] %v5144_v16  ;;  %v5155_v63 = vpop.permute.xlu0 %1729 }
 0x21d   : > { %1799 = vrot.lane.b32.xlu0 %v1792_v6, %s4398_s13  ;;  %2506 = vrot.lane.b32.xlu1 %v2493_v62, %s4405_s26  ;;  %7688 = vst [vmem:[#allocation62_spill] sm:$0xff] %v5155_v63  ;;  %v1857_v62 = vmul.f32 %v4821_v34, %v4689_v32  ;;  %v1833_v6 = vsel %vm605_vm2, %v1827_v23, %v1832_v15  ;;  %v1875_v15 = vrot.slane %v1861_v29, 2  ;;  %v5197_v29 = vstv %s4088_s6  ;;  %s4104_s6 = sld [smem:[#allocation6 + $0x2f]] }
 0x21e   : > { %v1900_v34 = vmul.f32 %v4828_v44, %v4845_v11 }
 0x21f   : > { %v5157_v8 = vpop.permute.xlu1 %1969  ;;  %v1869_v63 = vrot.slane %v1857_v62, 2 }
 0x220   : > { %7689 = vst [vmem:[#allocation63_spill] sm:$0xff] %v5157_v8  ;;  %v5171_v46 = vpop.permute.xlu0 %1756  ;;  %v1911_v22 = vrot.slane %v1900_v34, 2 }
 0x221   : > { %1836 = vrot.lane.b32.xlu0 %v1828_v45, %s4398_s13  ;;  %2539 = vrot.lane.b32.xlu1 %v2530_v49, %s4405_s26  ;;  %7691 = vst [vmem:[#allocation65_spill] sm:$0xff] %v5171_v46  ;;  %v5175_v45 = vstv %s4087_s5  ;;  %v1871_v23 = vsel %vm640_vm3, %v1869_v63, %v1870_v0  ;;  %v1876_v46 = vsel %vm640_vm3, %v1870_v0, %v1875_v15  ;;  %s4103_s5 = sld [smem:[#allocation6 + $0x59]] }
 0x222   : > { %v2592_v32 = vmul.f32 %v4995_v43, %v5175_v45  ;;  %v1902_v63 = vmul.f32 %v4828_v44, %v4892_v12 }
 0x223   : > { %v5166_v52 = vpop.permute.xlu1 %2006 }
 0x224   : > { %7690 = vst [vmem:[#allocation64_spill] sm:$0xff] %v5166_v52  ;;  %v2606_v27 = vrot.slane %v2592_v32, 4  ;;  %v5188_v62 = vpop.permute.xlu0 %1283  ;;  %v1916_v15 = vrot.slane %v1902_v63, 2 }
 0x225   : > { %1840 = vrot.lane.b32.xlu0 %v1833_v6, %s4398_s13  ;;  %2543 = vrot.lane.b32.xlu1 %v2530_v49, %s4405_s26  ;;  %v1898_v49 = vmul.f32 %v4828_v44, %v4694_v35  ;;  %7693 = vst [vmem:[#allocation67_spill] sm:$0xff] %v5188_v62  ;;  %v2631_v35 = vmul.f32 %v4995_v43, %v5197_v29 }
 0x226   : > { %v1943_v44 = vmul.f32 %v4835_v59, %v4838_v14 }
 0x227   : > { %v5179_v18 = vpop.permute.xlu1 %2010  ;;  %v2645_v34 = vrot.slane %v2631_v35, 5 }
 0x228   : > { %7692 = vst [vmem:[#allocation66_spill] sm:$0xff] %v5179_v18  ;;  %v1954_v63 = vrot.slane %v1943_v44, 3 }
 0x229   : > { %1879 = vrot.lane.b32.xlu0 %v1871_v23, %s4398_s13  ;;  %2578 = vrot.lane.b32.xlu1 %v2569_v13, %s4405_s26  ;;  %v1910_v23 = vrot.slane %v1898_v49, 2 }
 0x22b   : > { %v5190_v6 = vpop.permute.xlu1 %2049  ;;  %v1912_v0 = vsel %vm640_vm3, %v1910_v23, %v1911_v22  ;;  %v1917_v23 = vsel %vm640_vm3, %v1911_v22, %v1916_v15 }
 0x22c   : > { %7694 = vst [vmem:[#allocation68_spill] sm:$0xff] %v5190_v6 }
 0x22d   : > { %1883 = vrot.lane.b32.xlu0 %v1876_v46, %s4398_s13  ;;  %2582 = vrot.lane.b32.xlu1 %v2569_v13, %s4405_s26  ;;  %v5210_v13 = vld [vmem:[#allocation4] sm:$0xff] }
 0x22e   : > { %v1941_v46 = vmul.f32 %v5210_v13, %v4835_v59 }
 0x22f   : > { %v5201_v32 = vpop.permute.xlu1 %2053  ;;  %v5203_v62 = vpop.permute.xlu0 %1287 }
 0x230   : > { %7695 = vst [vmem:[#allocation69_spill] sm:$0xff] %v5201_v32  ;;  %7696 = vst [vmem:[#allocation70_spill] sm:$0xff] %v5203_v62  ;;  %v1945_v62 = vmul.f32 %v4835_v59, %v4881_v50  ;;  %v1953_v1 = vrot.slane %v1941_v46, 3  ;;  %v1984_v59 = vmul.f32 %v4851_v19, %v4845_v11 }
 0x231   : > { %1920 = vrot.lane.b32.xlu0 %v1912_v0, %s4398_s13  ;;  %2615 = vrot.lane.b32.xlu1 %v2606_v27, %s4405_s26  ;;  %v5223_v0 = vstv %s4089_s7  ;;  %s4105_s7 = sld [smem:[#allocation6 + $0x60]] }
 0x232   : > { %v2668_v35 = vmul.f32 %v4995_v43, %v5223_v0  ;;  %v1955_v22 = vsel %vm675_vm4, %v1953_v1, %v1954_v63  ;;  %v1959_v15 = vrot.slane %v1945_v62, 3  ;;  %v1995_v62 = vrot.slane %v1984_v59, 3 }
 0x233   : > { %v5214_v49 = vpop.permute.xlu1 %2090  ;;  %v5216_v58 = vpop.permute.xlu0 %1320 }
 0x234   : > { %7697 = vst [vmem:[#allocation71_spill] sm:$0xff] %v5214_v49  ;;  %7698 = vst [vmem:[#allocation72_spill] sm:$0xff] %v5216_v58  ;;  %v2682_v46 = vrot.slane %v2668_v35, 5  ;;  %v1960_v1 = vsel %vm675_vm4, %v1954_v63, %v1959_v15 }
 0x235   : > { %1924 = vrot.lane.b32.xlu0 %v1917_v23, %s4398_s13  ;;  %2619 = vrot.lane.b32.xlu1 %v2606_v27, %s4405_s26  ;;  %v5236_v27 = vld [vmem:[#allocation4 + $0x30] sm:$0xff] }
 0x236   : > { %v1982_v44 = vmul.f32 %v5236_v27, %v4851_v19 }
 0x237   : > { %v5227_v48 = vpop.permute.xlu1 %2094  ;;  %v5229_v58 = vpop.permute.xlu0 %1324 }
 0x238   : > { %7699 = vst [vmem:[#allocation73_spill] sm:$0xff] %v5227_v48  ;;  %7700 = vst [vmem:[#allocation74_spill] sm:$0xff] %v5229_v58  ;;  %v1986_v58 = vmul.f32 %v4851_v19, %v4892_v12  ;;  %v1994_v9 = vrot.slane %v1982_v44, 3  ;;  %v2027_v19 = vmul.f32 %v4868_v30, %v4838_v14 }
 0x239   : > { %1963 = vrot.lane.b32.xlu0 %v1955_v22, %s4398_s13  ;;  %2654 = vrot.lane.b32.xlu1 %v2645_v34, %s4405_s26  ;;  %v5249_v22 = vstv %s4090_s11  ;;  %s4106_s11 = sld [smem:[#allocation6 + $0x6]] }
 0x23a   : > { %v2707_v35 = vmul.f32 %v4995_v43, %v5249_v22  ;;  %v1996_v63 = vsel %vm675_vm4, %v1994_v9, %v1995_v62  ;;  %v2000_v15 = vrot.slane %v1986_v58, 3  ;;  %v2038_v53 = vrot.slane %v2027_v19, 4 }
 0x23b   : > { %v5240_v23 = vpop.permute.xlu1 %2133  ;;  %v5242_v57 = vpop.permute.xlu0 %1359  ;;  %v2029_v58 = vmul.f32 %v4868_v30, %v4881_v50  ;;  %v5273_v9 = vstv %s4091_s9  ;;  %s4107_s9 = sld [smem:[#allocation6 + $0x37]] }
 0x23c   : > { %7701 = vst [vmem:[#allocation75_spill] sm:$0xff] %v5240_v23  ;;  %7702 = vst [vmem:[#allocation76_spill] sm:$0xff] %v5242_v57  ;;  %v2721_v59 = vrot.slane %v2707_v35, 6  ;;  %v2744_v35 = vmul.f32 %v4995_v43, %v5273_v9 }
 0x23d   : > { %1967 = vrot.lane.b32.xlu0 %v1960_v1, %s4398_s13  ;;  %2658 = vrot.lane.b32.xlu1 %v2645_v34, %s4405_s26  ;;  %v2025_v34 = vmul.f32 %v5210_v13, %v4868_v30  ;;  %v2068_v30 = vmul.f32 %v4878_v42, %v4845_v11 }
 0x23f   : > { %v5253_v55 = vpop.permute.xlu1 %2137  ;;  %v5255_v57 = vpop.permute.xlu0 %1363 }
 0x240   : > { %7703 = vst [vmem:[#allocation77_spill] sm:$0xff] %v5253_v55  ;;  %7704 = vst [vmem:[#allocation78_spill] sm:$0xff] %v5255_v57  ;;  %v2001_v57 = vsel %vm675_vm4, %v1995_v62, %v2000_v15  ;;  %v2043_v15 = vrot.slane %v2029_v58, 4  ;;  %v2070_v58 = vmul.f32 %v4878_v42, %v4892_v12 }
 0x241   : > { %2004 = vrot.lane.b32.xlu0 %v1996_v63, %s4398_s13  ;;  %2691 = vrot.lane.b32.xlu1 %v2682_v46, %s4405_s26  ;;  %v2037_v63 = vrot.slane %v2025_v34, 4 }
 0x243   : > { %v5264_v44 = vpop.permute.xlu1 %2174  ;;  %v5266_v1 = vpop.permute.xlu0 %1396  ;;  %v2039_v62 = vsel %vm233_vm0, %v2037_v63, %v2038_v53 }
 0x244   : > { %7705 = vst [vmem:[#allocation79_spill] sm:$0xff] %v5264_v44  ;;  %7706 = vst [vmem:[#allocation80_spill] sm:$0xff] %v5266_v1  ;;  %v2079_v1 = vrot.slane %v2068_v30, 4  ;;  %v2084_v44 = vrot.slane %v2070_v58, 4  ;;  %v2113_v58 = vmul.f32 %v4901_v21, %v4881_v50 }
 0x245   : > { %2008 = vrot.lane.b32.xlu0 %v2001_v57, %s4398_s13  ;;  %2695 = vrot.lane.b32.xlu1 %v2682_v46, %s4405_s26  ;;  %v2066_v57 = vmul.f32 %v5236_v27, %v4878_v42  ;;  %v2758_v46 = vrot.slane %v2744_v35, 6 }
 0x247   : > { %v5277_v37 = vpop.permute.xlu1 %2178  ;;  %v5279_v40 = vpop.permute.xlu0 %1400  ;;  %v2078_v63 = vrot.slane %v2066_v57, 4  ;;  %v5313_v57 = vstv %s4092_s12  ;;  %s4108_s12 = sld [smem:[#allocation6 + $0xd]] }
 0x248   : > { %7707 = vst [vmem:[#allocation81_spill] sm:$0xff] %v5277_v37  ;;  %7708 = vst [vmem:[#allocation82_spill] sm:$0xff] %v5279_v40  ;;  %v2044_v40 = vsel %vm233_vm0, %v2038_v53, %v2043_v15  ;;  %v2111_v53 = vmul.f32 %v4901_v21, %v4838_v14  ;;  %v2085_v15 = vsel %vm233_vm0, %v2079_v1, %v2084_v44 }
 0x249   : > { %2047 = vrot.lane.b32.xlu0 %v2039_v62, %s4398_s13  ;;  %2730 = vrot.lane.b32.xlu1 %v2721_v59, %s4405_s26  ;;  %v2080_v35 = vsel %vm233_vm0, %v2078_v63, %v2079_v1  ;;  %v2783_v63 = vmul.f32 %v4995_v43, %v5313_v57  ;;  %v2127_v1 = vrot.slane %v2113_v58, 5  ;;  %v2154_v58 = vmul.f32 %v4920_v41, %v4892_v12 }
 0x24a   : > { %v2122_v30 = vrot.slane %v2111_v53, 5 }
 0x24b   : > { %v5288_v19 = vpop.permute.xlu1 %2217  ;;  %v5290_v34 = vpop.permute.xlu0 %1435 }
 0x24c   : > { %7709 = vst [vmem:[#allocation83_spill] sm:$0xff] %v5288_v19  ;;  %7710 = vst [vmem:[#allocation84_spill] sm:$0xff] %v5290_v34  ;;  %v5345_v34 = vstv %s4094_s28  ;;  %s4109_s28 = sld [smem:[#allocation6 + $0x3e]] }
 0x24d   : > { %2051 = vrot.lane.b32.xlu0 %v2044_v40, %s4398_s13  ;;  %2734 = vrot.lane.b32.xlu1 %v2721_v59, %s4405_s26  ;;  %v2109_v40 = vmul.f32 %v5210_v13, %v4901_v21  ;;  %v2152_v21 = vmul.f32 %v4920_v41, %v4845_v11 }
 0x24f   : > { %v5297_v62 = vpop.permute.xlu1 %2221  ;;  %v5299_v37 = vpop.permute.xlu0 %1439 }
 0x250   : > { %7711 = vst [vmem:[#allocation85_spill] sm:$0xff] %v5297_v62  ;;  %7712 = vst [vmem:[#allocation86_spill] sm:$0xff] %v5299_v37 }
 0x251   : > { %2088 = vrot.lane.b32.xlu0 %v2080_v35, %s4398_s13  ;;  %2767 = vrot.lane.b32.xlu1 %v2758_v46, %s4405_s26  ;;  %v2121_v35 = vrot.slane %v2109_v40, 5 }
 0x253   : > { %v5308_v42 = vpop.permute.xlu1 %2258  ;;  %v5310_v59 = vpop.permute.xlu0 %1472  ;;  %v2123_v44 = vsel %vm744_vm6, %v2121_v35, %v2122_v30  ;;  %v2163_v35 = vrot.slane %v2152_v21, 5 }
 0x254   : > { %7713 = vst [vmem:[#allocation87_spill] sm:$0xff] %v5308_v42  ;;  %7714 = vst [vmem:[#allocation88_spill] sm:$0xff] %v5310_v59 }
 0x255   : > { %2092 = vrot.lane.b32.xlu0 %v2085_v15, %s4398_s13  ;;  %2771 = vrot.lane.b32.xlu1 %v2758_v46, %s4405_s26  ;;  %v2150_v46 = vmul.f32 %v5236_v27, %v4920_v41  ;;  %v2128_v15 = vsel %vm744_vm6, %v2122_v30, %v2127_v1  ;;  %v2839_v30 = vmul.f32 %v4995_v43, %v5345_v34 }
 0x257   : > { %v5321_v37 = vpop.permute.xlu1 %2262  ;;  %v5323_v59 = vpop.permute.xlu0 %1476 }
 0x258   : > { %7715 = vst [vmem:[#allocation89_spill] sm:$0xff] %v5321_v37  ;;  %7716 = vst [vmem:[#allocation90_spill] sm:$0xff] %v5323_v59  ;;  %v5337_v59 = vstv %s4093_s1  ;;  %s4406_s1 = smov 122  }
 0x259   : > { %2131 = vrot.lane.b32.xlu0 %v2123_v44, %s4398_s13  ;;  %2792 = vrot.lane.b32.xlu1 %v2783_v63, %s4405_s26  ;;  %v2810_v44 = vmul.f32 %v4995_v43, %v5337_v59 }
 0x25b   : > { %v5332_v53 = vpop.permute.xlu1 %2287  ;;  %v5334_v40 = vpop.permute.xlu0 %1511 }
 0x25c   : > { %7717 = vst [vmem:[#allocation91_spill] sm:$0xff] %v5332_v53  ;;  %7718 = vst [vmem:[#allocation92_spill] sm:$0xff] %v5334_v40  ;;  %v2162_v53 = vrot.slane %v2150_v46, 5  ;;  %v2168_v40 = vrot.slane %v2154_v58, 5  ;;  %v2193_v46 = vmul.f32 %v5210_v13, %v4939_v26 }
 0x25d   : > { %2796 = vrot.lane.b32.xlu1 %v2783_v63, %s4405_s26  ;;  %2135 = vrot.lane.b32.xlu0 %v2128_v15, %s4398_s13  ;;  %v2195_v63 = vmul.f32 %v4939_v26, %v4838_v14  ;;  %v2853_v15 = vrot.slane %v2839_v30, 1  ;;  %v5369_v14 = vstv %s4095_s29  ;;  %s4110_s29 = sld [smem:[#allocation6 + $0x14]] }
 0x25e   : > { %v2164_v41 = vsel %vm744_vm6, %v2162_v53, %v2163_v35  ;;  %v2197_v53 = vmul.f32 %v4939_v26, %v4881_v50  ;;  %v2205_v58 = vrot.slane %v2193_v46, 6  ;;  %v2880_v30 = vmul.f32 %v4995_v43, %v5369_v14 }
 0x25f   : > { %v5349_v1 = vpop.permute.xlu1 %2291  ;;  %v5351_v21 = vpop.permute.xlu0 %1515  ;;  %v2236_v26 = vmul.f32 %v4958_v54, %v4845_v11  ;;  %v5393_v11 = vstv %s4096_s4  ;;  %s4111_s4 = sld [smem:[#allocation6 + $0x45]] }
 0x260   : > { %7719 = vst [vmem:[#allocation93_spill] sm:$0xff] %v5349_v1  ;;  %7720 = vst [vmem:[#allocation94_spill] sm:$0xff] %v5351_v21  ;;  %v2169_v1 = vsel %vm744_vm6, %v2163_v35, %v2168_v40  ;;  %v2206_v21 = vrot.slane %v2195_v63, 6  ;;  %v2211_v35 = vrot.slane %v2197_v53, 6  ;;  %v2238_v53 = vmul.f32 %v4958_v54, %v4892_v12 }
 0x261   : > { %2819 = vrot.lane.b32.xlu1 %v2810_v44, %s4405_s26  ;;  %2172 = vrot.lane.b32.xlu0 %v2164_v41, %s4398_s13 }
 0x262   : > { %v2207_v40 = vsel %vm779_vm7, %v2205_v58, %v2206_v21 }
 0x263   : > { %v5360_v37 = vpop.permute.xlu1 %2311  ;;  %v5362_v42 = vpop.permute.xlu0 %1548 }
 0x264   : > { %7721 = vst [vmem:[#allocation95_spill] sm:$0xff] %v5360_v37  ;;  %7722 = vst [vmem:[#allocation96_spill] sm:$0xff] %v5362_v42 }
 0x265   : > { %2823 = vrot.lane.b32.xlu1 %v2810_v44, %s4405_s26  ;;  %2176 = vrot.lane.b32.xlu0 %v2169_v1, %s4398_s13  ;;  %v2894_v44 = vrot.slane %v2880_v30, 1  ;;  %v2234_v1 = vmul.f32 %v5236_v27, %v4958_v54  ;;  %v2923_v30 = vmul.f32 %v4995_v43, %v5393_v11 }
 0x267   : > { %v5373_v41 = vpop.permute.xlu1 %2315  ;;  %v5375_v37 = vpop.permute.xlu0 %1552  ;;  %v2246_v58 = vrot.slane %v2234_v1, 6  ;;  %v2937_v12 = vrot.slane %v2923_v30, 2  ;;  %v2277_v30 = vmul.f32 %v5210_v13, %v4989_v39 }
 0x268   : > { %7723 = vst [vmem:[#allocation97_spill] sm:$0xff] %v5373_v41  ;;  %7724 = vst [vmem:[#allocation98_spill] sm:$0xff] %v5375_v37  ;;  %v2212_v41 = vsel %vm779_vm7, %v2206_v21, %v2211_v35  ;;  %v2247_v37 = vrot.slane %v2236_v26, 6  ;;  %v2252_v35 = vrot.slane %v2238_v53, 6  ;;  %v5411_v26 = vstv %s4097_s21  ;;  %s4038_s21 = sld [smem:[#allocation6 + $0x8]] }
 0x269   : > { %2862 = vrot.lane.b32.xlu1 %v2853_v15, %s4405_s26  ;;  %2215 = vrot.lane.b32.xlu0 %v2207_v40, %s4398_s13  ;;  %v2964_v1 = vmul.f32 %v4995_v43, %v5411_v26 }
 0x26a   : > { %v2248_v21 = vsel %vm779_vm7, %v2246_v58, %v2247_v37 }
 0x26b   : > { %v5384_v63 = vpop.permute.xlu1 %2350  ;;  %v5386_v46 = vpop.permute.xlu0 %1587 }
 0x26c   : > { %7725 = vst [vmem:[#allocation99_spill] sm:$0xff] %v5384_v63  ;;  %7726 = vst [vmem:[#allocation100_spill] sm:$0xff] %v5386_v46 }
 0x26d   : > { %2866 = vrot.lane.b32.xlu1 %v2853_v15, %s4405_s26  ;;  %2219 = vrot.lane.b32.xlu0 %v2212_v41, %s4398_s13  ;;  %v2253_v41 = vsel %vm779_vm7, %v2247_v37, %v2252_v35  ;;  %v2978_v37 = vrot.slane %v2964_v1, 2  ;;  %v5427_v35 = vld [vmem:[#allocation4 + $0x10] sm:$0xff] }
 0x26f   : > { %v5397_v40 = vpop.permute.xlu1 %2354  ;;  %v5399_v63 = vpop.permute.xlu0 %1591 }
 0x270   : > { %7727 = vst [vmem:[#allocation101_spill] sm:$0xff] %v5397_v40  ;;  %7728 = vst [vmem:[#allocation102_spill] sm:$0xff] %v5399_v63  ;;  %v2301_v40 = vmul.f32 %v5236_v27, %v5011_v7 }
 0x271   : > { %2903 = vrot.lane.b32.xlu1 %v2894_v44, %s4405_s26  ;;  %2256 = vrot.lane.b32.xlu0 %v2248_v21, %s4398_s13 }
 0x273   : > { %v5404_v54 = vpop.permute.xlu1 %2387  ;;  %v5406_v15 = vpop.permute.xlu0 %1624 }
 0x274   : > { %7729 = vst [vmem:[#allocation103_spill] sm:$0xff] %v5404_v54  ;;  %7730 = vst [vmem:[#allocation104_spill] sm:$0xff] %v5406_v15  ;;  %v2330_v15 = vmul.f32 %v5019_v38, %v4881_v50 }
 0x275   : > { %2907 = vrot.lane.b32.xlu1 %v2894_v44, %s4405_s26  ;;  %2260 = vrot.lane.b32.xlu0 %v2253_v41, %s4398_s13  ;;  %v2279_v41 = vmul.f32 %v5427_v35, %v4989_v39  ;;  %s4099_s13 = sld [smem:[#allocation6 + $0x4b]]  ;;  %v2328_v39 = vmul.f32 %v5427_v35, %v5019_v38 }
 0x277   : > { %v5415_v53 = vpop.permute.xlu1 %2391  ;;  %v5417_v58 = vpop.permute.xlu0 %1628 }
 0x278   : > { %7731 = vst [vmem:[#allocation105_spill] sm:$0xff] %v5415_v53  ;;  %7732 = vst [vmem:[#allocation106_spill] sm:$0xff] %v5417_v58  ;;  %v5433_v53 = vstv %s4098_s23  ;;  %s4112_s23 = sld [smem:[#allocation6 + $0x1b]] }
 0x279   : > { %2946 = vrot.lane.b32.xlu1 %v2937_v12, %s4405_s26  ;;  %2285 = vrot.lane.b32.xlu0 %v2277_v30, %s4405_s26  ;;  %v3007_v30 = vmul.f32 %v4995_v43, %v5433_v53 }
 0x27b   : > { %v5423_v44 = vpop.permute.xlu1 %2426  ;;  %v5425_v21 = vpop.permute.xlu0 %1663 }
 0x27c   : > { %7733 = vst [vmem:[#allocation107_spill] sm:$0xff] %v5423_v44  ;;  %7734 = vst [vmem:[#allocation108_spill] sm:$0xff] %v5425_v21  ;;  %v2339_v21 = vrot.slane %v2328_v39, 1  ;;  %v2344_v39 = vrot.slane %v2330_v15, 1 }
 0x27d   : > { %2950 = vrot.lane.b32.xlu1 %v2937_v12, %s4405_s26  ;;  %2289 = vrot.lane.b32.xlu0 %v2279_v41, %s4405_s26  ;;  %v3021_v12 = vrot.slane %v3007_v30, 3  ;;  %v2326_v41 = vmul.f32 %v5210_v13, %v5019_v38 }
 0x27f   : > { %v5437_v1 = vpop.permute.xlu1 %2430  ;;  %v5439_v58 = vpop.permute.xlu0 %1667  ;;  %v2338_v30 = vrot.slane %v2326_v41, 1 }
 0x280   : > { %7735 = vst [vmem:[#allocation109_spill] sm:$0xff] %v5437_v1  ;;  %7736 = vst [vmem:[#allocation110_spill] sm:$0xff] %v5439_v58  ;;  %v5453_v1 = vld [vmem:[#allocation4 + $0x40] sm:$0xff] }
 0x281   : > { %2987 = vrot.lane.b32.xlu1 %v2978_v37, %s4405_s26  ;;  %2309 = vrot.lane.b32.xlu0 %v2301_v40, %s4405_s26  ;;  %v2303_v58 = vmul.f32 %v5453_v1, %v5011_v7  ;;  %v5461_v40 = vstv %s4099_s13  ;;  %v2340_v7 = vsel %vm605_vm2, %v2338_v30, %v2339_v21  ;;  %v2365_v50 = vmul.f32 %v5453_v1, %v5039_v4  ;;  %v5481_v30 = vld [vmem:[#allocation4 + $0x50] sm:$0xff]  ;;  %s4040_s13 = sld [smem:[#allocation6 + $0xf]] }
 0x282   : > { %v2367_v15 = vmul.f32 %v5481_v30, %v5039_v4 }
 0x283   : > { %v5449_v54 = vpop.permute.xlu1 %2463  ;;  %v5451_v44 = vpop.permute.xlu0 %1700 }
 0x284   : > { %7737 = vst [vmem:[#allocation111_spill] sm:$0xff] %v5449_v54  ;;  %7738 = vst [vmem:[#allocation112_spill] sm:$0xff] %v5451_v44  ;;  %v3048_v54 = vmul.f32 %v4995_v43, %v5461_v40 }
 0x285   : > { %2991 = vrot.lane.b32.xlu1 %v2978_v37, %s4405_s26  ;;  %2313 = vrot.lane.b32.xlu0 %v2303_v58, %s4405_s26  ;;  %v2363_v58 = vmul.f32 %v5236_v27, %v5039_v4  ;;  %v2404_v4 = vmul.f32 %v5427_v35, %v5059_v24 }
 0x286   : > { %v3062_v38 = vrot.slane %v3048_v54, 3  ;;  %v5487_v54 = vstv %s4100_s20  ;;  %s4036_s20 = sld [smem:[#allocation6 + $0x1]] }
 0x287   : > { %v5465_v44 = vpop.permute.xlu1 %2467  ;;  %v5467_v63 = vpop.permute.xlu0 %1704 }
 0x288   : > { %7739 = vst [vmem:[#allocation113_spill] sm:$0xff] %v5465_v44  ;;  %7740 = vst [vmem:[#allocation114_spill] sm:$0xff] %v5467_v63  ;;  %v2345_v44 = vsel %vm605_vm2, %v2339_v21, %v2344_v39  ;;  %v2376_v63 = vrot.slane %v2365_v50, 1  ;;  %v2381_v50 = vrot.slane %v2367_v15, 1 }
 0x289   : > { %3030 = vrot.lane.b32.xlu1 %v3021_v12, %s4405_s26  ;;  %2348 = vrot.lane.b32.xlu0 %v2340_v7, %s4405_s26  ;;  %v2375_v7 = vrot.slane %v2363_v58, 1 }
 0x28b   : > { %v5476_v37 = vpop.permute.xlu1 %2502  ;;  %v5478_v41 = vpop.permute.xlu0 %1795  ;;  %v2377_v39 = vsel %vm605_vm2, %v2375_v7, %v2376_v63  ;;  %v5507_v7 = vld [vmem:[#allocation4 + $0x20] sm:$0xff] }
 0x28c   : > { %7741 = vst [vmem:[#allocation115_spill] sm:$0xff] %v5476_v37  ;;  %7742 = vst [vmem:[#allocation116_spill] sm:$0xff] %v5478_v41  ;;  %v3091_v37 = vmul.f32 %v4995_v43, %v5487_v54  ;;  %v2406_v15 = vmul.f32 %v5507_v7, %v5059_v24 }
 0x28d   : > { %3034 = vrot.lane.b32.xlu1 %v3021_v12, %s4405_s26  ;;  %2352 = vrot.lane.b32.xlu0 %v2345_v44, %s4405_s26  ;;  %v2402_v12 = vmul.f32 %v5210_v13, %v5059_v24  ;;  %v2441_v24 = vmul.f32 %v5453_v1, %v5083_v60 }
 0x28e   : > { %v3105_v44 = vrot.slane %v3091_v37, 4  ;;  %v5513_v37 = vstv %s4101_s22  ;;  %s4042_s22 = sld [smem:[#allocation6 + $0x16]] }
 0x28f   : > { %v5491_v41 = vpop.permute.xlu1 %2506  ;;  %v5493_v21 = vpop.permute.xlu0 %1799 }
 0x290   : > { %7743 = vst [vmem:[#allocation117_spill] sm:$0xff] %v5491_v41  ;;  %7744 = vst [vmem:[#allocation118_spill] sm:$0xff] %v5493_v21  ;;  %v2382_v41 = vsel %vm605_vm2, %v2376_v63, %v2381_v50  ;;  %v2415_v21 = vrot.slane %v2404_v4, 2  ;;  %v2420_v4 = vrot.slane %v2406_v15, 2  ;;  %v2443_v15 = vmul.f32 %v5481_v30, %v5083_v60 }
 0x291   : > { %3071 = vrot.lane.b32.xlu1 %v3062_v38, %s4405_s26  ;;  %2385 = vrot.lane.b32.xlu0 %v2377_v39, %s4405_s26  ;;  %v2414_v39 = vrot.slane %v2402_v12, 2 }
 0x293   : > { %v5502_v58 = vpop.permute.xlu1 %2539  ;;  %v5504_v46 = vpop.permute.xlu0 %1836  ;;  %v2416_v50 = vsel %vm640_vm3, %v2414_v39, %v2415_v21  ;;  %v5537_v39 = vstv %s4102_s27  ;;  %s5767_s27 = sld [smem:[#allocation6 + $0x39]] }
 0x294   : > { %7745 = vst [vmem:[#allocation119_spill] sm:$0xff] %v5502_v58  ;;  %7746 = vst [vmem:[#allocation120_spill] sm:$0xff] %v5504_v46  ;;  %v3132_v58 = vmul.f32 %v4995_v43, %v5513_v37 }
 0x295   : > { %3075 = vrot.lane.b32.xlu1 %v3062_v38, %s4405_s26  ;;  %2389 = vrot.lane.b32.xlu0 %v2382_v41, %s4405_s26  ;;  %v2439_v41 = vmul.f32 %v5236_v27, %v5083_v60  ;;  %7751 = vst [vmem:[#allocation125_spill] sm:$0xff] %v5537_v39  ;;  %v2480_v60 = vmul.f32 %v5427_v35, %v5105_v17 }
 0x296   : > { %v3146_v38 = vrot.slane %v3132_v58, 4 }
 0x297   : > { %v5517_v46 = vpop.permute.xlu1 %2543  ;;  %v5519_v63 = vpop.permute.xlu0 %1840  ;;  %v2451_v58 = vrot.slane %v2439_v41, 2 }
 0x298   : > { %7747 = vst [vmem:[#allocation121_spill] sm:$0xff] %v5517_v46  ;;  %7748 = vst [vmem:[#allocation122_spill] sm:$0xff] %v5519_v63  ;;  %v2421_v46 = vsel %vm640_vm3, %v2415_v21, %v2420_v4  ;;  %v2452_v63 = vrot.slane %v2441_v24, 2  ;;  %v2457_v4 = vrot.slane %v2443_v15, 2  ;;  %v2482_v15 = vmul.f32 %v5507_v7, %v5105_v17 }
 0x299   : > { %3114 = vrot.lane.b32.xlu1 %v3105_v44, %s4405_s26  ;;  %2424 = vrot.lane.b32.xlu0 %v2416_v50, %s4405_s26  ;;  %v3175_v50 = vmul.f32 %v4995_v43, %v5537_v39 }
 0x29a   : > { %v2453_v21 = vsel %vm640_vm3, %v2451_v58, %v2452_v63  ;;  %v5561_v58 = vstv %s4103_s5  ;;  %s5775_s5 = sld [smem:[#allocation6 + $0x4c]] }
 0x29b   : > { %v5528_v12 = vpop.permute.xlu1 %2578  ;;  %v5530_v42 = vpop.permute.xlu0 %1879  ;;  %7756 = vst [vmem:[#allocation130_spill] sm:$0xff] %v5561_v58 }
 0x29c   : > { %7749 = vst [vmem:[#allocation123_spill] sm:$0xff] %v5528_v12  ;;  %7750 = vst [vmem:[#allocation124_spill] sm:$0xff] %v5530_v42 }
 0x29d   : > { %3118 = vrot.lane.b32.xlu1 %v3105_v44, %s4405_s26  ;;  %2428 = vrot.lane.b32.xlu0 %v2421_v46, %s4405_s26  ;;  %v3189_v46 = vrot.slane %v3175_v50, 5  ;;  %v2478_v44 = vmul.f32 %v5210_v13, %v5105_v17  ;;  %v2517_v17 = vmul.f32 %v5453_v1, %v5129_v3 }
 0x29f   : > { %v5541_v12 = vpop.permute.xlu1 %2582  ;;  %v5543_v42 = vpop.permute.xlu0 %1883  ;;  %v2490_v50 = vrot.slane %v2478_v44, 3 }
 0x2a0   : > { %7752 = vst [vmem:[#allocation126_spill] sm:$0xff] %v5541_v12  ;;  %7753 = vst [vmem:[#allocation127_spill] sm:$0xff] %v5543_v42  ;;  %v2458_v12 = vsel %vm640_vm3, %v2452_v63, %v2457_v4  ;;  %v2491_v42 = vrot.slane %v2480_v60, 3  ;;  %v2496_v4 = vrot.slane %v2482_v15, 3  ;;  %v2519_v15 = vmul.f32 %v5481_v30, %v5129_v3 }
 0x2a1   : > { %3155 = vrot.lane.b32.xlu1 %v3146_v38, %s4405_s26  ;;  %2461 = vrot.lane.b32.xlu0 %v2453_v21, %s4405_s26  ;;  %v3216_v21 = vmul.f32 %v4995_v43, %v5561_v58  ;;  %v2842_v58 = vmul.f32 %v5507_v7, %v5345_v34 }
 0x2a2   : > { %v2492_v63 = vsel %vm675_vm4, %v2490_v50, %v2491_v42  ;;  %v5585_v50 = vstv %s4104_s6  ;;  %s5779_s6 = sld [smem:[#allocation6 + $0x1d]] }
 0x2a3   : > { %v5552_v24 = vpop.permute.xlu1 %2615  ;;  %v5554_v41 = vpop.permute.xlu0 %1920  ;;  %7761 = vst [vmem:[#allocation135_spill] sm:$0xff] %v5585_v50 }
 0x2a4   : > { %7754 = vst [vmem:[#allocation128_spill] sm:$0xff] %v5552_v24  ;;  %7755 = vst [vmem:[#allocation129_spill] sm:$0xff] %v5554_v41 }
 0x2a5   : > { %3159 = vrot.lane.b32.xlu1 %v3146_v38, %s4405_s26  ;;  %2465 = vrot.lane.b32.xlu0 %v2458_v12, %s4405_s26  ;;  %v3230_v38 = vrot.slane %v3216_v21, 5  ;;  %v2515_v12 = vmul.f32 %v5236_v27, %v5129_v3  ;;  %v2556_v3 = vmul.f32 %v5427_v35, %v5151_v33 }
 0x2a7   : > { %v5565_v24 = vpop.permute.xlu1 %2619  ;;  %v5567_v41 = vpop.permute.xlu0 %1924  ;;  %v2527_v21 = vrot.slane %v2515_v12, 3 }
 0x2a8   : > { %7757 = vst [vmem:[#allocation131_spill] sm:$0xff] %v5565_v24  ;;  %7758 = vst [vmem:[#allocation132_spill] sm:$0xff] %v5567_v41  ;;  %v2497_v24 = vsel %vm675_vm4, %v2491_v42, %v2496_v4  ;;  %v2528_v41 = vrot.slane %v2517_v17, 3  ;;  %v2533_v4 = vrot.slane %v2519_v15, 3  ;;  %v2558_v15 = vmul.f32 %v5507_v7, %v5151_v33 }
 0x2a9   : > { %3198 = vrot.lane.b32.xlu1 %v3189_v46, %s4405_s26  ;;  %2500 = vrot.lane.b32.xlu0 %v2492_v63, %s4405_s26  ;;  %v3259_v63 = vmul.f32 %v4995_v43, %v5585_v50  ;;  %v5812_v50 = vstv %s4042_s22  ;;  %s4117_s22 = sld [smem:[#allocation6 + $0x5a]] }
 0x2aa   : > { %v2529_v42 = vsel %vm675_vm4, %v2527_v21, %v2528_v41  ;;  %v2534_v12 = vsel %vm675_vm4, %v2528_v41, %v2533_v4  ;;  %v5609_v21 = vstv %s4105_s7  ;;  %v2572_v4 = vrot.slane %v2558_v15, 4  ;;  %s5785_s7 = sld [smem:[#allocation6 + $0x24]]  ;;  %7807 = vst [vmem:[#allocation181_spill] sm:$0xff] %v5812_v50 }
 0x2ab   : > { %v5576_v60 = vpop.permute.xlu1 %2654  ;;  %v5578_v44 = vpop.permute.xlu0 %1963  ;;  %7766 = vst [vmem:[#allocation140_spill] sm:$0xff] %v5609_v21  ;;  %v2595_v15 = vmul.f32 %v5481_v30, %v5175_v45 }
 0x2ac   : > { %7759 = vst [vmem:[#allocation133_spill] sm:$0xff] %v5576_v60  ;;  %7760 = vst [vmem:[#allocation134_spill] sm:$0xff] %v5578_v44 }
 0x2ad   : > { %3202 = vrot.lane.b32.xlu1 %v3189_v46, %s4405_s26  ;;  %2504 = vrot.lane.b32.xlu0 %v2497_v24, %s4405_s26  ;;  %v3273_v46 = vrot.slane %v3259_v63, 6  ;;  %v2554_v24 = vmul.f32 %v5210_v13, %v5151_v33  ;;  %v2593_v33 = vmul.f32 %v5453_v1, %v5175_v45 }
 0x2af   : > { %v5589_v60 = vpop.permute.xlu1 %2658  ;;  %v5591_v44 = vpop.permute.xlu0 %1967  ;;  %v2566_v63 = vrot.slane %v2554_v24, 4 }
 0x2b0   : > { %7762 = vst [vmem:[#allocation136_spill] sm:$0xff] %v5589_v60  ;;  %7763 = vst [vmem:[#allocation137_spill] sm:$0xff] %v5591_v44  ;;  %v2567_v60 = vrot.slane %v2556_v3, 4  ;;  %v2591_v3 = vmul.f32 %v5236_v27, %v5175_v45  ;;  %v2630_v45 = vmul.f32 %v5210_v13, %v5197_v29 }
 0x2b1   : > { %3239 = vrot.lane.b32.xlu1 %v3230_v38, %s4405_s26  ;;  %2537 = vrot.lane.b32.xlu0 %v2529_v42, %s4405_s26  ;;  %v5611_v42 = vld [vmem:[#allocation4 + $0x8] sm:$0xff] }
 0x2b2   : > { %v2568_v41 = vsel %vm233_vm0, %v2566_v63, %v2567_v60  ;;  %v2603_v63 = vrot.slane %v2591_v3, 4 }
 0x2b3   : > { %v5600_v17 = vpop.permute.xlu1 %2691  ;;  %v5602_v43 = vpop.permute.xlu0 %2004 }
 0x2b4   : > { %7764 = vst [vmem:[#allocation138_spill] sm:$0xff] %v5600_v17  ;;  %7765 = vst [vmem:[#allocation139_spill] sm:$0xff] %v5602_v43  ;;  %v3300_v17 = vmul.f32 %v5611_v42, %v5609_v21  ;;  %v2609_v21 = vrot.slane %v2595_v15, 4  ;;  %v2634_v15 = vmul.f32 %v5507_v7, %v5197_v29 }
 0x2b5   : > { %3243 = vrot.lane.b32.xlu1 %v3230_v38, %s4405_s26  ;;  %2541 = vrot.lane.b32.xlu0 %v2534_v12, %s4405_s26 }
 0x2b6   : > { %v3314_v38 = vrot.slane %v3300_v17, 6 }
 0x2b7   : > { %v5615_v44 = vpop.permute.xlu1 %2695  ;;  %v5617_v43 = vpop.permute.xlu0 %2008 }
 0x2b8   : > { %7767 = vst [vmem:[#allocation141_spill] sm:$0xff] %v5615_v44  ;;  %7768 = vst [vmem:[#allocation142_spill] sm:$0xff] %v5617_v43  ;;  %v2573_v44 = vsel %vm233_vm0, %v2567_v60, %v2572_v4  ;;  %v2604_v43 = vrot.slane %v2593_v33, 4  ;;  %v2632_v60 = vmul.f32 %v5427_v35, %v5197_v29  ;;  %v5651_v33 = vstv %s4106_s11  ;;  %s5787_s11 = sld [smem:[#allocation6 + $0x2b]] }
 0x2b9   : > { %3282 = vrot.lane.b32.xlu1 %v3273_v46, %s4405_s26  ;;  %2576 = vrot.lane.b32.xlu0 %v2568_v41, %s4405_s26  ;;  %7775 = vst [vmem:[#allocation149_spill] sm:$0xff] %v5651_v33  ;;  %v2669_v29 = vmul.f32 %v5453_v1, %v5223_v0 }
 0x2ba   : > { %v2610_v4 = vsel %vm233_vm0, %v2604_v43, %v2609_v21  ;;  %v2643_v3 = vrot.slane %v2632_v60, 5  ;;  %v2648_v21 = vrot.slane %v2634_v15, 5 }
 0x2bb   : > { %v5626_v24 = vpop.permute.xlu1 %2730  ;;  %v5628_v12 = vpop.permute.xlu0 %2047  ;;  %v2680_v15 = vrot.slane %v2669_v29, 5 }
 0x2bc   : > { %7769 = vst [vmem:[#allocation143_spill] sm:$0xff] %v5626_v24  ;;  %7770 = vst [vmem:[#allocation144_spill] sm:$0xff] %v5628_v12  ;;  %v2605_v24 = vsel %vm233_vm0, %v2603_v63, %v2604_v43  ;;  %v2642_v63 = vrot.slane %v2630_v45, 5 }
 0x2bd   : > { %3286 = vrot.lane.b32.xlu1 %v3273_v46, %s4405_s26  ;;  %2580 = vrot.lane.b32.xlu0 %v2573_v44, %s4405_s26 }
 0x2be   : > { %v2644_v43 = vsel %vm744_vm6, %v2642_v63, %v2643_v3  ;;  %v2671_v63 = vmul.f32 %v5481_v30, %v5223_v0 }
 0x2bf   : > { %v5635_v17 = vpop.permute.xlu1 %2734  ;;  %v5637_v41 = vpop.permute.xlu0 %2051 }
 0x2c0   : > { %7771 = vst [vmem:[#allocation145_spill] sm:$0xff] %v5635_v17  ;;  %7772 = vst [vmem:[#allocation146_spill] sm:$0xff] %v5637_v41 }
 0x2c1   : > { %3323 = vrot.lane.b32.xlu1 %v3314_v38, %s4405_s26  ;;  %2613 = vrot.lane.b32.xlu0 %v2605_v24, %s4405_s26  ;;  %v3343_v24 = vmul.f32 %v5611_v42, %v5651_v33 }
 0x2c3   : > { %v5646_v46 = vpop.permute.xlu1 %2767  ;;  %v5648_v44 = vpop.permute.xlu0 %2088 }
 0x2c4   : > { %7773 = vst [vmem:[#allocation147_spill] sm:$0xff] %v5646_v46  ;;  %7774 = vst [vmem:[#allocation148_spill] sm:$0xff] %v5648_v44 }
 0x2c5   : > { %3327 = vrot.lane.b32.xlu1 %v3314_v38, %s4405_s26  ;;  %2617 = vrot.lane.b32.xlu0 %v2610_v4, %s4405_s26  ;;  %v2667_v38 = vmul.f32 %v5236_v27, %v5223_v0  ;;  %v2649_v4 = vsel %vm744_vm6, %v2643_v3, %v2648_v21 }
 0x2c7   : > { %v5659_v17 = vpop.permute.xlu1 %2771  ;;  %v5661_v46 = vpop.permute.xlu0 %2092  ;;  %v2679_v44 = vrot.slane %v2667_v38, 5  ;;  %v2706_v38 = vmul.f32 %v5210_v13, %v5249_v22 }
 0x2c8   : > { %7776 = vst [vmem:[#allocation150_spill] sm:$0xff] %v5659_v17  ;;  %7777 = vst [vmem:[#allocation151_spill] sm:$0xff] %v5661_v46  ;;  %v5675_v17 = vstv %s4107_s9  ;;  %v5683_v46 = vstv %s4108_s12  ;;  %s5801_s9 = sld [smem:[#allocation6 + $0x32]]  ;;  %s5803_s12 = sld [smem:[#allocation6 + $0x40]] }
 0x2c9   : > { %3352 = vrot.lane.b32.xlu1 %v3343_v24, %s4406_s1  ;;  %2652 = vrot.lane.b32.xlu0 %v2644_v43, %s4405_s26  ;;  %7780 = vst [vmem:[#allocation154_spill] sm:$0xff] %v5675_v17  ;;  %v3367_v43 = vmul.f32 %v5611_v42, %v5675_v17  ;;  %7781 = vst [vmem:[#allocation155_spill] sm:$0xff] %v5683_v46  ;;  %v3392_v3 = vmul.f32 %v5611_v42, %v5683_v46 }
 0x2ca   : > { %v2681_v0 = vsel %vm744_vm6, %v2679_v44, %v2680_v15  ;;  %v2710_v44 = vmul.f32 %v5507_v7, %v5249_v22 }
 0x2cb   : > { %v5670_v60 = vpop.permute.xlu1 %2792  ;;  %v5672_v45 = vpop.permute.xlu0 %2131 }
 0x2cc   : > { %7778 = vst [vmem:[#allocation152_spill] sm:$0xff] %v5670_v60  ;;  %7779 = vst [vmem:[#allocation153_spill] sm:$0xff] %v5672_v45  ;;  %v2685_v45 = vrot.slane %v2671_v63, 5  ;;  %v5707_v63 = vstv %s4109_s28  ;;  %s5814_s28 = sld [smem:[#allocation6 + $0x47]] }
 0x2cd   : > { %3356 = vrot.lane.b32.xlu1 %v3343_v24, %s4406_s1  ;;  %2656 = vrot.lane.b32.xlu0 %v2649_v4, %s4405_s26  ;;  %v2708_v24 = vmul.f32 %v5427_v35, %v5249_v22  ;;  %v3406_v4 = vrot.slane %v3392_v3, 1  ;;  %7786 = vst [vmem:[#allocation160_spill] sm:$0xff] %v5707_v63  ;;  %v2718_v3 = vrot.slane %v2706_v38, 6  ;;  %v2745_v22 = vmul.f32 %v5453_v1, %v5273_v9 }
 0x2ce   : > { %v5865_v39 = vstv %s5801_s9  ;;  %s4407_s9 = smov 127  }
 0x2cf   : > { %v5687_v21 = vpop.permute.xlu1 %2796  ;;  %v5689_v29 = vpop.permute.xlu0 %2135  ;;  %v2719_v17 = vrot.slane %v2708_v24, 6  ;;  %7817 = vst [vmem:[#allocation191_spill] sm:$0xff] %v5865_v39 }
 0x2d0   : > { %7782 = vst [vmem:[#allocation156_spill] sm:$0xff] %v5687_v21  ;;  %7783 = vst [vmem:[#allocation157_spill] sm:$0xff] %v5689_v29  ;;  %v2686_v29 = vsel %vm744_vm6, %v2680_v15, %v2685_v45  ;;  %v2724_v15 = vrot.slane %v2710_v44, 6  ;;  %v2747_v44 = vmul.f32 %v5481_v30, %v5273_v9  ;;  %v818_v21 = vmul.f32 %v5611_v42, %v5865_v39 }
 0x2d1   : > { %3376 = vrot.lane.b32.xlu1 %v3367_v43, %s4406_s1  ;;  %2689 = vrot.lane.b32.xlu0 %v2681_v0, %s4405_s26  ;;  %v3429_v0 = vmul.f32 %v5611_v42, %v5707_v63  ;;  %v2720_v45 = vsel %vm779_vm7, %v2718_v3, %v2719_v17  ;;  %v2756_v63 = vrot.slane %v2745_v22, 6  ;;  %v5731_v3 = vstv %s4110_s29  ;;  %s5822_s29 = sld [smem:[#allocation6 + $0x22]] }
 0x2d2   : > { %7791 = vst [vmem:[#allocation165_spill] sm:$0xff] %v5731_v3 }
 0x2d3   : > { %v5698_v41 = vpop.permute.xlu1 %2819  ;;  %v5700_v12 = vpop.permute.xlu0 %2172 }
 0x2d4   : > { %7784 = vst [vmem:[#allocation158_spill] sm:$0xff] %v5698_v41  ;;  %7785 = vst [vmem:[#allocation159_spill] sm:$0xff] %v5700_v12 }
 0x2d5   : > { %3380 = vrot.lane.b32.xlu1 %v3367_v43, %s4406_s1  ;;  %2693 = vrot.lane.b32.xlu0 %v2686_v29, %s4405_s26  ;;  %v3443_v43 = vrot.slane %v3429_v0, 1  ;;  %v2743_v29 = vmul.f32 %v5236_v27, %v5273_v9 }
 0x2d7   : > { %v5711_v46 = vpop.permute.xlu1 %2823  ;;  %v5713_v12 = vpop.permute.xlu0 %2176  ;;  %v2755_v0 = vrot.slane %v2743_v29, 6  ;;  %v5749_v29 = vstv %s4111_s4  ;;  %s5870_s4 = sld [smem:[#allocation6 + $0x4e]] }
 0x2d8   : > { %7787 = vst [vmem:[#allocation161_spill] sm:$0xff] %v5711_v46  ;;  %7788 = vst [vmem:[#allocation162_spill] sm:$0xff] %v5713_v12  ;;  %v2725_v12 = vsel %vm779_vm7, %v2719_v17, %v2724_v15  ;;  %v2761_v15 = vrot.slane %v2747_v44, 6  ;;  %v3505_v44 = vmul.f32 %v5611_v42, %v5749_v29  ;;  %v5836_v46 = vstv %s5775_s5  ;;  %s4119_s5 = sld [smem:[#allocation6 + $0x61]] }
 0x2d9   : > { %3415 = vrot.lane.b32.xlu1 %v3406_v4, %s4406_s1  ;;  %2728 = vrot.lane.b32.xlu0 %v2720_v45, %s4405_s26  ;;  %v3468_v45 = vmul.f32 %v5611_v42, %v5731_v3  ;;  %v2757_v17 = vsel %vm779_vm7, %v2755_v0, %v2756_v63  ;;  %7796 = vst [vmem:[#allocation170_spill] sm:$0xff] %v5749_v29  ;;  %7811 = vst [vmem:[#allocation185_spill] sm:$0xff] %v5836_v46 }
 0x2da   : > { %v2762_v22 = vsel %vm779_vm7, %v2756_v63, %v2761_v15  ;;  %v3519_v63 = vrot.slane %v3505_v44, 2 }
 0x2db   : > { %v5722_v24 = vpop.permute.xlu1 %2862  ;;  %v5724_v38 = vpop.permute.xlu0 %2215  ;;  %v3482_v9 = vrot.slane %v3468_v45, 2 }
 0x2dc   : > { %7789 = vst [vmem:[#allocation163_spill] sm:$0xff] %v5722_v24  ;;  %7790 = vst [vmem:[#allocation164_spill] sm:$0xff] %v5724_v38 }
 0x2dd   : > { %3419 = vrot.lane.b32.xlu1 %v3406_v4, %s4406_s1  ;;  %2732 = vrot.lane.b32.xlu0 %v2725_v12, %s4405_s26  ;;  %v5918_v39 = vstv %s5870_s4  ;;  %s6162_s4 = sld [smem:[#allocation6 + $0x31]] }
 0x2df   : > { %v5735_v33 = vpop.permute.xlu1 %2866  ;;  %v5737_v38 = vpop.permute.xlu0 %2219 }
 0x2e0   : > { %7792 = vst [vmem:[#allocation166_spill] sm:$0xff] %v5735_v33  ;;  %7793 = vst [vmem:[#allocation167_spill] sm:$0xff] %v5737_v38  ;;  %v5795_v38 = vstv %s4040_s13  ;;  %s5920_s13 = sld [smem:[#allocation6 + $0x5c]] }
 0x2e1   : > { %3452 = vrot.lane.b32.xlu1 %v3443_v43, %s4406_s1  ;;  %2765 = vrot.lane.b32.xlu0 %v2757_v17, %s4405_s26  ;;  %v2782_v17 = vmul.f32 %v5210_v13, %v5313_v57  ;;  %7805 = vst [vmem:[#allocation179_spill] sm:$0xff] %v5795_v38 }
 0x2e3   : > { %v5742_v12 = vpop.permute.xlu1 %2903  ;;  %v5744_v4 = vpop.permute.xlu0 %2256 }
 0x2e4   : > { %7794 = vst [vmem:[#allocation168_spill] sm:$0xff] %v5742_v12  ;;  %7795 = vst [vmem:[#allocation169_spill] sm:$0xff] %v5744_v4  ;;  %v5773_v4 = vstv %s4112_s23  ;;  %s5891_s23 = sld [smem:[#allocation6 + $0x53]] }
 0x2e5   : > { %3456 = vrot.lane.b32.xlu1 %v3443_v43, %s4406_s1  ;;  %2769 = vrot.lane.b32.xlu0 %v2762_v22, %s4405_s26  ;;  %v2784_v22 = vmul.f32 %v5427_v35, %v5313_v57  ;;  %7802 = vst [vmem:[#allocation176_spill] sm:$0xff] %v5773_v4  ;;  %v5783_v57 = vmul.f32 %v5611_v42, %v5773_v4 }
 0x2e6   : > { %v893_v4 = vmul.f32 %v5611_v42, %v5795_v38 }
 0x2e7   : > { %v5753_v0 = vpop.permute.xlu1 %2907  ;;  %v5755_v45 = vpop.permute.xlu0 %2260  ;;  %v3558_v3 = vrot.slane %v5783_v57, 3 }
 0x2e8   : > { %7797 = vst [vmem:[#allocation171_spill] sm:$0xff] %v5753_v0  ;;  %7798 = vst [vmem:[#allocation172_spill] sm:$0xff] %v5755_v45  ;;  %v5769_v45 = vstv %s4038_s21  ;;  %s5882_s21 = sld [smem:[#allocation6 + $0x55]] }
 0x2e9   : > { %3491 = vrot.lane.b32.xlu1 %v3482_v9, %s4406_s1  ;;  %2790 = vrot.lane.b32.xlu0 %v2782_v17, %s4405_s26  ;;  %7801 = vst [vmem:[#allocation175_spill] sm:$0xff] %v5769_v45  ;;  %v829_v44 = vmul.f32 %v5611_v42, %v5769_v45  ;;  %v5810_v45 = vstv %s4036_s20  ;;  %s4116_s20 = sld [smem:[#allocation6 + $0x29]] }
 0x2ea   : > { %7806 = vst [vmem:[#allocation180_spill] sm:$0xff] %v5810_v45 }
 0x2eb   : > { %v5761_v43 = vpop.permute.xlu1 %2946  ;;  %v5763_v15 = vpop.permute.xlu0 %2285  ;;  %v843_v29 = vrot.slane %v829_v44, 1  ;;  %v5827_v44 = vstv %s5767_s27  ;;  %s4118_s27 = sld [smem:[#allocation6 + $0x30]] }
 0x2ec   : > { %7799 = vst [vmem:[#allocation173_spill] sm:$0xff] %v5761_v43  ;;  %7800 = vst [vmem:[#allocation174_spill] sm:$0xff] %v5763_v15  ;;  %v2840_v15 = vmul.f32 %v5427_v35, %v5345_v34  ;;  %v5889_v43 = vstv %s5822_s29  ;;  %s6160_s29 = sld [smem:[#allocation6 + $0x23]] }
 0x2ed   : > { %3495 = vrot.lane.b32.xlu1 %v3482_v9, %s4406_s1  ;;  %2794 = vrot.lane.b32.xlu0 %v2784_v22, %s4405_s26  ;;  %v2809_v22 = vmul.f32 %v5236_v27, %v5337_v59  ;;  %7810 = vst [vmem:[#allocation184_spill] sm:$0xff] %v5827_v44  ;;  %7822 = vst [vmem:[#allocation196_spill] sm:$0xff] %v5889_v43 }
 0x2ee   : > { %v2851_v57 = vrot.slane %v2840_v15, 1  ;;  %v5842_v15 = vmul.f32 %v5611_v42, %v5836_v46  ;;  %v2881_v46 = vmul.f32 %v5453_v1, %v5369_v14 }
 0x2ef   : > { %v5789_v9 = vpop.permute.xlu1 %2950  ;;  %v5791_v17 = vpop.permute.xlu0 %2289 }
 0x2f0   : > { %7803 = vst [vmem:[#allocation177_spill] sm:$0xff] %v5789_v9  ;;  %7804 = vst [vmem:[#allocation178_spill] sm:$0xff] %v5791_v17  ;;  %v2838_v17 = vmul.f32 %v5210_v13, %v5345_v34  ;;  %v957_v13 = vmul.f32 %v5611_v42, %v5812_v50  ;;  %v860_v50 = vmul.f32 %v5611_v42, %v5827_v44  ;;  %v5845_v34 = vstv %s5779_s6  ;;  %s6138_s6 = sld [smem:[#allocation6]] }
 0x2f1   : > { %3528 = vrot.lane.b32.xlu1 %v3519_v63, %s4406_s1  ;;  %2817 = vrot.lane.b32.xlu0 %v2809_v22, %s4405_s26  ;;  %v2811_v22 = vmul.f32 %v5453_v1, %v5337_v59  ;;  %7812 = vst [vmem:[#allocation186_spill] sm:$0xff] %v5845_v34  ;;  %v2856_v9 = vrot.slane %v2842_v58, 1  ;;  %v1021_v33 = vmul.f32 %v5611_v42, %v5845_v34 }
 0x2f2   : > { %v2850_v59 = vrot.slane %v2838_v17, 1  ;;  %v971_v12 = vrot.slane %v957_v13, 3  ;;  %v5880_v13 = vstv %s5814_s28  ;;  %s6154_s28 = sld [smem:[#allocation6 + $0x1c]] }
 0x2f3   : > { %v5816_v38 = vpop.permute.xlu1 %2987  ;;  %v5818_v0 = vpop.permute.xlu0 %2309  ;;  %7819 = vst [vmem:[#allocation193_spill] sm:$0xff] %v5880_v13 }
 0x2f4   : > { %7808 = vst [vmem:[#allocation182_spill] sm:$0xff] %v5816_v38  ;;  %7809 = vst [vmem:[#allocation183_spill] sm:$0xff] %v5818_v0  ;;  %v809_v38 = vmul.f32 %v5611_v42, %v5810_v45  ;;  %v907_v0 = vrot.slane %v893_v4, 2  ;;  %v5848_v45 = vstv %s5785_s7  ;;  %v5851_v4 = vstv %s5787_s11  ;;  %s6143_s7 = sld [smem:[#allocation6 + $0x7]]  ;;  %s6145_s11 = sld [smem:[#allocation6 + $0xe]] }
 0x2f5   : > { %3532 = vrot.lane.b32.xlu1 %v3519_v63, %s4406_s1  ;;  %2821 = vrot.lane.b32.xlu0 %v2811_v22, %s4405_s26  ;;  %7813 = vst [vmem:[#allocation187_spill] sm:$0xff] %v5848_v45  ;;  %7814 = vst [vmem:[#allocation188_spill] sm:$0xff] %v5851_v4  ;;  %v2879_v22 = vmul.f32 %v5236_v27, %v5369_v14  ;;  %v2852_v44 = vsel %vm605_vm2, %v2850_v59, %v2851_v57  ;;  %v874_v27 = vrot.slane %v860_v50, 1 }
 0x2f6   : > { %v855_v41 = vadd.f32 %v843_v29, %v809_v38  ;;  %v3595_v38 = vrot.slane %v5842_v15, 3  ;;  %v1085_v29 = vmul.f32 %v5611_v42, %v5848_v45  ;;  %v2857_v50 = vsel %vm605_vm2, %v2851_v57, %v2856_v9 }
 0x2f7   : > { %v5853_v63 = vpop.permute.xlu1 %2991  ;;  %v5855_v17 = vpop.permute.xlu0 %2313  ;;  %v2891_v34 = vrot.slane %v2879_v22, 1  ;;  %v2883_v15 = vmul.f32 %v5481_v30, %v5369_v14  ;;  %v1035_v45 = vrot.slane %v1021_v33, 4  ;;  %v1149_v14 = vmul.f32 %v5611_v42, %v5851_v4 }
 0x2f8   : > { %7815 = vst [vmem:[#allocation189_spill] sm:$0xff] %v5853_v63  ;;  %7816 = vst [vmem:[#allocation190_spill] sm:$0xff] %v5855_v17  ;;  %v5868_v63 = vstv %s5803_s12  ;;  %s6152_s12 = sld [smem:[#allocation6 + $0x15]] }
 0x2f9   : > { %7818 = vst [vmem:[#allocation192_spill] sm:$0xff] %v5868_v63  ;;  %3567 = vrot.lane.b32.xlu1 %v3558_v3, %s4406_s1  ;;  %2860 = vrot.lane.b32.xlu0 %v2852_v44, %s4405_s26  ;;  %v924_v58 = vmul.f32 %v5611_v42, %v5868_v63  ;;  %v2892_v44 = vrot.slane %v2881_v46, 1  ;;  %v919_v63 = vadd.f32 %v907_v0, %v855_v41  ;;  %v5910_v0 = vld [vmem:[#allocation4] sm:$0xff] }
 0x2fa   : > { %v3620_v46 = vmul.f32 %v5611_v42, %v5889_v43  ;;  %v2922_v9 = vmul.f32 %v5910_v0, %v5393_v11  ;;  %v886_v43 = vadd.f32 %v874_v27, %v818_v21 }
 0x2fb   : > { %v5884_v59 = vpop.permute.xlu1 %3030  ;;  %v5886_v17 = vpop.permute.xlu0 %2348  ;;  %v938_v22 = vrot.slane %v924_v58, 2  ;;  %v2893_v57 = vsel %vm605_vm2, %v2891_v34, %v2892_v44  ;;  %v2897_v58 = vrot.slane %v2883_v15, 1 }
 0x2fc   : > { %7820 = vst [vmem:[#allocation194_spill] sm:$0xff] %v5884_v59  ;;  %7821 = vst [vmem:[#allocation195_spill] sm:$0xff] %v5886_v17  ;;  %v988_v59 = vmul.f32 %v5611_v42, %v5880_v13  ;;  %v983_v17 = vadd.f32 %v971_v12, %v919_v63  ;;  %v3634_v34 = vrot.slane %v3620_v46, 4  ;;  %v5927_v13 = vstv %s5882_s21  ;;  %s6169_s21 = sld [smem:[#allocation6 + $0x2a]] }
 0x2fd   : > { %3571 = vrot.lane.b32.xlu1 %v3558_v3, %s4406_s1  ;;  %2864 = vrot.lane.b32.xlu0 %v2857_v50, %s4405_s26  ;;  %v1099_v3 = vrot.slane %v1085_v29, 5  ;;  %v2924_v50 = vmul.f32 %v5427_v35, %v5393_v11  ;;  %v1052_v29 = vmul.f32 %v5611_v42, %v5918_v39  ;;  %7825 = vst [vmem:[#allocation199_spill] sm:$0xff] %v5927_v13  ;;  %v2934_v21 = vrot.slane %v2922_v9, 2 }
 0x2fe   : > { %v5934_v12 = vstv %s5891_s23  ;;  %v2898_v63 = vsel %vm605_vm2, %v2892_v44, %v2897_v58  ;;  %v950_v24 = vadd.f32 %v938_v22, %v886_v43  ;;  %v1116_v46 = vmul.f32 %v5611_v42, %v5927_v13  ;;  %v5950_v43 = vld [vmem:[#allocation4 + $0x30] sm:$0xff]  ;;  %s6171_s23 = sld [smem:[#allocation6 + $0x38]] }
 0x2ff   : > { %v5906_v41 = vpop.permute.xlu1 %3034  ;;  %v5908_v33 = vpop.permute.xlu0 %2352  ;;  %7828 = vst [vmem:[#allocation202_spill] sm:$0xff] %v5934_v12  ;;  %v2935_v27 = vrot.slane %v2924_v50, 2  ;;  %v1066_v9 = vrot.slane %v1052_v29, 4  ;;  %v3657_v44 = vmul.f32 %v5611_v42, %v5934_v12  ;;  %v5957_v29 = vstv %s5920_s13  ;;  %s6178_s13 = sld [smem:[#allocation6 + $0x3f]] }
 0x300   : > { %7823 = vst [vmem:[#allocation197_spill] sm:$0xff] %v5906_v41  ;;  %7824 = vst [vmem:[#allocation198_spill] sm:$0xff] %v5908_v33  ;;  %v1002_v33 = vrot.slane %v988_v59, 3  ;;  %v1047_v59 = vadd.f32 %v1035_v45, %v983_v17  ;;  %v1163_v41 = vrot.slane %v1149_v14, 6  ;;  %v2963_v17 = vmul.f32 %v5950_v43, %v5411_v26 }
 0x301   : > { %3604 = vrot.lane.b32.xlu1 %v3595_v38, %s4406_s1  ;;  %2901 = vrot.lane.b32.xlu0 %v2893_v57, %s4405_s26  ;;  %v2926_v57 = vmul.f32 %v5507_v7, %v5393_v11  ;;  %v2936_v11 = vsel %vm640_vm3, %v2934_v21, %v2935_v27  ;;  %v1180_v21 = vmul.f32 %v5611_v42, %v5957_v29 }
 0x302   : > { %v1111_v22 = vadd.f32 %v1099_v3, %v1047_v59  ;;  %v1014_v14 = vadd.f32 %v1002_v33, %v950_v24  ;;  %v2967_v24 = vmul.f32 %v5481_v30, %v5411_v26  ;;  %v2975_v59 = vrot.slane %v2963_v17, 2 }
 0x303   : > { %v5929_v15 = vpop.permute.xlu1 %3071  ;;  %v5931_v4 = vpop.permute.xlu0 %2385  ;;  %v2940_v45 = vrot.slane %v2926_v57, 2  ;;  %v3671_v57 = vrot.slane %v3657_v44, 4  ;;  %v1194_v44 = vrot.slane %v1180_v21, 6  ;;  %v3006_v17 = vmul.f32 %v5910_v0, %v5433_v53 }
 0x304   : > { %7826 = vst [vmem:[#allocation200_spill] sm:$0xff] %v5929_v15  ;;  %7827 = vst [vmem:[#allocation201_spill] sm:$0xff] %v5931_v4  ;;  %v1175_v33 = vadd.f32 %v1163_v41, %v1111_v22  ;;  %v1078_v3 = vadd.f32 %v1066_v9, %v1014_v14  ;;  %v2981_v41 = vrot.slane %v2967_v24, 2  ;;  %v3010_v24 = vmul.f32 %v5507_v7, %v5433_v53 }
 0x305   : > { %3608 = vrot.lane.b32.xlu1 %v3595_v38, %s4406_s1  ;;  %2905 = vrot.lane.b32.xlu0 %v2898_v63, %s4405_s26  ;;  %v2965_v38 = vmul.f32 %v5453_v1, %v5411_v26  ;;  %v1130_v63 = vrot.slane %v1116_v46, 5  ;;  %v2941_v12 = vsel %vm640_vm3, %v2935_v27, %v2940_v45  ;;  %v5972_v46 = vstv %s4116_s20  ;;  %s6180_s20 = sld [smem:[#allocation6 + $0x46]] }
 0x306   : > { %7833 = vst [vmem:[#allocation207_spill] sm:$0xff] %v5972_v46 }
 0x307   : > { %v5945_v58 = vpop.permute.xlu1 %3075  ;;  %v5947_v50 = vpop.permute.xlu0 %2389  ;;  %v2976_v13 = vrot.slane %v2965_v38, 2  ;;  %v1142_v9 = vadd.f32 %v1130_v63, %v1078_v3  ;;  %v1742_v63 = vadd.f32 %v5023_v61, %v1175_v33 }
 0x308   : > { %7829 = vst [vmem:[#allocation203_spill] sm:$0xff] %v5945_v58  ;;  %7830 = vst [vmem:[#allocation204_spill] sm:$0xff] %v5947_v50 }
 0x309   : > { %3643 = vrot.lane.b32.xlu1 %v3634_v34, %s4406_s1  ;;  %2944 = vrot.lane.b32.xlu0 %v2936_v11, %s4405_s26  ;;  %v3696_v11 = vmul.f32 %v5611_v42, %v5972_v46  ;;  %v2977_v26 = vsel %vm640_vm3, %v2975_v59, %v2976_v13  ;;  %v2982_v14 = vsel %vm640_vm3, %v2976_v13, %v2981_v41 }
 0x30a   : > { %v1206_v3 = vadd.f32 %v1194_v44, %v1142_v9  ;;  %v3049_v44 = vmul.f32 %v5453_v1, %v5461_v40 }
 0x30b   : > { %v5963_v50 = vpop.permute.xlu1 %3114  ;;  %v5965_v4 = vpop.permute.xlu0 %2424  ;;  %v3710_v45 = vrot.slane %v3696_v11, 5  ;;  %v5999_v11 = vstv %s4117_s22  ;;  %s6186_s22 = sld [smem:[#allocation6 + $0x4d]] }
 0x30c   : > { %7831 = vst [vmem:[#allocation205_spill] sm:$0xff] %v5963_v50  ;;  %7832 = vst [vmem:[#allocation206_spill] sm:$0xff] %v5965_v4  ;;  %v3733_v13 = vmul.f32 %v5611_v42, %v5999_v11  ;;  %v1769_v1 = vadd.f32 %v5043_v5, %v1206_v3 }
 0x30d   : > { %3647 = vrot.lane.b32.xlu1 %v3634_v34, %s4406_s1  ;;  %2948 = vrot.lane.b32.xlu0 %v2941_v12, %s4405_s26  ;;  %v3008_v34 = vmul.f32 %v5427_v35, %v5433_v53  ;;  %v1740_v12 = vadd.f32 %v5008_v28, %v1175_v33  ;;  %7838 = vst [vmem:[#allocation212_spill] sm:$0xff] %v5999_v11  ;;  %v3024_v33 = vrot.slane %v3010_v24, 3  ;;  %v7916_v28 = vld [vmem:[#allocation193_spill] sm:$0xff] }
 0x30f   : > { %v5976_v4 = vpop.permute.xlu1 %3118  ;;  %v5978_v27 = vpop.permute.xlu0 %2428  ;;  %v3019_v21 = vrot.slane %v3008_v34, 3  ;;  %v1810_v59 = vadd.f32 %v5052_v56, %v1740_v12  ;;  %v1812_v12 = vadd.f32 %v5065_v31, %v1742_v63  ;;  %v3051_v63 = vmul.f32 %v5481_v30, %v5461_v40  ;;  %v7913_v31 = vld [vmem:[#allocation180_spill] sm:$0xff] }
 0x310   : > { %7834 = vst [vmem:[#allocation208_spill] sm:$0xff] %v5976_v4  ;;  %7835 = vst [vmem:[#allocation209_spill] sm:$0xff] %v5978_v27  ;;  %v3060_v27 = vrot.slane %v3049_v44, 3  ;;  %v1853_v44 = vadd.f32 %v5087_v25, %v1769_v1  ;;  %v3090_v1 = vmul.f32 %v5910_v0, %v5487_v54  ;;  %v7911_v25 = vld [vmem:[#allocation187_spill] sm:$0xff]  ;;  %v808_v56 = vmul.f32 %v5910_v0, %v7913_v31 }
 0x311   : > { %3680 = vrot.lane.b32.xlu1 %v3671_v57, %s4406_s1  ;;  %2985 = vrot.lane.b32.xlu0 %v2977_v26, %s4405_s26  ;;  %v3018_v26 = vrot.slane %v3006_v17, 3  ;;  %v1894_v9 = vadd.f32 %v5098_v2, %v1810_v59  ;;  %v3747_v17 = vrot.slane %v3733_v13, 5  ;;  %v6357_v2 = vmul.f32 %v5910_v0, %v7911_v25 }
 0x313   : > { %v5988_v38 = vpop.permute.xlu1 %3155  ;;  %v5990_v22 = vpop.permute.xlu0 %2461  ;;  %v3020_v53 = vsel %vm675_vm4, %v3018_v26, %v3019_v21  ;;  %v3025_v26 = vsel %vm675_vm4, %v3019_v21, %v3024_v33  ;;  %v1978_v13 = vadd.f32 %v5144_v16, %v1894_v9  ;;  %v7910_v16 = vld [vmem:[#allocation186_spill] sm:$0xff] }
 0x314   : > { %7836 = vst [vmem:[#allocation210_spill] sm:$0xff] %v5988_v38  ;;  %7837 = vst [vmem:[#allocation211_spill] sm:$0xff] %v5990_v22  ;;  %v6030_v22 = vstv %s4118_s27  ;;  %s6188_s27 = sld [smem:[#allocation6 + $0x54]] }
 0x315   : > { %3684 = vrot.lane.b32.xlu1 %v3671_v57, %s4406_s1  ;;  %2989 = vrot.lane.b32.xlu0 %v2982_v14, %s4405_s26  ;;  %v1767_v57 = vadd.f32 %v5032_v10, %v1206_v3  ;;  %v3047_v14 = vmul.f32 %v5950_v43, %v5461_v40  ;;  %7843 = vst [vmem:[#allocation217_spill] sm:$0xff] %v6030_v22 }
 0x316   : > { %v3772_v21 = vmul.f32 %v5611_v42, %v6030_v22 }
 0x317   : > { %v6003_v41 = vpop.permute.xlu1 %3159  ;;  %v6005_v34 = vpop.permute.xlu0 %2465  ;;  %v1851_v59 = vadd.f32 %v5074_v51, %v1767_v57  ;;  %v3059_v3 = vrot.slane %v3047_v14, 3  ;;  %v2062_v14 = vadd.f32 %v5190_v6, %v1978_v13  ;;  %v6062_v6 = vstv %s4119_s5  ;;  %s6190_s5 = sld [smem:[#allocation6 + $0x5b]] }
 0x318   : > { %7839 = vst [vmem:[#allocation213_spill] sm:$0xff] %v6003_v41  ;;  %7840 = vst [vmem:[#allocation214_spill] sm:$0xff] %v6005_v34 }
 0x319   : > { %3719 = vrot.lane.b32.xlu1 %v3710_v45, %s4406_s1  ;;  %3028 = vrot.lane.b32.xlu0 %v3020_v53, %s4405_s26  ;;  %v1896_v53 = vadd.f32 %v5109_v47, %v1812_v12  ;;  %v3061_v57 = vsel %vm675_vm4, %v3059_v3, %v3060_v27  ;;  %v3065_v12 = vrot.slane %v3051_v63, 3  ;;  %v1935_v9 = vadd.f32 %v5120_v20, %v1851_v59  ;;  %v7915_v20 = vld [vmem:[#allocation192_spill] sm:$0xff] }
 0x31a   : > { %7848 = vst [vmem:[#allocation222_spill] sm:$0xff] %v6062_v6  ;;  %v6370_v47 = vmul.f32 %v5950_v43, %v7915_v20 }
 0x31b   : > { %v6017_v34 = vpop.permute.xlu1 %3198  ;;  %v6019_v24 = vpop.permute.xlu0 %2500  ;;  %v3066_v59 = vsel %vm675_vm4, %v3060_v27, %v3065_v12  ;;  %v2019_v13 = vadd.f32 %v5166_v52, %v1935_v9  ;;  %v3809_v27 = vmul.f32 %v5611_v42, %v6062_v6  ;;  %v6072_v9 = vld [vmem:[#allocation4 + $0x40] sm:$0xff] }
 0x31c   : > { %7841 = vst [vmem:[#allocation215_spill] sm:$0xff] %v6017_v34  ;;  %7842 = vst [vmem:[#allocation216_spill] sm:$0xff] %v6019_v24  ;;  %v3786_v24 = vrot.slane %v3772_v21, 6  ;;  %v2146_v21 = vadd.f32 %v5240_v23, %v2062_v14  ;;  %v7909_v23 = vld [vmem:[#allocation181_spill] sm:$0xff] }
 0x31d   : > { %3723 = vrot.lane.b32.xlu1 %v3710_v45, %s4406_s1  ;;  %3032 = vrot.lane.b32.xlu0 %v3025_v26, %s4405_s26  ;;  %v3092_v45 = vmul.f32 %v5427_v35, %v5487_v54  ;;  %v1980_v26 = vadd.f32 %v5157_v8, %v1896_v53  ;;  %v1937_v35 = vadd.f32 %v5133_v36, %v1853_v44 }
 0x31e   : > { %v3094_v53 = vmul.f32 %v5507_v7, %v5487_v54  ;;  %v2230_v42 = vadd.f32 %v5288_v19, %v2146_v21  ;;  %v7852_v21 = vld [vmem:[#allocation79_spill] sm:$0xff] }
 0x31f   : > { %v6034_v33 = vpop.permute.xlu1 %3202  ;;  %v6036_v40 = vpop.permute.xlu0 %2504  ;;  %v3103_v3 = vrot.slane %v3092_v45, 4  ;;  %v2021_v54 = vadd.f32 %v5179_v18, %v1937_v35 }
 0x320   : > { %7844 = vst [vmem:[#allocation218_spill] sm:$0xff] %v6034_v33  ;;  %7845 = vst [vmem:[#allocation219_spill] sm:$0xff] %v6036_v40  ;;  %v3108_v45 = vrot.slane %v3094_v53, 4  ;;  %v2805_v35 = vadd.f32 %v5670_v60, %v2230_v42 }
 0x321   : > { %3756 = vrot.lane.b32.xlu1 %v3747_v17, %s4406_s1  ;;  %3069 = vrot.lane.b32.xlu0 %v3061_v57, %s4405_s26  ;;  %v2064_v57 = vadd.f32 %v5201_v32, %v1980_v26  ;;  %v2103_v26 = vadd.f32 %v5214_v49, %v2019_v13  ;;  %v2105_v53 = vadd.f32 %v5227_v48, %v2021_v54  ;;  %v7855_v54 = vld [vmem:[#allocation156_spill] sm:$0xff]  ;;  %v7862_v48 = vld [vmem:[#allocation194_spill] sm:$0xff] }
 0x322   : > { %v3109_v13 = vsel %vm233_vm0, %v3103_v3, %v3108_v45 }
 0x323   : > { %v6049_v40 = vpop.permute.xlu1 %3239  ;;  %v6051_v63 = vpop.permute.xlu0 %2537  ;;  %v2148_v14 = vadd.f32 %v5253_v55, %v2064_v57  ;;  %v3135_v57 = vmul.f32 %v5481_v30, %v5513_v37  ;;  %v2187_v19 = vadd.f32 %v7852_v21, %v2103_v26  ;;  %v7858_v30 = vld [vmem:[#allocation81_spill] sm:$0xff]  ;;  %v7861_v21 = vld [vmem:[#allocation166_spill] sm:$0xff] }
 0x324   : > { %7846 = vst [vmem:[#allocation220_spill] sm:$0xff] %v6049_v40  ;;  %7847 = vst [vmem:[#allocation221_spill] sm:$0xff] %v6051_v63  ;;  %v3102_v63 = vrot.slane %v3090_v1, 4  ;;  %v3823_v1 = vrot.slane %v3809_v27, 6  ;;  %v7853_v27 = vld [vmem:[#allocation163_spill] sm:$0xff] }
 0x325   : > { %3760 = vrot.lane.b32.xlu1 %v3747_v17, %s4406_s1  ;;  %3073 = vrot.lane.b32.xlu0 %v3066_v59, %s4405_s26  ;;  %v3133_v17 = vmul.f32 %v6072_v9, %v5513_v37  ;;  %v2875_v55 = vadd.f32 %v7853_v27, %v2805_v35  ;;  %v7859_v35 = vld [vmem:[#allocation125_spill] sm:$0xff] }
 0x326   : > { %v3104_v12 = vsel %vm233_vm0, %v3102_v63, %v3103_v3  ;;  %v3131_v63 = vmul.f32 %v5950_v43, %v5513_v37  ;;  %v7856_v3 = vld [vmem:[#allocation173_spill] sm:$0xff]  ;;  %v2189_v37 = vadd.f32 %v7858_v30, %v2105_v53  ;;  %v7868_v30 = vld [vmem:[#allocation168_spill] sm:$0xff] }
 0x327   : > { %v6066_v44 = vpop.permute.xlu0 %2541  ;;  %v6069_v7 = vpop.permute.xlu1 %3243  ;;  %v2959_v45 = vadd.f32 %v7856_v3, %v2875_v55  ;;  %v3174_v55 = vmul.f32 %v5910_v0, %v7859_v35 }
 0x328   : > { %7849 = vst [vmem:[#allocation223_spill] sm:$0xff] %v6066_v44  ;;  %7850 = vst [vmem:[#allocation224_spill] sm:$0xff] %v6069_v7  ;;  %v3144_v44 = vrot.slane %v3133_v17, 4 }
 0x329   : > { %3795 = vrot.lane.b32.xlu1 %v3786_v24, %s4406_s1  ;;  %3112 = vrot.lane.b32.xlu0 %v3104_v12, %s4405_s26  ;;  %v2232_v12 = vadd.f32 %v5297_v62, %v2148_v14  ;;  %v3149_v14 = vrot.slane %v3135_v57, 4  ;;  %v6103_v62 = vld [vmem:[#allocation4 + $0x10] sm:$0xff]  ;;  %v7864_v57 = vld [vmem:[#allocation177_spill] sm:$0xff] }
 0x32b   : > { %v6084_v59 = vpop.permute.xlu0 %2576  ;;  %v6095_v42 = vpop.permute.xlu1 %3282  ;;  %v2807_v60 = vadd.f32 %v7855_v54, %v2232_v12  ;;  %v3043_v12 = vadd.f32 %v7862_v48, %v2959_v45  ;;  %v3150_v45 = vsel %vm233_vm0, %v3144_v44, %v3149_v14 }
 0x32c   : > { %7851 = vst [vmem:[#allocation225_spill] sm:$0xff] %v6084_v59  ;;  %7854 = vst [vmem:[#allocation226_spill] sm:$0xff] %v6095_v42  ;;  %v3143_v59 = vrot.slane %v3131_v63, 4 }
 0x32d   : > { %3799 = vrot.lane.b32.xlu1 %v3786_v24, %s4406_s1  ;;  %3116 = vrot.lane.b32.xlu0 %v3109_v13, %s4405_s26  ;;  %v3176_v24 = vmul.f32 %v6103_v62, %v7859_v35  ;;  %v7860_v13 = vld [vmem:[#allocation87_spill] sm:$0xff]  ;;  %v2877_v63 = vadd.f32 %v7861_v21, %v2807_v60  ;;  %v3127_v3 = vadd.f32 %v5963_v50, %v3043_v12  ;;  %v6123_v21 = vld [vmem:[#allocation4 + $0x20] sm:$0xff] }
 0x32e   : > { %v3145_v26 = vsel %vm233_vm0, %v3143_v59, %v3144_v44  ;;  %v2271_v27 = vadd.f32 %v7860_v13, %v2187_v19  ;;  %v7863_v59 = vld [vmem:[#allocation158_spill] sm:$0xff]  ;;  %v7866_v19 = vld [vmem:[#allocation89_spill] sm:$0xff] }
 0x32f   : > { %v6099_v17 = vpop.permute.xlu0 %2580  ;;  %v2273_v13 = vadd.f32 %v7866_v19, %v2189_v37  ;;  %v6120_v60 = vpop.permute.xlu1 %3286  ;;  %v3187_v48 = vrot.slane %v3176_v24, 5  ;;  %v3211_v12 = vadd.f32 %v6017_v34, %v3127_v3  ;;  %v3186_v37 = vrot.slane %v3174_v55, 5  ;;  %v7871_v44 = vld [vmem:[#allocation182_spill] sm:$0xff] }
 0x330   : > { %7857 = vst [vmem:[#allocation227_spill] sm:$0xff] %v6099_v17  ;;  %v2832_v53 = vadd.f32 %v7863_v59, %v2271_v27  ;;  %v2961_v17 = vadd.f32 %v7864_v57, %v2877_v63  ;;  %7867 = vst [vmem:[#allocation228_spill] sm:$0xff] %v6120_v60  ;;  %v7869_v59 = vld [vmem:[#allocation197_spill] sm:$0xff]  ;;  %v7900_v34 = vstv %s6138_s6 }
 0x331   : > { %3832 = vrot.lane.b32.xlu1 %v3823_v1, %s4406_s1  ;;  %3153 = vrot.lane.b32.xlu0 %v3145_v26, %s4405_s26  ;;  %v3178_v26 = vmul.f32 %v6123_v21, %v7859_v35  ;;  %v3295_v57 = vadd.f32 %v6095_v42, %v3211_v12 }
 0x332   : > { %v2916_v27 = vadd.f32 %v7868_v30, %v2832_v53  ;;  %v3045_v63 = vadd.f32 %v7869_v59, %v2961_v17  ;;  %v3188_v17 = vsel %vm744_vm6, %v3186_v37, %v3187_v48  ;;  %v7873_v53 = vld [vmem:[#allocation130_spill] sm:$0xff]  ;;  %v6308_v59 = vmul.f32 %v5910_v0, %v7900_v34 }
 0x333   : > { %v6117_v54 = vpop.permute.xlu0 %2613  ;;  %v3192_v3 = vrot.slane %v3178_v26, 5  ;;  %v6156_v26 = vpop.permute.xlu1 %3323 }
 0x334   : > { %7865 = vst [vmem:[#allocation125_spill] sm:$0xff] %v6117_v54  ;;  %v7870_v54 = vld [vmem:[#allocation161_spill] sm:$0xff]  ;;  %v3000_v14 = vadd.f32 %v7871_v44, %v2916_v27  ;;  %v3129_v24 = vadd.f32 %v5976_v4, %v3045_v63  ;;  %7875 = vst [vmem:[#allocation130_spill] sm:$0xff] %v6156_v26  ;;  %v3215_v63 = vmul.f32 %v5950_v43, %v7873_v53 }
 0x335   : > { %3836 = vrot.lane.b32.xlu1 %v3823_v1, %s4406_s1  ;;  %3157 = vrot.lane.b32.xlu0 %v3150_v45, %s4405_s26  ;;  %v2834_v50 = vadd.f32 %v7870_v54, %v2273_v13  ;;  %v3217_v1 = vmul.f32 %v6072_v9, %v7873_v53  ;;  %v7874_v13 = vld [vmem:[#allocation171_spill] sm:$0xff]  ;;  %7901 = vst [vmem:[#allocation248_spill] sm:$0xff] %v6308_v59 }
 0x336   : > { %v3084_v45 = vadd.f32 %v5929_v15, %v3000_v14  ;;  %v3213_v27 = vadd.f32 %v6034_v33, %v3129_v24  ;;  %v3193_v24 = vsel %vm744_vm6, %v3187_v48, %v3192_v3  ;;  %v3227_v48 = vrot.slane %v3215_v63, 5 }
 0x337   : > { %v6136_v35 = vpop.permute.xlu0 %2617  ;;  %v2918_v55 = vadd.f32 %v7874_v13, %v2834_v50  ;;  %v7876_v50 = vld [vmem:[#allocation189_spill] sm:$0xff]  ;;  %v7892_v13 = vld [vmem:[#allocation140_spill] sm:$0xff] }
 0x338   : > { %7872 = vst [vmem:[#allocation229_spill] sm:$0xff] %v6136_v35  ;;  %v3168_v37 = vadd.f32 %v5988_v38, %v3084_v45  ;;  %v6174_v35 = vld [vmem:[#allocation4 + $0x50] sm:$0xff]  ;;  %v6236_v38 = vstv %s6178_s13 }
 0x339   : > { %3850 = vrot.lane.b32.xlu1 %v3295_v57, %s4407_s9  ;;  %3196 = vrot.lane.b32.xlu0 %v3188_v17, %s4405_s26  ;;  %v3002_v12 = vadd.f32 %v7876_v50, %v2918_v55  ;;  %v3297_v57 = vadd.f32 %v6120_v60, %v3213_v27  ;;  %v3228_v17 = vrot.slane %v3217_v1, 5  ;;  %v3219_v33 = vmul.f32 %v6174_v35, %v7873_v53  ;;  %v6196_v27 = vpop.permute.xlu1 %3327 }
 0x33a   : > { %v3252_v45 = vadd.f32 %v6049_v40, %v3168_v37  ;;  %7879 = vst [vmem:[#allocation232_spill] sm:$0xff] %v6196_v27  ;;  %v6233_v60 = vstv %s6169_s21  ;;  %7882 = vst [vmem:[#allocation233_spill] sm:$0xff] %v6236_v38  ;;  %v3303_v52 = vmul.f32 %v6174_v35, %v7892_v13 }
 0x33b   : > { %v6167_v14 = vpop.permute.xlu0 %2652  ;;  %v3086_v55 = vadd.f32 %v5945_v58, %v3002_v12  ;;  %v3229_v12 = vsel %vm744_vm6, %v3227_v48, %v3228_v17  ;;  %v3233_v37 = vrot.slane %v3219_v33, 5  ;;  %v6212_v48 = vstv %s6152_s12 }
 0x33c   : > { %7877 = vst [vmem:[#allocation230_spill] sm:$0xff] %v6167_v14  ;;  %v3336_v53 = vadd.f32 %v6156_v26, %v3252_v45  ;;  %v6209_v45 = vstv %s6145_s11  ;;  %v6280_v4 = vmul.f32 %v5910_v0, %v6212_v48  ;;  %v3299_v14 = vmul.f32 %v5950_v43, %v7892_v13 }
 0x33d   : > { %3854 = vrot.lane.b32.xlu1 %v3297_v57, %s4407_s9  ;;  %3200 = vrot.lane.b32.xlu0 %v3193_v24, %s4405_s26  ;;  %v3170_v3 = vadd.f32 %v6003_v41, %v3086_v55  ;;  %v7880_v57 = vld [vmem:[#allocation135_spill] sm:$0xff]  ;;  %v6206_v55 = vstv %s6143_s7  ;;  %v6217_v24 = vstv %s6154_s28  ;;  %v3234_v26 = vsel %vm744_vm6, %v3228_v17, %v3233_v37 }
 0x33e   : > { %v3260_v63 = vmul.f32 %v6103_v62, %v7880_v57  ;;  %v3258_v33 = vmul.f32 %v5910_v0, %v7880_v57  ;;  %v3262_v58 = vmul.f32 %v6123_v21, %v7880_v57  ;;  %v6251_v17 = vmul.f32 %v5910_v0, %v6206_v55  ;;  %7894 = vst [vmem:[#allocation242_spill] sm:$0xff] %v6280_v4 }
 0x33f   : > { %v6194_v1 = vpop.permute.xlu0 %2656  ;;  %v3254_v40 = vadd.f32 %v6069_v7, %v3170_v3  ;;  %v6220_v3 = vstv %s6160_s29  ;;  %v6227_v7 = vstv %s6171_s23  ;;  %v7886_v37 = vstv %s6162_s4  ;;  %s3902_s29 = scalar_lea.sflag [#allocation8], %s4572_s25 }
 0x340   : > { %7878 = vst [vmem:[#allocation231_spill] sm:$0xff] %v6194_v1  ;;  %v3271_v41 = vrot.slane %v3260_v63, 6  ;;  %v6256_v57 = vmul.f32 %v5950_v43, %v7886_v37  ;;  %v6260_v63 = vmul.f32 %v5950_v43, %v6227_v7  ;;  %v3276_v15 = vrot.slane %v3262_v58, 6 }
 0x341   : > { %3869 = vrot.lane.b32.xlu1 %v3336_v53, %s4407_s9  ;;  %3237 = vrot.lane.b32.xlu0 %v3229_v12, %s4405_s26  ;;  %v3338_v12 = vadd.f32 %v6196_v27, %v3254_v40  ;;  %v6241_v40 = vstv %s6180_s20  ;;  %v6244_v53 = vstv %s6186_s22  ;;  %v3301_v37 = vmul.f32 %v6072_v9, %v7892_v13 }
 0x342   : > { %7883 = vst [vmem:[#allocation234_spill] sm:$0xff] %v6241_v40  ;;  %7884 = vst [vmem:[#allocation235_spill] sm:$0xff] %v6244_v53  ;;  %v6247_v27 = vstv %s6188_s27  ;;  %v6276_v42 = vmul.f32 %v5910_v0, %v6209_v45  ;;  %v6288_v44 = vmul.f32 %v5950_v43, %v6241_v40  ;;  %v6293_v58 = vmul.f32 %v5910_v0, %v6220_v3 }
 0x343   : > { %v6224_v1 = vpop.permute.xlu0 %2689  ;;  %7885 = vst [vmem:[#allocation236_spill] sm:$0xff] %v6247_v27  ;;  %7887 = vst [vmem:[#allocation237_spill] sm:$0xff] %v6256_v57  ;;  %v6301_v54 = vmul.f32 %v5950_v43, %v6244_v53  ;;  %v6314_v19 = vmul.f32 %v5950_v43, %v6247_v27  ;;  %v3277_v32 = vsel %vm779_vm7, %v3271_v41, %v3276_v15  ;;  %v3312_v18 = vrot.slane %v3301_v37, 6  ;;  %v7928_v27 = vld [vmem:[#allocation176_spill] sm:$0xff] }
 0x344   : > { %7881 = vst [vmem:[#allocation135_spill] sm:$0xff] %v6224_v1  ;;  %v3270_v1 = vrot.slane %v3258_v33, 6  ;;  %7888 = vst [vmem:[#allocation238_spill] sm:$0xff] %v6260_v63  ;;  %v6269_v33 = vmul.f32 %v5950_v43, %v6236_v38  ;;  %v3311_v13 = vrot.slane %v3299_v14, 6  ;;  %v6346_v15 = vmul.f32 %v5910_v0, %v7909_v23 }
 0x345   : > { %3873 = vrot.lane.b32.xlu1 %v3338_v12, %s4407_s9  ;;  %3241 = vrot.lane.b32.xlu0 %v3234_v26, %s4405_s26  ;;  %v6263_v26 = vstv %s6190_s5  ;;  %7893 = vst [vmem:[#allocation140_spill] sm:$0xff] %v6276_v42  ;;  %7896 = vst [vmem:[#allocation244_spill] sm:$0xff] %v6288_v44  ;;  %v6350_v14 = vmul.f32 %v5910_v0, %v7910_v16  ;;  %v6443_v40 = vmul.f32 %v6072_v9, %v7915_v20 }
 0x346   : > { %7889 = vst [vmem:[#allocation239_spill] sm:$0xff] %v6263_v26  ;;  %7891 = vst [vmem:[#allocation241_spill] sm:$0xff] %v6269_v33  ;;  %v3272_v50 = vsel %vm779_vm7, %v3270_v1, %v3271_v41  ;;  %v6297_v1 = vmul.f32 %v5910_v0, %v6233_v60  ;;  %v6327_v8 = vmul.f32 %v5950_v43, %v6263_v26  ;;  %v7905_v41 = vld [vmem:[#allocation175_spill] sm:$0xff] }
 0x347   : > { %v6265_v12 = vpop.permute.xlu0 %2693  ;;  %7897 = vst [vmem:[#allocation245_spill] sm:$0xff] %v6293_v58  ;;  %7899 = vst [vmem:[#allocation247_spill] sm:$0xff] %v6301_v54  ;;  %v828_v37 = vmul.f32 %v5910_v0, %v7905_v41  ;;  %v6338_v30 = vmul.f32 %v6103_v62, %v7905_v41  ;;  %v3313_v34 = vsel %vm779_vm7, %v3311_v13, %v3312_v18  ;;  %v7914_v13 = vld [vmem:[#allocation184_spill] sm:$0xff]  ;;  %v7919_v26 = vld [vmem:[#allocation199_spill] sm:$0xff] }
 0x348   : > { %7890 = vst [vmem:[#allocation240_spill] sm:$0xff] %v6265_v12  ;;  %v6284_v12 = vmul.f32 %v5910_v0, %v6217_v24  ;;  %7898 = vst [vmem:[#allocation246_spill] sm:$0xff] %v6297_v1  ;;  %v6387_v44 = vmul.f32 %v6072_v9, %v7914_v13  ;;  %v7925_v1 = vld [vmem:[#allocation160_spill] sm:$0xff]  ;;  %v601_v38 = vmul.f32 %v6123_v21, %v6206_v55 }
 0x349   : > { %3280 = vrot.lane.b32.xlu0 %v3272_v50, %s4405_s26  ;;  %7902 = vst [vmem:[#allocation249_spill] sm:$0xff] %v6314_v19  ;;  %7904 = vst [vmem:[#allocation251_spill] sm:$0xff] %v6327_v8  ;;  %v3317_v50 = vrot.slane %v3303_v52, 6  ;;  %v840_v5 = vrot.slane %v828_v37, 1  ;;  %v859_v52 = vmul.f32 %v5950_v43, %v7914_v13  ;;  %v6375_v8 = vmul.f32 %v5950_v43, %v7916_v28 }
 0x34a   : > { %7895 = vst [vmem:[#allocation243_spill] sm:$0xff] %v6284_v12  ;;  %7906 = vst [vmem:[#allocation252_spill] sm:$0xff] %v6338_v30  ;;  %v968_v37 = vrot.slane %v6346_v15, 3  ;;  %v7920_v15 = vld [vmem:[#allocation191_spill] sm:$0xff]  ;;  %v7921_v31 = vrot.slane %v6338_v30, 1  ;;  %v6424_v30 = vmul.f32 %v5950_v43, %v7925_v1  ;;  %v6448_v12 = vmul.f32 %v5910_v0, %v7928_v27 }
 0x34b   : > { %v6316_v49 = vpop.permute.xlu0 %2728  ;;  %v817_v54 = vmul.f32 %v5950_v43, %v7920_v15  ;;  %v871_v57 = vrot.slane %v859_v52, 1  ;;  %v7930_v52 = vld [vmem:[#allocation154_spill] sm:$0xff]  ;;  %v7933_v58 = vrot.slane %v6387_v44, 1 }
 0x34c   : > { %7903 = vst [vmem:[#allocation250_spill] sm:$0xff] %v6316_v49  ;;  %v7907_v49 = vld [vmem:[#allocation179_spill] sm:$0xff]  ;;  %v842_v33 = vsel %vm605_vm2, %v840_v5, %v7921_v31  ;;  %v7926_v31 = vld [vmem:[#allocation165_spill] sm:$0xff]  ;;  %v3366_v4 = vmul.f32 %v5950_v43, %v7930_v52 }
 0x34d   : > { %3284 = vrot.lane.b32.xlu0 %v3277_v32, %s4405_s26  ;;  %v892_v36 = vmul.f32 %v5910_v0, %v7907_v49  ;;  %v6392_v61 = vmul.f32 %v6103_v62, %v7907_v49  ;;  %v6428_v5 = vmul.f32 %v5910_v0, %v7926_v31  ;;  %v6433_v49 = vmul.f32 %v6103_v62, %v7909_v23 }
 0x34e   : > { %v854_v41 = vadd.f32 %v842_v33, %v808_v56  ;;  %v7932_v33 = vld [vmem:[#allocation196_spill] sm:$0xff]  ;;  %v873_v27 = vsel %vm605_vm2, %v871_v57, %v7933_v58 }
 0x34f   : > { %v6342_v32 = vpop.permute.xlu0 %2732  ;;  %v904_v10 = vrot.slane %v892_v36, 2  ;;  %v3318_v36 = vsel %vm779_vm7, %v3312_v18, %v3317_v50  ;;  %7918 = vst [vmem:[#allocation187_spill] sm:$0xff] %v6392_v61  ;;  %v935_v18 = vrot.slane %v6370_v47, 2  ;;  %v6406_v50 = vmul.f32 %v5950_v43, %v5957_v29  ;;  %v7924_v47 = vld [vmem:[#allocation155_spill] sm:$0xff] }
 0x350   : > { %7908 = vst [vmem:[#allocation253_spill] sm:$0xff] %v6342_v32  ;;  %v7912_v32 = vld [vmem:[#allocation188_spill] sm:$0xff]  ;;  %v6420_v53 = vmul.f32 %v5910_v0, %v7924_v47  ;;  %v6462_v20 = vmul.f32 %v5910_v0, %v7932_v33  ;;  %v7934_v42 = vrot.slane %v6392_v61, 2  ;;  %v6476_v33 = vmul.f32 %v6103_v62, %v7910_v16 }
 0x351   : > { %v6361_v51 = vmul.f32 %v5910_v0, %v7912_v32  ;;  %3321 = vrot.lane.b32.xlu0 %v3313_v34, %s4405_s26  ;;  %v6379_v34 = vmul.f32 %v5950_v43, %v5918_v39  ;;  %v7941_v61 = vrot.slane %v6433_v49, 3 }
 0x352   : > { %v906_v59 = vsel %vm640_vm3, %v904_v10, %v7934_v42  ;;  %v885_v10 = vadd.f32 %v873_v27, %v817_v54  ;;  %v6502_v54 = vmul.f32 %v5950_v43, %v5999_v11  ;;  %v6506_v27 = vmul.f32 %v5910_v0, %v6030_v22 }
 0x353   : > { %v6381_v19 = vpop.permute.xlu0 %2765  ;;  %v918_v58 = vadd.f32 %v906_v59, %v854_v41  ;;  %v3393_v59 = vmul.f32 %v6103_v62, %v7924_v47  ;;  %v6498_v41 = vmul.f32 %v5910_v0, %v5972_v46 }
 0x354   : > { %7917 = vst [vmem:[#allocation186_spill] sm:$0xff] %v6381_v19  ;;  %v6398_v19 = vmul.f32 %v5950_v43, %v7919_v26  ;;  %7939 = vst [vmem:[#allocation160_spill] sm:$0xff] %v6502_v54 }
 0x355   : > { %3325 = vrot.lane.b32.xlu0 %v3318_v36, %s4405_s26  ;;  %v7923_v36 = vld [vmem:[#allocation149_spill] sm:$0xff]  ;;  %7938 = vst [vmem:[#allocation155_spill] sm:$0xff] %v6498_v41  ;;  %7940 = vst [vmem:[#allocation165_spill] sm:$0xff] %v6506_v27  ;;  %s7399_s26 = sld [smem:[#allocation5]] }
 0x356   : > { %v3342_v15 = vmul.f32 %v5910_v0, %v7923_v36  ;;  %v7943_v0 = vrot.slane %v6443_v40, 2 }
 0x357   : > { %v6413_v63 = vpop.permute.xlu0 %2769 }
 0x358   : > { %7922 = vst [vmem:[#allocation188_spill] sm:$0xff] %v6413_v63  ;;  %v7927_v63 = vld [vmem:[#allocation170_spill] sm:$0xff]  ;;  %v937_v22 = vsel %vm640_vm3, %v935_v18, %v7943_v0  ;;  %v3395_v18 = vmul.f32 %v6123_v21, %v7924_v47  ;;  %v7948_v0 = vrot.slane %v6375_v8, 3 }
 0x359   : > { %3350 = vrot.lane.b32.xlu0 %v3342_v15, %s4406_s1  ;;  %v6439_v13 = vmul.f32 %v5950_v43, %v7927_v63  ;;  %v3344_v15 = vmul.f32 %v6103_v62, %v7923_v36  ;;  %v7931_v63 = vld [vmem:[#allocation185_spill] sm:$0xff]  ;;  %v6483_v36 = vmul.f32 %v6072_v9, %v7916_v28 }
 0x35a   : > { %v6458_v56 = vmul.f32 %v5950_v43, %v7931_v63  ;;  %v970_v63 = vsel %vm675_vm4, %v968_v37, %v7941_v61  ;;  %v6527_v61 = vmul.f32 %v6072_v9, %v5918_v39  ;;  %v949_v37 = vadd.f32 %v937_v22, %v885_v10 }
 0x35b   : > { %v6450_v23 = vpop.permute.xlu0 %2790  ;;  %v982_v11 = vadd.f32 %v970_v63, %v918_v58  ;;  %v3404_v58 = vrot.slane %v3393_v59, 1  ;;  %v7945_v22 = vrot.slane %v6476_v33, 4  ;;  %v7946_v10 = vrot.slane %v6350_v14, 4 }
 0x35c   : > { %7929 = vst [vmem:[#allocation193_spill] sm:$0xff] %v6450_v23  ;;  %v3403_v23 = vrot.slane %v6420_v53, 1  ;;  %v6514_v53 = vmul.f32 %v6103_v62, %v7911_v25  ;;  %v6552_v59 = vmul.f32 %v6103_v62, %v6206_v55  ;;  %v7947_v46 = vrot.slane %v6483_v36, 3 }
 0x35d   : > { %3354 = vrot.lane.b32.xlu0 %v3344_v15, %s4406_s1  ;;  %v7936_v15 = vld [vmem:[#allocation202_spill] sm:$0xff]  ;;  %v6567_v55 = vmul.f32 %v6072_v9, %v5957_v29 }
 0x35e   : > { %v6492_v57 = vmul.f32 %v5950_v43, %v7936_v15  ;;  %v1001_v14 = vsel %vm675_vm4, %v7948_v0, %v7947_v46  ;;  %v3405_v8 = vsel %vm605_vm2, %v3403_v23, %v3404_v58  ;;  %v3430_v46 = vmul.f32 %v6072_v9, %v7925_v1 }
 0x35f   : > { %v6486_v42 = vpop.permute.xlu0 %2794  ;;  %v1013_v63 = vadd.f32 %v1001_v14, %v949_v37  ;;  %7949 = vst [vmem:[#allocation254_spill] sm:$0xff] %v6567_v55  ;;  %v7951_v37 = vrot.slane %v6514_v53, 5  ;;  %v7952_v14 = vrot.slane %v6357_v2, 5  ;;  %v636_v23 = vmul.f32 %v6123_v21, %v6209_v45 }
 0x360   : > { %7935 = vst [vmem:[#allocation199_spill] sm:$0xff] %v6486_v42  ;;  %7937 = vst [vmem:[#allocation149_spill] sm:$0xff] %v6492_v57  ;;  %v6519_v42 = vmul.f32 %v5950_v43, %v6062_v6  ;;  %v3368_v43 = vmul.f32 %v6072_v9, %v7930_v52  ;;  %v1034_v6 = vsel %vm233_vm0, %v7946_v10, %v7945_v22  ;;  %v7956_v2 = vrot.slane %v6379_v34, 4 }
 0x361   : > { %3374 = vrot.lane.b32.xlu0 %v3366_v4, %s4406_s1  ;;  %v6548_v52 = vmul.f32 %v6103_v62, %v7912_v32  ;;  %v1046_v47 = vadd.f32 %v1034_v6, %v982_v11  ;;  %v6563_v10 = vmul.f32 %v6072_v9, %v7919_v26  ;;  %v3409_v11 = vrot.slane %v3395_v18, 1  ;;  %v7953_v18 = vld [vmem:[#allocation15_spill] sm:$0xff]  ;;  %v7954_v6 = vld [vmem:[#allocation48_spill] sm:$0xff] }
 0x362   : > { %7942 = vst [vmem:[#allocation154_spill] sm:$0xff] %v6519_v42  ;;  %v1098_v22 = vsel %vm744_vm6, %v7952_v14, %v7951_v37  ;;  %v6589_v27 = vsel %vm1228_vm8, %v7954_v6, %v7953_v18  ;;  %v7955_v42 = vrot.slane %v6527_v61, 4  ;;  %v7958_v6 = vstv %s6138_s6  ;;  %v7959_v18 = vld [vmem:[#allocation17_spill] sm:$0xff]  ;;  %s4128_s6 = sshll.u32 %s4374_s17, 8  ;;  %s4408_s17 = smov [#allocation11]  }
 0x363   : > { %v6531_v4 = vpop.permute.xlu0 %2817  ;;  %v1110_v0 = vadd.f32 %v1098_v22, %v1046_v47  ;;  %v7626_v14 = vrot.slane %v6563_v10, 5  ;;  %v588_v47 = vmul.f32 %v6103_v62, %v7958_v6  ;;  %v3410_v22 = vsel %vm605_vm2, %v3404_v58, %v3409_v11  ;;  %s7419_s28 = scalar_lea.hbm %s7473_s3, %s4128_s6  ;;  %s4300_s21 = sshll.u32 %s4408_s17, 4  ;;  %s4301_s21 = int_to_ptr.vmem [resolvable:$false] %s4300_s21 }
 0x364   : > { %7944 = vst [vmem:[#allocation202_spill] sm:$0xff] %v6531_v4  ;;  %v609_v4 = vrot.slane %v601_v38, 1  ;;  %v1065_v37 = vsel %vm233_vm0, %v7956_v2, %v7955_v42  ;;  %v3441_v34 = vrot.slane %v3430_v46, 1  ;;  %v3432_v42 = vmul.f32 %v6174_v35, %v7925_v1  ;;  %s4302_s23 = scalar_lea.vmem %s4301_s21, 512 }
 0x365   : > { %3378 = vrot.lane.b32.xlu0 %v3368_v43, %s4406_s1  ;;  %v644_v38 = vrot.slane %v636_v23, 2  ;;  %v671_v6 = vmul.f32 %v6123_v21, %v6212_v48  ;;  %v7965_v1 = vrot.slane %v6398_v19, 5  ;;  %v7966_v23 = vrot.slane %v6567_v55, 6 }
 0x366   : > { %v740_v19 = vmul.f32 %v6123_v21, %v6220_v3 }
 0x367   : > { %v6569_v43 = vpop.permute.xlu0 %2821  ;;  %v1129_v11 = vsel %vm744_vm6, %v7965_v1, %v7626_v14  ;;  %v739_v1 = vmul.f32 %v6103_v62, %v6220_v3  ;;  %v618_v3 = vmul.f32 %v6174_v35, %v6227_v7 }
 0x368   : > { %7950 = vst [vmem:[#allocation255_spill] sm:$0xff] %v6569_v43  ;;  %v607_v43 = vrot.slane %v6552_v59, 1  ;;  %v1077_v59 = vadd.f32 %v1065_v37, %v1013_v63  ;;  %v7960_v63 = vld [vmem:[#allocation51_spill] sm:$0xff] }
 0x369   : > { %3413 = vrot.lane.b32.xlu0 %v3405_v8, %s4406_s1  ;;  %v635_v8 = vmul.f32 %v6103_v62, %v6209_v45  ;;  %v6612_v2 = vsel %vm1228_vm8, %v7960_v63, %v7959_v18  ;;  %v7963_v45 = vrot.slane %v6361_v51, 6  ;;  %v670_v51 = vmul.f32 %v6103_v62, %v6212_v48 }
 0x36a   : > { %v610_v54 = vsel %vm605_vm2, %v607_v43, %v609_v4  ;;  %7961 = vst [vmem:[#allocation48_spill] sm:$0xff] %v6612_v2  ;;  %v7962_v4 = vrot.slane %v6548_v52, 6  ;;  %v1141_v18 = vadd.f32 %v1129_v11, %v1077_v59  ;;  %v7967_v63 = vrot.slane %v6406_v50, 6 }
 0x36b   : > { %v6601_v41 = vpop.permute.xlu0 %2860  ;;  %v614_v46 = vadd.f32 %v610_v54, %v588_v47  ;;  %v7969_v54 = vrot.slane %v6424_v30, 1  ;;  %v3446_v59 = vrot.slane %v3432_v42, 1  ;;  %v3469_v47 = vmul.f32 %v6103_v62, %v7926_v31 }
 0x36c   : > { %7957 = vst [vmem:[#allocation15_spill] sm:$0xff] %v6601_v41  ;;  %v1162_v37 = vsel %vm779_vm7, %v7963_v45, %v7962_v4  ;;  %v1193_v4 = vsel %vm779_vm7, %v7967_v63, %v7966_v23  ;;  %v677_v23 = vrot.slane %v670_v51, 3  ;;  %v6655_v30 = vmul.f32 %v6103_v62, %v6233_v60 }
 0x36d   : > { %3417 = vrot.lane.b32.xlu0 %v3410_v22, %s4406_s1  ;;  %v6622_v58 = vadd.f32 %v1162_v37, %v1110_v0  ;;  %v642_v22 = vrot.slane %v635_v8, 2  ;;  %v706_v0 = vmul.f32 %v6123_v21, %v6217_v24  ;;  %v3442_v48 = vsel %vm605_vm2, %v7969_v54, %v3441_v34 }
 0x36e   : > { %v679_v37 = vrot.slane %v671_v6, 3  ;;  %v705_v8 = vmul.f32 %v6103_v62, %v6217_v24  ;;  %v6659_v42 = vmul.f32 %v6123_v21, %v6233_v60  ;;  %v7971_v24 = vrot.slane %v6251_v17, 1 }
 0x36f   : > { %7964 = vst [vmem:[#allocation17_spill] sm:$0xff] %v6622_v58  ;;  %v6638_v45 = vpop.permute.xlu0 %2864  ;;  %v645_v50 = vsel %vm640_vm3, %v642_v22, %v644_v38  ;;  %v6661_v38 = vadd.f32 %v1193_v4, %v1141_v18  ;;  %v713_v6 = vrot.slane %v706_v0, 4  ;;  %v748_v51 = vrot.slane %v740_v19, 5 }
 0x370   : > { %7968 = vst [vmem:[#allocation51_spill] sm:$0xff] %v6638_v45  ;;  %v649_v11 = vadd.f32 %v645_v50, %v614_v46  ;;  %v608_v63 = vsel %vm605_vm2, %v7971_v24, %v607_v43  ;;  %v3447_v54 = vsel %vm605_vm2, %v3441_v34, %v3446_v59  ;;  %v3471_v60 = vmul.f32 %v6123_v21, %v7926_v31  ;;  %v7973_v24 = vld [vmem:[#allocation248_spill] sm:$0xff] }
 0x371   : > { %3450 = vrot.lane.b32.xlu0 %v3442_v48, %s4406_s1  ;;  %7970 = vst [vmem:[#allocation256_spill] sm:$0xff] %v6661_v38  ;;  %v3480_v48 = vrot.slane %v3469_v47, 2  ;;  %v680_v18 = vsel %vm675_vm4, %v677_v23, %v679_v37  ;;  %v711_v4 = vrot.slane %v705_v8, 4  ;;  %v746_v0 = vrot.slane %v739_v1, 5  ;;  %v7974_v47 = vld [vmem:[#allocation140_spill] sm:$0xff]  ;;  %v7976_v1 = vld [vmem:[#allocation233_spill] sm:$0xff] }
 0x372   : > { %v617_v17 = vmul.f32 %v6072_v9, %v6227_v7  ;;  %v684_v43 = vadd.f32 %v680_v18, %v649_v11  ;;  %v613_v34 = vadd.f32 %v608_v63, %v7973_v24  ;;  %v7975_v31 = vrot.slane %v7974_v47, 2  ;;  %v7979_v24 = vld [vmem:[#allocation170_spill] sm:$0xff] }
 0x373   : > { %v6668_v46 = vpop.permute.xlu0 %2901  ;;  %v714_v59 = vsel %vm233_vm0, %v711_v4, %v713_v6  ;;  %v625_v8 = vrot.slane %v618_v3, 1  ;;  %v653_v7 = vmul.f32 %v6174_v35, %v7976_v1  ;;  %v749_v11 = vsel %vm744_vm6, %v746_v0, %v748_v51  ;;  %v7980_v47 = vld [vmem:[#allocation242_spill] sm:$0xff]  ;;  %v7982_v3 = vld [vmem:[#allocation243_spill] sm:$0xff] }
 0x374   : > { %7972 = vst [vmem:[#allocation257_spill] sm:$0xff] %v6668_v46  ;;  %v643_v37 = vsel %vm640_vm3, %v7975_v31, %v642_v22  ;;  %v3485_v63 = vrot.slane %v3471_v60, 2  ;;  %v3506_v6 = vmul.f32 %v6072_v9, %v7979_v24  ;;  %v7981_v19 = vrot.slane %v7980_v47, 3  ;;  %v7984_v60 = vld [vmem:[#allocation245_spill] sm:$0xff] }
 0x375   : > { %3454 = vrot.lane.b32.xlu0 %v3447_v54, %s4406_s1  ;;  %v7978_v54 = vrot.slane %v6428_v5, 2  ;;  %v7983_v31 = vrot.slane %v7982_v3, 4  ;;  %v652_v51 = vmul.f32 %v6072_v9, %v7976_v1  ;;  %v718_v5 = vadd.f32 %v714_v59, %v684_v43  ;;  %v7987_v3 = vld [vmem:[#allocation234_spill] sm:$0xff]  ;;  %v7990_v43 = vld [vmem:[#allocation184_spill] sm:$0xff] }
 0x376   : > { %v678_v22 = vsel %vm675_vm4, %v7981_v19, %v677_v23  ;;  %v648_v47 = vadd.f32 %v643_v37, %v613_v34  ;;  %v7986_v45 = vstv %s6162_s4  ;;  %v863_v59 = vmul.f32 %v6174_v35, %v7990_v43 }
 0x377   : > { %v6686_v14 = vpop.permute.xlu0 %2905  ;;  %v3481_v18 = vsel %vm640_vm3, %v7978_v54, %v3480_v48  ;;  %v6700_v50 = vsel %vm233_vm0, %v7983_v31, %v711_v4  ;;  %v7985_v54 = vrot.slane %v7984_v60, 5  ;;  %v593_v23 = vmul.f32 %v6072_v9, %v7986_v45  ;;  %v7988_v31 = vld [vmem:[#allocation175_spill] sm:$0xff] }
 0x378   : > { %7977 = vst [vmem:[#allocation248_spill] sm:$0xff] %v6686_v14  ;;  %v623_v14 = vrot.slane %v617_v17, 1  ;;  %v660_v4 = vrot.slane %v653_v7, 2  ;;  %v687_v17 = vmul.f32 %v6072_v9, %v7987_v3  ;;  %v832_v1 = vmul.f32 %v6123_v21, %v7988_v31 }
 0x379   : > { %3489 = vrot.lane.b32.xlu0 %v3481_v18, %s4406_s1  ;;  %v6708_v46 = vsel %vm744_vm6, %v7985_v54, %v746_v0  ;;  %v3486_v0 = vsel %vm640_vm3, %v3480_v48, %v3485_v63  ;;  %v3517_v34 = vrot.slane %v3506_v6, 2  ;;  %v3508_v45 = vmul.f32 %v6174_v35, %v7979_v24  ;;  %v7995_v6 = vld [vmem:[#allocation238_spill] sm:$0xff] }
 0x37a   : > { %v626_v19 = vsel %vm605_vm2, %v623_v14, %v625_v8  ;;  %v7991_v37 = vrot.slane %v6655_v30, 6  ;;  %v7992_v8 = vld [vmem:[#allocation246_spill] sm:$0xff]  ;;  %v658_v54 = vrot.slane %v652_v51, 2  ;;  %v688_v31 = vmul.f32 %v6174_v35, %v7987_v3 }
 0x37b   : > { %v6718_v18 = vpop.permute.xlu0 %2944  ;;  %v7993_v7 = vrot.slane %v7992_v8, 6  ;;  %v6739_v48 = vadd.f32 %v749_v11, %v718_v5  ;;  %v6741_v63 = vadd.f32 %v678_v22, %v648_v47  ;;  %v630_v24 = vadd.f32 %v626_v19, %v593_v23  ;;  %v7999_v47 = vld [vmem:[#allocation176_spill] sm:$0xff] }
 0x37c   : > { %7989 = vst [vmem:[#allocation140_spill] sm:$0xff] %v6718_v18  ;;  %v7994_v18 = vld [vmem:[#allocation235_spill] sm:$0xff]  ;;  %v7996_v8 = vrot.slane %v7995_v6, 1  ;;  %v661_v51 = vsel %vm640_vm3, %v658_v54, %v660_v4  ;;  %v846_v41 = vrot.slane %v832_v1, 1  ;;  %v877_v38 = vrot.slane %v863_v59, 1  ;;  %v8000_v4 = vld [vmem:[#allocation236_spill] sm:$0xff] }
 0x37d   : > { %v6730_v60 = vsel %vm779_vm7, %v7993_v7, %v7991_v37  ;;  %v6736_v43 = vmul.f32 %v6072_v9, %v7994_v18  ;;  %3493 = vrot.lane.b32.xlu0 %v3486_v0, %s4406_s1  ;;  %v693_v7 = vrot.slane %v687_v17, 3  ;;  %v722_v3 = vmul.f32 %v6174_v35, %v7994_v18  ;;  %v8001_v18 = vld [vmem:[#allocation237_spill] sm:$0xff]  ;;  %v8002_v0 = vld [vmem:[#allocation179_spill] sm:$0xff]  ;;  %v8003_v6 = vld [vmem:[#allocation192_spill] sm:$0xff] }
 0x37e   : > { %v624_v37 = vsel %vm605_vm2, %v7996_v8, %v623_v14  ;;  %v7998_v11 = vrot.slane %v6439_v13, 2  ;;  %v3522_v5 = vrot.slane %v3508_v45, 2  ;;  %v3545_v23 = vmul.f32 %v6103_v62, %v7999_v47  ;;  %v8004_v8 = vld [vmem:[#allocation239_spill] sm:$0xff] }
 0x37f   : > { %v6749_v57 = vpop.permute.xlu0 %2948  ;;  %v695_v19 = vrot.slane %v688_v31, 3  ;;  %v727_v14 = vrot.slane %v6736_v43, 4  ;;  %v6759_v17 = vmul.f32 %v6072_v9, %v8000_v4  ;;  %v629_v1 = vadd.f32 %v624_v37, %v8001_v18 }
 0x380   : > { %7997 = vst [vmem:[#allocation233_spill] sm:$0xff] %v6749_v57  ;;  %v3518_v22 = vsel %vm640_vm3, %v7998_v11, %v3517_v34  ;;  %v665_v59 = vadd.f32 %v661_v51, %v630_v24  ;;  %v6765_v13 = vmul.f32 %v6174_v35, %v8000_v4  ;;  %v896_v45 = vmul.f32 %v6123_v21, %v8002_v0  ;;  %v8005_v57 = vld [vmem:[#allocation241_spill] sm:$0xff]  ;;  %v8007_v24 = vld [vmem:[#allocation252_spill] sm:$0xff] }
 0x381   : > { %3526 = vrot.lane.b32.xlu0 %v3518_v22, %s4406_s1  ;;  %v927_v31 = vmul.f32 %v6174_v35, %v8003_v6  ;;  %v729_v43 = vrot.slane %v722_v3, 4  ;;  %v6773_v11 = vmul.f32 %v6072_v9, %v8004_v8  ;;  %v8006_v37 = vrot.slane %v8005_v57, 2  ;;  %v8011_v57 = vld [vmem:[#allocation180_spill] sm:$0xff] }
 0x382   : > { %v8008_v51 = vrot.slane %v8007_v24, 1  ;;  %v8010_v0 = vrot.slane %v6387_v44, 1  ;;  %v3523_v3 = vsel %vm640_vm3, %v3517_v34, %v3522_v5  ;;  %v3556_v6 = vrot.slane %v3545_v23, 3 }
 0x383   : > { %v659_v22 = vsel %vm640_vm3, %v8006_v37, %v658_v54  ;;  %v6781_v18 = vpop.permute.xlu0 %2985  ;;  %v3547_v55 = vmul.f32 %v6123_v21, %v7999_v47  ;;  %v810_v54 = vmul.f32 %v6103_v62, %v8011_v57  ;;  %v8012_v37 = vld [vmem:[#allocation181_spill] sm:$0xff]  ;;  %v6798_v44 = vmul.f32 %v6174_v35, %v8004_v8  ;;  %v8014_v57 = vld [vmem:[#allocation244_spill] sm:$0xff] }
 0x384   : > { %v847_v4 = vsel %vm605_vm2, %v8008_v51, %v846_v41  ;;  %8009 = vst [vmem:[#allocation170_spill] sm:$0xff] %v6781_v18  ;;  %v878_v58 = vsel %vm605_vm2, %v8010_v0, %v877_v38  ;;  %v664_v2 = vadd.f32 %v659_v22, %v629_v1  ;;  %v960_v24 = vmul.f32 %v6123_v21, %v8012_v37  ;;  %v8013_v41 = vld [vmem:[#allocation191_spill] sm:$0xff] }
 0x385   : > { %v819_v51 = vmul.f32 %v6072_v9, %v8013_v41  ;;  %3530 = vrot.lane.b32.xlu0 %v3523_v3, %s4406_s1  ;;  %v910_v38 = vrot.slane %v896_v45, 2  ;;  %v941_v34 = vrot.slane %v927_v31, 2  ;;  %v991_v5 = vmul.f32 %v6174_v35, %v7916_v28  ;;  %v8017_v41 = vld [vmem:[#allocation185_spill] sm:$0xff] }
 0x386   : > { %v696_v47 = vsel %vm675_vm4, %v693_v7, %v695_v19  ;;  %v762_v23 = vrot.slane %v6759_v17, 5  ;;  %v856_v1 = vadd.f32 %v847_v4, %v810_v54  ;;  %v8015_v37 = vrot.slane %v8014_v57, 3  ;;  %v8018_v4 = vld [vmem:[#allocation187_spill] sm:$0xff] }
 0x387   : > { %v887_v22 = vadd.f32 %v878_v58, %v819_v51  ;;  %v6804_v0 = vpop.permute.xlu0 %2989  ;;  %v8016_v8 = vrot.slane %v6448_v12, 3  ;;  %v3561_v31 = vrot.slane %v3547_v55, 3  ;;  %v3582_v28 = vmul.f32 %v6072_v9, %v8017_v41 }
 0x388   : > { %v694_v3 = vsel %vm675_vm4, %v8015_v37, %v693_v7  ;;  %v764_v19 = vrot.slane %v6765_v13, 5  ;;  %v974_v17 = vrot.slane %v960_v24, 3  ;;  %v1024_v58 = vmul.f32 %v6123_v21, %v7910_v16 }
 0x389   : > { %v3557_v45 = vsel %vm675_vm4, %v8016_v8, %v3556_v6  ;;  %v699_v18 = vadd.f32 %v694_v3, %v664_v2  ;;  %v8019_v54 = vrot.slane %v8018_v4, 2  ;;  %v8020_v12 = vrot.slane %v6443_v40, 2  ;;  %v8021_v3 = vld [vmem:[#allocation247_spill] sm:$0xff] }
 0x38a   : > { %3565 = vrot.lane.b32.xlu0 %v3557_v45, %s4406_s1  ;;  %v1005_v51 = vrot.slane %v991_v5, 3  ;;  %v1055_v57 = vmul.f32 %v6174_v35, %v5918_v39  ;;  %v700_v13 = vadd.f32 %v696_v47, %v665_v59  ;;  %v730_v2 = vsel %vm233_vm0, %v727_v14, %v729_v43  ;;  %v6839_v47 = vpop.permute.xlu1 %3352 }
 0x38b   : > { %v911_v7 = vsel %vm640_vm3, %v8019_v54, %v910_v38  ;;  %v942_v55 = vsel %vm640_vm3, %v8020_v12, %v941_v34  ;;  %v6827_v16 = vpop.permute.xlu0 %3028  ;;  %v8022_v8 = vrot.slane %v8021_v3, 4  ;;  %v3562_v38 = vsel %vm675_vm4, %v3556_v6, %v3561_v31 }
 0x38c   : > { %v920_v24 = vadd.f32 %v911_v7, %v856_v1  ;;  %v951_v37 = vadd.f32 %v942_v55, %v887_v22  ;;  %v3593_v40 = vrot.slane %v3582_v28, 3  ;;  %v3584_v34 = vmul.f32 %v6174_v35, %v8017_v41  ;;  %v8028_v7 = vld [vmem:[#allocation196_spill] sm:$0xff] }
 0x38d   : > { %v728_v45 = vsel %vm233_vm0, %v8022_v8, %v727_v14  ;;  %v717_v39 = vadd.f32 %v6700_v50, %v6741_v63  ;;  %v1038_v59 = vrot.slane %v1024_v58, 4  ;;  %v1088_v43 = vmul.f32 %v6123_v21, %v7911_v25  ;;  %v8025_v58 = vld [vmem:[#allocation249_spill] sm:$0xff] }
 0x38e   : > { %v733_v5 = vadd.f32 %v728_v45, %v699_v18  ;;  %3569 = vrot.lane.b32.xlu0 %v3562_v38, %s4406_s1  ;;  %v8023_v14 = vrot.slane %v6433_v49, 3  ;;  %v8024_v1 = vrot.slane %v6483_v36, 3  ;;  %v1069_v31 = vrot.slane %v1055_v57, 4  ;;  %v6875_v45 = vpop.permute.xlu1 %3356  ;;  %v8031_v38 = vld [vmem:[#allocation251_spill] sm:$0xff] }
 0x38f   : > { %v1119_v50 = vmul.f32 %v6174_v35, %v7919_v26  ;;  %v734_v63 = vadd.f32 %v730_v2, %v700_v13  ;;  %v797_v25 = vrot.slane %v6773_v11, 6  ;;  %v6851_v28 = vpop.permute.xlu0 %3032  ;;  %v8026_v4 = vrot.slane %v8025_v58, 5  ;;  %v8038_v58 = vld [vmem:[#allocation53_spill] sm:$0xff] }
 0x390   : > { %v975_v6 = vsel %vm675_vm4, %v8023_v14, %v974_v17  ;;  %v1006_v22 = vsel %vm675_vm4, %v8024_v1, %v1005_v51  ;;  %v8027_v17 = vrot.slane %v6458_v56, 3  ;;  %v3598_v54 = vrot.slane %v3584_v34, 3 }
 0x391   : > { %v984_v18 = vadd.f32 %v975_v6, %v920_v24  ;;  %v1015_v41 = vadd.f32 %v1006_v22, %v951_v37  ;;  %v763_v49 = vsel %vm744_vm6, %v8026_v4, %v762_v23  ;;  %v3621_v12 = vmul.f32 %v6103_v62, %v8028_v7 }
 0x392   : > { %v3594_v36 = vsel %vm675_vm4, %v8027_v17, %v3593_v40  ;;  %v752_v26 = vadd.f32 %v6708_v46, %v717_v39  ;;  %v8029_v11 = vrot.slane %v6476_v33, 4  ;;  %v1152_v51 = vmul.f32 %v6123_v21, %v7912_v32 }
 0x393   : > { %v768_v57 = vadd.f32 %v763_v49, %v733_v5  ;;  %3602 = vrot.lane.b32.xlu0 %v3594_v36, %s4406_s1  ;;  %v1102_v13 = vrot.slane %v1088_v43, 5  ;;  %v8030_v56 = vrot.slane %v6527_v61, 4  ;;  %v1133_v24 = vrot.slane %v1119_v50, 5  ;;  %v6877_v32 = vpop.permute.xlu0 %3069 }
 0x394   : > { %v1039_v55 = vsel %vm233_vm0, %v8029_v11, %v1038_v59  ;;  %v1183_v37 = vmul.f32 %v6174_v35, %v5957_v29  ;;  %v765_v46 = vsel %vm744_vm6, %v762_v23, %v764_v19  ;;  %v799_v33 = vrot.slane %v6798_v44, 6  ;;  %v8043_v11 = vld [vmem:[#allocation56_spill] sm:$0xff] }
 0x395   : > { %v1070_v2 = vsel %vm233_vm0, %v8030_v56, %v1069_v31  ;;  %v1048_v3 = vadd.f32 %v1039_v55, %v984_v18  ;;  %v8032_v34 = vrot.slane %v8031_v38, 6  ;;  %v3599_v39 = vsel %vm675_vm4, %v3593_v40, %v3598_v54  ;;  %v8048_v56 = vld [vmem:[#allocation254_spill] sm:$0xff] }
 0x396   : > { %v1079_v8 = vadd.f32 %v1070_v2, %v1015_v41  ;;  %v3632_v59 = vrot.slane %v3621_v12, 4  ;;  %v3623_v29 = vmul.f32 %v6123_v21, %v8028_v7  ;;  %v769_v43 = vadd.f32 %v765_v46, %v734_v63  ;;  %v8041_v7 = vld [vmem:[#allocation48_spill] sm:$0xff] }
 0x397   : > { %v798_v61 = vsel %vm779_vm7, %v8032_v34, %v797_v25  ;;  %v787_v23 = vadd.f32 %v6730_v60, %v752_v26  ;;  %v1166_v44 = vrot.slane %v1152_v51, 6  ;;  %3606 = vrot.lane.b32.xlu0 %v3599_v39, %s4406_s1  ;;  %v8033_v5 = vrot.slane %v6659_v42, 6  ;;  %v6900_v42 = vpop.permute.xlu0 %3073  ;;  %v6915_v26 = vpop.permute.xlu1 %3376  ;;  %v8044_v51 = vld [vmem:[#allocation16_spill] sm:$0xff]  ;;  %v8053_v39 = vld [vmem:[#allocation46_spill] sm:$0xff] }
 0x398   : > { %v803_v19 = vadd.f32 %v798_v61, %v768_v57  ;;  %v8034_v14 = vrot.slane %v6655_v30, 6  ;;  %v8035_v1 = vrot.slane %v6514_v53, 5  ;;  %v8036_v22 = vrot.slane %v6563_v10, 5  ;;  %v8037_v30 = vld [vmem:[#allocation43_spill] sm:$0xff]  ;;  %v8045_v57 = vld [vmem:[#allocation58_spill] sm:$0xff] }
 0x399   : > { %v1197_v50 = vrot.slane %v1183_v37, 6  ;;  %v800_v63 = vsel %vm779_vm7, %v797_v25, %v799_v33  ;;  %v1733_v4 = vsel %vm1228_vm8, %v8038_v58, %v8037_v30  ;;  %v8039_v53 = vrot.slane %v6462_v20, 4  ;;  %v8042_v20 = vld [vmem:[#allocation45_spill] sm:$0xff] }
 0x39a   : > { %v784_v6 = vsel %vm779_vm7, %v8034_v14, %v8033_v5  ;;  %v1103_v40 = vsel %vm744_vm6, %v8035_v1, %v1102_v13  ;;  %v1134_v31 = vsel %vm744_vm6, %v8036_v22, %v1133_v24  ;;  %v3637_v10 = vrot.slane %v3623_v29, 4  ;;  %v8046_v13 = vld [vmem:[#allocation18_spill] sm:$0xff]  ;;  %v8050_v37 = vld [vmem:[#allocation17_spill] sm:$0xff]  ;;  %v8055_v5 = vld [vmem:[#allocation256_spill] sm:$0xff] }
 0x39b   : > { %v788_v60 = vadd.f32 %v784_v6, %v6739_v48  ;;  %v1112_v18 = vadd.f32 %v1103_v40, %v1048_v3  ;;  %v1143_v41 = vadd.f32 %v1134_v31, %v1079_v8  ;;  %v3633_v49 = vsel %vm233_vm0, %v8039_v53, %v3632_v59  ;;  %v8051_v3 = vld [vmem:[#allocation44_spill] sm:$0xff]  ;;  %v8052_v8 = vld [vmem:[#allocation62_spill] sm:$0xff]  ;;  %v6936_v61 = vpop.permute.xlu0 %3112  ;;  %v8054_v29 = vld [vmem:[#allocation65_spill] sm:$0xff] }
 0x39c   : > { %v3658_v17 = vmul.f32 %v6072_v9, %v7936_v15  ;;  %v804_v36 = vadd.f32 %v800_v63, %v769_v43  ;;  %v1233_v48 = vadd.f32 %v6589_v27, %v787_v23  ;;  %v8040_v25 = vrot.slane %v6548_v52, 6  ;;  %3641 = vrot.lane.b32.xlu0 %v3633_v49, %s4406_s1  ;;  %v8047_v27 = vld [vmem:[#allocation60_spill] sm:$0xff]  ;;  %v8056_v40 = vld [vmem:[#allocation207_spill] sm:$0xff]  ;;  %v8061_v30 = vld [vmem:[#allocation21_spill] sm:$0xff] }
 0x39d   : > { %v1256_v12 = vadd.f32 %v8041_v7, %v803_v19  ;;  %v1760_v55 = vsel %vm1228_vm8, %v8043_v11, %v8042_v20  ;;  %v1230_v9 = vsel %vm1228_vm8, %v8045_v57, %v8044_v51  ;;  %v1253_v52 = vsel %vm1228_vm8, %v8047_v27, %v8046_v13  ;;  %v8057_v31 = vld [vmem:[#allocation19_spill] sm:$0xff]  ;;  %v8064_v49 = vld [vmem:[#allocation74_spill] sm:$0xff]  ;;  %v8067_v11 = vld [vmem:[#allocation76_spill] sm:$0xff] }
 0x39e   : > { %v1167_v54 = vsel %vm779_vm7, %v8040_v25, %v1166_v44  ;;  %v8049_v2 = vrot.slane %v8048_v56, 6  ;;  %v6931_v46 = vadd.f32 %v1733_v4, %v8050_v37  ;;  %v1734_v38 = vsel %vm1228_vm8, %v8052_v8, %v8051_v3  ;;  %v4249_v25 = vld [vmem:[#allocation4 + $0x40] sm:$0xff]  ;;  %v8066_v20 = vld [vmem:[#allocation23_spill] sm:$0xff]  ;;  %v8070_v37 = vld [vmem:[#allocation24_spill] sm:$0xff] }
 0x39f   : > { %v1176_v33 = vadd.f32 %v1167_v54, %v1112_v18  ;;  %v1761_v43 = vsel %vm1228_vm8, %v8054_v29, %v8053_v39  ;;  %v3638_v23 = vsel %vm233_vm0, %v3632_v59, %v3637_v10  ;;  %v3669_v44 = vrot.slane %v3658_v17, 4  ;;  %v8059_v18 = vld [vmem:[#allocation20_spill] sm:$0xff]  ;;  %v8060_v59 = vld [vmem:[#allocation70_spill] sm:$0xff]  ;;  %v6968_v17 = vpop.permute.xlu1 %3380  ;;  %v8068_v51 = vld [vmem:[#allocation149_spill] sm:$0xff] }
 0x3a0   : > { %v1198_v24 = vsel %vm779_vm7, %v8049_v2, %v1197_v50  ;;  %v3660_v19 = vmul.f32 %v6174_v35, %v7936_v15  ;;  %v6945_v14 = vadd.f32 %v1760_v55, %v8055_v5  ;;  %v1234_v6 = vadd.f32 %v1230_v9, %v788_v60  ;;  %3645 = vrot.lane.b32.xlu0 %v3638_v23, %s4406_s1  ;;  %v8058_v50 = vld [vmem:[#allocation67_spill] sm:$0xff]  ;;  %v8062_v15 = vld [vmem:[#allocation72_spill] sm:$0xff]  ;;  %v8072_v8 = vld [vmem:[#allocation25_spill] sm:$0xff] }
 0x3a1   : > { %v1207_v34 = vadd.f32 %v1198_v24, %v1143_v41  ;;  %v1257_v1 = vadd.f32 %v1253_v52, %v804_v36  ;;  %v3697_v22 = vmul.f32 %v6103_v62, %v8056_v40  ;;  %v1291_v63 = vsel %vm1228_vm8, %v8058_v50, %v8057_v31  ;;  %v8063_v62 = vld [vmem:[#allocation22_spill] sm:$0xff]  ;;  %v6970_v36 = vpop.permute.xlu0 %3116  ;;  %v8065_v54 = vld [vmem:[#allocation212_spill] sm:$0xff]  ;;  %v4250_v29 = vld [vmem:[#allocation4 + $0x10] sm:$0xff] }
 0x3a2   : > { %v1292_v41 = vsel %vm1228_vm8, %v8060_v59, %v8059_v18  ;;  %v1328_v58 = vsel %vm1228_vm8, %v8062_v15, %v8061_v30  ;;  %v3699_v60 = vmul.f32 %v6123_v21, %v8056_v40  ;;  %v6961_v4 = vadd.f32 %v1734_v38, %v1176_v33  ;;  %v8071_v33 = vld [vmem:[#allocation78_spill] sm:$0xff]  ;;  %v8073_v38 = vld [vmem:[#allocation80_spill] sm:$0xff] }
 0x3a3   : > { %v6963_v53 = vadd.f32 %v1761_v43, %v1207_v34  ;;  %v1329_v10 = vsel %vm1228_vm8, %v8064_v49, %v8063_v62  ;;  %v3734_v7 = vmul.f32 %v4249_v25, %v8065_v54  ;;  %v1367_v55 = vsel %vm1228_vm8, %v8067_v11, %v8066_v20  ;;  %v8074_v43 = vld [vmem:[#allocation217_spill] sm:$0xff]  ;;  %v8075_v40 = vld [vmem:[#allocation26_spill] sm:$0xff]  ;;  %v6998_v15 = vpop.permute.xlu1 %3415  ;;  %v8080_v62 = vld [vmem:[#allocation27_spill] sm:$0xff] }
 0x3a4   : > { %v8069_v57 = vrot.slane %v8068_v51, 4  ;;  %v3674_v13 = vrot.slane %v3660_v19, 4  ;;  %v3736_v27 = vmul.f32 %v6174_v35, %v8065_v54  ;;  %v1295_v52 = vadd.f32 %v1291_v63, %v1233_v48  ;;  %v8077_v18 = vld [vmem:[#allocation222_spill] sm:$0xff]  ;;  %v8081_v49 = vld [vmem:[#allocation84_spill] sm:$0xff] }
 0x3a5   : > { %v1296_v56 = vadd.f32 %v1292_v41, %v1234_v6  ;;  %v1332_v2 = vadd.f32 %v1328_v58, %v1256_v12  ;;  %v3708_v24 = vrot.slane %v3697_v22, 5  ;;  %v1368_v3 = vsel %vm1228_vm8, %v8071_v33, %v8070_v37  ;;  %v6989_v48 = vpop.permute.xlu0 %3153  ;;  %v8076_v22 = vld [vmem:[#allocation82_spill] sm:$0xff]  ;;  %v8085_v51 = vld [vmem:[#allocation88_spill] sm:$0xff] }
 0x3a6   : > { %v3670_v9 = vsel %vm233_vm0, %v8069_v57, %v3669_v44  ;;  %v1404_v34 = vsel %vm1228_vm8, %v8073_v38, %v8072_v8  ;;  %v3713_v39 = vrot.slane %v3699_v60, 5  ;;  %v3773_v23 = vmul.f32 %v4250_v29, %v8074_v43  ;;  %v8083_v54 = vld [vmem:[#allocation86_spill] sm:$0xff]  ;;  %v8090_v33 = vld [vmem:[#allocation32_spill] sm:$0xff]  ;;  %v8092_v29 = vld [vmem:[#allocation33_spill] sm:$0xff] }
 0x3a7   : > { %3678 = vrot.lane.b32.xlu0 %v3670_v9, %s4406_s1  ;;  %v1333_v19 = vadd.f32 %v1329_v10, %v1257_v1  ;;  %v1371_v5 = vadd.f32 %v1367_v55, %v1295_v52  ;;  %v3745_v12 = vrot.slane %v3734_v7, 5  ;;  %v3775_v6 = vmul.f32 %v6123_v21, %v8074_v43  ;;  %v8078_v1 = vld [vmem:[#allocation155_spill] sm:$0xff]  ;;  %v8082_v10 = vld [vmem:[#allocation28_spill] sm:$0xff]  ;;  %v8084_v55 = vld [vmem:[#allocation29_spill] sm:$0xff] }
 0x3a8   : > { %v1405_v31 = vsel %vm1228_vm8, %v8076_v22, %v8075_v40  ;;  %v3675_v50 = vsel %vm233_vm0, %v3669_v44, %v3674_v13  ;;  %v3750_v63 = vrot.slane %v3736_v27, 5  ;;  %v3810_v59 = vmul.f32 %v4249_v25, %v8077_v18  ;;  %v8093_v43 = vld [vmem:[#allocation96_spill] sm:$0xff]  ;;  %v8094_v40 = vld [vmem:[#allocation35_spill] sm:$0xff] }
 0x3a9   : > { %v1372_v41 = vadd.f32 %v1368_v3, %v1296_v56  ;;  %v1408_v30 = vadd.f32 %v1404_v34, %v1332_v2  ;;  %v8079_v58 = vrot.slane %v8078_v1, 5  ;;  %v3812_v21 = vmul.f32 %v6174_v35, %v8077_v18  ;;  %v7018_v9 = vpop.permute.xlu0 %3157  ;;  %v8086_v35 = vld [vmem:[#allocation160_spill] sm:$0xff]  ;;  %v8088_v56 = vld [vmem:[#allocation31_spill] sm:$0xff]  ;;  %v8097_v18 = vld [vmem:[#allocation102_spill] sm:$0xff] }
 0x3aa   : > { %v1443_v44 = vsel %vm1228_vm8, %v8081_v49, %v8080_v62  ;;  %v1444_v25 = vsel %vm1228_vm8, %v8083_v54, %v8082_v10  ;;  %v3714_v7 = vsel %vm744_vm6, %v3708_v24, %v3713_v39  ;;  %v3784_v20 = vrot.slane %v3773_v23, 6  ;;  %v8089_v2 = vld [vmem:[#allocation92_spill] sm:$0xff]  ;;  %v8102_v10 = vld [vmem:[#allocation39_spill] sm:$0xff] }
 0x3ab   : > { %3682 = vrot.lane.b32.xlu0 %v3675_v50, %s4406_s1  ;;  %v3709_v60 = vsel %vm744_vm6, %v8079_v58, %v3708_v24  ;;  %v7013_v11 = vadd.f32 %v1405_v31, %v1333_v19  ;;  %v1480_v57 = vsel %vm1228_vm8, %v8085_v51, %v8084_v55  ;;  %v8087_v13 = vrot.slane %v8086_v35, 5  ;;  %v8091_v24 = vld [vmem:[#allocation94_spill] sm:$0xff]  ;;  %v8095_v22 = vld [vmem:[#allocation100_spill] sm:$0xff]  ;;  %v8100_v58 = vld [vmem:[#allocation37_spill] sm:$0xff] }
 0x3ac   : > { %v3789_v52 = vrot.slane %v3775_v6, 6  ;;  %v1519_v37 = vsel %vm1228_vm8, %v8089_v2, %v8088_v56  ;;  %v1520_v3 = vsel %vm1228_vm8, %v8091_v24, %v8090_v33  ;;  %v7030_v8 = vsel %vm744_vm6, %v3745_v12, %v3750_v63  ;;  %v8096_v50 = vld [vmem:[#allocation36_spill] sm:$0xff]  ;;  %v8098_v63 = vld [vmem:[#allocation165_spill] sm:$0xff]  ;;  %v8104_v55 = vld [vmem:[#allocation47_spill] sm:$0xff] }
 0x3ad   : > { %v3746_v27 = vsel %vm744_vm6, %v8087_v13, %v3745_v12  ;;  %v3821_v38 = vrot.slane %v3810_v59, 6  ;;  %v1447_v34 = vadd.f32 %v1443_v44, %v1371_v5  ;;  %v1448_v39 = vadd.f32 %v1444_v25, %v1372_v41  ;;  %v8101_v62 = vld [vmem:[#allocation104_spill] sm:$0xff]  ;;  %v8106_v35 = vld [vmem:[#allocation154_spill] sm:$0xff]  ;;  %v8108_v33 = vld [vmem:[#allocation49_spill] sm:$0xff] }
 0x3ae   : > { %v1556_v23 = vsel %vm1228_vm8, %v8093_v43, %v8092_v29  ;;  %v3826_v19 = vrot.slane %v3812_v21, 6  ;;  %v1484_v6 = vadd.f32 %v1480_v57, %v1408_v30  ;;  %v1595_v31 = vsel %vm1228_vm8, %v8095_v22, %v8094_v40  ;;  %v7050_v30 = vpop.permute.xlu1 %3419  ;;  %v7052_v21 = vpop.permute.xlu0 %3196  ;;  %v8103_v54 = vld [vmem:[#allocation108_spill] sm:$0xff]  ;;  %v8109_v24 = vld [vmem:[#allocation118_spill] sm:$0xff] }
 0x3af   : > { %3717 = vrot.lane.b32.xlu0 %v3709_v60, %s4406_s1  ;;  %v1596_v12 = vsel %vm1228_vm8, %v8097_v18, %v8096_v50  ;;  %v8099_v59 = vrot.slane %v8098_v63, 6  ;;  %v1523_v41 = vadd.f32 %v1519_v37, %v1447_v34  ;;  %v1524_v1 = vadd.f32 %v1520_v3, %v1448_v39  ;;  %v8105_v51 = vld [vmem:[#allocation116_spill] sm:$0xff]  ;;  %v8110_v34 = vld [vmem:[#allocation50_spill] sm:$0xff]  ;;  %v8118_v63 = vld [vmem:[#allocation41_spill] sm:$0xff] }
 0x3b0   : > { %v1632_v60 = vsel %vm1228_vm8, %v8101_v62, %v8100_v58  ;;  %v7055_v49 = vsel %vm779_vm7, %v3784_v20, %v3789_v52  ;;  %v1560_v44 = vadd.f32 %v1556_v23, %v1484_v6  ;;  %v1671_v25 = vsel %vm1228_vm8, %v8103_v54, %v8102_v10  ;;  %v8111_v39 = vld [vmem:[#allocation120_spill] sm:$0xff]  ;;  %v8112_v43 = vld [vmem:[#allocation54_spill] sm:$0xff]  ;;  %v8121_v58 = vld [vmem:[#allocation127_spill] sm:$0xff] }
 0x3b1   : > { %v7045_v5 = vsel %vm779_vm7, %v8099_v59, %v3784_v20  ;;  %v1803_v57 = vsel %vm1228_vm8, %v8105_v51, %v8104_v55  ;;  %v8107_v13 = vrot.slane %v8106_v35, 6  ;;  %v1599_v2 = vadd.f32 %v1595_v31, %v1523_v41  ;;  %v8113_v23 = vld [vmem:[#allocation124_spill] sm:$0xff]  ;;  %v8115_v31 = vld [vmem:[#allocation110_spill] sm:$0xff]  ;;  %v8124_v54 = vld [vmem:[#allocation61_spill] sm:$0xff] }
 0x3b2   : > { %v7068_v37 = vadd.f32 %v1596_v12, %v1524_v1  ;;  %v7072_v20 = vsel %vm779_vm7, %v3821_v38, %v3826_v19  ;;  %v1636_v52 = vadd.f32 %v1632_v60, %v1560_v44  ;;  %v1804_v3 = vsel %vm1228_vm8, %v8109_v24, %v8108_v33  ;;  %v8114_v22 = vld [vmem:[#allocation40_spill] sm:$0xff]  ;;  %v8117_v50 = vld [vmem:[#allocation122_spill] sm:$0xff]  ;;  %v7092_v12 = vpop.permute.xlu0 %3200  ;;  %v8120_v1 = vld [vmem:[#allocation55_spill] sm:$0xff]  ;;  %v7111_v33 = vpop.permute.xlu1 %3452 }
 0x3b3   : > { %v7066_v56 = vsel %vm779_vm7, %v8107_v13, %v3821_v38  ;;  %3721 = vrot.lane.b32.xlu0 %v3714_v7, %s4406_s1  ;;  %v1844_v29 = vsel %vm1228_vm8, %v8111_v39, %v8110_v34  ;;  %v1887_v6 = vsel %vm1228_vm8, %v8113_v23, %v8112_v43  ;;  %v1675_v40 = vadd.f32 %v1671_v25, %v1599_v2  ;;  %v8116_v19 = vld [vmem:[#allocation52_spill] sm:$0xff]  ;;  %v8122_v60 = vld [vmem:[#allocation57_spill] sm:$0xff]  ;;  %v8126_v35 = vld [vmem:[#allocation59_spill] sm:$0xff] }
 0x3b4   : > { %v7086_v7 = vsel %vm1228_vm8, %v8115_v31, %v8114_v22  ;;  %v1809_v38 = vadd.f32 %v1803_v57, %v6931_v46  ;;  %v1845_v18 = vsel %vm1228_vm8, %v8117_v50, %v8116_v19  ;;  %v8119_v59 = vld [vmem:[#allocation112_spill] sm:$0xff]  ;;  %v1888_v62 = vsel %vm1228_vm8, %v8121_v58, %v8120_v1  ;;  %v8123_v44 = vld [vmem:[#allocation129_spill] sm:$0xff]  ;;  %v8125_v46 = vld [vmem:[#allocation134_spill] sm:$0xff] }
 0x3b5   : > { %v1708_v41 = vsel %vm1228_vm8, %v8119_v59, %v8118_v63  ;;  %v1928_v10 = vsel %vm1228_vm8, %v8123_v44, %v8122_v60  ;;  %v1971_v25 = vsel %vm1228_vm8, %v8125_v46, %v8124_v54  ;;  %v1811_v55 = vadd.f32 %v1804_v3, %v6961_v4  ;;  %v8127_v13 = vld [vmem:[#allocation132_spill] sm:$0xff]  ;;  %v8128_v34 = vld [vmem:[#allocation63_spill] sm:$0xff]  ;;  %v8129_v39 = vld [vmem:[#allocation137_spill] sm:$0xff] }
 0x3b6   : > { %v1850_v51 = vadd.f32 %v1844_v29, %v6945_v14  ;;  %v1893_v57 = vadd.f32 %v1887_v6, %v1809_v38  ;;  %v1929_v2 = vsel %vm1228_vm8, %v8127_v13, %v8126_v35  ;;  %v1852_v24 = vadd.f32 %v1845_v18, %v6963_v53  ;;  %v8130_v23 = vld [vmem:[#allocation64_spill] sm:$0xff]  ;;  %v8131_v22 = vld [vmem:[#allocation139_spill] sm:$0xff]  ;;  %v8134_v19 = vld [vmem:[#allocation66_spill] sm:$0xff]  ;;  %v7127_v53 = vpop.permute.xlu0 %3237 }
 0x3b7   : > { %3754 = vrot.lane.b32.xlu0 %v3746_v27, %s4406_s1  ;;  %v1972_v43 = vsel %vm1228_vm8, %v8129_v39, %v8128_v34  ;;  %v2012_v4 = vsel %vm1228_vm8, %v8131_v22, %v8130_v23  ;;  %v8132_v14 = vld [vmem:[#allocation68_spill] sm:$0xff]  ;;  %v1895_v6 = vadd.f32 %v1888_v62, %v1811_v55  ;;  %v8135_v50 = vld [vmem:[#allocation142_spill] sm:$0xff]  ;;  %v1712_v18 = vadd.f32 %v1708_v41, %v1636_v52  ;;  %v8136_v59 = vld [vmem:[#allocation69_spill] sm:$0xff] }
 0x3b8   : > { %v8133_v3 = vld [vmem:[#allocation144_spill] sm:$0xff]  ;;  %v1934_v31 = vadd.f32 %v1928_v10, %v1850_v51  ;;  %v1977_v38 = vadd.f32 %v1971_v25, %v1893_v57  ;;  %v2013_v27 = vsel %vm1228_vm8, %v8135_v50, %v8134_v19  ;;  %v1936_v63 = vadd.f32 %v1929_v2, %v1852_v24  ;;  %v8137_v1 = vld [vmem:[#allocation146_spill] sm:$0xff]  ;;  %v8138_v60 = vld [vmem:[#allocation75_spill] sm:$0xff] }
 0x3b9   : > { %v2055_v29 = vsel %vm1228_vm8, %v8133_v3, %v8132_v14  ;;  %v2056_v58 = vsel %vm1228_vm8, %v8137_v1, %v8136_v59  ;;  %v8139_v44 = vld [vmem:[#allocation153_spill] sm:$0xff]  ;;  %v1979_v46 = vadd.f32 %v1972_v43, %v1895_v6  ;;  %v8140_v25 = vld [vmem:[#allocation71_spill] sm:$0xff]  ;;  %v8141_v55 = vld [vmem:[#allocation148_spill] sm:$0xff] }
 0x3ba   : > { %v2139_v54 = vsel %vm1228_vm8, %v8139_v44, %v8138_v60  ;;  %v2018_v62 = vadd.f32 %v2012_v4, %v1934_v31  ;;  %v2061_v10 = vadd.f32 %v2055_v29, %v1977_v38  ;;  %v2096_v51 = vsel %vm1228_vm8, %v8141_v55, %v8140_v25  ;;  %v8142_v41 = vld [vmem:[#allocation73_spill] sm:$0xff]  ;;  %v8143_v57 = vld [vmem:[#allocation151_spill] sm:$0xff]  ;;  %v8147_v39 = vld [vmem:[#allocation164_spill] sm:$0xff]  ;;  %v7155_v31 = vpop.permute.xlu1 %3456  ;;  %v7157_v38 = vpop.permute.xlu0 %3241 }
 0x3bb   : > { %3758 = vrot.lane.b32.xlu0 %v7030_v8, %s4406_s1  ;;  %v2020_v52 = vadd.f32 %v2013_v27, %v1936_v63  ;;  %v2097_v35 = vsel %vm1228_vm8, %v8143_v57, %v8142_v41  ;;  %v8144_v13 = vld [vmem:[#allocation77_spill] sm:$0xff]  ;;  %v8146_v34 = vld [vmem:[#allocation83_spill] sm:$0xff]  ;;  %v2063_v23 = vadd.f32 %v2056_v58, %v1979_v46  ;;  %v8151_v29 = vld [vmem:[#allocation174_spill] sm:$0xff] }
 0x3bc   : > { %v8145_v2 = vld [vmem:[#allocation157_spill] sm:$0xff]  ;;  %v2223_v43 = vsel %vm1228_vm8, %v8147_v39, %v8146_v34  ;;  %v2145_v22 = vadd.f32 %v2139_v54, %v2061_v10  ;;  %v8148_v4 = vld [vmem:[#allocation79_spill] sm:$0xff]  ;;  %v2102_v19 = vadd.f32 %v2096_v51, %v2018_v62  ;;  %v8153_v27 = vld [vmem:[#allocation162_spill] sm:$0xff] }
 0x3bd   : > { %v2140_v24 = vsel %vm1228_vm8, %v8145_v2, %v8144_v13  ;;  %v8149_v14 = vld [vmem:[#allocation159_spill] sm:$0xff]  ;;  %v8152_v50 = vld [vmem:[#allocation81_spill] sm:$0xff]  ;;  %v8156_v60 = vld [vmem:[#allocation152_spill] sm:$0xff]  ;;  %v2104_v46 = vadd.f32 %v2097_v35, %v2020_v52 }
 0x3be   : > { %v2180_v3 = vsel %vm1228_vm8, %v8149_v14, %v8148_v4  ;;  %v8150_v8 = vld [vmem:[#allocation91_spill] sm:$0xff]  ;;  %v2181_v63 = vsel %vm1228_vm8, %v8153_v27, %v8152_v50  ;;  %v8154_v59 = vld [vmem:[#allocation85_spill] sm:$0xff]  ;;  %v2147_v10 = vadd.f32 %v2140_v24, %v2063_v23  ;;  %v2229_v25 = vadd.f32 %v2223_v43, %v2145_v22  ;;  %v8165_v43 = vld [vmem:[#allocation206_spill] sm:$0xff] }
 0x3bf   : > { %v2294_v6 = vsel %vm2293_vm9, %v8151_v29, %v8150_v8  ;;  %v8155_v1 = vld [vmem:[#allocation167_spill] sm:$0xff]  ;;  %v8157_v44 = vld [vmem:[#allocation193_spill] sm:$0xff]  ;;  %3793 = vrot.lane.b32.xlu0 %v7045_v5, %s4406_s1  ;;  %v2186_v62 = vadd.f32 %v2180_v3, %v2102_v19  ;;  %v2188_v52 = vadd.f32 %v2181_v63, %v2104_v46  ;;  %v3281_v8 = vpop.permute.xlu0 %3280  ;;  %v8168_v50 = vld [vmem:[#allocation156_spill] sm:$0xff] }
 0x3c0   : > { %v2224_v58 = vsel %vm1228_vm8, %v8155_v1, %v8154_v59  ;;  %v2798_v54 = vsel %vm2293_vm9, %v8157_v44, %v8156_v60  ;;  %v8158_v55 = vld [vmem:[#allocation99_spill] sm:$0xff]  ;;  %v8161_v13 = vld [vmem:[#allocation169_spill] sm:$0xff]  ;;  %v2298_v34 = vadd.f32 %v2294_v6, %v1675_v40  ;;  %v8171_v59 = vld [vmem:[#allocation140_spill] sm:$0xff] }
 0x3c1   : > { %v8159_v41 = vld [vmem:[#allocation195_spill] sm:$0xff]  ;;  %v2231_v35 = vadd.f32 %v2224_v58, %v2147_v10  ;;  %v2804_v22 = vadd.f32 %v2798_v54, %v2229_v25  ;;  %v8170_v6 = vld [vmem:[#allocation173_spill] sm:$0xff]  ;;  %v8173_v60 = vld [vmem:[#allocation172_spill] sm:$0xff]  ;;  %v7197_v25 = vpop.permute.xlu1 %3491 }
 0x3c2   : > { %v2356_v57 = vsel %vm2293_vm9, %v8159_v41, %v8158_v55  ;;  %v8160_v51 = vld [vmem:[#allocation87_spill] sm:$0xff]  ;;  %v2952_v63 = vsel %vm2293_vm9, %v8171_v59, %v8170_v6  ;;  %v8172_v58 = vld [vmem:[#allocation89_spill] sm:$0xff]  ;;  %v8175_v46 = vld [vmem:[#allocation216_spill] sm:$0xff] }
 0x3c3   : > { %v2264_v2 = vsel %vm1228_vm8, %v8161_v13, %v8160_v51  ;;  %v8162_v39 = vld [vmem:[#allocation163_spill] sm:$0xff]  ;;  %v2360_v19 = vadd.f32 %v2356_v57, %v2298_v34  ;;  %v2265_v44 = vsel %vm1228_vm8, %v8173_v60, %v8172_v58  ;;  %3797 = vrot.lane.b32.xlu0 %v7055_v49, %s4406_s1  ;;  %v8177_v57 = vld [vmem:[#allocation201_spill] sm:$0xff]  ;;  %v8184_v6 = vld [vmem:[#allocation202_spill] sm:$0xff] }
 0x3c4   : > { %v8163_v4 = vld [vmem:[#allocation15_spill] sm:$0xff]  ;;  %v2270_v1 = vadd.f32 %v2264_v2, %v2186_v62  ;;  %v8178_v62 = vld [vmem:[#allocation166_spill] sm:$0xff]  ;;  %v8186_v59 = vld [vmem:[#allocation233_spill] sm:$0xff] }
 0x3c5   : > { %v2868_v14 = vsel %vm2293_vm9, %v8163_v4, %v8162_v39  ;;  %v8164_v24 = vld [vmem:[#allocation107_spill] sm:$0xff]  ;;  %v8180_v39 = vld [vmem:[#allocation194_spill] sm:$0xff]  ;;  %v8187_v60 = vld [vmem:[#allocation205_spill] sm:$0xff] }
 0x3c6   : > { %v2432_v23 = vsel %vm2293_vm9, %v8165_v43, %v8164_v24  ;;  %v8166_v29 = vld [vmem:[#allocation95_spill] sm:$0xff]  ;;  %v2874_v55 = vadd.f32 %v2868_v14, %v2804_v22  ;;  %v3036_v4 = vsel %vm2293_vm9, %v6827_v16, %v8180_v39  ;;  %v3120_v16 = vsel %vm2293_vm9, %v6936_v61, %v8187_v60  ;;  %v8194_v39 = vld [vmem:[#allocation161_spill] sm:$0xff]  ;;  %v8203_v60 = vld [vmem:[#allocation248_spill] sm:$0xff] }
 0x3c7   : > { %v8167_v5 = vld [vmem:[#allocation183_spill] sm:$0xff]  ;;  %v2436_v13 = vadd.f32 %v2432_v23, %v2360_v19  ;;  %v8185_v19 = vld [vmem:[#allocation177_spill] sm:$0xff]  ;;  %3830 = vrot.lane.b32.xlu0 %v7066_v56, %s4406_s1 }
 0x3c8   : > { %v2317_v3 = vsel %vm2293_vm9, %v8167_v5, %v8166_v29  ;;  %v8169_v27 = vld [vmem:[#allocation199_spill] sm:$0xff]  ;;  %v8182_v29 = vld [vmem:[#allocation225_spill] sm:$0xff]  ;;  %v2958_v49 = vadd.f32 %v2952_v63, %v2874_v55  ;;  %v3285_v5 = vpop.permute.xlu0 %3284  ;;  %v2953_v58 = vsel %vm2293_vm9, %v8186_v59, %v8185_v19 }
 0x3c9   : > { %v2799_v40 = vsel %vm2293_vm9, %v8169_v27, %v8168_v50  ;;  %v8174_v54 = vld [vmem:[#allocation115_spill] sm:$0xff]  ;;  %v2321_v24 = vadd.f32 %v2317_v3, %v1712_v18  ;;  %v8183_v27 = vld [vmem:[#allocation158_spill] sm:$0xff]  ;;  %v2272_v18 = vadd.f32 %v2265_v44, %v2188_v52  ;;  %v8189_v63 = vld [vmem:[#allocation257_spill] sm:$0xff] }
 0x3ca   : > { %v2508_v10 = vsel %vm2293_vm9, %v8175_v46, %v8174_v54  ;;  %v8176_v41 = vld [vmem:[#allocation103_spill] sm:$0xff]  ;;  %v2806_v22 = vadd.f32 %v2799_v40, %v2231_v35  ;;  %v2825_v23 = vsel %vm2293_vm9, %v8184_v6, %v8183_v27  ;;  %v3042_v46 = vadd.f32 %v3036_v4, %v2958_v49  ;;  %v8188_v40 = vld [vmem:[#allocation168_spill] sm:$0xff]  ;;  %v8190_v55 = vld [vmem:[#allocation197_spill] sm:$0xff] }
 0x3cb   : > { %v2393_v51 = vsel %vm2293_vm9, %v8177_v57, %v8176_v41  ;;  %v8179_v2 = vld [vmem:[#allocation51_spill] sm:$0xff]  ;;  %v2512_v50 = vadd.f32 %v2508_v10, %v2436_v13  ;;  %v2909_v10 = vsel %vm2293_vm9, %v8189_v63, %v8188_v40  ;;  %v3037_v41 = vsel %vm2293_vm9, %v6851_v28, %v8190_v55  ;;  %v8192_v52 = vld [vmem:[#allocation133_spill] sm:$0xff]  ;;  %v8193_v44 = vld [vmem:[#allocation230_spill] sm:$0xff]  ;;  %v7236_v13 = vpop.permute.xlu1 %3495  ;;  %3834 = vrot.lane.b32.xlu0 %v7072_v20, %s4406_s1  ;;  %s4022_s1 = sshll.u32 %s4572_s25, 4 }
 0x3cc   : > { %v2869_v34 = vsel %vm2293_vm9, %v8179_v2, %v8178_v62  ;;  %v8181_v43 = vld [vmem:[#allocation123_spill] sm:$0xff]  ;;  %v2397_v3 = vadd.f32 %v2393_v51, %v2321_v24  ;;  %v2660_v51 = vsel %vm2293_vm9, %v8193_v44, %v8192_v52  ;;  %v2831_v56 = vadd.f32 %v2825_v23, %v2270_v1  ;;  %v8197_v28 = vld [vmem:[#allocation170_spill] sm:$0xff]  ;;  %s217_s7 = scalar_lea.vmem [#allocation11], %s4022_s1 }
 0x3cd   : > { %v2584_v14 = vsel %vm2293_vm9, %v8182_v29, %v8181_v43  ;;  %v2876_v54 = vadd.f32 %v2869_v34, %v2806_v22  ;;  %v8191_v57 = vld [vmem:[#allocation215_spill] sm:$0xff]  ;;  %v3126_v2 = vadd.f32 %v3120_v16, %v3042_v46  ;;  %v3322_v34 = vpop.permute.xlu0 %3321  ;;  %v8196_v43 = vld [vmem:[#allocation182_spill] sm:$0xff]  ;;  %s3915_s11 = sshll.u32 %s217_s7, 4  ;;  %s7421_s11 = int_to_ptr.vmem [resolvable:$true] %s3915_s11 }
 0x3ce   : > { %v2588_v35 = vadd.f32 %v2584_v14, %v2512_v50  ;;  %v3204_v61 = vsel %vm2293_vm9, %v7052_v21, %v8191_v57  ;;  %v8195_v4 = vld [vmem:[#allocation255_spill] sm:$0xff]  ;;  %v2993_v29 = vsel %vm2293_vm9, %v8197_v28, %v8196_v43  ;;  %v8198_v14 = vld [vmem:[#allocation208_spill] sm:$0xff]  ;;  %v8199_v22 = vld [vmem:[#allocation226_spill] sm:$0xff]  ;;  %v2915_v6 = vadd.f32 %v2909_v10, %v2831_v56  ;;  %s4296_s4 = scalar_lea.vmem %s7421_s11, 256  ;;  %p4303_p4 = scmp.lt.s32.totalorder %s7421_s11, %s4301_s21 }
 0x3cf   : > { %v2960_v62 = vadd.f32 %v2953_v58, %v2876_v54  ;;  %v2826_v24 = vsel %vm2293_vm9, %v8195_v4, %v8194_v39  ;;  %v3121_v21 = vsel %vm2293_vm9, %v6970_v36, %v8198_v14  ;;  %v3288_v49 = vsel %vm2293_vm9, %v3281_v8, %v8199_v22  ;;  %v8200_v50 = vld [vmem:[#allocation111_spill] sm:$0xff]  ;;  %v8204_v54 = vld [vmem:[#allocation200_spill] sm:$0xff]  ;;  %v8205_v8 = vld [vmem:[#allocation218_spill] sm:$0xff]  ;;  %p4297_p8 = scmp.ne.s32.totalorder %s7421_s11, %s4296_s4  ;;  %p4304_p9 = scmp.lt.s32.totalorder %s4302_s23, %s4296_s4 }
 0x3d0   : > { %v8201_v1 = vld [vmem:[#allocation211_spill] sm:$0xff]  ;;  %v3210_v19 = vadd.f32 %v3204_v61, %v3126_v2  ;;  %v2664_v59 = vadd.f32 %v2660_v51, %v2588_v35  ;;  %v3077_v36 = vsel %vm2293_vm9, %v6877_v32, %v8204_v54  ;;  %v3205_v46 = vsel %vm2293_vm9, %v7092_v12, %v8205_v8  ;;  %v8207_v20 = vld [vmem:[#allocation250_spill] sm:$0xff]  ;;  %v8208_v61 = vld [vmem:[#allocation189_spill] sm:$0xff] }
 0x3d1   : > { %v2469_v27 = vsel %vm2293_vm9, %v8201_v1, %v8200_v50  ;;  %v3044_v23 = vadd.f32 %v3037_v41, %v2960_v62  ;;  %v8202_v58 = vld [vmem:[#allocation171_spill] sm:$0xff]  ;;  %v2833_v40 = vadd.f32 %v2826_v24, %v2272_v18  ;;  %v2999_v63 = vadd.f32 %v2993_v29, %v2915_v6  ;;  %v3326_v41 = vpop.permute.xlu0 %3325  ;;  %v8209_v44 = vld [vmem:[#allocation210_spill] sm:$0xff]  ;;  %v8210_v51 = vld [vmem:[#allocation228_spill] sm:$0xff]  ;;  %v7274_v18 = vpop.permute.xlu1 %3528  ;;  %p4298_p2 = pnand %p4297_p8, %p8261_p0  ;;  %p4305_p13 = por %p4304_p9, %p4303_p4 }
 0x3d2   : > { %v2910_v16 = vsel %vm2293_vm9, %v8203_v60, %v8202_v58  ;;  %v3294_v55 = vadd.f32 %v3288_v49, %v3210_v19  ;;  %v8206_v57 = vld [vmem:[#allocation143_spill] sm:$0xff]  ;;  %v2994_v52 = vsel %vm2293_vm9, %v6804_v0, %v8208_v61  ;;  %v3161_v32 = vsel %vm2293_vm9, %v6989_v48, %v8209_v44  ;;  %v8212_v24 = vld [vmem:[#allocation221_spill] sm:$0xff]  ;;  %v8214_v28 = vld [vmem:[#allocation220_spill] sm:$0xff] }
 0x3d3   : > { %v3128_v10 = vadd.f32 %v3121_v21, %v3044_v23  ;;  %v2736_v35 = vsel %vm2293_vm9, %v8207_v20, %v8206_v57  ;;  %v3289_v12 = vsel %vm2293_vm9, %v3285_v5, %v8210_v51  ;;  %v2917_v56 = vadd.f32 %v2910_v16, %v2833_v40  ;;  %v8211_v4 = vld [vmem:[#allocation119_spill] sm:$0xff]  ;;  %v8215_v50 = vld [vmem:[#allocation128_spill] sm:$0xff]  ;;  %v8216_v1 = vld [vmem:[#allocation125_spill] sm:$0xff]  ;;  %p4299_p5 = pneg %p4298_p2 }
 0x3d4   : > { %v3083_v62 = vadd.f32 %v3077_v36, %v2999_v63  ;;  %3848 = vrot.lane.b32.xlu0 %v3294_v55, %s4407_s9  ;;  %v2473_v39 = vadd.f32 %v2469_v27, %v2397_v3  ;;  %v2545_v0 = vsel %vm2293_vm9, %v8212_v24, %v8211_v4  ;;  %v8213_v43 = vld [vmem:[#allocation203_spill] sm:$0xff]  ;;  %v3245_v5 = vsel %vm2293_vm9, %v7127_v53, %v8214_v28  ;;  %v8217_v27 = vld [vmem:[#allocation213_spill] sm:$0xff]  ;;  %v8218_v23 = vld [vmem:[#allocation130_spill] sm:$0xff] }
 0x3d5   : > { %v3212_v2 = vadd.f32 %v3205_v46, %v3128_v10  ;;  %v3078_v48 = vsel %vm2293_vm9, %v6900_v42, %v8213_v43  ;;  %v2740_v29 = vadd.f32 %v2736_v35, %v2664_v59  ;;  %v3001_v14 = vadd.f32 %v2994_v52, %v2917_v56  ;;  %v3351_v49 = vpop.permute.xlu0 %3350  ;;  %v8219_v16 = vld [vmem:[#allocation30_spill] sm:$0xff]  ;;  %v8221_v8 = vld [vmem:[#allocation93_spill] sm:$0xff]  ;;  %v8224_v63 = vld [vmem:[#allocation135_spill] sm:$0xff]  ;;  %v7311_v20 = vpop.permute.xlu1 %3532  ;;  %p4306_p11 = pnand %p4305_p13, %p4299_p5 }
 0x3d6   : > { %v3167_v21 = vadd.f32 %v3161_v32, %v3083_v62  ;;  %v2621_v3 = vsel %vm2293_vm9, %v8216_v1, %v8215_v50  ;;  %v3162_v6 = vsel %vm2293_vm9, %v7018_v9, %v8217_v27  ;;  %v3329_v42 = vsel %vm2293_vm9, %v3322_v34, %v8218_v23  ;;  %v8220_v54 = vld [vmem:[#allocation90_spill] sm:$0xff]  ;;  %v8225_v10 = vld [vmem:[#allocation224_spill] sm:$0xff]  ;;  %v8240_v23 = vld [vmem:[#allocation219_spill] sm:$0xff] }
 0x3d7   : > { %v3296_v22 = vadd.f32 %v3289_v12, %v3212_v2  ;;  %v3359_v19 = vsel %vm3358_vm10, %v3351_v49, %v6839_v47  ;;  %v2549_v53 = vadd.f32 %v2545_v0, %v2473_v39  ;;  %v3085_v59 = vadd.f32 %v3078_v48, %v3001_v14  ;;  %v8222_v46 = vld [vmem:[#allocation178_spill] sm:$0xff]  ;;  %v8228_v12 = vld [vmem:[#allocation101_spill] sm:$0xff]  ;;  %v8230_v2 = vld [vmem:[#allocation147_spill] sm:$0xff] }
 0x3d8   : > { %v3251_v58 = vadd.f32 %v3245_v5, %v3167_v21  ;;  %v3363_v60 = vadd.f32 %v3359_v19, %v2740_v29  ;;  %v1481_v36 = vsel %vm1228_vm8, %v8220_v54, %v8219_v16  ;;  %v2295_v9 = vsel %vm2293_vm9, %v8222_v46, %v8221_v8  ;;  %v8223_v40 = vld [vmem:[#allocation138_spill] sm:$0xff]  ;;  %v8232_v4 = vld [vmem:[#allocation232_spill] sm:$0xff]  ;;  %v8235_v29 = vld [vmem:[#allocation109_spill] sm:$0xff] }
 0x3d9   : > { %3852 = vrot.lane.b32.xlu0 %v3296_v22, %s4407_s9  ;;  %v2697_v34 = vsel %vm2293_vm9, %v8224_v63, %v8223_v40  ;;  %v3246_v47 = vsel %vm2293_vm9, %v7157_v38, %v8225_v10  ;;  %v1676_v55 = vadd.f32 %v7086_v7, %v7068_v37  ;;  %v2625_v57 = vadd.f32 %v2621_v3, %v2549_v53  ;;  %v3355_v52 = vpop.permute.xlu0 %3354  ;;  %v8226_v44 = vld [vmem:[#allocation34_spill] sm:$0xff]  ;;  %v8236_v14 = vld [vmem:[#allocation209_spill] sm:$0xff] }
 0x3da   : > { %v3169_v35 = vadd.f32 %v3162_v6, %v3085_v59  ;;  %v3335_v61 = vadd.f32 %v3329_v42, %v3251_v58  ;;  %v8227_v32 = vld [vmem:[#allocation98_spill] sm:$0xff]  ;;  %v3330_v37 = vsel %vm2293_vm9, %v3326_v41, %v8232_v4  ;;  %v1485_v7 = vadd.f32 %v1481_v36, %v7013_v11  ;;  %v8239_v6 = vld [vmem:[#allocation117_spill] sm:$0xff]  ;;  %v3568_v58 = vpop.permute.xlu1 %3567 }
 0x3db   : > { %v1557_v51 = vsel %vm1228_vm8, %v8227_v32, %v8226_v44  ;;  %v8229_v56 = vld [vmem:[#allocation198_spill] sm:$0xff]  ;;  %v2299_v24 = vadd.f32 %v2295_v9, %v1676_v55  ;;  %v2701_v0 = vadd.f32 %v2697_v34, %v2625_v57  ;;  %v2433_v21 = vsel %vm2293_vm9, %v8236_v14, %v8235_v29  ;;  %v8241_v54 = vld [vmem:[#allocation97_spill] sm:$0xff]  ;;  %v8244_v9 = vld [vmem:[#allocation227_spill] sm:$0xff] }
 0x3dc   : > { %v2357_v62 = vsel %vm2293_vm9, %v8229_v56, %v8228_v12  ;;  %v8231_v39 = vld [vmem:[#allocation186_spill] sm:$0xff]  ;;  %v3253_v43 = vadd.f32 %v3246_v47, %v3169_v35  ;;  %v1561_v22 = vadd.f32 %v1557_v51, %v1485_v7  ;;  %v2509_v42 = vsel %vm2293_vm9, %v8240_v23, %v8239_v6  ;;  %v8245_v47 = vld [vmem:[#allocation105_spill] sm:$0xff]  ;;  %v8246_v55 = vld [vmem:[#allocation204_spill] sm:$0xff] }
 0x3dd   : > { %v2773_v38 = vsel %vm2293_vm9, %v8231_v39, %v8230_v2  ;;  %3867 = vrot.lane.b32.xlu0 %v3335_v61, %s4407_s9  ;;  %v8233_v48 = vld [vmem:[#allocation38_spill] sm:$0xff]  ;;  %v2361_v49 = vadd.f32 %v2357_v62, %v2299_v24  ;;  %v3375_v41 = vpop.permute.xlu0 %3374  ;;  %v8247_v57 = vld [vmem:[#allocation136_spill] sm:$0xff]  ;;  %v8248_v35 = vld [vmem:[#allocation231_spill] sm:$0xff] }
 0x3de   : > { %v8234_v28 = vld [vmem:[#allocation106_spill] sm:$0xff]  ;;  %v2777_v50 = vadd.f32 %v2773_v38, %v2701_v0  ;;  %v3337_v1 = vadd.f32 %v3330_v37, %v3253_v43  ;;  %v3382_v19 = vsel %vm3358_vm10, %v3375_v41, %v6915_v26  ;;  %v2394_v26 = vsel %vm2293_vm9, %v8246_v55, %v8245_v47  ;;  %v8249_v51 = vld [vmem:[#allocation113_spill] sm:$0xff]  ;;  %v3572_v37 = vpop.permute.xlu1 %3571  ;;  %v8254_v0 = vld [vmem:[#allocation223_spill] sm:$0xff] }
 0x3df   : > { %v1633_v5 = vsel %vm1228_vm8, %v8234_v28, %v8233_v48  ;;  %v8237_v3 = vld [vmem:[#allocation42_spill] sm:$0xff]  ;;  %v2437_v59 = vadd.f32 %v2433_v21, %v2361_v49  ;;  %v2661_v61 = vsel %vm2293_vm9, %v8248_v35, %v8247_v57  ;;  %v8251_v62 = vld [vmem:[#allocation145_spill] sm:$0xff]  ;;  %v3360_v48 = vsel %vm3358_vm10, %v3355_v52, %v6875_v45  ;;  %v8255_v21 = vld [vmem:[#allocation131_spill] sm:$0xff] }
 0x3e0   : > { %v8238_v11 = vld [vmem:[#allocation114_spill] sm:$0xff]  ;;  %v1637_v53 = vadd.f32 %v1633_v5, %v1561_v22  ;;  %v3386_v16 = vadd.f32 %v3382_v19, %v2777_v50  ;;  %v8252_v2 = vld [vmem:[#allocation253_spill] sm:$0xff] }
 0x3e1   : > { %v1709_v27 = vsel %vm1228_vm8, %v8238_v11, %v8237_v3  ;;  %3871 = vrot.lane.b32.xlu0 %v3337_v1, %s4407_s9  ;;  %v8242_v36 = vld [vmem:[#allocation190_spill] sm:$0xff]  ;;  %v2513_v34 = vadd.f32 %v2509_v42, %v2437_v59  ;;  %v3379_v10 = vpop.permute.xlu0 %3378  ;;  %v2737_v39 = vsel %vm2293_vm9, %v8252_v2, %v8251_v62  ;;  %v8253_v24 = vld [vmem:[#allocation121_spill] sm:$0xff]  ;;  %v8258_v11 = vld [vmem:[#allocation240_spill] sm:$0xff] }
 0x3e2   : > { %v2318_v8 = vsel %vm2293_vm9, %v8242_v36, %v8241_v54  ;;  %v8243_v46 = vld [vmem:[#allocation126_spill] sm:$0xff]  ;;  %v1713_v63 = vadd.f32 %v1709_v27, %v1637_v53  ;;  %v2546_v43 = vsel %vm2293_vm9, %v8254_v0, %v8253_v24  ;;  %v8256_v22 = vld [vmem:[#allocation229_spill] sm:$0xff]  ;;  %v3605_v6 = vpop.permute.xlu1 %3604  ;;  %v8260_v42 = vld [vmem:[#allocation188_spill] sm:$0xff]  ;;  %v3383_v59 = vsel %vm3358_vm10, %v3379_v10, %v6968_v17 }
 0x3e3   : > { %v2585_v40 = vsel %vm2293_vm9, %v8244_v9, %v8243_v46  ;;  %v8250_v12 = vld [vmem:[#allocation214_spill] sm:$0xff]  ;;  %v2622_v49 = vsel %vm2293_vm9, %v8256_v22, %v8255_v21  ;;  %v8257_v3 = vld [vmem:[#allocation141_spill] sm:$0xff] }
 0x3e4   : > { %v2322_v44 = vadd.f32 %v2318_v8, %v1713_v63  ;;  %v2589_v32 = vadd.f32 %v2585_v40, %v2513_v34  ;;  %v2470_v56 = vsel %vm2293_vm9, %v8250_v12, %v8249_v51  ;;  %v2698_v27 = vsel %vm2293_vm9, %v8258_v11, %v8257_v3  ;;  %v8259_v23 = vld [vmem:[#allocation150_spill] sm:$0xff] }
 0x3e5   : > { %v3414_v7 = vpop.permute.xlu0 %3413 }
 0x3e6   : > { %v2398_v38 = vadd.f32 %v2394_v26, %v2322_v44  ;;  %v2665_v4 = vadd.f32 %v2661_v61, %v2589_v32  ;;  %v3421_v28 = vsel %vm3358_vm10, %v3414_v7, %v6998_v15  ;;  %v3609_v46 = vpop.permute.xlu1 %3608 }
 0x3e7   : > { %v3425_v14 = vadd.f32 %v3421_v28, %v3363_v60  ;;  %v2774_v60 = vsel %vm2293_vm9, %v8260_v42, %v8259_v23 }
 0x3e8   : > { %v2474_v5 = vadd.f32 %v2470_v56, %v2398_v38  ;;  %v2741_v29 = vadd.f32 %v2737_v39, %v2665_v4 }
 0x3e9   : > { %v3418_v41 = vpop.permute.xlu0 %3417 }
 0x3ea   : > { %v2550_v50 = vadd.f32 %v2546_v43, %v2474_v5  ;;  %v3364_v1 = vadd.f32 %v3360_v48, %v2741_v29  ;;  %v3422_v45 = vsel %vm3358_vm10, %v3418_v41, %v7050_v30  ;;  %v3644_v55 = vpop.permute.xlu1 %3643 }
 0x3ec   : > { %v2626_v52 = vadd.f32 %v2622_v49, %v2550_v50  ;;  %v3426_v15 = vadd.f32 %v3422_v45, %v3364_v1 }
 0x3ed   : > { %v3451_v53 = vpop.permute.xlu0 %3450 }
 0x3ee   : > { %v2702_v19 = vadd.f32 %v2698_v27, %v2626_v52  ;;  %v3458_v54 = vsel %vm3358_vm10, %v3451_v53, %v7111_v33  ;;  %v3648_v10 = vpop.permute.xlu1 %3647 }
 0x3ef   : > { %v3462_v8 = vadd.f32 %v3458_v54, %v3386_v16 }
 0x3f0   : > { %v2778_v36 = vadd.f32 %v2774_v60, %v2702_v19 }
 0x3f1   : > { %v3455_v30 = vpop.permute.xlu0 %3454 }
 0x3f2   : > { %v3387_v9 = vadd.f32 %v3383_v59, %v2778_v36  ;;  %v3459_v40 = vsel %vm3358_vm10, %v3455_v30, %v7155_v31  ;;  %v3681_v32 = vpop.permute.xlu1 %3680 }
 0x3f4   : > { %v3463_v63 = vadd.f32 %v3459_v40, %v3387_v9 }
 0x3f5   : > { %v3490_v34 = vpop.permute.xlu0 %3489 }
 0x3f6   : > { %v3497_v47 = vsel %vm3358_vm10, %v3490_v34, %v7197_v25  ;;  %v3685_v62 = vpop.permute.xlu1 %3684 }
 0x3f7   : > { %v3501_v26 = vadd.f32 %v3497_v47, %v3425_v14 }
 0x3f9   : > { %v3494_v57 = vpop.permute.xlu0 %3493 }
 0x3fa   : > { %v3498_v17 = vsel %vm3358_vm10, %v3494_v57, %v7236_v13  ;;  %v3720_v4 = vpop.permute.xlu1 %3719 }
 0x3fb   : > { %v3502_v33 = vadd.f32 %v3498_v17, %v3426_v15 }
 0x3fd   : > { %v3527_v16 = vpop.permute.xlu0 %3526 }
 0x3fe   : > { %v3534_v35 = vsel %vm3358_vm10, %v3527_v16, %v7274_v18  ;;  %v3724_v18 = vpop.permute.xlu1 %3723 }
 0x3ff   : > { %v3538_v61 = vadd.f32 %v3534_v35, %v3462_v8 }
 0x401   : > { %v3531_v44 = vpop.permute.xlu0 %3530 }
 0x402   : > { %v3535_v31 = vsel %vm3358_vm10, %v3531_v44, %v7311_v20  ;;  %v3757_v43 = vpop.permute.xlu1 %3756 }
 0x403   : > { %v3539_v51 = vadd.f32 %v3535_v31, %v3463_v63 }
 0x405   : > { %v3566_v25 = vpop.permute.xlu0 %3565 }
 0x406   : > { %v3573_v12 = vsel %vm3358_vm10, %v3566_v25, %v3568_v58  ;;  %v3761_v20 = vpop.permute.xlu1 %3760 }
 0x407   : > { %v3577_v56 = vadd.f32 %v3573_v12, %v3501_v26 }
 0x409   : > { %v3570_v2 = vpop.permute.xlu0 %3569 }
 0x40a   : > { %v3574_v13 = vsel %vm3358_vm10, %v3570_v2, %v3572_v37  ;;  %v3796_v29 = vpop.permute.xlu1 %3795 }
 0x40b   : > { %v3578_v39 = vadd.f32 %v3574_v13, %v3502_v33 }
 0x40d   : > { %v3603_v38 = vpop.permute.xlu0 %3602 }
 0x40e   : > { %v3800_v58 = vpop.permute.xlu1 %3799  ;;  %v3610_v27 = vsel %vm3358_vm10, %v3603_v38, %v3605_v6 }
 0x40f   : > { %v3614_v42 = vadd.f32 %v3610_v27, %v3538_v61 }
 0x411   : > { %v3607_v7 = vpop.permute.xlu0 %3606 }
 0x412   : > { %v3833_v49 = vpop.permute.xlu1 %3832  ;;  %v3611_v60 = vsel %vm3358_vm10, %v3607_v7, %v3609_v46 }
 0x413   : > { %v3615_v46 = vadd.f32 %v3611_v60, %v3539_v51 }
 0x415   : > { %v3642_v24 = vpop.permute.xlu0 %3641 }
 0x416   : > { %v3837_v37 = vpop.permute.xlu1 %3836  ;;  %v3649_v15 = vsel %vm3358_vm10, %v3642_v24, %v3644_v55 }
 0x417   : > { %v3653_v59 = vadd.f32 %v3649_v15, %v3577_v56  ;;  %v3884_v56 = vstv %s7399_s26 }
 0x419   : > { %v3646_v0 = vpop.permute.xlu0 %3645 }
 0x41a   : > { %v3851_v3 = vpop.permute.xlu1 %3850  ;;  %v3650_v6 = vsel %vm3358_vm10, %v3646_v0, %v3648_v10 }
 0x41b   : > { %v3654_v57 = vadd.f32 %v3650_v6, %v3578_v39 }
 0x41d   : > { %v3679_v48 = vpop.permute.xlu0 %3678 }
 0x41e   : > { %v3855_v45 = vpop.permute.xlu1 %3854  ;;  %v3686_v23 = vsel %vm3358_vm10, %v3679_v48, %v3681_v32 }
 0x41f   : > { %v3690_v54 = vadd.f32 %v3686_v23, %v3614_v42 }
 0x421   : > { %v3683_v28 = vpop.permute.xlu0 %3682 }
 0x422   : > { %v3687_v8 = vsel %vm3358_vm10, %v3683_v28, %v3685_v62  ;;  %v3870_v40 = vpop.permute.xlu1 %3869 }
 0x423   : > { %v3691_v17 = vadd.f32 %v3687_v8, %v3615_v46 }
 0x425   : > { %v3718_v5 = vpop.permute.xlu0 %3717 }
 0x426   : > { %v3725_v19 = vsel %vm3358_vm10, %v3718_v5, %v3720_v4  ;;  %v3874_v62 = vpop.permute.xlu1 %3873 }
 0x427   : > { %v3729_v63 = vadd.f32 %v3725_v19, %v3653_v59 }
 0x429   : > { %v3722_v14 = vpop.permute.xlu0 %3721 }
 0x42a   : > { %v3726_v47 = vsel %vm3358_vm10, %v3722_v14, %v3724_v18 }
 0x42b   : > { %v3730_v31 = vadd.f32 %v3726_v47, %v3654_v57 }
 0x42d   : > { %v3755_v21 = vpop.permute.xlu0 %3754 }
 0x42e   : > { %v3762_v53 = vsel %vm3358_vm10, %v3755_v21, %v3757_v43 }
 0x42f   : > { %v3766_v34 = vadd.f32 %v3762_v53, %v3690_v54 }
 0x431   : > { %v3759_v22 = vpop.permute.xlu0 %3758 }
 0x432   : > { %v3763_v55 = vsel %vm3358_vm10, %v3759_v22, %v3761_v20 }
 0x433   : > { %v3767_v32 = vadd.f32 %v3763_v55, %v3691_v17 }
 0x435   : > { %v3794_v50 = vpop.permute.xlu0 %3793 }
 0x436   : > { %v3801_v9 = vsel %vm3358_vm10, %v3794_v50, %v3796_v29 }
 0x437   : > { %v3805_v33 = vadd.f32 %v3801_v9, %v3729_v63 }
 0x439   : > { %v3798_v1 = vpop.permute.xlu0 %3797 }
 0x43a   : > { %v3802_v35 = vsel %vm3358_vm10, %v3798_v1, %v3800_v58 }
 0x43b   : > { %v3806_v2 = vadd.f32 %v3802_v35, %v3730_v31 }
 0x43d   : > { %v3831_v41 = vpop.permute.xlu0 %3830 }
 0x43e   : > { %v3838_v30 = vsel %vm3358_vm10, %v3831_v41, %v3833_v49 }
 0x43f   : > { %v3842_v10 = vadd.f32 %v3838_v30, %v3766_v34 }
 0x441   : > { %v3835_v11 = vpop.permute.xlu0 %3834 }
 0x442   : > { %v3839_v61 = vsel %vm3358_vm10, %v3835_v11, %v3837_v37 }
 0x443   : > { %v3843_v13 = vadd.f32 %v3839_v61, %v3767_v32 }
 0x446   : > { %v3849_v52 = vpop.permute.xlu0 %3848 }
 0x447   : > { %v3857_v26 = vsel %vm3856_vm11, %v3849_v52, %v3851_v3 }
 0x448   : > { %v3861_v51 = vadd.f32 %v3857_v26, %v3805_v33 }
 0x44b   : > { %v3853_v36 = vpop.permute.xlu0 %3852 }
 0x44c   : > { %v3858_v12 = vsel %vm3856_vm11, %v3853_v36, %v3855_v45 }
 0x44d   : > { %v3862_v7 = vadd.f32 %v3858_v12, %v3806_v2 }
 0x44f   : > { %v3868_v16 = vpop.permute.xlu0 %3867 }
 0x450   : > { %v3875_v44 = vsel %vm3856_vm11, %v3868_v16, %v3870_v40 }
 0x451   : > { %v3879_v25 = vadd.f32 %v3875_v44, %v3842_v10 }
 0x453   : > { %v3881_v39 = vadd.f32 %v3879_v25, %v3861_v51  ;;  %v3872_v38 = vpop.permute.xlu0 %3871 }
 0x454   : > { %v3876_v4 = vsel %vm3856_vm11, %v3872_v38, %v3874_v62 }
 0x455   : > { %v3885_v18 = vadd.f32 %v3884_v56, %v3881_v39  ;;  %v3880_v24 = vadd.f32 %v3876_v4, %v3843_v13 }
 0x457   : > { %v4120_v0 = vmul.f32 -1.442695, %v3885_v18  ;;  %v3882_v43 = vadd.f32 %v3880_v24, %v3862_v7 }
 0x459   : > { %4227 = vpow2.f32 %v4120_v0  ;;  %v3886_v48 = vadd.f32 %v3884_v56, %v3882_v43 }
 0x45b   : > { %v4121_v20 = vmul.f32 -1.442695, %v3886_v48 }
 0x45d   : > { %4229 = vpow2.f32 %v4121_v20 }
 0x463   : > { %v4228_v28 = vpop.eup %4227 }
 0x464   : > { %v3893_v5 = vadd.f32 1.0, %v4228_v28 }
 0x466   : > { %4231 = vrcp.f32 %v3893_v5 }
 0x467   : > { %v4230_v29 = vpop.eup %4229 }
 0x468   : > { %v3894_v14 = vadd.f32 1.0, %v4230_v29 }
 0x46a   : > { %4233 = vrcp.f32 %v3894_v14 }
 0x470   : > { %v4232_v58 = vpop.eup %4231 }
 0x471   : > { %3899 = vst [vmem:[%s217_s7] sm:$0xff] %v4232_v58 }
 0x474   : > { %v4234_v21 = vpop.eup %4233 }
 0x475   : > { %3900 = vst [vmem:[%s217_s7 + $0x8] sm:$0xff] %v4234_v21 }
 0x476   : > { %4309 = shalt.err (!%p4306_p11)
}
 0x477   : > { %s4310_s13 = scalar_lea.hbm %s7419_s28, 256  ;;  %s4314_s27 = scalar_lea.hbm %s7473_s3, 512 }
 0x478   : > { %p4311_p3 = scmp.ne.s32.totalorder %s7419_s28, %s4310_s13  ;;  %p4315_p6 = scmp.lt.u32.totalorder %s7419_s28, %s7473_s3 }
 0x479   : > { %p4316_p12 = scmp.lt.u32.totalorder %s4314_s27, %s4310_s13  ;;  %p4318_p8 = scmp.lt.u32.totalorder %s4310_s13, %s7419_s28 }
 0x47a   : > { %p4312_p7 = pnand %p4311_p3, %p8261_p0 }
 0x47b   : > { %p4317_p1 = por %p4316_p12, %p4315_p6 }
 0x47c   : > { %p4313_p10 = pneg %p4312_p7 }
 0x47d   : > { %p4319_p2 = por %p4318_p8, %p4317_p1 }
 0x47f   : > { %p4320_p5 = pnand %p4319_p2, %p4313_p10 }
 0x481   : > { %4323 = shalt.err (!%p4320_p5)
}
 0x482   : > { %s4409_s1 = smov 128   ;;  %s4410_s6 = smov 8  }
 0x483   : > { %4135 = dma.vmem_to_hbm [thread:$0]  (%p8261_p0), %s7421_s11, 256, %s7419_s28, %s3902_s29, %s4409_s1, %s4409_s1, %s4410_s6  }
 0x484 PF: > { %s3930_s7 = sand.u32 1, %s4362_s14   ;;  %p8262_p4 = scmp.ne.s32.totalorder %s7632_s24, 0 }
 0x485   : > { %p8263_p9 = scmp.ge.s32.totalorder %s4382_s19, 2  ;;  %s3931_s9 = scalar_lea.sflag [#allocation8], %s3930_s7 }
 0x487   : > { %p4146_p13 = pnand %p8263_p9, %p8262_p4 }
 0x489   : > { %4357 = dma.done.wait (!%p4146_p13), %s3931_s9, 256  }
 0x48a   : > { %4359 = vsyncadd (!%p4146_p13), %s3931_s9, 4294967040  ;;  %s21_s19 = sadd.s32 1, %s4382_s19   ;;  %s8264_s14 = smov %s4366_s15 }
 0x48b   : > { %p18_p11 = scmp.ge.s32.totalorder %s21_s19, 4   ;;  %s8265_s15 = smov %s4370_s16 }
 0x48c   : > { %s8266_s16 = smov %s4526_s10  ;;  %s8267_s17 = smov %s4378_s18 }
 0x48d   : > { %s8268_s18 = smov %s8270_s30  ;;  %20 = sbr.rel (!%p18_p11) target bundleno = 9 (0x9), region = 91 }
 0x494   :  { %3936 = vsyncpa [#allocation7], 1 }
 0x495   :  { %3938 = vsyncpa [#allocation7 + $0x1], 1 }
 0x496   :  { %3939 = vsyncpa [#allocation8], 1 }
 0x497   :  { %3941 = vsyncpa [#allocation8 + $0x1], 1 }
 0x498   :  { %3942 = vsyncpa [#allocation9], 1 }
 0x499   :  { %3944 = vsyncpa [#allocation9 + $0x1], 1 }

</bundles_post_ra>
